<compile_context>
chip_gen: v6e
topology: v6e:2x2x1
jax: 0.10.0
libtpu: 0.0.40
codegen_flags: <defaults>
</compile_context>

<pallas_src>
import functools

import jax
import jax.numpy as jnp
from jax.experimental import pallas as pl
from jax.experimental.pallas import tpu as pltpu

_HALO_OFF = 8                      # interior starts at sublane column 8 (aligned stores)
_VMEM_LIMIT = 48 * 1024 * 1024     # ~75% of v7x's 64 MiB/TC; ample headroom on v5e/v6e


def _silu_f32(x):
    # x * sigmoid(x) written with a single EUP transcendental (tanh); exact.
    return x * (0.5 * jnp.tanh(0.5 * x) + 0.5)


def _zero_halo(ref, H, W):
    """Zero the 1-px halo ring around the interior [1:H+1, L:L+W, :]."""
    L = _HALO_OFF
    Wp = ref.shape[1]
    C = ref.shape[2]
    dt = ref.dtype
    ref[0:1, :, :] = jnp.zeros((1, Wp, C), dt)                  # top halo row
    ref[H + 1:H + 2, :, :] = jnp.zeros((1, Wp, C), dt)          # bottom halo row
    ref[:, L - 1:L, :] = jnp.zeros((H + 2, 1, C), dt)           # left halo column
    ref[:, L + W:L + W + 1, :] = jnp.zeros((H + 2, 1, C), dt)   # right halo column


def _conv3x3_rows(src_ref, w_ref, r0, nrows, W):
    """3x3 conv (stride 1) for output rows [r0, r0+nrows).

    src_ref: zero-halo'd (H+2, L+W+1, C_in) VMEM ref, interior at [1:H+1, L:L+W].
    w_ref:   (9, C_in, C_out) weight slabs, tap index = dy*3 + dx.
    Returns an f32 (nrows*W, C_out) accumulator: 9 accumulating MXU matmuls,
    one per tap (no im2col concat, no (H*W, 3C) temp).
    """
    L = _HALO_OFF
    C_in = src_ref.shape[-1]
    C_out = w_ref.shape[-1]
    acc = jnp.zeros((nrows * W, C_out), jnp.float32)
    for dy in range(3):
        for dx in range(3):
            tap = src_ref[dy + r0:dy + r0 + nrows, L - 1 + dx:L - 1 + dx + W, :]
            acc = acc + jnp.dot(tap.reshape(nrows * W, C_in),
                                w_ref[dy * 3 + dx],
                                preferred_element_type=jnp.float32)
    return acc


def _bottleneck_kernel(x_ref, w1_ref, b1_ref, w2_ref, b2_ref, o_ref,
                       xp_ref, yp_ref, *, H, W, TH, add_residual):
    L = _HALO_OFF
    Cm = w1_ref.shape[-1]
    C2 = w2_ref.shape[-1]
    cdt = xp_ref.dtype

    # Halo ring only (interior is fully overwritten every step).  Re-done each
    # step because each TensorCore has its own scratch under megacore sharding
    # and only one core ever runs program_id(0) == 0.
    _zero_halo(xp_ref, H, W)
    _zero_halo(yp_ref, H, W)

    # Stage x into the sublane-aligned halo interior; bf16 cast fuses into the
    # store.  The f32 x block itself is reused below for the exact residual.
    # TODO(synk): DMA x straight into this window (memory_space=pl.ANY +
    # make_async_copy, double-buffered) to drop this VMEM->VMEM pass entirely.
    xp_ref[1:H + 1, L:L + W, :] = x_ref[...].astype(cdt)

    # cv1: per-tap matmuls + folded-BN bias + SiLU, tiled over row chunks so
    # the f32 accumulator stays bounded; result lands in the bf16 yp interior.
    for r0 in range(0, H, TH):
        nr = min(TH, H - r0)
        a1 = _conv3x3_rows(xp_ref, w1_ref, r0, nr, W) + b1_ref[...]
        yp_ref[1 + r0:1 + r0 + nr, L:L + W, :] = (
            _silu_f32(a1).reshape(nr, W, Cm).astype(cdt))

    # cv2: same structure; residual added in f32 from the original x block.
    for r0 in range(0, H, TH):
        nr = min(TH, H - r0)
        z = _silu_f32(_conv3x3_rows(yp_ref, w2_ref, r0, nr, W) + b2_ref[...])
        if add_residual:
            z = z + x_ref[r0:r0 + nr, :, :].astype(jnp.float32).reshape(nr * W, C2)
        o_ref[r0:r0 + nr, :, :] = z.reshape(nr, W, C2).astype(o_ref.dtype)


def _pick_row_tile(H, W):
    # ~512 output pixels per matmul chunk keeps the MXU M dim well fed while
    # bounding the f32 accumulator / elementwise temps at production H*W.
    return max(1, min(H, max(1, 512 // max(W, 1))))


def bottleneck_forward(x_nchw, params, compute_dtype=jnp.bfloat16):
    """Bottleneck forward.  x_nchw: (N, C1, H, W) f32 -> (N, C2, H, W) f32."""
    N, C1, H, W = x_nchw.shape
    (w1, b1), (w2, b2) = params["cv1"], params["cv2"]
    Cm, C2 = w1.shape[0], w2.shape[0]
    add = bool(params["add"]) and (C1 == C2)

    # NCHW -> NHWC (channels on lanes).  x stays f32 so the shortcut adds the
    # exact input; the conv operand is cast to bf16 inside the kernel.
    # TODO(synk): keep the surrounding network NHWC (and emit bf16) so these
    # interface transposes and the f32 writeback disappear.
    x_nhwc = jnp.transpose(x_nchw, (0, 2, 3, 1))

    # OIHW -> (kh, kw, cin, cout) -> (9, cin, cout); tap index = dy*3 + dx.
    w1_t = jnp.transpose(w1, (2, 3, 1, 0)).reshape(9, C1, Cm).astype(compute_dtype)
    w2_t = jnp.transpose(w2, (2, 3, 1, 0)).reshape(9, Cm, C2).astype(compute_dtype)
    b1_r = b1.reshape(1, Cm).astype(jnp.float32)
    b2_r = b2.reshape(1, C2).astype(jnp.float32)

    TH = _pick_row_tile(H, W)
    kernel = functools.partial(_bottleneck_kernel, H=H, W=W, TH=TH,
                               add_residual=add)

    Wp = _HALO_OFF + W + 1
    # TODO(synk): at production shapes (C >= 256, H*W >= 1600) add an H-tile
    # grid axis (2-row halo) marked "parallel" so v7x's second TensorCore gets
    # work at N=1 and the per-step VMEM footprint stays well under 64 MiB.
    out_nhwc = pl.pallas_call(
        kernel,
        out_shape=jax.ShapeDtypeStruct((N, H, W, C2), jnp.float32),
        grid=(N,),
        in_specs=[
            pl.BlockSpec((None, H, W, C1), lambda n: (n, 0, 0, 0)),
            pl.BlockSpec((9, C1, Cm), lambda n: (0, 0, 0)),
            pl.BlockSpec((1, Cm), lambda n: (0, 0)),
            pl.BlockSpec((9, Cm, C2), lambda n: (0, 0, 0)),
            pl.BlockSpec((1, C2), lambda n: (0, 0)),
        ],
        out_specs=pl.BlockSpec((None, H, W, C2), lambda n: (n, 0, 0, 0)),
        scratch_shapes=[
            pltpu.VMEM((H + 2, Wp, C1), compute_dtype),   # zero-halo'd x (bf16)
            pltpu.VMEM((H + 2, Wp, Cm), compute_dtype),   # zero-halo'd y (bf16)
        ],
        compiler_params=pltpu.CompilerParams(
            dimension_semantics=("parallel",),
            vmem_limit_bytes=_VMEM_LIMIT,
        ),
    )(x_nhwc, w1_t, b1_r, w2_t, b2_r)

    return jnp.transpose(out_nhwc, (0, 3, 1, 2))


# ---------------------------------------------------------------------------
# Parameter construction (deterministic, BN folded into conv) and references
# ---------------------------------------------------------------------------
def _fold_bn(key, c_out, c_in, k, eps=1e-3):
    kw, kg, kb, km, kv = jax.random.split(key, 5)
    w = jax.random.normal(kw, (c_out, c_in, k, k), jnp.float32) * 0.2
    gamma = jax.random.uniform(kg, (c_out,), jnp.float32, 0.5, 1.5)
    beta = jax.random.normal(kb, (c_out,), jnp.float32) * 0.1
    mean = jax.random.normal(km, (c_out,), jnp.float32) * 0.1
    var = jax.random.uniform(kv, (c_out,), jnp.float32, 0.5, 1.5)
    scale = gamma / jnp.sqrt(var + eps)
    return w * scale[:, None, None, None], beta - mean * scale


def make_bottleneck_params(key, c1, c2, shortcut=True, e=0.5):
    c_ = max(int(c2 * e), 1)
    k1, k2 = jax.random.split(key)
    w1, b1 = _fold_bn(k1, c_, c1, 3)
    w2, b2 = _fold_bn(k2, c2, c_, 3)
    return {"cv1": (w1, b1), "cv2": (w2, b2),
            "add": bool(shortcut and c1 == c2)}


def _conv_bn_silu_ref(x, w, b):
    y = jax.lax.conv_general_dilated(
        x, w, (1, 1), [(1, 1), (1, 1)],
        dimension_numbers=("NCHW", "OIHW", "NCHW"))
    y = y + b[None, :, None, None]
    return y * jax.nn.sigmoid(y)


def bottleneck_reference(x_nchw, params):
    (w1, b1), (w2, b2) = params["cv1"], params["cv2"]
    z = _conv_bn_silu_ref(_conv_bn_silu_ref(x_nchw, w1, b1), w2, b2)
    if params["add"] and x_nchw.shape[1] == w2.shape[0]:
        z = z + x_nchw
    return z


def _bf16_round(a):
    return a.astype(jnp.bfloat16).astype(jnp.float32)


def bottleneck_reference_bf16ops(x_nchw, params):
    """Mirrors the kernel's numerics: bf16 conv operands / bf16 intermediate,
    f32 accumulation, exact SiLU, f32 residual."""
    (w1, b1), (w2, b2) = params["cv1"], params["cv2"]
    y = _conv_bn_silu_ref(_bf16_round(x_nchw), _bf16_round(w1), b1)
    z = _conv_bn_silu_ref(_bf16_round(y), _bf16_round(w2), b2)
    if params["add"] and x_nchw.shape[1] == w2.shape[0]:
        z = z + x_nchw
    return z


if __name__ == "__main__":
    key = jax.random.PRNGKey(0)
    k_x, k_p1, k_p2 = jax.random.split(key, 3)

    # Case 1: shortcut bottleneck (c1 == c2 == 8, e=0.5 -> hidden c_ = 4).
    N, C, H, W = 2, 8, 16, 16
    x = jax.random.normal(k_x, (N, C, H, W), jnp.float32)
    params = make_bottleneck_params(k_p1, C, C, shortcut=True)

    out = jax.block_until_ready(bottleneck_forward(x, params))
    assert out.shape == (N, C, H, W)

    # Tight check against a reference using the same bf16 conv operands.
    ref_q = bottleneck_reference_bf16ops(x, params)
    err_q = float(jnp.max(jnp.abs(out - ref_q)))
    assert jnp.allclose(out, ref_q, atol=5e-2, rtol=5e-2), err_q

    # Loose sanity check against the full-f32 reference (bf16 quantization only).
    ref = bottleneck_reference(x, params)
    err = float(jnp.max(jnp.abs(out - ref)))
    assert jnp.allclose(out, ref, atol=2.5e-1, rtol=2.5e-1), err

    # Case 2: no residual path (c1 != c2) exercises add_residual=False.
    params2 = make_bottleneck_params(k_p2, C, 16, shortcut=True)
    out2 = jax.block_until_ready(bottleneck_forward(x, params2))
    assert out2.shape == (N, 16, H, W)
    ref2_q = bottleneck_reference_bf16ops(x, params2)
    err2 = float(jnp.max(jnp.abs(out2 - ref2_q)))
    assert jnp.allclose(out2, ref2_q, atol=5e-2, rtol=5e-2), err2

    print("KERNEL_OK")
</pallas_src>

<mosaic_0001>
module attributes {stable_mosaic.version = 11 : i64} {
  func.func @_bottleneck_kernel(%arg0: i32, %arg1: memref<1x16x16x8xf32, #tpu.memory_space<vmem>>, %arg2: memref<9x8x4xbf16, #tpu.memory_space<vmem>>, %arg3: memref<1x4xf32, #tpu.memory_space<vmem>>, %arg4: memref<9x4x8xbf16, #tpu.memory_space<vmem>>, %arg5: memref<1x8xf32, #tpu.memory_space<vmem>>, %arg6: memref<1x16x16x8xf32, #tpu.memory_space<vmem>>, %arg7: memref<18x25x8xbf16, #tpu.memory_space<vmem>>, %arg8: memref<18x25x4xbf16, #tpu.memory_space<vmem>>) attributes {dimension_semantics = [#tpu.dimension_semantics<parallel>], iteration_bounds = array<i64: 2>, scalar_prefetch = 0 : i64, scratch_operands = 2 : i64, tpu.core_type = #tpu.core_type<tc>, window_params = [{transform_indices = @transform_0, window_bounds = array<i64: 1, 16, 16, 8>}, {pipeline_mode = #tpu.pipeline_mode<synchronous>, transform_indices = @transform_1, window_bounds = array<i64: 9, 8, 4>}, {pipeline_mode = #tpu.pipeline_mode<synchronous>, transform_indices = @transform_2, window_bounds = array<i64: 1, 4>}, {pipeline_mode = #tpu.pipeline_mode<synchronous>, transform_indices = @transform_3, window_bounds = array<i64: 9, 4, 8>}, {pipeline_mode = #tpu.pipeline_mode<synchronous>, transform_indices = @transform_4, window_bounds = array<i64: 1, 8>}, {transform_indices = @transform_5, window_bounds = array<i64: 1, 16, 16, 8>}]} {
    %cst = arith.constant 0.000000e+00 : bf16
    %0 = vector.broadcast %cst : bf16 to vector<1x25x8xbf16>
    %c0 = arith.constant 0 : index
    %c0_0 = arith.constant 0 : index
    %c0_1 = arith.constant 0 : index
    %1 = vector.load %arg7[%c0, %c0_0, %c0_1] : memref<18x25x8xbf16, #tpu.memory_space<vmem>>, vector<1x25x8xbf16>
    tpu.vector_store %arg7[%c0, %c0_0, %c0_1], %0 {strides = array<i32>} : memref<18x25x8xbf16, #tpu.memory_space<vmem>>, vector<1x25x8xbf16>,
    %cst_2 = arith.constant 0.000000e+00 : bf16
    %2 = vector.broadcast %cst_2 : bf16 to vector<1x25x8xbf16>
    %c17 = arith.constant 17 : index
    %c0_3 = arith.constant 0 : index
    %c0_4 = arith.constant 0 : index
    %3 = vector.load %arg7[%c17, %c0_3, %c0_4] : memref<18x25x8xbf16, #tpu.memory_space<vmem>>, vector<1x25x8xbf16>
    tpu.vector_store %arg7[%c17, %c0_3, %c0_4], %2 {strides = array<i32>} : memref<18x25x8xbf16, #tpu.memory_space<vmem>>, vector<1x25x8xbf16>,
    %cst_5 = arith.constant 0.000000e+00 : bf16
    %4 = vector.broadcast %cst_5 : bf16 to vector<18x1x8xbf16>
    %c0_6 = arith.constant 0 : index
    %c7 = arith.constant 7 : index
    %c0_7 = arith.constant 0 : index
    %5 = vector.load %arg7[%c0_6, %c7, %c0_7] : memref<18x25x8xbf16, #tpu.memory_space<vmem>>, vector<18x1x8xbf16>
    tpu.vector_store %arg7[%c0_6, %c7, %c0_7], %4 {strides = array<i32>} : memref<18x25x8xbf16, #tpu.memory_space<vmem>>, vector<18x1x8xbf16>,
    %cst_8 = arith.constant 0.000000e+00 : bf16
    %6 = vector.broadcast %cst_8 : bf16 to vector<18x1x8xbf16>
    %c0_9 = arith.constant 0 : index
    %c24 = arith.constant 24 : index
    %c0_10 = arith.constant 0 : index
    %7 = vector.load %arg7[%c0_9, %c24, %c0_10] : memref<18x25x8xbf16, #tpu.memory_space<vmem>>, vector<18x1x8xbf16>
    tpu.vector_store %arg7[%c0_9, %c24, %c0_10], %6 {strides = array<i32>} : memref<18x25x8xbf16, #tpu.memory_space<vmem>>, vector<18x1x8xbf16>,
    %cst_11 = arith.constant 0.000000e+00 : bf16
    %8 = vector.broadcast %cst_11 : bf16 to vector<1x25x4xbf16>
    %c0_12 = arith.constant 0 : index
    %c0_13 = arith.constant 0 : index
    %c0_14 = arith.constant 0 : index
    %9 = vector.load %arg8[%c0_12, %c0_13, %c0_14] : memref<18x25x4xbf16, #tpu.memory_space<vmem>>, vector<1x25x4xbf16>
    tpu.vector_store %arg8[%c0_12, %c0_13, %c0_14], %8 {strides = array<i32>} : memref<18x25x4xbf16, #tpu.memory_space<vmem>>, vector<1x25x4xbf16>,
    %cst_15 = arith.constant 0.000000e+00 : bf16
    %10 = vector.broadcast %cst_15 : bf16 to vector<1x25x4xbf16>
    %c17_16 = arith.constant 17 : index
    %c0_17 = arith.constant 0 : index
    %c0_18 = arith.constant 0 : index
    %11 = vector.load %arg8[%c17_16, %c0_17, %c0_18] : memref<18x25x4xbf16, #tpu.memory_space<vmem>>, vector<1x25x4xbf16>
    tpu.vector_store %arg8[%c17_16, %c0_17, %c0_18], %10 {strides = array<i32>} : memref<18x25x4xbf16, #tpu.memory_space<vmem>>, vector<1x25x4xbf16>,
    %cst_19 = arith.constant 0.000000e+00 : bf16
    %12 = vector.broadcast %cst_19 : bf16 to vector<18x1x4xbf16>
    %c0_20 = arith.constant 0 : index
    %c7_21 = arith.constant 7 : index
    %c0_22 = arith.constant 0 : index
    %13 = vector.load %arg8[%c0_20, %c7_21, %c0_22] : memref<18x25x4xbf16, #tpu.memory_space<vmem>>, vector<18x1x4xbf16>
    tpu.vector_store %arg8[%c0_20, %c7_21, %c0_22], %12 {strides = array<i32>} : memref<18x25x4xbf16, #tpu.memory_space<vmem>>, vector<18x1x4xbf16>,
    %cst_23 = arith.constant 0.000000e+00 : bf16
    %14 = vector.broadcast %cst_23 : bf16 to vector<18x1x4xbf16>
    %c0_24 = arith.constant 0 : index
    %c24_25 = arith.constant 24 : index
    %c0_26 = arith.constant 0 : index
    %15 = vector.load %arg8[%c0_24, %c24_25, %c0_26] : memref<18x25x4xbf16, #tpu.memory_space<vmem>>, vector<18x1x4xbf16>
    tpu.vector_store %arg8[%c0_24, %c24_25, %c0_26], %14 {strides = array<i32>} : memref<18x25x4xbf16, #tpu.memory_space<vmem>>, vector<18x1x4xbf16>,
    %c0_27 = arith.constant 0 : index
    %c0_28 = arith.constant 0 : index
    %c0_29 = arith.constant 0 : index
    %c0_30 = arith.constant 0 : index
    %16 = vector.load %arg1[%c0_27, %c0_28, %c0_29, %c0_30] : memref<1x16x16x8xf32, #tpu.memory_space<vmem>>, vector<1x16x16x8xf32>
    %17 = vector.shape_cast %16 : vector<1x16x16x8xf32> to vector<16x16x8xf32>
    %18 = arith.truncf %17 : vector<16x16x8xf32> to vector<16x16x8xbf16>
    %c1 = arith.constant 1 : index
    %c8 = arith.constant 8 : index
    %c0_31 = arith.constant 0 : index
    %19 = vector.load %arg7[%c1, %c8, %c0_31] : memref<18x25x8xbf16, #tpu.memory_space<vmem>>, vector<16x16x8xbf16>
    tpu.vector_store %arg7[%c1, %c8, %c0_31], %18 {strides = array<i32>} : memref<18x25x8xbf16, #tpu.memory_space<vmem>>, vector<16x16x8xbf16>,
    %cst_32 = arith.constant 0.000000e+00 : f32
    %20 = vector.broadcast %cst_32 : f32 to vector<256x4xf32>
    %c0_33 = arith.constant 0 : index
    %c7_34 = arith.constant 7 : index
    %c0_35 = arith.constant 0 : index
    %21 = vector.load %arg7[%c0_33, %c7_34, %c0_35] : memref<18x25x8xbf16, #tpu.memory_space<vmem>>, vector<16x16x8xbf16>
    %22 = vector.shape_cast %21 : vector<16x16x8xbf16> to vector<256x8xbf16>
    %c0_36 = arith.constant 0 : index
    %c0_37 = arith.constant 0 : index
    %c0_38 = arith.constant 0 : index
    %23 = vector.load %arg2[%c0_36, %c0_37, %c0_38] : memref<9x8x4xbf16, #tpu.memory_space<vmem>>, vector<1x8x4xbf16>
    %24 = vector.shape_cast %23 : vector<1x8x4xbf16> to vector<8x4xbf16>
    %cst_39 = arith.constant dense<0.000000e+00> : vector<256x4xf32>
    %25 = tpu.matmul %22, %24, %cst_39 {dimension_numbers = #tpu.dot_dimension_numbers<[1], [0], [0], [1], [0, 0, 1, 1], [], []>} : vector<256x8xbf16>, vector<8x4xbf16>, vector<256x4xf32> -> vector<256x4xf32>
    %26 = arith.addf %20, %25 : vector<256x4xf32>
    %c0_40 = arith.constant 0 : index
    %c8_41 = arith.constant 8 : index
    %c0_42 = arith.constant 0 : index
    %27 = vector.load %arg7[%c0_40, %c8_41, %c0_42] : memref<18x25x8xbf16, #tpu.memory_space<vmem>>, vector<16x16x8xbf16>
    %28 = vector.shape_cast %27 : vector<16x16x8xbf16> to vector<256x8xbf16>
    %c1_43 = arith.constant 1 : index
    %c0_44 = arith.constant 0 : index
    %c0_45 = arith.constant 0 : index
    %29 = vector.load %arg2[%c1_43, %c0_44, %c0_45] : memref<9x8x4xbf16, #tpu.memory_space<vmem>>, vector<1x8x4xbf16>
    %30 = vector.shape_cast %29 : vector<1x8x4xbf16> to vector<8x4xbf16>
    %cst_46 = arith.constant dense<0.000000e+00> : vector<256x4xf32>
    %31 = tpu.matmul %28, %30, %cst_46 {dimension_numbers = #tpu.dot_dimension_numbers<[1], [0], [0], [1], [0, 0, 1, 1], [], []>} : vector<256x8xbf16>, vector<8x4xbf16>, vector<256x4xf32> -> vector<256x4xf32>
    %32 = arith.addf %26, %31 : vector<256x4xf32>
    %c0_47 = arith.constant 0 : index
    %c9 = arith.constant 9 : index
    %c0_48 = arith.constant 0 : index
    %33 = vector.load %arg7[%c0_47, %c9, %c0_48] : memref<18x25x8xbf16, #tpu.memory_space<vmem>>, vector<16x16x8xbf16>
    %34 = vector.shape_cast %33 : vector<16x16x8xbf16> to vector<256x8xbf16>
    %c2 = arith.constant 2 : index
    %c0_49 = arith.constant 0 : index
    %c0_50 = arith.constant 0 : index
    %35 = vector.load %arg2[%c2, %c0_49, %c0_50] : memref<9x8x4xbf16, #tpu.memory_space<vmem>>, vector<1x8x4xbf16>
    %36 = vector.shape_cast %35 : vector<1x8x4xbf16> to vector<8x4xbf16>
    %cst_51 = arith.constant dense<0.000000e+00> : vector<256x4xf32>
    %37 = tpu.matmul %34, %36, %cst_51 {dimension_numbers = #tpu.dot_dimension_numbers<[1], [0], [0], [1], [0, 0, 1, 1], [], []>} : vector<256x8xbf16>, vector<8x4xbf16>, vector<256x4xf32> -> vector<256x4xf32>
    %38 = arith.addf %32, %37 : vector<256x4xf32>
    %c1_52 = arith.constant 1 : index
    %c7_53 = arith.constant 7 : index
    %c0_54 = arith.constant 0 : index
    %39 = vector.load %arg7[%c1_52, %c7_53, %c0_54] : memref<18x25x8xbf16, #tpu.memory_space<vmem>>, vector<16x16x8xbf16>
    %40 = vector.shape_cast %39 : vector<16x16x8xbf16> to vector<256x8xbf16>
    %c3 = arith.constant 3 : index
    %c0_55 = arith.constant 0 : index
    %c0_56 = arith.constant 0 : index
    %41 = vector.load %arg2[%c3, %c0_55, %c0_56] : memref<9x8x4xbf16, #tpu.memory_space<vmem>>, vector<1x8x4xbf16>
    %42 = vector.shape_cast %41 : vector<1x8x4xbf16> to vector<8x4xbf16>
    %cst_57 = arith.constant dense<0.000000e+00> : vector<256x4xf32>
    %43 = tpu.matmul %40, %42, %cst_57 {dimension_numbers = #tpu.dot_dimension_numbers<[1], [0], [0], [1], [0, 0, 1, 1], [], []>} : vector<256x8xbf16>, vector<8x4xbf16>, vector<256x4xf32> -> vector<256x4xf32>
    %44 = arith.addf %38, %43 : vector<256x4xf32>
    %c1_58 = arith.constant 1 : index
    %c8_59 = arith.constant 8 : index
    %c0_60 = arith.constant 0 : index
    %45 = vector.load %arg7[%c1_58, %c8_59, %c0_60] : memref<18x25x8xbf16, #tpu.memory_space<vmem>>, vector<16x16x8xbf16>
    %46 = vector.shape_cast %45 : vector<16x16x8xbf16> to vector<256x8xbf16>
    %c4 = arith.constant 4 : index
    %c0_61 = arith.constant 0 : index
    %c0_62 = arith.constant 0 : index
    %47 = vector.load %arg2[%c4, %c0_61, %c0_62] : memref<9x8x4xbf16, #tpu.memory_space<vmem>>, vector<1x8x4xbf16>
    %48 = vector.shape_cast %47 : vector<1x8x4xbf16> to vector<8x4xbf16>
    %cst_63 = arith.constant dense<0.000000e+00> : vector<256x4xf32>
    %49 = tpu.matmul %46, %48, %cst_63 {dimension_numbers = #tpu.dot_dimension_numbers<[1], [0], [0], [1], [0, 0, 1, 1], [], []>} : vector<256x8xbf16>, vector<8x4xbf16>, vector<256x4xf32> -> vector<256x4xf32>
    %50 = arith.addf %44, %49 : vector<256x4xf32>
    %c1_64 = arith.constant 1 : index
    %c9_65 = arith.constant 9 : index
    %c0_66 = arith.constant 0 : index
    %51 = vector.load %arg7[%c1_64, %c9_65, %c0_66] : memref<18x25x8xbf16, #tpu.memory_space<vmem>>, vector<16x16x8xbf16>
    %52 = vector.shape_cast %51 : vector<16x16x8xbf16> to vector<256x8xbf16>
    %c5 = arith.constant 5 : index
    %c0_67 = arith.constant 0 : index
    %c0_68 = arith.constant 0 : index
    %53 = vector.load %arg2[%c5, %c0_67, %c0_68] : memref<9x8x4xbf16, #tpu.memory_space<vmem>>, vector<1x8x4xbf16>
    %54 = vector.shape_cast %53 : vector<1x8x4xbf16> to vector<8x4xbf16>
    %cst_69 = arith.constant dense<0.000000e+00> : vector<256x4xf32>
    %55 = tpu.matmul %52, %54, %cst_69 {dimension_numbers = #tpu.dot_dimension_numbers<[1], [0], [0], [1], [0, 0, 1, 1], [], []>} : vector<256x8xbf16>, vector<8x4xbf16>, vector<256x4xf32> -> vector<256x4xf32>
    %56 = arith.addf %50, %55 : vector<256x4xf32>
    %c2_70 = arith.constant 2 : index
    %c7_71 = arith.constant 7 : index
    %c0_72 = arith.constant 0 : index
    %57 = vector.load %arg7[%c2_70, %c7_71, %c0_72] : memref<18x25x8xbf16, #tpu.memory_space<vmem>>, vector<16x16x8xbf16>
    %58 = vector.shape_cast %57 : vector<16x16x8xbf16> to vector<256x8xbf16>
    %c6 = arith.constant 6 : index
    %c0_73 = arith.constant 0 : index
    %c0_74 = arith.constant 0 : index
    %59 = vector.load %arg2[%c6, %c0_73, %c0_74] : memref<9x8x4xbf16, #tpu.memory_space<vmem>>, vector<1x8x4xbf16>
    %60 = vector.shape_cast %59 : vector<1x8x4xbf16> to vector<8x4xbf16>
    %cst_75 = arith.constant dense<0.000000e+00> : vector<256x4xf32>
    %61 = tpu.matmul %58, %60, %cst_75 {dimension_numbers = #tpu.dot_dimension_numbers<[1], [0], [0], [1], [0, 0, 1, 1], [], []>} : vector<256x8xbf16>, vector<8x4xbf16>, vector<256x4xf32> -> vector<256x4xf32>
    %62 = arith.addf %56, %61 : vector<256x4xf32>
    %c2_76 = arith.constant 2 : index
    %c8_77 = arith.constant 8 : index
    %c0_78 = arith.constant 0 : index
    %63 = vector.load %arg7[%c2_76, %c8_77, %c0_78] : memref<18x25x8xbf16, #tpu.memory_space<vmem>>, vector<16x16x8xbf16>
    %64 = vector.shape_cast %63 : vector<16x16x8xbf16> to vector<256x8xbf16>
    %c7_79 = arith.constant 7 : index
    %c0_80 = arith.constant 0 : index
    %c0_81 = arith.constant 0 : index
    %65 = vector.load %arg2[%c7_79, %c0_80, %c0_81] : memref<9x8x4xbf16, #tpu.memory_space<vmem>>, vector<1x8x4xbf16>
    %66 = vector.shape_cast %65 : vector<1x8x4xbf16> to vector<8x4xbf16>
    %cst_82 = arith.constant dense<0.000000e+00> : vector<256x4xf32>
    %67 = tpu.matmul %64, %66, %cst_82 {dimension_numbers = #tpu.dot_dimension_numbers<[1], [0], [0], [1], [0, 0, 1, 1], [], []>} : vector<256x8xbf16>, vector<8x4xbf16>, vector<256x4xf32> -> vector<256x4xf32>
    %68 = arith.addf %62, %67 : vector<256x4xf32>
    %c2_83 = arith.constant 2 : index
    %c9_84 = arith.constant 9 : index
    %c0_85 = arith.constant 0 : index
    %69 = vector.load %arg7[%c2_83, %c9_84, %c0_85] : memref<18x25x8xbf16, #tpu.memory_space<vmem>>, vector<16x16x8xbf16>
    %70 = vector.shape_cast %69 : vector<16x16x8xbf16> to vector<256x8xbf16>
    %c8_86 = arith.constant 8 : index
    %c0_87 = arith.constant 0 : index
    %c0_88 = arith.constant 0 : index
    %71 = vector.load %arg2[%c8_86, %c0_87, %c0_88] : memref<9x8x4xbf16, #tpu.memory_space<vmem>>, vector<1x8x4xbf16>
    %72 = vector.shape_cast %71 : vector<1x8x4xbf16> to vector<8x4xbf16>
    %cst_89 = arith.constant dense<0.000000e+00> : vector<256x4xf32>
    %73 = tpu.matmul %70, %72, %cst_89 {dimension_numbers = #tpu.dot_dimension_numbers<[1], [0], [0], [1], [0, 0, 1, 1], [], []>} : vector<256x8xbf16>, vector<8x4xbf16>, vector<256x4xf32> -> vector<256x4xf32>
    %74 = arith.addf %68, %73 : vector<256x4xf32>
    %c0_90 = arith.constant 0 : index
    %c0_91 = arith.constant 0 : index
    %75 = vector.load %arg3[%c0_90, %c0_91] : memref<1x4xf32, #tpu.memory_space<vmem>>, vector<1x4xf32>
    %76 = vector.broadcast %75 : vector<1x4xf32> to vector<256x4xf32>
    %77 = arith.addf %74, %76 : vector<256x4xf32>
    %cst_92 = arith.constant 5.000000e-01 : f32
    %78 = vector.broadcast %cst_92 : f32 to vector<256x4xf32>
    %79 = arith.mulf %78, %77 : vector<256x4xf32>
    %80 = math.tanh %79 : vector<256x4xf32>
    %cst_93 = arith.constant 5.000000e-01 : f32
    %81 = vector.broadcast %cst_93 : f32 to vector<256x4xf32>
    %82 = arith.mulf %81, %80 : vector<256x4xf32>
    %cst_94 = arith.constant 5.000000e-01 : f32
    %83 = vector.broadcast %cst_94 : f32 to vector<256x4xf32>
    %84 = arith.addf %82, %83 : vector<256x4xf32>
    %85 = arith.mulf %77, %84 : vector<256x4xf32>
    %86 = vector.shape_cast %85 : vector<256x4xf32> to vector<16x16x4xf32>
    %87 = arith.truncf %86 : vector<16x16x4xf32> to vector<16x16x4xbf16>
    %c1_95 = arith.constant 1 : index
    %c8_96 = arith.constant 8 : index
    %c0_97 = arith.constant 0 : index
    %88 = vector.load %arg8[%c1_95, %c8_96, %c0_97] : memref<18x25x4xbf16, #tpu.memory_space<vmem>>, vector<16x16x4xbf16>
    tpu.vector_store %arg8[%c1_95, %c8_96, %c0_97], %87 {strides = array<i32>} : memref<18x25x4xbf16, #tpu.memory_space<vmem>>, vector<16x16x4xbf16>,
    %cst_98 = arith.constant 0.000000e+00 : f32
    %89 = vector.broadcast %cst_98 : f32 to vector<256x8xf32>
    %c0_99 = arith.constant 0 : index
    %c7_100 = arith.constant 7 : index
    %c0_101 = arith.constant 0 : index
    %90 = vector.load %arg8[%c0_99, %c7_100, %c0_101] : memref<18x25x4xbf16, #tpu.memory_space<vmem>>, vector<16x16x4xbf16>
    %91 = vector.shape_cast %90 : vector<16x16x4xbf16> to vector<256x4xbf16>
    %c0_102 = arith.constant 0 : index
    %c0_103 = arith.constant 0 : index
    %c0_104 = arith.constant 0 : index
    %92 = vector.load %arg4[%c0_102, %c0_103, %c0_104] : memref<9x4x8xbf16, #tpu.memory_space<vmem>>, vector<1x4x8xbf16>
    %93 = vector.shape_cast %92 : vector<1x4x8xbf16> to vector<4x8xbf16>
    %cst_105 = arith.constant dense<0.000000e+00> : vector<256x8xf32>
    %94 = tpu.matmul %91, %93, %cst_105 {dimension_numbers = #tpu.dot_dimension_numbers<[1], [0], [0], [1], [0, 0, 1, 1], [], []>} : vector<256x4xbf16>, vector<4x8xbf16>, vector<256x8xf32> -> vector<256x8xf32>
    %95 = arith.addf %89, %94 : vector<256x8xf32>
    %c0_106 = arith.constant 0 : index
    %c8_107 = arith.constant 8 : index
    %c0_108 = arith.constant 0 : index
    %96 = vector.load %arg8[%c0_106, %c8_107, %c0_108] : memref<18x25x4xbf16, #tpu.memory_space<vmem>>, vector<16x16x4xbf16>
    %97 = vector.shape_cast %96 : vector<16x16x4xbf16> to vector<256x4xbf16>
    %c1_109 = arith.constant 1 : index
    %c0_110 = arith.constant 0 : index
    %c0_111 = arith.constant 0 : index
    %98 = vector.load %arg4[%c1_109, %c0_110, %c0_111] : memref<9x4x8xbf16, #tpu.memory_space<vmem>>, vector<1x4x8xbf16>
    %99 = vector.shape_cast %98 : vector<1x4x8xbf16> to vector<4x8xbf16>
    %cst_112 = arith.constant dense<0.000000e+00> : vector<256x8xf32>
    %100 = tpu.matmul %97, %99, %cst_112 {dimension_numbers = #tpu.dot_dimension_numbers<[1], [0], [0], [1], [0, 0, 1, 1], [], []>} : vector<256x4xbf16>, vector<4x8xbf16>, vector<256x8xf32> -> vector<256x8xf32>
    %101 = arith.addf %95, %100 : vector<256x8xf32>
    %c0_113 = arith.constant 0 : index
    %c9_114 = arith.constant 9 : index
    %c0_115 = arith.constant 0 : index
    %102 = vector.load %arg8[%c0_113, %c9_114, %c0_115] : memref<18x25x4xbf16, #tpu.memory_space<vmem>>, vector<16x16x4xbf16>
    %103 = vector.shape_cast %102 : vector<16x16x4xbf16> to vector<256x4xbf16>
    %c2_116 = arith.constant 2 : index
    %c0_117 = arith.constant 0 : index
    %c0_118 = arith.constant 0 : index
    %104 = vector.load %arg4[%c2_116, %c0_117, %c0_118] : memref<9x4x8xbf16, #tpu.memory_space<vmem>>, vector<1x4x8xbf16>
    %105 = vector.shape_cast %104 : vector<1x4x8xbf16> to vector<4x8xbf16>
    %cst_119 = arith.constant dense<0.000000e+00> : vector<256x8xf32>
    %106 = tpu.matmul %103, %105, %cst_119 {dimension_numbers = #tpu.dot_dimension_numbers<[1], [0], [0], [1], [0, 0, 1, 1], [], []>} : vector<256x4xbf16>, vector<4x8xbf16>, vector<256x8xf32> -> vector<256x8xf32>
    %107 = arith.addf %101, %106 : vector<256x8xf32>
    %c1_120 = arith.constant 1 : index
    %c7_121 = arith.constant 7 : index
    %c0_122 = arith.constant 0 : index
    %108 = vector.load %arg8[%c1_120, %c7_121, %c0_122] : memref<18x25x4xbf16, #tpu.memory_space<vmem>>, vector<16x16x4xbf16>
    %109 = vector.shape_cast %108 : vector<16x16x4xbf16> to vector<256x4xbf16>
    %c3_123 = arith.constant 3 : index
    %c0_124 = arith.constant 0 : index
    %c0_125 = arith.constant 0 : index
    %110 = vector.load %arg4[%c3_123, %c0_124, %c0_125] : memref<9x4x8xbf16, #tpu.memory_space<vmem>>, vector<1x4x8xbf16>
    %111 = vector.shape_cast %110 : vector<1x4x8xbf16> to vector<4x8xbf16>
    %cst_126 = arith.constant dense<0.000000e+00> : vector<256x8xf32>
    %112 = tpu.matmul %109, %111, %cst_126 {dimension_numbers = #tpu.dot_dimension_numbers<[1], [0], [0], [1], [0, 0, 1, 1], [], []>} : vector<256x4xbf16>, vector<4x8xbf16>, vector<256x8xf32> -> vector<256x8xf32>
    %113 = arith.addf %107, %112 : vector<256x8xf32>
    %c1_127 = arith.constant 1 : index
    %c8_128 = arith.constant 8 : index
    %c0_129 = arith.constant 0 : index
    %114 = vector.load %arg8[%c1_127, %c8_128, %c0_129] : memref<18x25x4xbf16, #tpu.memory_space<vmem>>, vector<16x16x4xbf16>
    %115 = vector.shape_cast %114 : vector<16x16x4xbf16> to vector<256x4xbf16>
    %c4_130 = arith.constant 4 : index
    %c0_131 = arith.constant 0 : index
    %c0_132 = arith.constant 0 : index
    %116 = vector.load %arg4[%c4_130, %c0_131, %c0_132] : memref<9x4x8xbf16, #tpu.memory_space<vmem>>, vector<1x4x8xbf16>
    %117 = vector.shape_cast %116 : vector<1x4x8xbf16> to vector<4x8xbf16>
    %cst_133 = arith.constant dense<0.000000e+00> : vector<256x8xf32>
    %118 = tpu.matmul %115, %117, %cst_133 {dimension_numbers = #tpu.dot_dimension_numbers<[1], [0], [0], [1], [0, 0, 1, 1], [], []>} : vector<256x4xbf16>, vector<4x8xbf16>, vector<256x8xf32> -> vector<256x8xf32>
    %119 = arith.addf %113, %118 : vector<256x8xf32>
    %c1_134 = arith.constant 1 : index
    %c9_135 = arith.constant 9 : index
    %c0_136 = arith.constant 0 : index
    %120 = vector.load %arg8[%c1_134, %c9_135, %c0_136] : memref<18x25x4xbf16, #tpu.memory_space<vmem>>, vector<16x16x4xbf16>
    %121 = vector.shape_cast %120 : vector<16x16x4xbf16> to vector<256x4xbf16>
    %c5_137 = arith.constant 5 : index
    %c0_138 = arith.constant 0 : index
    %c0_139 = arith.constant 0 : index
    %122 = vector.load %arg4[%c5_137, %c0_138, %c0_139] : memref<9x4x8xbf16, #tpu.memory_space<vmem>>, vector<1x4x8xbf16>
    %123 = vector.shape_cast %122 : vector<1x4x8xbf16> to vector<4x8xbf16>
    %cst_140 = arith.constant dense<0.000000e+00> : vector<256x8xf32>
    %124 = tpu.matmul %121, %123, %cst_140 {dimension_numbers = #tpu.dot_dimension_numbers<[1], [0], [0], [1], [0, 0, 1, 1], [], []>} : vector<256x4xbf16>, vector<4x8xbf16>, vector<256x8xf32> -> vector<256x8xf32>
    %125 = arith.addf %119, %124 : vector<256x8xf32>
    %c2_141 = arith.constant 2 : index
    %c7_142 = arith.constant 7 : index
    %c0_143 = arith.constant 0 : index
    %126 = vector.load %arg8[%c2_141, %c7_142, %c0_143] : memref<18x25x4xbf16, #tpu.memory_space<vmem>>, vector<16x16x4xbf16>
    %127 = vector.shape_cast %126 : vector<16x16x4xbf16> to vector<256x4xbf16>
    %c6_144 = arith.constant 6 : index
    %c0_145 = arith.constant 0 : index
    %c0_146 = arith.constant 0 : index
    %128 = vector.load %arg4[%c6_144, %c0_145, %c0_146] : memref<9x4x8xbf16, #tpu.memory_space<vmem>>, vector<1x4x8xbf16>
    %129 = vector.shape_cast %128 : vector<1x4x8xbf16> to vector<4x8xbf16>
    %cst_147 = arith.constant dense<0.000000e+00> : vector<256x8xf32>
    %130 = tpu.matmul %127, %129, %cst_147 {dimension_numbers = #tpu.dot_dimension_numbers<[1], [0], [0], [1], [0, 0, 1, 1], [], []>} : vector<256x4xbf16>, vector<4x8xbf16>, vector<256x8xf32> -> vector<256x8xf32>
    %131 = arith.addf %125, %130 : vector<256x8xf32>
    %c2_148 = arith.constant 2 : index
    %c8_149 = arith.constant 8 : index
    %c0_150 = arith.constant 0 : index
    %132 = vector.load %arg8[%c2_148, %c8_149, %c0_150] : memref<18x25x4xbf16, #tpu.memory_space<vmem>>, vector<16x16x4xbf16>
    %133 = vector.shape_cast %132 : vector<16x16x4xbf16> to vector<256x4xbf16>
    %c7_151 = arith.constant 7 : index
    %c0_152 = arith.constant 0 : index
    %c0_153 = arith.constant 0 : index
    %134 = vector.load %arg4[%c7_151, %c0_152, %c0_153] : memref<9x4x8xbf16, #tpu.memory_space<vmem>>, vector<1x4x8xbf16>
    %135 = vector.shape_cast %134 : vector<1x4x8xbf16> to vector<4x8xbf16>
    %cst_154 = arith.constant dense<0.000000e+00> : vector<256x8xf32>
    %136 = tpu.matmul %133, %135, %cst_154 {dimension_numbers = #tpu.dot_dimension_numbers<[1], [0], [0], [1], [0, 0, 1, 1], [], []>} : vector<256x4xbf16>, vector<4x8xbf16>, vector<256x8xf32> -> vector<256x8xf32>
    %137 = arith.addf %131, %136 : vector<256x8xf32>
    %c2_155 = arith.constant 2 : index
    %c9_156 = arith.constant 9 : index
    %c0_157 = arith.constant 0 : index
    %138 = vector.load %arg8[%c2_155, %c9_156, %c0_157] : memref<18x25x4xbf16, #tpu.memory_space<vmem>>, vector<16x16x4xbf16>
    %139 = vector.shape_cast %138 : vector<16x16x4xbf16> to vector<256x4xbf16>
    %c8_158 = arith.constant 8 : index
    %c0_159 = arith.constant 0 : index
    %c0_160 = arith.constant 0 : index
    %140 = vector.load %arg4[%c8_158, %c0_159, %c0_160] : memref<9x4x8xbf16, #tpu.memory_space<vmem>>, vector<1x4x8xbf16>
    %141 = vector.shape_cast %140 : vector<1x4x8xbf16> to vector<4x8xbf16>
    %cst_161 = arith.constant dense<0.000000e+00> : vector<256x8xf32>
    %142 = tpu.matmul %139, %141, %cst_161 {dimension_numbers = #tpu.dot_dimension_numbers<[1], [0], [0], [1], [0, 0, 1, 1], [], []>} : vector<256x4xbf16>, vector<4x8xbf16>, vector<256x8xf32> -> vector<256x8xf32>
    %143 = arith.addf %137, %142 : vector<256x8xf32>
    %c0_162 = arith.constant 0 : index
    %c0_163 = arith.constant 0 : index
    %144 = vector.load %arg5[%c0_162, %c0_163] : memref<1x8xf32, #tpu.memory_space<vmem>>, vector<1x8xf32>
    %145 = vector.broadcast %144 : vector<1x8xf32> to vector<256x8xf32>
    %146 = arith.addf %143, %145 : vector<256x8xf32>
    %cst_164 = arith.constant 5.000000e-01 : f32
    %147 = vector.broadcast %cst_164 : f32 to vector<256x8xf32>
    %148 = arith.mulf %147, %146 : vector<256x8xf32>
    %149 = math.tanh %148 : vector<256x8xf32>
    %cst_165 = arith.constant 5.000000e-01 : f32
    %150 = vector.broadcast %cst_165 : f32 to vector<256x8xf32>
    %151 = arith.mulf %150, %149 : vector<256x8xf32>
    %cst_166 = arith.constant 5.000000e-01 : f32
    %152 = vector.broadcast %cst_166 : f32 to vector<256x8xf32>
    %153 = arith.addf %151, %152 : vector<256x8xf32>
    %154 = arith.mulf %146, %153 : vector<256x8xf32>
    %c0_167 = arith.constant 0 : index
    %c0_168 = arith.constant 0 : index
    %c0_169 = arith.constant 0 : index
    %c0_170 = arith.constant 0 : index
    %155 = vector.load %arg1[%c0_167, %c0_168, %c0_169, %c0_170] : memref<1x16x16x8xf32, #tpu.memory_space<vmem>>, vector<1x16x16x8xf32>
    %156 = vector.shape_cast %155 : vector<1x16x16x8xf32> to vector<16x16x8xf32>
    %157 = vector.shape_cast %156 : vector<16x16x8xf32> to vector<256x8xf32>
    %158 = arith.addf %154, %157 : vector<256x8xf32>
    %159 = vector.shape_cast %158 : vector<256x8xf32> to vector<16x16x8xf32>
    %c0_171 = arith.constant 0 : index
    %c0_172 = arith.constant 0 : index
    %c0_173 = arith.constant 0 : index
    %c0_174 = arith.constant 0 : index
    %160 = vector.load %arg6[%c0_171, %c0_172, %c0_173, %c0_174] : memref<1x16x16x8xf32, #tpu.memory_space<vmem>>, vector<1x16x16x8xf32>
    %161 = vector.shape_cast %160 : vector<1x16x16x8xf32> to vector<16x16x8xf32>
    %162 = vector.shape_cast %159 : vector<16x16x8xf32> to vector<1x16x16x8xf32>
    tpu.vector_store %arg6[%c0_171, %c0_172, %c0_173, %c0_174], %162 {strides = array<i32>} : memref<1x16x16x8xf32, #tpu.memory_space<vmem>>, vector<1x16x16x8xf32>,
    return
  }
  func.func @transform_0(%arg0: i32) -> (i32, i32, i32, i32) {
    %c0_i32 = arith.constant 0 : i32
    %c0_i32_0 = arith.constant 0 : i32
    %c0_i32_1 = arith.constant 0 : i32
    %c0_i32_2 = arith.constant 0 : i32
    return %arg0, %c0_i32, %c0_i32_0, %c0_i32_1 : i32, i32, i32, i32
  }
  func.func @transform_1(%arg0: i32) -> (i32, i32, i32) {
    %c0_i32 = arith.constant 0 : i32
    %c0_i32_0 = arith.constant 0 : i32
    %c0_i32_1 = arith.constant 0 : i32
    %c0_i32_2 = arith.constant 0 : i32
    return %c0_i32, %c0_i32_0, %c0_i32_1 : i32, i32, i32
  }
  func.func @transform_2(%arg0: i32) -> (i32, i32) {
    %c0_i32 = arith.constant 0 : i32
    %c0_i32_0 = arith.constant 0 : i32
    %c0_i32_1 = arith.constant 0 : i32
    return %c0_i32, %c0_i32_0 : i32, i32
  }
  func.func @transform_3(%arg0: i32) -> (i32, i32, i32) {
    %c0_i32 = arith.constant 0 : i32
    %c0_i32_0 = arith.constant 0 : i32
    %c0_i32_1 = arith.constant 0 : i32
    %c0_i32_2 = arith.constant 0 : i32
    return %c0_i32, %c0_i32_0, %c0_i32_1 : i32, i32, i32
  }
  func.func @transform_4(%arg0: i32) -> (i32, i32) {
    %c0_i32 = arith.constant 0 : i32
    %c0_i32_0 = arith.constant 0 : i32
    %c0_i32_1 = arith.constant 0 : i32
    return %c0_i32, %c0_i32_0 : i32, i32
  }
  func.func @transform_5(%arg0: i32) -> (i32, i32, i32, i32) {
    %c0_i32 = arith.constant 0 : i32
    %c0_i32_0 = arith.constant 0 : i32
    %c0_i32_1 = arith.constant 0 : i32
    %c0_i32_2 = arith.constant 0 : i32
    return %arg0, %c0_i32, %c0_i32_0, %c0_i32_1 : i32, i32, i32, i32
  }
}

</mosaic_0001>

<bundles_post_ra>
// kernel: tpu_custom_call.1
= control target key start
LH: loop header
LB: loop body
LE: loop exit
PB: predicated region body
PF: predicated region fallthrough
CT: control target
= control target key end

     0   :  { %s13798_s18 = smov 0   ;;  %s18261_s0 = inlined_call_operand.vmem [shape: f32[2,16,16,8], index: 0, kind: input, shape index: {}]   ;;  %s18262_s1 = inlined_call_operand.vmem [shape: bf16[9,8,4], index: 1, kind: input, shape index: {}]   ;;  %s18263_s2 = inlined_call_operand.vmem [shape: f32[1,4], index: 2, kind: input, shape index: {}]   ;;  %s18264_s3 = inlined_call_operand.vmem [shape: bf16[9,4,8], index: 3, kind: input, shape index: {}]   ;;  %s18265_s4 = inlined_call_operand.vmem [shape: f32[1,8], index: 4, kind: input, shape index: {}]   ;;  %s18266_s5 = inlined_call_operand.vmem [shape: f32[2,16,16,8], index: 5, kind: output, shape index: {}]  }
   0x1 LB: > { %s11740_s19 = sadd.s32 4294967295, %s13765_s18   ;;  %p11744_p0 = scmp.ge.s32.totalorder %s13765_s18, 1  ;;  %s13765_s18 = sphi %s13798_s18, %s15_s18  }
   0x2   : > { %p187_p1 = scmp.lt.s32.totalorder %s13765_s18, 3 }
   0x4   : > { %p188_p2 = pnand %p11744_p0, %p187_p1 }
   0x6   : > { %191 = sbr.rel (%p188_p2) target bundleno = 1300 (0x514), region = 40 }
   0xb   : > { %v11797_v0 = vld [vmem:[%s18262_s1 + $0x4] sm:$0xf]  ;;  %vm1207_vm0 = vcmask 1043456   ;;  %vm226_vm1 = vcmask 60416   ;;  %v18267_v2 = vmov 0   ;;  %p215_p3 = scmp.lt.s32.totalorder %s11740_s19, 1 }
   0xc   : > { %13489 = vmatprep.subr.msk.bf16.mxu0 %vm1207_vm0, %v11797_v0  ;;  %v1209_v1 = vsel %vm1207_vm0, %v11797_v0, 0  ;;  %228 = vst.msk [vmem:[#allocation2 + $0x4] sm:$0xf] %vm226_vm1, %v18267_v2  ;;  %229 = vst.msk [vmem:[#allocation2 + $0x8] sm:$0xf] %vm226_vm1, %v18267_v2  ;;  %vm243_vm2 = vcmask 60419  }
   0xd   : > { %227 = vst.msk [vmem:[#allocation2] sm:$0xf] %vm226_vm1, %v18267_v2  ;;  %237 = vst.msk [vmem:[#allocation2 + $0x110] sm:$0xf] %vm226_vm1, %v18267_v2  ;;  %v11862_v3 = vld [vmem:[%s18262_s1 + $0x8] sm:$0xf]  ;;  %12878 = vmatpush3.bf16.msra.mxu0 %v1209_v1 }
   0xe   : > { %238 = vst.msk [vmem:[#allocation2 + $0x114] sm:$0xf] %vm226_vm1, %v18267_v2  ;;  %239 = vst.msk [vmem:[#allocation2 + $0x118] sm:$0xf] %vm226_vm1, %v18267_v2  ;;  %v1075_v4 = vld [vmem:[%s18262_s1] sm:$0xf]  ;;  %13491 = vmatprep.subr.msk.bf16.mxu0 %vm1207_vm0, %v11862_v3 }
   0xf   : > { %13490 = vmatprep.subr.msk.bf16.mxu1 %vm1207_vm0, %v1075_v4  ;;  %v1469_v5 = vsel %vm1207_vm0, %v1075_v4, 0  ;;  %s18728_s19 = smov (!%p215_p3, %s11740_s19), 1  ;;  %vm231_vm3 = vsmask.f32 256  ;;  %vm244_vm4 = vsmask.f32 7950 }
  0x10   : > { %12912 = vmatpush3.bf16.msra.mxu1 %v1469_v5  ;;  %vm13835_vm5 = vmand %vm243_vm2, %vm244_vm4  ;;  %vm721_vm6 = vsmask.f32 4368  ;;  %v249_v7 = vld [vmem:[#allocation2 + $0x10] sm:$0x8]  ;;  %v252_v8 = vld [vmem:[#allocation2 + $0x20] sm:$0x8] }
  0x11   : > { %s12505_s26 = sshll.u32 %s18728_s19, 8  ;;  %v250_v9 = vsel %vm13835_vm5, 0, %v249_v7  ;;  %v253_v10 = vsel %vm13835_vm5, 0, %v252_v8  ;;  %v255_v11 = vld [vmem:[#allocation2 + $0x30] sm:$0x8]  ;;  %vm1158_vm7 = vcmask 64512   ;;  %vm13892_vm8 = vmor %vm231_vm3, %vm721_vm6 }
  0x12   : > { %s13849_s29 = scalar_lea.vmem %s18261_s0, %s12505_s26  ;;  %251 = vst [vmem:[#allocation2 + $0x10] sm:$0x8] %v250_v9  ;;  %254 = vst [vmem:[#allocation2 + $0x20] sm:$0x8] %v253_v10  ;;  %v256_v12 = vsel %vm13835_vm5, 0, %v255_v11  ;;  %v13856_v17 = vsel %vm1207_vm0, %v11862_v3, 0  ;;  %s18022_s30 = scalar_lea.vmem %s18266_s5, %s12505_s26 }
  0x13   : > { %v258_v13 = vld [vmem:[#allocation2 + $0x40] sm:$0x8]  ;;  %v261_v14 = vld [vmem:[#allocation2 + $0x50] sm:$0x8]  ;;  %v481_v16 = vld [vmem:[%s13849_s29 + $0x8] sm:$0xff]  ;;  %v18284_v60 = vmov 0 }
  0x14   : > { %v480_v15 = vld [vmem:[%s13849_s29] sm:$0xff]  ;;  %v482_v18 = vld [vmem:[%s13849_s29 + $0x10] sm:$0xff]  ;;  %257 = vst [vmem:[#allocation2 + $0x30] sm:$0x8] %v256_v12  ;;  %v259_v19 = vsel %vm13835_vm5, 0, %v258_v13  ;;  %v262_v20 = vsel %vm13835_vm5, 0, %v261_v14  ;;  %v12508_v24 = vpack.c.bf16 %v481_v16, %v481_v16 }
  0x15   : > { %v13863_v21 = vld [vmem:[#allocation2 + $0x4] sm:$0xf]  ;;  %v675_v22 = vld [vmem:[#allocation2 + $0x8] sm:$0xf]  ;;  %v12507_v23 = vpack.c.bf16 %v480_v15, %v480_v15  ;;  %v246_v25 = vld [vmem:[#allocation2] sm:$0x8]  ;;  %v12509_v26 = vpack.c.bf16 %v482_v18, %v482_v18 }
  0x16   : > { %260 = vst [vmem:[#allocation2 + $0x40] sm:$0x8] %v259_v19  ;;  %263 = vst [vmem:[#allocation2 + $0x50] sm:$0x8] %v262_v20  ;;  %v729_v27 = vshrl.u32 %v13863_v21, 16  ;;  %v732_v28 = vshll.u32 %v13863_v21, 16  ;;  %v11798_v33 = vcombine.low %v13863_v21, %v675_v22 }
  0x17   : > { %v738_v29 = vshrl.u32 %v675_v22, 16  ;;  %v741_v30 = vshll.u32 %v675_v22, 16  ;;  %v483_v31 = vld [vmem:[%s13849_s29 + $0x18] sm:$0xff]  ;;  %v484_v32 = vld [vmem:[%s13849_s29 + $0x20] sm:$0xff]  ;;  %641 = vst.msk [vmem:[#allocation2 + $0x14] sm:$0xf] %vm226_vm1, %v12507_v23 }
  0x18   : > { %642 = vst.msk [vmem:[#allocation2 + $0x18] sm:$0xf] %vm226_vm1, %v12508_v24  ;;  %v247_v34 = vsel %vm13835_vm5, 0, %v246_v25  ;;  %v12510_v35 = vpack.c.bf16 %v483_v31, %v483_v31  ;;  %643 = vst.msk [vmem:[#allocation2 + $0x24] sm:$0xf] %vm226_vm1, %v12509_v26  ;;  %v485_v36 = vld [vmem:[%s13849_s29 + $0x28] sm:$0xff]  ;;  %v12511_v37 = vpack.c.bf16 %v484_v32, %v484_v32  ;;  %12879 = vmatprep.mubr.msk.bf16.mxu0 %vm1158_vm7, %v11798_v33 }
  0x19   : > { %v486_v38 = vld [vmem:[%s13849_s29 + $0x30] sm:$0xff]  ;;  %v487_v39 = vld [vmem:[%s13849_s29 + $0x38] sm:$0xff]  ;;  %v731_v40 = vrot.slane %v729_v27, 7  ;;  %v740_v41 = vrot.slane %v738_v29, 7  ;;  %248 = vst [vmem:[#allocation2] sm:$0x8] %v247_v34  ;;  %v12512_v42 = vpack.c.bf16 %v485_v36, %v485_v36 }
  0x1a   : > { %v12513_v43 = vpack.c.bf16 %v486_v38, %v486_v38  ;;  %v488_v44 = vld [vmem:[%s13849_s29 + $0x40] sm:$0xff]  ;;  %v489_v45 = vld [vmem:[%s13849_s29 + $0x48] sm:$0xff]  ;;  %v490_v46 = vld [vmem:[%s13849_s29 + $0x50] sm:$0xff]  ;;  %644 = vst.msk [vmem:[#allocation2 + $0x28] sm:$0xf] %vm226_vm1, %v12510_v35  ;;  %v12514_v47 = vpack.c.bf16 %v487_v39, %v487_v39  ;;  %v18285_v60 = vsel %vm13892_vm8, 4294967295, %v18284_v60 }
  0x1b   : > { %645 = vst.msk [vmem:[#allocation2 + $0x34] sm:$0xf] %vm226_vm1, %v12511_v37  ;;  %v12515_v48 = vpack.c.bf16 %v488_v44, %v488_v44  ;;  %v12516_v49 = vpack.c.bf16 %v489_v45, %v489_v45  ;;  %v491_v50 = vld [vmem:[%s13849_s29 + $0x58] sm:$0xff]  ;;  %v12517_v51 = vpack.c.bf16 %v490_v46, %v490_v46  ;;  %v492_v52 = vld [vmem:[%s13849_s29 + $0x60] sm:$0xff]  ;;  %v493_v53 = vld [vmem:[%s13849_s29 + $0x68] sm:$0xff]  ;;  %v736_v54 = vrot.slane %v731_v40, 4 }
  0x1c   : > { %v743_v55 = vor.u32 %v741_v30, %v740_v41  ;;  %v676_v56 = vld [vmem:[#allocation2 + $0x10] sm:$0x8]  ;;  %646 = vst.msk [vmem:[#allocation2 + $0x38] sm:$0xf] %vm226_vm1, %v12512_v42  ;;  %v679_v57 = vld [vmem:[#allocation2 + $0x20] sm:$0x8]  ;;  %v12518_v58 = vpack.c.bf16 %v491_v50, %v491_v50  ;;  %v12519_v0 = vpack.c.bf16 %v492_v52, %v492_v52  ;;  %v12520_v1 = vpack.c.bf16 %v493_v53, %v493_v53 }
  0x1d   : > { %647 = vst.msk [vmem:[#allocation2 + $0x44] sm:$0xf] %vm226_vm1, %v12513_v43  ;;  %v494_v59 = vld [vmem:[%s13849_s29 + $0x70] sm:$0xff]  ;;  %18286 = vst [vmem:[#allocation4_spill] sm:$0xff] %v18285_v60  ;;  %v746_v61 = vshrl.u32 %v676_v56, 16  ;;  %v768_v62 = vshrl.u32 %v679_v57, 16  ;;  %v734_v19 = vor.u32 %v732_v28, %v731_v40 }
  0x1e   : > { %648 = vst.msk [vmem:[#allocation2 + $0x48] sm:$0xf] %vm226_vm1, %v12514_v47  ;;  %v13897_v63 = vld [vmem:[#allocation2 + $0x30] sm:$0x8]  ;;  %649 = vst.msk [vmem:[#allocation2 + $0x54] sm:$0xf] %vm226_vm1, %v12515_v48  ;;  %v12521_v9 = vpack.c.bf16 %v494_v59, %v494_v59  ;;  %v744_v20 = vsel %vm13892_vm8, %v736_v54, %v743_v55 }
  0x1f   : > { %650 = vst.msk [vmem:[#allocation2 + $0x58] sm:$0xf] %vm226_vm1, %v12516_v49  ;;  %651 = vst.msk [vmem:[#allocation2 + $0x64] sm:$0xf] %vm226_vm1, %v12517_v51  ;;  %v264_v3 = vld [vmem:[#allocation2 + $0x60] sm:$0x8] }
  0x20   : > { %v790_v4 = vshrl.u32 %v13897_v63, 16  ;;  %v13903_v5 = vld [vmem:[#allocation2 + $0x40] sm:$0x8]  ;;  %652 = vst.msk [vmem:[#allocation2 + $0x68] sm:$0xf] %vm226_vm1, %v12518_v58  ;;  %v265_v8 = vsel %vm13835_vm5, 0, %v264_v3 }
  0x21   : > { %v13906_v7 = vld [vmem:[#allocation2 + $0x50] sm:$0x8]  ;;  %v11782_v10 = vrot.slane %v746_v61, 11  ;;  %v13910_v11 = vrot.slane %v768_v62, 11  ;;  %v812_v12 = vshrl.u32 %v13903_v5, 16  ;;  %v495_v14 = vld [vmem:[%s13849_s29 + $0x78] sm:$0xff] }
  0x22   : > { %v834_v13 = vshrl.u32 %v13906_v7, 16  ;;  %653 = vst.msk [vmem:[#allocation2 + $0x74] sm:$0xf] %vm226_vm1, %v12519_v0  ;;  %654 = vst.msk [vmem:[#allocation2 + $0x78] sm:$0xf] %vm226_vm1, %v12520_v1  ;;  %v496_v15 = vld [vmem:[%s13849_s29 + $0x80] sm:$0xff]  ;;  %v12522_v23 = vpack.c.bf16 %v495_v14, %v495_v14 }
  0x23   : > { %266 = vst [vmem:[#allocation2 + $0x60] sm:$0x8] %v265_v8  ;;  %v677_v16 = vld [vmem:[#allocation2 + $0x14] sm:$0xf]  ;;  %v678_v18 = vld [vmem:[#allocation2 + $0x18] sm:$0xf]  ;;  %v12523_v24 = vpack.c.bf16 %v496_v15, %v496_v15 }
  0x24   : > { %v680_v22 = vld [vmem:[#allocation2 + $0x24] sm:$0xf]  ;;  %655 = vst.msk [vmem:[#allocation2 + $0x84] sm:$0xf] %vm226_vm1, %v12521_v9  ;;  %v751_v25 = vshrl.u32 %v677_v16, 16  ;;  %v754_v26 = vshll.u32 %v677_v16, 16  ;;  %v11799_v31 = vcombine.low %v677_v16, %v678_v18 }
  0x25   : > { %v760_v27 = vshrl.u32 %v678_v18, 16  ;;  %v763_v29 = vshll.u32 %v678_v18, 16  ;;  %v673_v30 = vld [vmem:[#allocation2] sm:$0x8]  ;;  %v681_v33 = vld [vmem:[#allocation2 + $0x28] sm:$0xf] }
  0x26   : > { %v724_v32 = vshrl.u32 %v673_v30, 16  ;;  %v773_v34 = vshrl.u32 %v680_v22, 16  ;;  %v776_v35 = vshll.u32 %v680_v22, 16  ;;  %656 = vst.msk [vmem:[#allocation2 + $0x88] sm:$0xf] %vm226_vm1, %v12522_v23  ;;  %v753_v21 = vrot.slane %v751_v25, 7  ;;  %12880 = vmatmul.mubr.msk.bf16.vlgmr.msra.gmra.mxu0 %vm1158_vm7, %v11799_v31 }
  0x27   : > { %657 = vst.msk [vmem:[#allocation2 + $0x94] sm:$0xf] %vm226_vm1, %v12523_v24  ;;  %v762_v28 = vrot.slane %v760_v27, 7  ;;  %v782_v36 = vshrl.u32 %v681_v33, 16  ;;  %v785_v37 = vshll.u32 %v681_v33, 16  ;;  %v11800_v41 = vcombine.low %v680_v22, %v681_v33  ;;  %12946 = vmatpush3.bf16.msra.mxu0 %v13856_v17 }
  0x28   : > { %v683_v38 = vld [vmem:[#allocation2 + $0x34] sm:$0xf]  ;;  %v11781_v39 = vrot.slane %v724_v32, 11  ;;  %v775_v40 = vrot.slane %v773_v34, 7  ;;  %v684_v42 = vld [vmem:[#allocation2 + $0x38] sm:$0xf]  ;;  %v756_v45 = vor.u32 %v754_v26, %v753_v21 }
  0x29   : > { %v795_v43 = vshrl.u32 %v683_v38, 16  ;;  %v784_v44 = vrot.slane %v782_v36, 7  ;;  %v758_v46 = vrot.slane %v753_v21, 4  ;;  %v765_v47 = vor.u32 %v763_v29, %v762_v28  ;;  %12883 = vmatprep.mubr.msk.bf16.mxu0 %vm1158_vm7, %v11800_v41  ;;  %v686_v52 = vld [vmem:[#allocation2 + $0x44] sm:$0xf] }
  0x2a   : > { %v735_v48 = vsel %vm13892_vm8, %v11781_v39, %v734_v19  ;;  %v798_v50 = vshll.u32 %v683_v38, 16  ;;  %v804_v51 = vshrl.u32 %v684_v42, 16  ;;  %v757_v54 = vsel %vm13892_vm8, %v11782_v10, %v756_v45  ;;  %v687_v56 = vld [vmem:[#allocation2 + $0x48] sm:$0xf]  ;;  %v689_v15 = vld [vmem:[#allocation2 + $0x54] sm:$0xf] }
  0x2b   : > { %v797_v49 = vrot.slane %v795_v43, 7  ;;  %v11830_v53 = vcombine.low %v735_v48, %v744_v20  ;;  %v766_v17 = vsel %vm13892_vm8, %v758_v46, %v765_v47  ;;  %v807_v55 = vshll.u32 %v684_v42, 16  ;;  %v690_v16 = vld [vmem:[#allocation2 + $0x58] sm:$0xf]  ;;  %v692_v31 = vld [vmem:[#allocation2 + $0x64] sm:$0xf] }
  0x2c   : > { %v11831_v57 = vcombine.low %v757_v54, %v766_v17  ;;  %v806_v58 = vrot.slane %v804_v51, 7  ;;  %v11801_v59 = vcombine.low %v683_v38, %v684_v42  ;;  %v778_v61 = vor.u32 %v776_v35, %v775_v40  ;;  %v693_v34 = vld [vmem:[#allocation2 + $0x68] sm:$0xf]  ;;  %v13954_v45 = vld [vmem:[#allocation2 + $0x74] sm:$0xf] }
  0x2d   : > { %12913 = vmatprep.mubr.msk.bf16.mxu1 %vm1158_vm7, %v11830_v53  ;;  %v780_v62 = vrot.slane %v775_v40, 4  ;;  %v787_v0 = vor.u32 %v785_v37, %v784_v44  ;;  %v817_v1 = vshrl.u32 %v686_v52, 16  ;;  %v820_v3 = vshll.u32 %v686_v52, 16  ;;  %v13956_v46 = vld [vmem:[#allocation2 + $0x78] sm:$0xf] }
  0x2e   : > { %12914 = vmatmul.mubr.msk.bf16.vlgmr.msra.gmra.mxu1 %vm1158_vm7, %v11831_v57  ;;  %v779_v8 = vsel %vm13892_vm8, %v13910_v11, %v778_v61  ;;  %v826_v9 = vshrl.u32 %v687_v56, 16  ;;  %v829_v10 = vshll.u32 %v687_v56, 16  ;;  %v11802_v14 = vcombine.low %v686_v52, %v687_v56  ;;  %12884 = vmatmul.mubr.msk.bf16.gmra.mxu0 %vm1158_vm7, %v11801_v59  ;;  %v13986_v59 = vld [vmem:[%s18262_s1 + $0x10] sm:$0xf] }
  0x2f   : > { %v788_v18 = vsel %vm13892_vm8, %v780_v62, %v787_v0  ;;  %v819_v19 = vrot.slane %v817_v1, 7  ;;  %v11784_v20 = vrot.slane %v790_v4, 11  ;;  %v800_v22 = vor.u32 %v798_v50, %v797_v49  ;;  %v13966_v50 = vld [vmem:[%s18262_s1 + $0xc] sm:$0xf]  ;;  %13493 = vmatprep.subr.msk.bf16.mxu0 %vm1207_vm0, %v13986_v59 }
  0x30   : > { %v11832_v23 = vcombine.low %v779_v8, %v788_v18  ;;  %v828_v24 = vrot.slane %v826_v9, 7  ;;  %v802_v25 = vrot.slane %v797_v49, 4  ;;  %v809_v26 = vor.u32 %v807_v55, %v806_v58  ;;  %12887 = vmatprep.mubr.msk.bf16.mxu0 %vm1158_vm7, %v11802_v14  ;;  %v691_v49 = vld [vmem:[#allocation2 + $0x60] sm:$0x8]  ;;  %13492 = vmatprep.subr.msk.bf16.mxu1 %vm1207_vm0, %v13966_v50  ;;  %v13975_v55 = vld [vmem:[#allocation2 + $0x84] sm:$0xf] }
  0x31   : > { %v801_v11 = vsel %vm13892_vm8, %v11784_v20, %v800_v22  ;;  %v839_v27 = vshrl.u32 %v689_v15, 16  ;;  %v842_v29 = vshll.u32 %v689_v15, 16  ;;  %v848_v30 = vshrl.u32 %v690_v16, 16  ;;  %v13981_v58 = vld [vmem:[#allocation2 + $0x88] sm:$0xf] }
  0x32   : > { %12917 = vmatprep.mubr.msk.bf16.mxu1 %vm1158_vm7, %v11832_v23  ;;  %v810_v63 = vsel %vm13892_vm8, %v802_v25, %v809_v26  ;;  %v851_v4 = vshll.u32 %v690_v16, 16  ;;  %v11803_v32 = vcombine.low %v689_v15, %v690_v16  ;;  %v11785_v33 = vrot.slane %v812_v12, 11  ;;  %v497_v20 = vld [vmem:[%s13849_s29 + $0x88] sm:$0xff]  ;;  %v13999_v22 = vld [vmem:[#allocation2 + $0x94] sm:$0xf] }
  0x33   : > { %v11833_v35 = vcombine.low %v801_v11, %v810_v63  ;;  %v841_v21 = vrot.slane %v839_v27, 7  ;;  %v850_v28 = vrot.slane %v848_v30, 7  ;;  %v822_v36 = vor.u32 %v820_v3, %v819_v19  ;;  %v267_v3 = vld [vmem:[#allocation2 + $0x70] sm:$0x8]  ;;  %v270_v11 = vld [vmem:[#allocation2 + $0x80] sm:$0x8] }
  0x34   : > { %v824_v37 = vrot.slane %v819_v19, 4  ;;  %v831_v38 = vor.u32 %v829_v10, %v828_v24  ;;  %v861_v39 = vshrl.u32 %v692_v31, 16  ;;  %v864_v40 = vshll.u32 %v692_v31, 16  ;;  %v498_v27 = vld [vmem:[%s13849_s29 + $0x90] sm:$0xff] }
  0x35   : > { %v823_v41 = vsel %vm13892_vm8, %v11785_v33, %v822_v36  ;;  %v870_v42 = vshrl.u32 %v693_v34, 16  ;;  %v873_v43 = vshll.u32 %v693_v34, 16  ;;  %v11804_v44 = vcombine.low %v692_v31, %v693_v34  ;;  %v273_v63 = vld [vmem:[#allocation2 + $0x90] sm:$0x8] }
  0x36   : > { %12918 = vmatmul.mubr.msk.bf16.gmra.mxu1 %vm1158_vm7, %v11833_v35  ;;  %v832_v5 = vsel %vm13892_vm8, %v824_v37, %v831_v38  ;;  %v863_v12 = vrot.slane %v861_v39, 7  ;;  %v11786_v47 = vrot.slane %v834_v13, 11  ;;  %v844_v48 = vor.u32 %v842_v29, %v841_v21  ;;  %12888 = vmatmul.mubr.msk.bf16.gmra.mxu0 %vm1158_vm7, %v11803_v32  ;;  %v499_v29 = vld [vmem:[%s13849_s29 + $0x98] sm:$0xff]  ;;  %v501_v32 = vld [vmem:[%s13849_s29 + $0xa8] sm:$0xff]  ;;  %v502_v36 = vld [vmem:[%s13849_s29 + $0xb0] sm:$0xff] }
  0x37   : > { %v11834_v51 = vcombine.low %v823_v41, %v832_v5  ;;  %v872_v52 = vrot.slane %v870_v42, 7  ;;  %v846_v53 = vrot.slane %v841_v21, 4  ;;  %v853_v54 = vor.u32 %v851_v4, %v850_v28  ;;  %12891 = vmatprep.mubr.msk.bf16.mxu0 %vm1158_vm7, %v11804_v44  ;;  %v500_v4 = vld [vmem:[%s13849_s29 + $0xa0] sm:$0xff]  ;;  %v503_v41 = vld [vmem:[%s13849_s29 + $0xb8] sm:$0xff]  ;;  %v279_v42 = vld [vmem:[#allocation2 + $0xb0] sm:$0x8] }
  0x38   : > { %v845_v7 = vsel %vm13892_vm8, %v11786_v47, %v844_v48  ;;  %v883_v13 = vshrl.u32 %v13954_v45, 16  ;;  %v892_v17 = vshrl.u32 %v13956_v46, 16  ;;  %v856_v57 = vshrl.u32 %v691_v49, 16  ;;  %v276_v28 = vld [vmem:[#allocation2 + $0xa0] sm:$0x8] }
  0x39   : > { %12921 = vmatprep.mubr.msk.bf16.mxu1 %vm1158_vm7, %v11834_v51  ;;  %v854_v56 = vsel %vm13892_vm8, %v846_v53, %v853_v54  ;;  %v886_v62 = vshll.u32 %v13954_v45, 16  ;;  %v895_v0 = vshll.u32 %v13956_v46, 16  ;;  %v866_v1 = vor.u32 %v864_v40, %v863_v12  ;;  %v504_v5 = vld [vmem:[%s13849_s29 + $0xc0] sm:$0xff]  ;;  %v506_v53 = vld [vmem:[%s13849_s29 + $0xd0] sm:$0xff]  ;;  %v507_v54 = vld [vmem:[%s13849_s29 + $0xd8] sm:$0xff] }
  0x3a   : > { %v11835_v61 = vcombine.low %v845_v7, %v854_v56  ;;  %v11787_v8 = vrot.slane %v856_v57, 11  ;;  %v868_v9 = vrot.slane %v863_v12, 4  ;;  %v875_v10 = vor.u32 %v873_v43, %v872_v52  ;;  %v505_v12 = vld [vmem:[%s13849_s29 + $0xc8] sm:$0xff]  ;;  %v282_v47 = vld [vmem:[#allocation2 + $0xc0] sm:$0x8] }
  0x3b   : > { %v905_v14 = vshrl.u32 %v13975_v55, 16  ;;  %v13993_v15 = vrot.slane %v883_v13, 7  ;;  %v894_v16 = vrot.slane %v892_v17, 7  ;;  %v11805_v18 = vcombine.low %v13954_v45, %v13956_v46  ;;  %v285_v7 = vld [vmem:[#allocation2 + $0xd0] sm:$0x8] }
  0x3c   : > { %v914_v19 = vshrl.u32 %v13981_v58, 16  ;;  %v867_v23 = vsel %vm13892_vm8, %v11787_v8, %v866_v1  ;;  %v876_v24 = vsel %vm13892_vm8, %v868_v9, %v875_v10  ;;  %v11806_v25 = vcombine.low %v13975_v55, %v13981_v58  ;;  %v291_v9 = vld [vmem:[#allocation2 + $0xf0] sm:$0x8] }
  0x3d   : > { %v268_v26 = vsel %vm13835_vm5, 0, %v267_v3  ;;  %v11836_v30 = vcombine.low %v867_v23, %v876_v24  ;;  %v14012_v31 = vrot.slane %v905_v14, 7  ;;  %vm230_vm9 = vcmask 57344   ;;  %v233_v14 = vld [vmem:[#allocation2 + $0xc] sm:$0x1] }
  0x3e   : > { %12922 = vmatmul.mubr.msk.bf16.gmra.mxu1 %vm1158_vm7, %v11835_v61  ;;  %269 = vst [vmem:[#allocation2 + $0x70] sm:$0x8] %v268_v26  ;;  %v916_v33 = vrot.slane %v914_v19, 7  ;;  %v917_v34 = vshll.u32 %v13981_v58, 16  ;;  %v12524_v35 = vpack.c.bf16 %v497_v20, %v497_v20  ;;  %v927_v21 = vshrl.u32 %v13999_v22, 16  ;;  %12892 = vmatmul.mubr.msk.bf16.gmra.mxu0 %vm1158_vm7, %v11805_v18  ;;  %v508_v58 = vld [vmem:[%s13849_s29 + $0xe0] sm:$0xff]  ;;  %vm14053_vm10 = vmand %vm230_vm9, %vm231_vm3 }
  0x3f   : > { %12925 = vmatprep.mubr.msk.bf16.mxu1 %vm1158_vm7, %v11836_v30  ;;  %v908_v37 = vshll.u32 %v13975_v55, 16  ;;  %v14023_v38 = vor.u32 %v886_v62, %v13993_v15  ;;  %v890_v39 = vrot.slane %v13993_v15, 4  ;;  %v271_v40 = vsel %vm13835_vm5, 0, %v270_v11  ;;  %12895 = vmatprep.mubr.msk.bf16.mxu0 %vm1158_vm7, %v11806_v25  ;;  %v509_v61 = vld [vmem:[%s13849_s29 + $0xe8] sm:$0xff]  ;;  %v288_v62 = vld [vmem:[#allocation2 + $0xe0] sm:$0x8] }
  0x40   : > { %v897_v43 = vor.u32 %v895_v0, %v894_v16  ;;  %658 = vst.msk [vmem:[#allocation2 + $0x98] sm:$0xf] %vm226_vm1, %v12524_v35  ;;  %v930_v44 = vshll.u32 %v13999_v22, 16  ;;  %272 = vst [vmem:[#allocation2 + $0x80] sm:$0x8] %v271_v40  ;;  %v12525_v45 = vpack.c.bf16 %v498_v27, %v498_v27  ;;  %v12526_v46 = vpack.c.bf16 %v499_v29, %v499_v29 }
  0x41   : > { %v912_v48 = vrot.slane %v14012_v31, 4  ;;  %v274_v49 = vsel %vm13835_vm5, 0, %v273_v63  ;;  %v12527_v51 = vpack.c.bf16 %v500_v4, %v500_v4  ;;  %v12528_v52 = vpack.c.bf16 %v501_v32, %v501_v32  ;;  %v14062_v24 = vld [vmem:[#allocation2 + $0x4] sm:$0xf] }
  0x42   : > { %v14039_v13 = vrot.slane %v927_v21, 7  ;;  %v919_v17 = vor.u32 %v917_v34, %v916_v33  ;;  %659 = vst.msk [vmem:[#allocation2 + $0xa4] sm:$0xf] %vm226_vm1, %v12525_v45  ;;  %660 = vst.msk [vmem:[#allocation2 + $0xa8] sm:$0xf] %vm226_vm1, %v12526_v46  ;;  %v277_v56 = vsel %vm13835_vm5, 0, %v276_v28  ;;  %v12529_v57 = vpack.c.bf16 %v502_v36, %v502_v36 }
  0x43   : > { %275 = vst [vmem:[#allocation2 + $0x90] sm:$0x8] %v274_v49  ;;  %661 = vst.msk [vmem:[#allocation2 + $0xb4] sm:$0xf] %vm226_vm1, %v12527_v51  ;;  %v12530_v0 = vpack.c.bf16 %v503_v41, %v503_v41  ;;  %v280_v1 = vsel %vm13835_vm5, 0, %v279_v42  ;;  %v12531_v3 = vpack.c.bf16 %v504_v5, %v504_v5  ;;  %v12532_v8 = vpack.c.bf16 %v505_v12, %v505_v12 }
  0x44   : > { %662 = vst.msk [vmem:[#allocation2 + $0xb8] sm:$0xf] %vm226_vm1, %v12528_v52  ;;  %278 = vst [vmem:[#allocation2 + $0xa0] sm:$0x8] %v277_v56  ;;  %v18287_v10 = vmov 0  ;;  %v283_v18 = vsel %vm13835_vm5, 0, %v282_v47  ;;  %v12533_v19 = vpack.c.bf16 %v506_v53, %v506_v53  ;;  %v12534_v20 = vpack.c.bf16 %v507_v54, %v507_v54 }
  0x45   : > { %v18288_v10 = vsel %vm14053_vm10, 4294967295, %v18287_v10  ;;  %v694_v16 = vld [vmem:[#allocation2 + $0x70] sm:$0x8]  ;;  %663 = vst.msk [vmem:[#allocation2 + $0xc4] sm:$0xf] %vm226_vm1, %v12529_v57  ;;  %v286_v23 = vsel %vm13835_vm5, 0, %v285_v7  ;;  %v12535_v26 = vpack.c.bf16 %v508_v58, %v508_v58  ;;  %v12536_v11 = vpack.c.bf16 %v509_v61, %v509_v61 }
  0x46   : > { %18289 = vst [vmem:[#allocation5_spill] sm:$0xff] %v18288_v10  ;;  %281 = vst [vmem:[#allocation2 + $0xb0] sm:$0x8] %v280_v1  ;;  %v878_v25 = vshrl.u32 %v694_v16, 16  ;;  %v289_v27 = vsel %vm13835_vm5, 0, %v288_v62  ;;  %v934_v29 = vrot.slane %v14039_v13, 4  ;;  %v898_v33 = vsel %vm13892_vm8, %v890_v39, %v897_v43 }
  0x47   : > { %664 = vst.msk [vmem:[#allocation2 + $0xc8] sm:$0xf] %vm226_vm1, %v12530_v0  ;;  %665 = vst.msk [vmem:[#allocation2 + $0xd4] sm:$0xf] %vm226_vm1, %v12531_v3  ;;  %v2860_v30 = vsel %vm1207_vm0, %v13966_v50, 0  ;;  %v292_v63 = vsel %vm13835_vm5, 0, %v291_v9  ;;  %v910_v21 = vor.u32 %v908_v37, %v14012_v31  ;;  %v920_v55 = vsel %vm13892_vm8, %v912_v48, %v919_v17 }
  0x48   : > { %666 = vst.msk [vmem:[#allocation2 + $0xd8] sm:$0xf] %vm226_vm1, %v12532_v8  ;;  %284 = vst [vmem:[#allocation2 + $0xc0] sm:$0x8] %v283_v18  ;;  %v234_v4 = vsel %vm14053_vm10, 0, %v233_v14  ;;  %v11788_v32 = vrot.slane %v878_v25, 11  ;;  %12980 = vmatpush3.bf16.msra.mxu1 %v2860_v30  ;;  %v932_v43 = vor.u32 %v930_v44, %v14039_v13 }
  0x49   : > { %287 = vst [vmem:[#allocation2 + $0xd0] sm:$0x8] %v286_v23  ;;  %667 = vst.msk [vmem:[#allocation2 + $0xe4] sm:$0xf] %vm226_vm1, %v12533_v19  ;;  %v702_v34 = vld [vmem:[#allocation2 + $0x98] sm:$0xf] }
  0x4a   : > { %668 = vst.msk [vmem:[#allocation2 + $0xe8] sm:$0xf] %vm226_vm1, %v12534_v20  ;;  %290 = vst [vmem:[#allocation2 + $0xe0] sm:$0x8] %v289_v27  ;;  %v697_v35 = vld [vmem:[#allocation2 + $0x80] sm:$0x8]  ;;  %v11807_v36 = vcombine.low %v13999_v22, %v702_v34  ;;  %v889_v40 = vsel %vm13892_vm8, %v11788_v32, %v14023_v38 }
  0x4b   : > { %669 = vst.msk [vmem:[#allocation2 + $0xf4] sm:$0xf] %vm226_vm1, %v12535_v26  ;;  %670 = vst.msk [vmem:[#allocation2 + $0xf8] sm:$0xf] %vm226_vm1, %v12536_v11  ;;  %v1684_v50 = vshrl.u32 %v14062_v24, 16  ;;  %v936_v28 = vshrl.u32 %v702_v34, 16  ;;  %v11837_v45 = vcombine.low %v889_v40, %v898_v33 }
  0x4c   : > { %293 = vst [vmem:[#allocation2 + $0xf0] sm:$0x8] %v292_v63  ;;  %235 = vst [vmem:[#allocation2 + $0xc] sm:$0x1] %v234_v4  ;;  %v939_v15 = vshll.u32 %v702_v34, 16  ;;  %v900_v39 = vshrl.u32 %v697_v35, 16  ;;  %12896 = vmatmul.mubr.msk.bf16.gmra.mxu0 %vm1158_vm7, %v11807_v36 }
  0x4d   : > { %v704_v37 = vld [vmem:[#allocation2 + $0xa4] sm:$0xf]  ;;  %v705_v41 = vld [vmem:[#allocation2 + $0xa8] sm:$0xf]  ;;  %v700_v42 = vld [vmem:[#allocation2 + $0x90] sm:$0x8]  ;;  %12926 = vmatmul.mubr.msk.bf16.gmra.mxu1 %vm1158_vm7, %v11837_v45 }
  0x4e   : > { %v938_v46 = vrot.slane %v936_v28, 7  ;;  %v11789_v5 = vrot.slane %v900_v39, 11  ;;  %v949_v12 = vshrl.u32 %v704_v37, 16  ;;  %v707_v47 = vld [vmem:[#allocation2 + $0xb4] sm:$0xf]  ;;  %v952_v38 = vshll.u32 %v704_v37, 16 }
  0x4f   : > { %v958_v49 = vshrl.u32 %v705_v41, 16  ;;  %v961_v31 = vshll.u32 %v705_v41, 16  ;;  %v11808_v51 = vcombine.low %v704_v37, %v705_v41  ;;  %v708_v52 = vld [vmem:[#allocation2 + $0xb8] sm:$0xf]  ;;  %v922_v22 = vshrl.u32 %v700_v42, 16 }
  0x50   : > { %v911_v48 = vsel %vm13892_vm8, %v11789_v5, %v910_v21  ;;  %v951_v53 = vrot.slane %v949_v12, 7  ;;  %v941_v44 = vor.u32 %v939_v15, %v938_v46  ;;  %v703_v54 = vld [vmem:[#allocation2 + $0xa0] sm:$0x8]  ;;  %v971_v17 = vshrl.u32 %v707_v47, 16  ;;  %v710_v0 = vld [vmem:[#allocation2 + $0xc4] sm:$0xf] }
  0x51   : > { %v11838_v7 = vcombine.low %v911_v48, %v920_v55  ;;  %v960_v13 = vrot.slane %v958_v49, 7  ;;  %12899 = vmatprep.mubr.msk.bf16.mxu0 %vm1158_vm7, %v11808_v51  ;;  %v974_v56 = vshll.u32 %v707_v47, 16  ;;  %v11790_v57 = vrot.slane %v922_v22, 11  ;;  %v711_v14 = vld [vmem:[#allocation2 + $0xc8] sm:$0xf] }
  0x52   : > { %v942_v58 = vsel %vm13892_vm8, %v934_v29, %v941_v44  ;;  %v980_v61 = vshrl.u32 %v708_v52, 16  ;;  %v983_v62 = vshll.u32 %v708_v52, 16  ;;  %v973_v1 = vrot.slane %v971_v17, 7  ;;  %v706_v23 = vld [vmem:[#allocation2 + $0xb0] sm:$0x8] }
  0x53   : > { %12929 = vmatprep.mubr.msk.bf16.mxu1 %vm1158_vm7, %v11838_v7  ;;  %v11809_v3 = vcombine.low %v707_v47, %v708_v52  ;;  %v944_v8 = vshrl.u32 %v703_v54, 16  ;;  %v954_v9 = vor.u32 %v952_v38, %v951_v53  ;;  %v933_v16 = vsel %vm13892_vm8, %v11790_v57, %v932_v43  ;;  %v713_v32 = vld [vmem:[#allocation2 + $0xd4] sm:$0xf]  ;;  %v714_v33 = vld [vmem:[#allocation2 + $0xd8] sm:$0xf] }
  0x54   : > { %v982_v18 = vrot.slane %v980_v61, 7  ;;  %v956_v19 = vrot.slane %v951_v53, 4  ;;  %v963_v20 = vor.u32 %v961_v31, %v960_v13  ;;  %v11839_v25 = vcombine.low %v933_v16, %v942_v58  ;;  %v709_v15 = vld [vmem:[#allocation2 + $0xc0] sm:$0x8]  ;;  %v716_v47 = vld [vmem:[#allocation2 + $0xe4] sm:$0xf] }
  0x55   : > { %v11791_v26 = vrot.slane %v944_v8, 11  ;;  %v993_v11 = vshrl.u32 %v710_v0, 16  ;;  %v996_v27 = vshll.u32 %v710_v0, 16  ;;  %12900 = vmatmul.mubr.msk.bf16.gmra.mxu0 %vm1158_vm7, %v11809_v3  ;;  %v1002_v30 = vshrl.u32 %v711_v14, 16  ;;  %v717_v38 = vld [vmem:[#allocation2 + $0xe8] sm:$0xf] }
  0x56   : > { %v964_v29 = vsel %vm13892_vm8, %v956_v19, %v963_v20  ;;  %v1005_v63 = vshll.u32 %v711_v14, 16  ;;  %v11810_v4 = vcombine.low %v710_v0, %v711_v14  ;;  %v966_v21 = vshrl.u32 %v706_v23, 16  ;;  %12930 = vmatmul.mubr.msk.bf16.gmra.mxu1 %vm1158_vm7, %v11839_v25  ;;  %v712_v48 = vld [vmem:[#allocation2 + $0xd0] sm:$0x8]  ;;  %v719_v57 = vld [vmem:[#allocation2 + $0xf4] sm:$0xf] }
  0x57   : > { %v955_v34 = vsel %vm13892_vm8, %v11791_v26, %v954_v9  ;;  %v995_v35 = vrot.slane %v993_v11, 7  ;;  %v976_v28 = vor.u32 %v974_v56, %v973_v1  ;;  %v1004_v39 = vrot.slane %v1002_v30, 7  ;;  %v715_v16 = vld [vmem:[#allocation2 + $0xe0] sm:$0x8] }
  0x58   : > { %v11840_v36 = vcombine.low %v955_v34, %v964_v29  ;;  %12903 = vmatprep.mubr.msk.bf16.mxu0 %vm1158_vm7, %v11810_v4  ;;  %v978_v40 = vrot.slane %v973_v1, 4  ;;  %v985_v55 = vor.u32 %v983_v62, %v982_v18  ;;  %v11792_v37 = vrot.slane %v966_v21, 11  ;;  %v720_v1 = vld [vmem:[#allocation2 + $0xf8] sm:$0xf]  ;;  %v718_v29 = vld [vmem:[#allocation2 + $0xf0] sm:$0x8] }
  0x59   : > { %v1015_v41 = vshrl.u32 %v713_v32, 16  ;;  %v1018_v42 = vshll.u32 %v713_v32, 16  ;;  %v1024_v43 = vshrl.u32 %v714_v33, 16  ;;  %v1027_v46 = vshll.u32 %v714_v33, 16 }
  0x5a   : > { %12933 = vmatprep.mubr.msk.bf16.mxu1 %vm1158_vm7, %v11840_v36  ;;  %v986_v45 = vsel %vm13892_vm8, %v978_v40, %v985_v55  ;;  %v11811_v5 = vcombine.low %v713_v32, %v714_v33  ;;  %v988_v12 = vshrl.u32 %v709_v15, 16  ;;  %v977_v49 = vsel %vm13892_vm8, %v11792_v37, %v976_v28  ;;  %v300_v33 = vld [vmem:[#allocation2 + $0xc] sm:$0x1]  ;;  %v1633_v55 = vld [vmem:[#allocation2 + $0x8] sm:$0xf] }
  0x5b   : > { %v1017_v31 = vrot.slane %v1015_v41, 7  ;;  %v1026_v51 = vrot.slane %v1024_v43, 7  ;;  %v998_v52 = vor.u32 %v996_v27, %v995_v35  ;;  %v11841_v53 = vcombine.low %v977_v49, %v986_v45  ;;  %v303_v37 = vld [vmem:[#allocation2 + $0x1c] sm:$0x1]  ;;  %v1635_v45 = vld [vmem:[#allocation2 + $0x14] sm:$0xf] }
  0x5c   : > { %v11793_v22 = vrot.slane %v988_v12, 11  ;;  %v1000_v44 = vrot.slane %v995_v35, 4  ;;  %v1007_v54 = vor.u32 %v1005_v63, %v1004_v39  ;;  %v1037_v7 = vshrl.u32 %v716_v47, 16 }
  0x5d   : > { %v1040_v13 = vshll.u32 %v716_v47, 16  ;;  %v1046_v17 = vshrl.u32 %v717_v38, 16  ;;  %v1049_v56 = vshll.u32 %v717_v38, 16  ;;  %12904 = vmatmul.mubr.msk.bf16.gmra.mxu0 %vm1158_vm7, %v11811_v5  ;;  %v11812_v62 = vcombine.low %v716_v47, %v717_v38 }
  0x5e   : > { %v999_v58 = vsel %vm13892_vm8, %v11793_v22, %v998_v52  ;;  %v1008_v61 = vsel %vm13892_vm8, %v1000_v44, %v1007_v54  ;;  %v1010_v0 = vshrl.u32 %v712_v48, 16  ;;  %v1039_v8 = vrot.slane %v1037_v7, 7  ;;  %12934 = vmatmul.mubr.msk.bf16.gmra.mxu1 %vm1158_vm7, %v11841_v53  ;;  %v1636_v52 = vld [vmem:[#allocation2 + $0x18] sm:$0xf]  ;;  %v2361_v54 = vld [vmem:[#allocation2 + $0x10] sm:$0x8] }
  0x5f   : > { %v11842_v3 = vcombine.low %v999_v58, %v1008_v61  ;;  %v1048_v9 = vrot.slane %v1046_v17, 7  ;;  %v1020_v14 = vor.u32 %v1018_v42, %v1017_v31  ;;  %12907 = vmatprep.mubr.msk.bf16.mxu0 %vm1158_vm7, %v11812_v62  ;;  %v1022_v19 = vrot.slane %v1017_v31, 4  ;;  %v2362_v17 = vld [vmem:[#allocation2 + $0x14] sm:$0xf] }
  0x60   : > { %v11794_v18 = vrot.slane %v1010_v0, 11  ;;  %v1029_v20 = vor.u32 %v1027_v46, %v1026_v51  ;;  %v1059_v23 = vshrl.u32 %v719_v57, 16  ;;  %v1062_v25 = vshll.u32 %v719_v57, 16 }
  0x61   : > { %12937 = vmatprep.mubr.msk.bf16.mxu1 %vm1158_vm7, %v11842_v3  ;;  %v1068_v26 = vshrl.u32 %v720_v1, 16  ;;  %v1071_v11 = vshll.u32 %v720_v1, 16  ;;  %v11813_v27 = vcombine.low %v719_v57, %v720_v1  ;;  %vm1680_vm11 = vsmask.f32 3328  ;;  %v2363_v3 = vld [vmem:[#allocation2 + $0x18] sm:$0xf] }
  0x62   : > { %v1021_v30 = vsel %vm13892_vm8, %v11794_v18, %v1020_v14  ;;  %v1030_v63 = vsel %vm13892_vm8, %v1022_v19, %v1029_v20  ;;  %v1061_v4 = vrot.slane %v1059_v23, 7  ;;  %v1032_v32 = vshrl.u32 %v715_v16, 16  ;;  %v306_v20 = vld [vmem:[#allocation2 + $0x2c] sm:$0x1] }
  0x63   : > { %v11843_v34 = vcombine.low %v1021_v30, %v1030_v63  ;;  %v1070_v35 = vrot.slane %v1068_v26, 7  ;;  %v1042_v21 = vor.u32 %v1040_v13, %v1039_v8  ;;  %v1044_v28 = vrot.slane %v1039_v8, 4 }
  0x64   : > { %v11795_v15 = vrot.slane %v1032_v32, 11  ;;  %v1051_v36 = vor.u32 %v1049_v56, %v1048_v9  ;;  %v1054_v39 = vshrl.u32 %v718_v29, 16  ;;  %v1064_v40 = vor.u32 %v1062_v25, %v1061_v4 }
  0x65   : > { %v1066_v41 = vrot.slane %v1061_v4, 4  ;;  %v1073_v42 = vor.u32 %v1071_v11, %v1070_v35  ;;  %v301_v43 = vsel %vm14053_vm10, 0, %v300_v33  ;;  %vm1681_vm12 = vsmask.f32 7440  ;;  %12908 = vmatmul.mubr.msk.bf16.gmra.mxu0 %vm1158_vm7, %v11813_v27  ;;  %v1638_v4 = vld [vmem:[#allocation2 + $0x24] sm:$0xf] }
  0x66   : > { %v1043_v46 = vsel %vm13892_vm8, %v11795_v15, %v1042_v21  ;;  %v1052_v5 = vsel %vm13892_vm8, %v1044_v28, %v1051_v36  ;;  %v11796_v12 = vrot.slane %v1054_v39, 11  ;;  %302 = vst [vmem:[#allocation2 + $0xc] sm:$0x1] %v301_v43  ;;  %v1686_v47 = vrot.slane %v1684_v50, 4  ;;  %12938 = vmatmul.mubr.msk.bf16.gmra.mxu1 %vm1158_vm7, %v11843_v34  ;;  %vm14157_vm13 = vmor %vm1680_vm11, %vm1681_vm12  ;;  %v1639_v21 = vld [vmem:[#allocation2 + $0x28] sm:$0xf] }
  0x67   : > { %v11844_v38 = vcombine.low %v1043_v46, %v1052_v5  ;;  %v1074_v49 = vsel %vm13892_vm8, %v1066_v41, %v1073_v42  ;;  %v1687_v31 = vshll.u32 %v14062_v24, 16  ;;  %v1693_v51 = vshll.u32 %v1633_v55, 16  ;;  %v2364_v43 = vld [vmem:[#allocation2 + $0x20] sm:$0x8] }
  0x68   : > { %v1065_v48 = vsel %vm13892_vm8, %v11796_v12, %v1064_v40  ;;  %v1697_v53 = vshrl.u32 %v1633_v55, 16  ;;  %v304_v22 = vsel %vm14053_vm10, 0, %v303_v37  ;;  %v1708_v44 = vshrl.u32 %v1635_v45, 16 }
  0x69   : > { %12941 = vmatprep.mubr.msk.bf16.mxu1 %vm1158_vm7, %v11844_v38  ;;  %v11845_v50 = vcombine.low %v1065_v48, %v1074_v49  ;;  %v1689_v7 = vrot.slane %v1687_v31, 5  ;;  %v1695_v13 = vrot.slane %v1693_v51, 5  ;;  %305 = vst [vmem:[#allocation2 + $0x1c] sm:$0x1] %v304_v22  ;;  %v1711_v24 = vshll.u32 %v1635_v45, 16 }
  0x6a   : > { %v1699_v56 = vrot.slane %v1697_v53, 4  ;;  %v1710_v57 = vrot.slane %v1708_v44, 4  ;;  %v1717_v58 = vshll.u32 %v1636_v52, 16  ;;  %v1721_v61 = vshrl.u32 %v1636_v52, 16  ;;  %v2366_v22 = vld [vmem:[#allocation2 + $0x28] sm:$0xf] }
  0x6b   : > { %v1690_v62 = vor.u32 %v1689_v7, %v1686_v47  ;;  %v1713_v0 = vrot.slane %v1711_v24, 5  ;;  %v14153_v1 = vsel %vm1207_vm0, %v13986_v59, 0  ;;  %v2410_v8 = vshrl.u32 %v2361_v54, 16  ;;  %v2365_v47 = vld [vmem:[#allocation2 + $0x24] sm:$0xf] }
  0x6c   : > { %v18290_v9 = vmov 0  ;;  %v1700_v14 = vor.u32 %v1699_v56, %v1695_v13  ;;  %v1719_v16 = vrot.slane %v1717_v58, 5  ;;  %v1723_v18 = vrot.slane %v1721_v61, 4  ;;  %v309_v24 = vld [vmem:[#allocation2 + $0x3c] sm:$0x1] }
  0x6d   : > { %v18291_v9 = vsel %vm14157_vm13, 4294967295, %v18290_v9  ;;  %v2415_v19 = vshrl.u32 %v2362_v17, 16  ;;  %v1634_v23 = vld [vmem:[#allocation2 + $0xc] sm:$0x1]  ;;  %v1691_v25 = vrot.slane %v1690_v62, 4  ;;  %v1714_v26 = vor.u32 %v1713_v0, %v1710_v57 }
  0x6e   : > { %18292 = vst [vmem:[#allocation6_spill] sm:$0xff] %v18291_v9  ;;  %v11895_v11 = vrot.slane %v2410_v8, 11  ;;  %v2418_v27 = vshll.u32 %v2362_v17, 16  ;;  %v1701_v59 = vrot.slane %v1700_v14, 4  ;;  %v1703_v29 = vshll.u32 %v1634_v23, 16  ;;  %12942 = vmatmul.mubr.msk.bf16.gmra.mxu1 %vm1158_vm7, %v11845_v50 }
  0x6f   : > { %v1724_v30 = vor.u32 %v1723_v18, %v1719_v16  ;;  %v2417_v63 = vrot.slane %v2415_v19, 7  ;;  %v1696_v32 = vsel %vm14157_vm13, %v1691_v25, %v1695_v13  ;;  %v1715_v33 = vrot.slane %v1714_v26, 4  ;;  %v1641_v61 = vld [vmem:[#allocation2 + $0x34] sm:$0xf]  ;;  %v1642_v14 = vld [vmem:[#allocation2 + $0x38] sm:$0xf] }
  0x70   : > { %v2424_v34 = vshrl.u32 %v2363_v3, 16  ;;  %v2427_v35 = vshll.u32 %v2363_v3, 16  ;;  %v1705_v28 = vrot.slane %v1703_v29, 5  ;;  %v1637_v15 = vld [vmem:[#allocation2 + $0x1c] sm:$0x1]  ;;  %v307_v42 = vsel %vm14053_vm10, 0, %v306_v20 }
  0x71   : > { %v1725_v36 = vrot.slane %v1724_v30, 4  ;;  %v2420_v39 = vor.u32 %v2418_v27, %v2417_v63  ;;  %v2422_v40 = vrot.slane %v2417_v63, 4  ;;  %v1720_v55 = vsel %vm14157_vm13, %v1715_v33, %v1719_v16  ;;  %308 = vst [vmem:[#allocation2 + $0x2c] sm:$0x1] %v307_v42  ;;  %v2367_v23 = vld [vmem:[#allocation2 + $0x30] sm:$0x8] }
  0x72   : > { %v1727_v37 = vshll.u32 %v1637_v15, 16  ;;  %v2426_v41 = vrot.slane %v2424_v34, 7  ;;  %v1706_v45 = vsel %vm14157_vm13, %v1701_v59, %v1705_v28  ;;  %v1732_v5 = vshrl.u32 %v1638_v4, 16  ;;  %v312_v42 = vld [vmem:[#allocation2 + $0x4c] sm:$0x1] }
  0x73   : > { %v2421_v46 = vsel %vm13892_vm8, %v11895_v11, %v2420_v39  ;;  %v1735_v12 = vshll.u32 %v1638_v4, 16  ;;  %v11863_v38 = vcombine.low %v1696_v32, %v1706_v45  ;;  %v1741_v51 = vshll.u32 %v1639_v21, 16  ;;  %v2368_v32 = vld [vmem:[#allocation2 + $0x34] sm:$0xf] }
  0x74   : > { %v1729_v49 = vrot.slane %v1727_v37, 5  ;;  %v2429_v31 = vor.u32 %v2427_v35, %v2426_v41  ;;  %v1734_v52 = vrot.slane %v1732_v5, 4  ;;  %v1745_v53 = vshrl.u32 %v1639_v21, 16 }
  0x75   : > { %v1737_v48 = vrot.slane %v1735_v12, 5  ;;  %v2432_v44 = vshrl.u32 %v2364_v43, 16  ;;  %12947 = vmatprep.mubr.msk.bf16.mxu0 %vm1158_vm7, %v11863_v38  ;;  %v1743_v7 = vrot.slane %v1741_v51, 5  ;;  %v2437_v13 = vshrl.u32 %v2365_v47, 16  ;;  %v1644_v12 = vld [vmem:[#allocation2 + $0x44] sm:$0xf] }
  0x76   : > { %v1730_v54 = vsel %vm14157_vm13, %v1725_v36, %v1729_v49  ;;  %v2430_v50 = vsel %vm13892_vm8, %v2422_v40, %v2429_v31  ;;  %v1747_v58 = vrot.slane %v1745_v53, 4  ;;  %v2440_v3 = vshll.u32 %v2365_v47, 16  ;;  %v2369_v36 = vld [vmem:[#allocation2 + $0x38] sm:$0xf]  ;;  %v1645_v51 = vld [vmem:[#allocation2 + $0x48] sm:$0xf] }
  0x77   : > { %v11864_v17 = vcombine.low %v1720_v55, %v1730_v54  ;;  %v11912_v56 = vcombine.low %v2421_v46, %v2430_v50  ;;  %v1738_v57 = vor.u32 %v1737_v48, %v1734_v52  ;;  %v11896_v62 = vrot.slane %v2432_v44, 11 }
  0x78   : > { %v2439_v0 = vrot.slane %v2437_v13, 7  ;;  %v2446_v8 = vshrl.u32 %v2366_v22, 16  ;;  %v1748_v18 = vor.u32 %v1747_v58, %v1743_v7  ;;  %v2449_v19 = vshll.u32 %v2366_v22, 16  ;;  %v1640_v25 = vld [vmem:[#allocation2 + $0x2c] sm:$0x1] }
  0x79   : > { %12948 = vmatmul.mubr.msk.bf16.vlgmr.msra.gmra.mxu0 %vm1158_vm7, %v11864_v17  ;;  %12981 = vmatprep.mubr.msk.bf16.mxu1 %vm1158_vm7, %v11912_v56  ;;  %v1739_v16 = vrot.slane %v1738_v57, 4  ;;  %v310_v20 = vsel %vm14053_vm10, 0, %v309_v24  ;;  %v1756_v59 = vshrl.u32 %v1641_v61, 16  ;;  %v1751_v63 = vshll.u32 %v1640_v25, 16  ;;  %v2370_v24 = vld [vmem:[#allocation2 + $0x40] sm:$0x8] }
  0x7a   : > { %13014 = vmatpush3.bf16.msra.mxu0 %v14153_v1  ;;  %v2442_v26 = vor.u32 %v2440_v3, %v2439_v0  ;;  %v2444_v11 = vrot.slane %v2439_v0, 4  ;;  %v2448_v27 = vrot.slane %v2446_v8, 7  ;;  %311 = vst [vmem:[#allocation2 + $0x3c] sm:$0x1] %v310_v20  ;;  %v1749_v30 = vrot.slane %v1748_v18, 4 }
  0x7b   : > { %v1744_v29 = vsel %vm14157_vm13, %v1739_v16, %v1743_v7  ;;  %v1759_v4 = vshll.u32 %v1641_v61, 16  ;;  %v1758_v35 = vrot.slane %v1756_v59, 4  ;;  %v1765_v21 = vshll.u32 %v1642_v14, 16  ;;  %v2371_v61 = vld [vmem:[#allocation2 + $0x44] sm:$0xf] }
  0x7c   : > { %v2443_v33 = vsel %vm13892_vm8, %v11896_v62, %v2442_v26  ;;  %v2451_v34 = vor.u32 %v2449_v19, %v2448_v27  ;;  %v1753_v1 = vrot.slane %v1751_v63, 5  ;;  %v1769_v15 = vshrl.u32 %v1642_v14, 16  ;;  %v2372_v19 = vld [vmem:[#allocation2 + $0x48] sm:$0xf]  ;;  %v315_v27 = vld [vmem:[#allocation2 + $0x5c] sm:$0x1] }
  0x7d   : > { %v1761_v28 = vrot.slane %v1759_v4, 5  ;;  %v2454_v39 = vshrl.u32 %v2367_v23, 16  ;;  %v1767_v55 = vrot.slane %v1765_v21, 5  ;;  %v2459_v37 = vshrl.u32 %v2368_v32, 16  ;;  %v1647_v4 = vld [vmem:[#allocation2 + $0x54] sm:$0xf] }
  0x7e   : > { %v2452_v40 = vsel %vm13892_vm8, %v2444_v11, %v2451_v34  ;;  %v2462_v41 = vshll.u32 %v2368_v32, 16  ;;  %v1754_v43 = vsel %vm14157_vm13, %v1749_v30, %v1753_v1  ;;  %v1771_v5 = vrot.slane %v1769_v15, 4  ;;  %v1648_v32 = vld [vmem:[#allocation2 + $0x58] sm:$0xf]  ;;  %v2373_v1 = vld [vmem:[#allocation2 + $0x50] sm:$0x8] }
  0x7f   : > { %v11913_v45 = vcombine.low %v2443_v33, %v2452_v40  ;;  %v1762_v46 = vor.u32 %v1761_v28, %v1758_v35  ;;  %v11865_v47 = vcombine.low %v1744_v29, %v1754_v43  ;;  %v11897_v38 = vrot.slane %v2454_v39, 11  ;;  %v2374_v43 = vld [vmem:[#allocation2 + $0x54] sm:$0xf] }
  0x80   : > { %v2461_v49 = vrot.slane %v2459_v37, 7  ;;  %v2468_v31 = vshrl.u32 %v2369_v36, 16  ;;  %v1772_v53 = vor.u32 %v1771_v5, %v1767_v55  ;;  %v2471_v22 = vshll.u32 %v2369_v36, 16 }
  0x81   : > { %12982 = vmatmul.mubr.msk.bf16.vlgmr.msra.gmra.mxu1 %vm1158_vm7, %v11913_v45  ;;  %v1643_v52 = vld [vmem:[#allocation2 + $0x3c] sm:$0x1]  ;;  %v1763_v48 = vrot.slane %v1762_v46, 4  ;;  %v313_v44 = vsel %vm14053_vm10, 0, %v312_v42  ;;  %12951 = vmatprep.mubr.msk.bf16.mxu0 %vm1158_vm7, %v11865_v47  ;;  %v1780_v57 = vshrl.u32 %v1644_v12, 16  ;;  %v1783_v58 = vshll.u32 %v1644_v12, 16 }
  0x82   : > { %v1775_v54 = vshll.u32 %v1643_v52, 16  ;;  %v2464_v50 = vor.u32 %v2462_v41, %v2461_v49  ;;  %v2466_v7 = vrot.slane %v2461_v49, 4  ;;  %v2470_v13 = vrot.slane %v2468_v31, 7  ;;  %314 = vst [vmem:[#allocation2 + $0x4c] sm:$0x1] %v313_v44 }
  0x83   : > { %v1768_v17 = vsel %vm14157_vm13, %v1763_v48, %v1767_v55  ;;  %v1773_v56 = vrot.slane %v1772_v53, 4  ;;  %v1789_v8 = vshll.u32 %v1645_v51, 16  ;;  %v1782_v14 = vrot.slane %v1780_v57, 4  ;;  %v14211_v47 = vld [vmem:[%s18262_s1 + $0x14] sm:$0xf] }
  0x84   : > { %v1777_v62 = vrot.slane %v1775_v54, 5  ;;  %v2465_v0 = vsel %vm13892_vm8, %v11897_v38, %v2464_v50  ;;  %v2473_v3 = vor.u32 %v2471_v22, %v2470_v13  ;;  %v1785_v16 = vrot.slane %v1783_v58, 5  ;;  %13494 = vmatprep.subr.msk.bf16.mxu1 %vm1207_vm0, %v14211_v47  ;;  %v2375_v22 = vld [vmem:[#allocation2 + $0x58] sm:$0xf] }
  0x85   : > { %v1793_v18 = vshrl.u32 %v1645_v51, 16  ;;  %v2476_v20 = vshrl.u32 %v2370_v24, 16  ;;  %v1791_v26 = vrot.slane %v1789_v8, 5  ;;  %v2481_v11 = vshrl.u32 %v2371_v61, 16  ;;  %v318_v24 = vld [vmem:[#allocation2 + $0x6c] sm:$0x1] }
  0x86   : > { %v1778_v23 = vsel %vm14157_vm13, %v1773_v56, %v1777_v62  ;;  %v2474_v25 = vsel %vm13892_vm8, %v2466_v7, %v2473_v3  ;;  %v1786_v30 = vor.u32 %v1785_v16, %v1782_v14  ;;  %v2484_v35 = vshll.u32 %v2371_v61, 16  ;;  %v1650_v62 = vld [vmem:[#allocation2 + $0x64] sm:$0xf]  ;;  %v1651_v16 = vld [vmem:[#allocation2 + $0x68] sm:$0xf] }
  0x87   : > { %v11866_v59 = vcombine.low %v1768_v17, %v1778_v23  ;;  %v11914_v29 = vcombine.low %v2465_v0, %v2474_v25  ;;  %v1795_v63 = vrot.slane %v1793_v18, 4  ;;  %v11898_v33 = vrot.slane %v2476_v20, 11  ;;  %v14224_v17 = vld [vmem:[%s18262_s1 + $0x18] sm:$0xf] }
  0x88   : > { %v2483_v34 = vrot.slane %v2481_v11, 7  ;;  %v2490_v21 = vshrl.u32 %v2372_v19, 16  ;;  %v1787_v15 = vrot.slane %v1786_v30, 4  ;;  %v2493_v39 = vshll.u32 %v2372_v19, 16  ;;  %13495 = vmatprep.subr.msk.bf16.mxu0 %vm1207_vm0, %v14224_v17 }
  0x89   : > { %12952 = vmatmul.mubr.msk.bf16.gmra.mxu0 %vm1158_vm7, %v11866_v59  ;;  %12985 = vmatprep.mubr.msk.bf16.mxu1 %vm1158_vm7, %v11914_v29  ;;  %v1646_v28 = vld [vmem:[#allocation2 + $0x4c] sm:$0x1]  ;;  %v1796_v36 = vor.u32 %v1795_v63, %v1791_v26  ;;  %v316_v40 = vsel %vm14053_vm10, 0, %v315_v27  ;;  %v1804_v5 = vshrl.u32 %v1647_v4, 16  ;;  %v1807_v12 = vshll.u32 %v1647_v4, 16 }
  0x8a   : > { %v1799_v55 = vshll.u32 %v1646_v28, 16  ;;  %v2486_v37 = vor.u32 %v2484_v35, %v2483_v34  ;;  %v2488_v41 = vrot.slane %v2483_v34, 4  ;;  %v2492_v42 = vrot.slane %v2490_v21, 7  ;;  %317 = vst [vmem:[#allocation2 + $0x5c] sm:$0x1] %v316_v40 }
  0x8b   : > { %v1792_v45 = vsel %vm14157_vm13, %v1787_v15, %v1791_v26  ;;  %v1797_v46 = vrot.slane %v1796_v36, 4  ;;  %v1813_v51 = vshll.u32 %v1648_v32, 16  ;;  %v1806_v52 = vrot.slane %v1804_v5, 4  ;;  %v2376_v29 = vld [vmem:[#allocation2 + $0x60] sm:$0x8] }
  0x8c   : > { %v1801_v38 = vrot.slane %v1799_v55, 5  ;;  %v2487_v49 = vsel %vm13892_vm8, %v11898_v33, %v2486_v37  ;;  %v2495_v31 = vor.u32 %v2493_v39, %v2492_v42  ;;  %v1809_v48 = vrot.slane %v1807_v12, 5  ;;  %v2377_v33 = vld [vmem:[#allocation2 + $0x64] sm:$0xf]  ;;  %v2378_v39 = vld [vmem:[#allocation2 + $0x68] sm:$0xf] }
  0x8d   : > { %v1817_v53 = vshrl.u32 %v1648_v32, 16  ;;  %v2498_v44 = vshrl.u32 %v2373_v1, 16  ;;  %v1815_v7 = vrot.slane %v1813_v51, 5  ;;  %v2503_v13 = vshrl.u32 %v2374_v43, 16 }
  0x8e   : > { %v1802_v54 = vsel %vm14157_vm13, %v1797_v46, %v1801_v38  ;;  %v2496_v50 = vsel %vm13892_vm8, %v2488_v41, %v2495_v31  ;;  %v1810_v58 = vor.u32 %v1809_v48, %v1806_v52  ;;  %v2506_v8 = vshll.u32 %v2374_v43, 16  ;;  %v321_v43 = vld [vmem:[#allocation2 + $0x7c] sm:$0x1]  ;;  %v1653_v38 = vld [vmem:[#allocation2 + $0x74] sm:$0xf] }
  0x8f   : > { %v11867_v56 = vcombine.low %v1792_v45, %v1802_v54  ;;  %v11915_v57 = vcombine.low %v2487_v49, %v2496_v50  ;;  %v1819_v61 = vrot.slane %v1817_v53, 4  ;;  %v11899_v0 = vrot.slane %v2498_v44, 11  ;;  %v1654_v48 = vld [vmem:[#allocation2 + $0x78] sm:$0xf] }
  0x90   : > { %v2505_v3 = vrot.slane %v2503_v13, 7  ;;  %v2512_v14 = vshrl.u32 %v2375_v22, 16  ;;  %v1811_v19 = vrot.slane %v1810_v58, 4  ;;  %v2515_v23 = vshll.u32 %v2375_v22, 16 }
  0x91   : > { %12955 = vmatprep.mubr.msk.bf16.mxu0 %vm1158_vm7, %v11867_v56  ;;  %12986 = vmatmul.mubr.msk.bf16.gmra.mxu1 %vm1158_vm7, %v11915_v57  ;;  %v1649_v18 = vld [vmem:[#allocation2 + $0x5c] sm:$0x1]  ;;  %v1820_v20 = vor.u32 %v1819_v61, %v1815_v7  ;;  %v319_v25 = vsel %vm14053_vm10, 0, %v318_v24  ;;  %v1828_v4 = vshrl.u32 %v1650_v62, 16  ;;  %v1831_v32 = vshll.u32 %v1650_v62, 16 }
  0x92   : > { %v1823_v26 = vshll.u32 %v1649_v18, 16  ;;  %v2508_v11 = vor.u32 %v2506_v8, %v2505_v3  ;;  %v2510_v27 = vrot.slane %v2505_v3, 4  ;;  %v2514_v59 = vrot.slane %v2512_v14, 7  ;;  %320 = vst [vmem:[#allocation2 + $0x6c] sm:$0x1] %v319_v25 }
  0x93   : > { %v1816_v30 = vsel %vm14157_vm13, %v1811_v19, %v1815_v7  ;;  %v1821_v63 = vrot.slane %v1820_v20, 4  ;;  %v1837_v1 = vshll.u32 %v1651_v16, 16  ;;  %v1830_v28 = vrot.slane %v1828_v4, 4  ;;  %v2379_v57 = vld [vmem:[#allocation2 + $0x70] sm:$0x8] }
  0x94   : > { %v1825_v34 = vrot.slane %v1823_v26, 5  ;;  %v2509_v35 = vsel %vm13892_vm8, %v11899_v0, %v2508_v11  ;;  %v2517_v21 = vor.u32 %v2515_v23, %v2514_v59  ;;  %v1833_v15 = vrot.slane %v1831_v32, 5  ;;  %v2380_v3 = vld [vmem:[#allocation2 + $0x74] sm:$0xf]  ;;  %v2381_v25 = vld [vmem:[#allocation2 + $0x78] sm:$0xf] }
  0x95   : > { %v1841_v36 = vshrl.u32 %v1651_v16, 16  ;;  %v2520_v40 = vshrl.u32 %v2376_v29, 16  ;;  %v1839_v41 = vrot.slane %v1837_v1, 5  ;;  %v2525_v42 = vshrl.u32 %v2377_v33, 16 }
  0x96   : > { %v1826_v55 = vsel %vm14157_vm13, %v1821_v63, %v1825_v34  ;;  %v2518_v37 = vsel %vm13892_vm8, %v2510_v27, %v2517_v21  ;;  %v1834_v5 = vor.u32 %v1833_v15, %v1830_v28  ;;  %v2528_v51 = vshll.u32 %v2377_v33, 16  ;;  %v1656_v34 = vld [vmem:[#allocation2 + $0x84] sm:$0xf]  ;;  %v1657_v15 = vld [vmem:[#allocation2 + $0x88] sm:$0xf] }
  0x97   : > { %v11868_v45 = vcombine.low %v1816_v30, %v1826_v55  ;;  %v11916_v46 = vcombine.low %v2509_v35, %v2518_v37  ;;  %v1843_v12 = vrot.slane %v1841_v36, 4  ;;  %v11900_v49 = vrot.slane %v2520_v40, 11  ;;  %v324_v30 = vld [vmem:[#allocation2 + $0x8c] sm:$0x1] }
  0x98   : > { %v2527_v31 = vrot.slane %v2525_v42, 7  ;;  %v2534_v52 = vshrl.u32 %v2378_v39, 16  ;;  %v1835_v22 = vrot.slane %v1834_v5, 4  ;;  %v2537_v54 = vshll.u32 %v2378_v39, 16 }
  0x99   : > { %12956 = vmatmul.mubr.msk.bf16.gmra.mxu0 %vm1158_vm7, %v11868_v45  ;;  %12989 = vmatprep.mubr.msk.bf16.mxu1 %vm1158_vm7, %v11916_v46  ;;  %v1652_v53 = vld [vmem:[#allocation2 + $0x6c] sm:$0x1]  ;;  %v1844_v44 = vor.u32 %v1843_v12, %v1839_v41  ;;  %v322_v50 = vsel %vm14053_vm10, 0, %v321_v43  ;;  %v1852_v62 = vshrl.u32 %v1653_v38, 16  ;;  %v1855_v0 = vshll.u32 %v1653_v38, 16 }
  0x9a   : > { %v1847_v7 = vshll.u32 %v1652_v53, 16  ;;  %v2530_v13 = vor.u32 %v2528_v51, %v2527_v31  ;;  %v2532_v24 = vrot.slane %v2527_v31, 4  ;;  %v2536_v56 = vrot.slane %v2534_v52, 7  ;;  %323 = vst [vmem:[#allocation2 + $0x7c] sm:$0x1] %v322_v50 }
  0x9b   : > { %v1840_v58 = vsel %vm14157_vm13, %v1835_v22, %v1839_v41  ;;  %v1845_v61 = vrot.slane %v1844_v44, 4  ;;  %v1861_v18 = vshll.u32 %v1654_v48, 16  ;;  %v1854_v19 = vrot.slane %v1852_v62, 4  ;;  %v2382_v46 = vld [vmem:[#allocation2 + $0x80] sm:$0x8] }
  0x9c   : > { %v1849_v8 = vrot.slane %v1847_v7, 5  ;;  %v2531_v14 = vsel %vm13892_vm8, %v11900_v49, %v2530_v13  ;;  %v2539_v16 = vor.u32 %v2537_v54, %v2536_v56  ;;  %v1857_v20 = vrot.slane %v1855_v0, 5  ;;  %v2383_v31 = vld [vmem:[#allocation2 + $0x84] sm:$0xf]  ;;  %v2384_v50 = vld [vmem:[#allocation2 + $0x88] sm:$0xf] }
  0x9d   : > { %v1865_v23 = vshrl.u32 %v1654_v48, 16  ;;  %v2542_v26 = vshrl.u32 %v2379_v57, 16  ;;  %v1863_v59 = vrot.slane %v1861_v18, 5  ;;  %v2547_v29 = vshrl.u32 %v2380_v3, 16 }
  0x9e   : > { %v1850_v11 = vsel %vm14157_vm13, %v1845_v61, %v1849_v8  ;;  %v2540_v27 = vsel %vm13892_vm8, %v2532_v24, %v2539_v16  ;;  %v1858_v32 = vor.u32 %v1857_v20, %v1854_v19  ;;  %v2550_v1 = vshll.u32 %v2380_v3, 16  ;;  %v1659_v8 = vld [vmem:[#allocation2 + $0x94] sm:$0xf]  ;;  %v1660_v20 = vld [vmem:[#allocation2 + $0x98] sm:$0xf] }
  0x9f   : > { %v11869_v63 = vcombine.low %v1840_v58, %v1850_v11  ;;  %v11917_v4 = vcombine.low %v2531_v14, %v2540_v27  ;;  %v1867_v33 = vrot.slane %v1865_v23, 4  ;;  %v11901_v35 = vrot.slane %v2542_v26, 11  ;;  %v327_v58 = vld [vmem:[#allocation2 + $0x9c] sm:$0x1] }
  0xa0   : > { %v2549_v21 = vrot.slane %v2547_v29, 7  ;;  %v2556_v28 = vshrl.u32 %v2381_v25, 16  ;;  %v1859_v39 = vrot.slane %v1858_v32, 4  ;;  %v2559_v55 = vshll.u32 %v2381_v25, 16 }
  0xa1   : > { %12959 = vmatprep.mubr.msk.bf16.mxu0 %vm1158_vm7, %v11869_v63  ;;  %12990 = vmatmul.mubr.msk.bf16.gmra.mxu1 %vm1158_vm7, %v11917_v4  ;;  %v1655_v36 = vld [vmem:[#allocation2 + $0x7c] sm:$0x1]  ;;  %v1868_v40 = vor.u32 %v1867_v33, %v1863_v59  ;;  %v325_v37 = vsel %vm14053_vm10, 0, %v324_v30  ;;  %v1876_v38 = vshrl.u32 %v1656_v34, 16  ;;  %v1879_v49 = vshll.u32 %v1656_v34, 16 }
  0xa2   : > { %v1871_v41 = vshll.u32 %v1655_v36, 16  ;;  %v2552_v42 = vor.u32 %v2550_v1, %v2549_v21  ;;  %v2554_v43 = vrot.slane %v2549_v21, 4  ;;  %v2558_v45 = vrot.slane %v2556_v28, 7  ;;  %326 = vst [vmem:[#allocation2 + $0x8c] sm:$0x1] %v325_v37 }
  0xa3   : > { %v1864_v5 = vsel %vm14157_vm13, %v1859_v39, %v1863_v59  ;;  %v1869_v12 = vrot.slane %v1868_v40, 4  ;;  %v1885_v53 = vshll.u32 %v1657_v15, 16  ;;  %v1878_v22 = vrot.slane %v1876_v38, 4  ;;  %v2385_v4 = vld [vmem:[#allocation2 + $0x90] sm:$0x8] }
  0xa4   : > { %v1873_v51 = vrot.slane %v1871_v41, 5  ;;  %v2553_v52 = vsel %vm13892_vm8, %v11901_v35, %v2552_v42  ;;  %v2561_v48 = vor.u32 %v2559_v55, %v2558_v45  ;;  %v1881_v44 = vrot.slane %v1879_v49, 5  ;;  %v14270_v21 = vld [vmem:[#allocation2 + $0x94] sm:$0xf]  ;;  %v14274_v37 = vld [vmem:[#allocation2 + $0x98] sm:$0xf] }
  0xa5   : > { %v1889_v54 = vshrl.u32 %v1657_v15, 16  ;;  %v2564_v7 = vshrl.u32 %v2382_v46, 16  ;;  %v1887_v56 = vrot.slane %v1885_v53, 5  ;;  %v2569_v57 = vshrl.u32 %v2383_v31, 16 }
  0xa6   : > { %v1874_v13 = vsel %vm14157_vm13, %v1869_v12, %v1873_v51  ;;  %v2562_v24 = vsel %vm13892_vm8, %v2554_v43, %v2561_v48  ;;  %v1882_v0 = vor.u32 %v1881_v44, %v1878_v22  ;;  %v2572_v18 = vshll.u32 %v2383_v31, 16  ;;  %v1662_v51 = vld [vmem:[#allocation2 + $0xa4] sm:$0xf]  ;;  %v1663_v44 = vld [vmem:[#allocation2 + $0xa8] sm:$0xf] }
  0xa7   : > { %v11870_v61 = vcombine.low %v1864_v5, %v1874_v13  ;;  %v11918_v62 = vcombine.low %v2553_v52, %v2562_v24  ;;  %v1891_v3 = vrot.slane %v1889_v54, 4  ;;  %v11902_v14 = vrot.slane %v2564_v7, 11  ;;  %v330_v5 = vld [vmem:[#allocation2 + $0xac] sm:$0x1] }
  0xa8   : > { %v2571_v16 = vrot.slane %v2569_v57, 7  ;;  %v2578_v19 = vshrl.u32 %v2384_v50, 16  ;;  %v1883_v25 = vrot.slane %v1882_v0, 4  ;;  %v2581_v11 = vshll.u32 %v2384_v50, 16 }
  0xa9   : > { %12960 = vmatmul.mubr.msk.bf16.gmra.mxu0 %vm1158_vm7, %v11870_v61  ;;  %12993 = vmatprep.mubr.msk.bf16.mxu1 %vm1158_vm7, %v11918_v62  ;;  %v1658_v23 = vld [vmem:[#allocation2 + $0x8c] sm:$0x1]  ;;  %v1892_v26 = vor.u32 %v1891_v3, %v1887_v56  ;;  %v328_v27 = vsel %vm14053_vm10, 0, %v327_v58  ;;  %v1900_v34 = vshrl.u32 %v1659_v8, 16  ;;  %v1903_v35 = vshll.u32 %v1659_v8, 16 }
  0xaa   : > { %v1895_v59 = vshll.u32 %v1658_v23, 16  ;;  %v2574_v29 = vor.u32 %v2572_v18, %v2571_v16  ;;  %v2576_v30 = vrot.slane %v2571_v16, 4  ;;  %v2580_v63 = vrot.slane %v2578_v19, 7  ;;  %329 = vst [vmem:[#allocation2 + $0x9c] sm:$0x1] %v328_v27 }
  0xab   : > { %v1888_v32 = vsel %vm14157_vm13, %v1883_v25, %v1887_v56  ;;  %v1893_v33 = vrot.slane %v1892_v26, 4  ;;  %v1909_v36 = vshll.u32 %v1660_v20, 16  ;;  %v1902_v39 = vrot.slane %v1900_v34, 4  ;;  %v2388_v62 = vld [vmem:[#allocation2 + $0xa0] sm:$0x8] }
  0xac   : > { %v1897_v1 = vrot.slane %v1895_v59, 5  ;;  %v2575_v28 = vsel %vm13892_vm8, %v11902_v14, %v2574_v29  ;;  %v2583_v15 = vor.u32 %v2581_v11, %v2580_v63  ;;  %v1905_v40 = vrot.slane %v1903_v35, 5  ;;  %v14290_v16 = vld [vmem:[#allocation2 + $0xa4] sm:$0xf]  ;;  %v14294_v27 = vld [vmem:[#allocation2 + $0xa8] sm:$0xf] }
  0xad   : > { %v1913_v55 = vshrl.u32 %v1660_v20, 16  ;;  %v2586_v41 = vshrl.u32 %v2385_v4, 16  ;;  %v1911_v45 = vrot.slane %v1909_v36, 5  ;;  %v2591_v46 = vshrl.u32 %v14270_v21, 16 }
  0xae   : > { %v1898_v42 = vsel %vm14157_vm13, %v1893_v33, %v1897_v1  ;;  %v2584_v43 = vsel %vm13892_vm8, %v2576_v30, %v2583_v15  ;;  %v1906_v49 = vor.u32 %v1905_v40, %v1902_v39  ;;  %v2594_v53 = vshll.u32 %v14270_v21, 16 }
  0xaf   : > { %v11871_v12 = vcombine.low %v1888_v32, %v1898_v42  ;;  %v11919_v38 = vcombine.low %v2575_v28, %v2584_v43  ;;  %v1915_v31 = vrot.slane %v1913_v55, 4  ;;  %v11903_v52 = vrot.slane %v2586_v41, 11  ;;  %v333_v32 = vld [vmem:[#allocation2 + $0xbc] sm:$0x1]  ;;  %v1665_v28 = vld [vmem:[#allocation2 + $0xb4] sm:$0xf] }
  0xb0   : > { %v2593_v48 = vrot.slane %v2591_v46, 7  ;;  %v2600_v22 = vshrl.u32 %v14274_v37, 16  ;;  %v1907_v50 = vrot.slane %v1906_v49, 4  ;;  %v2603_v13 = vshll.u32 %v14274_v37, 16  ;;  %v1666_v55 = vld [vmem:[#allocation2 + $0xb8] sm:$0xf] }
  0xb1   : > { %12963 = vmatprep.mubr.msk.bf16.mxu0 %vm1158_vm7, %v11871_v12  ;;  %12994 = vmatmul.mubr.msk.bf16.gmra.mxu1 %vm1158_vm7, %v11919_v38  ;;  %v1661_v54 = vld [vmem:[#allocation2 + $0x9c] sm:$0x1]  ;;  %v1916_v7 = vor.u32 %v1915_v31, %v1911_v45  ;;  %v331_v24 = vsel %vm14053_vm10, 0, %v330_v5  ;;  %v1924_v8 = vshrl.u32 %v1662_v51, 16  ;;  %v1927_v14 = vshll.u32 %v1662_v51, 16 }
  0xb2   : > { %v1919_v56 = vshll.u32 %v1661_v54, 16  ;;  %v2596_v57 = vor.u32 %v2594_v53, %v2593_v48  ;;  %v2598_v58 = vrot.slane %v2593_v48, 4  ;;  %v2602_v61 = vrot.slane %v2600_v22, 7  ;;  %332 = vst [vmem:[#allocation2 + $0xac] sm:$0x1] %v331_v24 }
  0xb3   : > { %v1912_v0 = vsel %vm14157_vm13, %v1907_v50, %v1911_v45  ;;  %v1917_v3 = vrot.slane %v1916_v7, 4  ;;  %v1933_v23 = vshll.u32 %v1663_v44, 16  ;;  %v1926_v25 = vrot.slane %v1924_v8, 4  ;;  %v2391_v31 = vld [vmem:[#allocation2 + $0xb0] sm:$0x8] }
  0xb4   : > { %v1921_v18 = vrot.slane %v1919_v56, 5  ;;  %v2597_v19 = vsel %vm13892_vm8, %v11903_v52, %v2596_v57  ;;  %v2605_v20 = vor.u32 %v2603_v13, %v2602_v61  ;;  %v1929_v26 = vrot.slane %v1927_v14, 5  ;;  %v14310_v22 = vld [vmem:[#allocation2 + $0xb4] sm:$0xf]  ;;  %v14314_v57 = vld [vmem:[#allocation2 + $0xb8] sm:$0xf] }
  0xb5   : > { %v1937_v11 = vshrl.u32 %v1663_v44, 16  ;;  %v2608_v59 = vshrl.u32 %v2388_v62, 16  ;;  %v1935_v63 = vrot.slane %v1933_v23, 5  ;;  %v2613_v4 = vshrl.u32 %v14290_v16, 16  ;;  %v336_v8 = vld [vmem:[#allocation2 + $0xcc] sm:$0x1] }
  0xb6   : > { %v1922_v29 = vsel %vm14157_vm13, %v1917_v3, %v1921_v18  ;;  %v2606_v30 = vsel %vm13892_vm8, %v2598_v58, %v2605_v20  ;;  %v1930_v35 = vor.u32 %v1929_v26, %v1926_v25  ;;  %v2616_v39 = vshll.u32 %v14290_v16, 16  ;;  %v1668_v23 = vld [vmem:[#allocation2 + $0xc4] sm:$0xf] }
  0xb7   : > { %v11872_v33 = vcombine.low %v1912_v0, %v1922_v29  ;;  %v11920_v34 = vcombine.low %v2597_v19, %v2606_v30  ;;  %v1939_v1 = vrot.slane %v1937_v11, 4  ;;  %v11904_v15 = vrot.slane %v2608_v59, 11  ;;  %v1669_v29 = vld [vmem:[#allocation2 + $0xc8] sm:$0xf] }
  0xb8   : > { %v2615_v36 = vrot.slane %v2613_v4, 7  ;;  %v2622_v40 = vshrl.u32 %v14294_v27, 16  ;;  %v1931_v42 = vrot.slane %v1930_v35, 4  ;;  %v2625_v45 = vshll.u32 %v14294_v27, 16 }
  0xb9   : > { %12964 = vmatmul.mubr.msk.bf16.gmra.mxu0 %vm1158_vm7, %v11872_v33  ;;  %12997 = vmatprep.mubr.msk.bf16.mxu1 %vm1158_vm7, %v11920_v34  ;;  %v1664_v41 = vld [vmem:[#allocation2 + $0xac] sm:$0x1]  ;;  %v1940_v43 = vor.u32 %v1939_v1, %v1935_v63  ;;  %v334_v46 = vsel %vm14053_vm10, 0, %v333_v32  ;;  %v1948_v48 = vshrl.u32 %v1665_v28, 16  ;;  %v1951_v53 = vshll.u32 %v1665_v28, 16 }
  0xba   : > { %v1943_v5 = vshll.u32 %v1664_v41, 16  ;;  %v2618_v12 = vor.u32 %v2616_v39, %v2615_v36  ;;  %v2620_v38 = vrot.slane %v2615_v36, 4  ;;  %v2624_v49 = vrot.slane %v2622_v40, 7  ;;  %335 = vst [vmem:[#allocation2 + $0xbc] sm:$0x1] %v334_v46 }
  0xbb   : > { %v1936_v51 = vsel %vm14157_vm13, %v1931_v42, %v1935_v63  ;;  %v1941_v52 = vrot.slane %v1940_v43, 4  ;;  %v1957_v7 = vshll.u32 %v1666_v55, 16  ;;  %v1950_v13 = vrot.slane %v1948_v48, 4  ;;  %v14330_v41 = vld [vmem:[#allocation2 + $0xc4] sm:$0xf] }
  0xbc   : > { %v1945_v44 = vrot.slane %v1943_v5, 5  ;;  %v2619_v54 = vsel %vm13892_vm8, %v11904_v15, %v2618_v12  ;;  %v2627_v50 = vor.u32 %v2625_v45, %v2624_v49  ;;  %v1953_v24 = vrot.slane %v1951_v53, 5  ;;  %v2394_v15 = vld [vmem:[#allocation2 + $0xc0] sm:$0x8]  ;;  %v14334_v49 = vld [vmem:[#allocation2 + $0xc8] sm:$0xf] }
  0xbd   : > { %v1961_v56 = vshrl.u32 %v1666_v55, 16  ;;  %v2630_v58 = vshrl.u32 %v2391_v31, 16  ;;  %v1959_v0 = vrot.slane %v1957_v7, 5  ;;  %v2635_v3 = vshrl.u32 %v14310_v22, 16 }
  0xbe   : > { %v1946_v61 = vsel %vm14157_vm13, %v1941_v52, %v1945_v44  ;;  %v2628_v62 = vsel %vm13892_vm8, %v2620_v38, %v2627_v50  ;;  %v1954_v19 = vor.u32 %v1953_v24, %v1950_v13  ;;  %v2638_v11 = vshll.u32 %v14310_v22, 16  ;;  %v339_v44 = vld [vmem:[#allocation2 + $0xdc] sm:$0x1]  ;;  %v1671_v24 = vld [vmem:[#allocation2 + $0xd4] sm:$0xf] }
  0xbf   : > { %v11873_v14 = vcombine.low %v1936_v51, %v1946_v61  ;;  %v11921_v18 = vcombine.low %v2619_v54, %v2628_v62  ;;  %v1963_v20 = vrot.slane %v1961_v56, 4  ;;  %v11905_v25 = vrot.slane %v2630_v58, 11 }
  0xc0   : > { %v2637_v26 = vrot.slane %v2635_v3, 7  ;;  %v2644_v59 = vshrl.u32 %v14314_v57, 16  ;;  %v1955_v63 = vrot.slane %v1954_v19, 4  ;;  %v2647_v32 = vshll.u32 %v14314_v57, 16 }
  0xc1   : > { %12967 = vmatprep.mubr.msk.bf16.mxu0 %vm1158_vm7, %v11873_v14  ;;  %12998 = vmatmul.mubr.msk.bf16.gmra.mxu1 %vm1158_vm7, %v11921_v18  ;;  %v1667_v30 = vld [vmem:[#allocation2 + $0xbc] sm:$0x1]  ;;  %v1964_v4 = vor.u32 %v1963_v20, %v1959_v0  ;;  %v337_v33 = vsel %vm14053_vm10, 0, %v336_v8  ;;  %v1972_v40 = vshrl.u32 %v1668_v23, 16  ;;  %v1975_v55 = vshll.u32 %v1668_v23, 16 }
  0xc2   : > { %v1967_v34 = vshll.u32 %v1667_v30, 16  ;;  %v2640_v35 = vor.u32 %v2638_v11, %v2637_v26  ;;  %v2642_v1 = vrot.slane %v2637_v26, 4  ;;  %v2646_v28 = vrot.slane %v2644_v59, 7  ;;  %338 = vst [vmem:[#allocation2 + $0xcc] sm:$0x1] %v337_v33 }
  0xc3   : > { %v1960_v36 = vsel %vm14157_vm13, %v1955_v63, %v1959_v0  ;;  %v1965_v39 = vrot.slane %v1964_v4, 4  ;;  %v1981_v46 = vshll.u32 %v1669_v29, 16  ;;  %v1974_v5 = vrot.slane %v1972_v40, 4  ;;  %v1672_v0 = vld [vmem:[#allocation2 + $0xd8] sm:$0xf] }
  0xc4   : > { %v1969_v42 = vrot.slane %v1967_v34, 5  ;;  %v2641_v43 = vsel %vm13892_vm8, %v11905_v25, %v2640_v35  ;;  %v2649_v45 = vor.u32 %v2647_v32, %v2646_v28  ;;  %v1977_v12 = vrot.slane %v1975_v55, 5  ;;  %v2397_v11 = vld [vmem:[#allocation2 + $0xd0] sm:$0x8]  ;;  %v14350_v4 = vld [vmem:[#allocation2 + $0xd4] sm:$0xf] }
  0xc5   : > { %v1985_v38 = vshrl.u32 %v1669_v29, 16  ;;  %v2652_v31 = vshrl.u32 %v2394_v15, 16  ;;  %v1983_v48 = vrot.slane %v1981_v46, 5  ;;  %v2657_v53 = vshrl.u32 %v14330_v41, 16 }
  0xc6   : > { %v1970_v51 = vsel %vm14157_vm13, %v1965_v39, %v1969_v42  ;;  %v2650_v52 = vsel %vm13892_vm8, %v2642_v1, %v2649_v45  ;;  %v1978_v7 = vor.u32 %v1977_v12, %v1974_v5  ;;  %v2660_v61 = vshll.u32 %v14330_v41, 16  ;;  %v342_v45 = vld [vmem:[#allocation2 + $0xec] sm:$0x1] }
  0xc7   : > { %v11874_v54 = vcombine.low %v1960_v36, %v1970_v51  ;;  %v11922_v50 = vcombine.low %v2641_v43, %v2650_v52  ;;  %v1987_v13 = vrot.slane %v1985_v38, 4  ;;  %v11906_v56 = vrot.slane %v2652_v31, 11  ;;  %v14354_v36 = vld [vmem:[#allocation2 + $0xd8] sm:$0xf]  ;;  %v1674_v31 = vld [vmem:[#allocation2 + $0xe4] sm:$0xf] }
  0xc8   : > { %v2659_v58 = vrot.slane %v2657_v53, 7  ;;  %v2666_v62 = vshrl.u32 %v14334_v49, 16  ;;  %v1979_v8 = vrot.slane %v1978_v7, 4  ;;  %v2669_v18 = vshll.u32 %v14334_v49, 16 }
  0xc9   : > { %12968 = vmatmul.mubr.msk.bf16.gmra.mxu0 %vm1158_vm7, %v11874_v54  ;;  %13001 = vmatprep.mubr.msk.bf16.mxu1 %vm1158_vm7, %v11922_v50  ;;  %v1670_v3 = vld [vmem:[#allocation2 + $0xcc] sm:$0x1]  ;;  %v1988_v14 = vor.u32 %v1987_v13, %v1983_v48  ;;  %v340_v19 = vsel %vm14053_vm10, 0, %v339_v44  ;;  %v1996_v30 = vshrl.u32 %v1671_v24, 16  ;;  %v1999_v63 = vshll.u32 %v1671_v24, 16 }
  0xca   : > { %v1991_v20 = vshll.u32 %v1670_v3, 16  ;;  %v2662_v23 = vor.u32 %v2660_v61, %v2659_v58  ;;  %v2664_v25 = vrot.slane %v2659_v58, 4  ;;  %v2668_v26 = vrot.slane %v2666_v62, 7  ;;  %341 = vst [vmem:[#allocation2 + $0xdc] sm:$0x1] %v340_v19 }
  0xcb   : > { %v1984_v59 = vsel %vm14157_vm13, %v1979_v8, %v1983_v48  ;;  %v1989_v29 = vrot.slane %v1988_v14, 4  ;;  %v2005_v35 = vshll.u32 %v1672_v0, 16  ;;  %v1998_v1 = vrot.slane %v1996_v30, 4  ;;  %v1675_v44 = vld [vmem:[#allocation2 + $0xe8] sm:$0xf] }
  0xcc   : > { %v1993_v32 = vrot.slane %v1991_v20, 5  ;;  %v2663_v33 = vsel %vm13892_vm8, %v11906_v56, %v2662_v23  ;;  %v2671_v34 = vor.u32 %v2669_v18, %v2668_v26  ;;  %v2001_v28 = vrot.slane %v1999_v63, 5  ;;  %v14370_v19 = vld [vmem:[#allocation2 + $0xe4] sm:$0xf]  ;;  %v14374_v30 = vld [vmem:[#allocation2 + $0xe8] sm:$0xf] }
  0xcd   : > { %v2009_v15 = vshrl.u32 %v1672_v0, 16  ;;  %v2674_v39 = vshrl.u32 %v2397_v11, 16  ;;  %v2007_v42 = vrot.slane %v2005_v35, 5  ;;  %v2679_v43 = vshrl.u32 %v14350_v4, 16  ;;  %v2400_v0 = vld [vmem:[#allocation2 + $0xe0] sm:$0x8] }
  0xce   : > { %v1994_v40 = vsel %vm14157_vm13, %v1989_v29, %v1993_v32  ;;  %v2672_v55 = vsel %vm13892_vm8, %v2664_v25, %v2671_v34  ;;  %v2002_v12 = vor.u32 %v2001_v28, %v1998_v1  ;;  %v2682_v48 = vshll.u32 %v14350_v4, 16  ;;  %v345_v1 = vld [vmem:[#allocation2 + $0xfc] sm:$0x1] }
  0xcf   : > { %v11875_v46 = vcombine.low %v1984_v59, %v1994_v40  ;;  %v11923_v5 = vcombine.low %v2663_v33, %v2672_v55  ;;  %v2011_v38 = vrot.slane %v2009_v15, 4  ;;  %v11907_v51 = vrot.slane %v2674_v39, 11  ;;  %v1677_v55 = vld [vmem:[#allocation2 + $0xf4] sm:$0xf] }
  0xd0   : > { %v2681_v52 = vrot.slane %v2679_v43, 7  ;;  %v2688_v53 = vshrl.u32 %v14354_v36, 16  ;;  %v2003_v50 = vrot.slane %v2002_v12, 4  ;;  %v2691_v13 = vshll.u32 %v14354_v36, 16 }
  0xd1   : > { %12971 = vmatprep.mubr.msk.bf16.mxu0 %vm1158_vm7, %v11875_v46  ;;  %13002 = vmatmul.mubr.msk.bf16.gmra.mxu1 %vm1158_vm7, %v11923_v5  ;;  %v1673_v54 = vld [vmem:[#allocation2 + $0xdc] sm:$0x1]  ;;  %v2012_v7 = vor.u32 %v2011_v38, %v2007_v42  ;;  %v343_v24 = vsel %vm14053_vm10, 0, %v342_v45  ;;  %v2020_v14 = vshrl.u32 %v1674_v31, 16  ;;  %v2023_v18 = vshll.u32 %v1674_v31, 16 }
  0xd2   : > { %v2015_v56 = vshll.u32 %v1673_v54, 16  ;;  %v2684_v58 = vor.u32 %v2682_v48, %v2681_v52  ;;  %v2686_v61 = vrot.slane %v2681_v52, 4  ;;  %v2690_v62 = vrot.slane %v2688_v53, 7  ;;  %344 = vst [vmem:[#allocation2 + $0xec] sm:$0x1] %v343_v24 }
  0xd3   : > { %v2008_v3 = vsel %vm14157_vm13, %v2003_v50, %v2007_v42  ;;  %v2013_v8 = vrot.slane %v2012_v7, 4  ;;  %v2029_v26 = vshll.u32 %v1675_v44, 16  ;;  %v2022_v11 = vrot.slane %v2020_v14, 4  ;;  %v1678_v5 = vld [vmem:[#allocation2 + $0xf8] sm:$0xf] }
  0xd4   : > { %v2017_v20 = vrot.slane %v2015_v56, 5  ;;  %v2685_v23 = vsel %vm13892_vm8, %v11907_v51, %v2684_v58  ;;  %v2693_v25 = vor.u32 %v2691_v13, %v2690_v62  ;;  %v2025_v59 = vrot.slane %v2023_v18, 5  ;;  %v2403_v50 = vld [vmem:[#allocation2 + $0xf0] sm:$0x8]  ;;  %v14390_v58 = vld [vmem:[#allocation2 + $0xf4] sm:$0xf] }
  0xd5   : > { %v2033_v29 = vshrl.u32 %v1675_v44, 16  ;;  %v2696_v63 = vshrl.u32 %v2400_v0, 16  ;;  %v2031_v34 = vrot.slane %v2029_v26, 5  ;;  %v2701_v35 = vshrl.u32 %v14370_v19, 16 }
  0xd6   : > { %v2018_v32 = vsel %vm14157_vm13, %v2013_v8, %v2017_v20  ;;  %v2694_v33 = vsel %vm13892_vm8, %v2686_v61, %v2693_v25  ;;  %v2026_v39 = vor.u32 %v2025_v59, %v2022_v11  ;;  %v2704_v45 = vshll.u32 %v14370_v19, 16  ;;  %v14394_v20 = vld [vmem:[#allocation2 + $0xf8] sm:$0xf] }
  0xd7   : > { %v11876_v28 = vcombine.low %v2008_v3, %v2018_v32  ;;  %v11924_v15 = vcombine.low %v2685_v23, %v2694_v33  ;;  %v2035_v40 = vrot.slane %v2033_v29, 4  ;;  %v11908_v42 = vrot.slane %v2696_v63, 11 }
  0xd8   : > { %v2703_v43 = vrot.slane %v2701_v35, 7  ;;  %v2710_v46 = vshrl.u32 %v14374_v30, 16  ;;  %v2027_v38 = vrot.slane %v2026_v39, 4  ;;  %v2713_v51 = vshll.u32 %v14374_v30, 16  ;;  %v510_v35 = vld [vmem:[%s13849_s29 + $0xf0] sm:$0xff] }
  0xd9   : > { %12972 = vmatmul.mubr.msk.bf16.gmra.mxu0 %vm1158_vm7, %v11876_v28  ;;  %13005 = vmatprep.mubr.msk.bf16.mxu1 %vm1158_vm7, %v11924_v15  ;;  %v1676_v12 = vld [vmem:[#allocation2 + $0xec] sm:$0x1]  ;;  %v2036_v31 = vor.u32 %v2035_v40, %v2031_v34  ;;  %v346_v52 = vsel %vm14053_vm10, 0, %v345_v1  ;;  %v2044_v24 = vshrl.u32 %v1677_v55, 16  ;;  %v2047_v56 = vshll.u32 %v1677_v55, 16 }
  0xda   : > { %v2039_v48 = vshll.u32 %v1676_v12, 16  ;;  %v2706_v53 = vor.u32 %v2704_v45, %v2703_v43  ;;  %v2708_v44 = vrot.slane %v2703_v43, 4  ;;  %v2712_v54 = vrot.slane %v2710_v46, 7  ;;  %347 = vst [vmem:[#allocation2 + $0xfc] sm:$0x1] %v346_v52 }
  0xdb   : > { %v2032_v7 = vsel %vm14157_vm13, %v2027_v38, %v2031_v34  ;;  %v2037_v13 = vrot.slane %v2036_v31, 4  ;;  %v2053_v3 = vshll.u32 %v1678_v5, 16  ;;  %v2046_v8 = vrot.slane %v2044_v24, 4  ;;  %v294_v34 = vld [vmem:[#allocation2 + $0x100] sm:$0x8] }
  0xdc   : > { %v2041_v61 = vrot.slane %v2039_v48, 5  ;;  %v2707_v62 = vsel %vm13892_vm8, %v11908_v42, %v2706_v53  ;;  %v2715_v0 = vor.u32 %v2713_v51, %v2712_v54  ;;  %v2049_v14 = vrot.slane %v2047_v56, 5  ;;  %v14407_v40 = vld [vmem:[%s18262_s1 + $0x1c] sm:$0xf]  ;;  %v3381_v52 = vld [vmem:[#allocation2 + $0x14] sm:$0xf] }
  0xdd   : > { %v2057_v18 = vshrl.u32 %v1678_v5, 16  ;;  %v2718_v23 = vshrl.u32 %v2403_v50, 16  ;;  %v2055_v11 = vrot.slane %v2053_v3, 5  ;;  %v2723_v59 = vshrl.u32 %v14390_v58, 16  ;;  %v511_v5 = vld [vmem:[%s13849_s29 + $0xf8] sm:$0xff] }
  0xde   : > { %v2042_v25 = vsel %vm14157_vm13, %v2037_v13, %v2041_v61  ;;  %v2716_v26 = vsel %vm13892_vm8, %v2708_v44, %v2715_v0  ;;  %v2050_v32 = vor.u32 %v2049_v14, %v2046_v8  ;;  %v2726_v15 = vshll.u32 %v14390_v58, 16  ;;  %v3382_v50 = vld [vmem:[#allocation2 + $0x18] sm:$0xf]  ;;  %v13725_v56 = vld [vmem:[#allocation2 + $0x14] sm:$0xf] }
  0xdf   : > { %v11877_v29 = vcombine.low %v2032_v7, %v2042_v25  ;;  %v11925_v63 = vcombine.low %v2707_v62, %v2716_v26  ;;  %v2059_v33 = vrot.slane %v2057_v18, 4  ;;  %v11909_v1 = vrot.slane %v2718_v23, 11  ;;  %v13726_v61 = vld [vmem:[#allocation2 + $0x18] sm:$0xf]  ;;  %v14424_v0 = vld [vmem:[#allocation2 + $0x24] sm:$0xf] }
  0xe0   : > { %v2725_v28 = vrot.slane %v2723_v59, 7  ;;  %v2732_v39 = vshrl.u32 %v14394_v20, 16  ;;  %v2051_v42 = vrot.slane %v2050_v32, 4  ;;  %v2735_v45 = vshll.u32 %v14394_v20, 16  ;;  %v14426_v3 = vld [vmem:[#allocation2 + $0x28] sm:$0xf] }
  0xe1   : > { %12975 = vmatprep.mubr.msk.bf16.mxu0 %vm1158_vm7, %v11877_v29  ;;  %13006 = vmatmul.mubr.msk.bf16.gmra.mxu1 %vm1158_vm7, %v11925_v63  ;;  %v1679_v55 = vld [vmem:[#allocation2 + $0xfc] sm:$0x1]  ;;  %v2060_v43 = vor.u32 %v2059_v33, %v2055_v11  ;;  %v3912_v46 = vsel %vm1207_vm0, %v14211_v47, 0  ;;  %v295_v44 = vsel %vm13835_vm5, 0, %v294_v34  ;;  %v12537_v54 = vpack.c.bf16 %v510_v35, %v510_v35  ;;  %v3384_v29 = vld [vmem:[#allocation2 + $0x24] sm:$0xf] }
  0xe2   : > { %v2063_v12 = vshll.u32 %v1679_v55, 16  ;;  %v2728_v38 = vor.u32 %v2726_v15, %v2725_v28  ;;  %v2730_v31 = vrot.slane %v2725_v28, 4  ;;  %v2734_v51 = vrot.slane %v2732_v39, 7  ;;  %13048 = vmatpush3.bf16.msra.mxu1 %v3912_v46  ;;  %296 = vst [vmem:[#allocation2 + $0x100] sm:$0x8] %v295_v44 }
  0xe3   : > { %v2056_v48 = vsel %vm14157_vm13, %v2051_v42, %v2055_v11  ;;  %v2061_v53 = vrot.slane %v2060_v43, 4  ;;  %13496 = vmatprep.subr.msk.bf16.mxu1 %vm1207_vm0, %v14407_v40  ;;  %v12538_v24 = vpack.c.bf16 %v511_v5, %v511_v5  ;;  %671 = vst.msk [vmem:[#allocation2 + $0x104] sm:$0xf] %vm226_vm1, %v12537_v54  ;;  %v11945_v62 = vcombine.low %v13725_v56, %v13726_v61  ;;  %v3383_v18 = vld [vmem:[#allocation2 + $0x1c] sm:$0x1] }
  0xe4   : > { %v2065_v47 = vrot.slane %v2063_v12, 5  ;;  %v2729_v7 = vsel %vm13892_vm8, %v11909_v1, %v2728_v38  ;;  %v2737_v13 = vor.u32 %v2735_v45, %v2734_v51  ;;  %v11946_v8 = vcombine.low %v14424_v0, %v14426_v3  ;;  %v3385_v63 = vld [vmem:[#allocation2 + $0x28] sm:$0xf]  ;;  %v13729_v39 = vld [vmem:[#allocation2 + $0x34] sm:$0xf] }
  0xe5   : > { %v14432_v14 = vsel %vm1207_vm0, %v14224_v17, 0  ;;  %v3430_v23 = vshrl.u32 %v3381_v52, 16  ;;  %672 = vst.msk [vmem:[#allocation2 + $0x108] sm:$0xf] %vm226_vm1, %v12538_v24  ;;  %v3433_v11 = vshll.u32 %v3381_v52, 16  ;;  %v3439_v59 = vshll.u32 %v3382_v50, 16 }
  0xe6   : > { %v2066_v25 = vsel %vm14157_vm13, %v2061_v53, %v2065_v47  ;;  %v2738_v26 = vsel %vm13892_vm8, %v2730_v31, %v2737_v13  ;;  %v3443_v35 = vshrl.u32 %v3382_v50, 16  ;;  %v3386_v17 = vld [vmem:[#allocation2 + $0x2c] sm:$0x1]  ;;  %v3449_v15 = vshll.u32 %v3383_v18, 16  ;;  %v13730_v55 = vld [vmem:[#allocation2 + $0x38] sm:$0xf]  ;;  %v14444_v61 = vpop.f32.mrf.mxu0 }
  0xe7   : > { %v11878_v32 = vcombine.low %v2056_v48, %v2066_v25  ;;  %v11926_v33 = vcombine.low %v2729_v7, %v2738_v26  ;;  %v3432_v34 = vrot.slane %v3430_v23, 4  ;;  %v3435_v1 = vrot.slane %v3433_v11, 5  ;;  %v3387_v50 = vld [vmem:[#allocation2 + $0x34] sm:$0xf] }
  0xe8   : > { %v3441_v28 = vrot.slane %v3439_v59, 5  ;;  %v11947_v42 = vcombine.low %v13729_v39, %v13730_v55  ;;  %v3445_v43 = vrot.slane %v3443_v35, 4  ;;  %v3454_v45 = vshrl.u32 %v3384_v29, 16  ;;  %v14458_v55 = vld [vmem:[#allocation2 + $0x44] sm:$0xf] }
  0xe9   : > { %12976 = vmatmul.mubr.msk.bf16.gmra.mxu0 %vm1158_vm7, %v11878_v32  ;;  %13009 = vmatprep.mubr.msk.bf16.mxu1 %vm1158_vm7, %v11926_v33  ;;  %v3457_v46 = vshll.u32 %v3384_v29, 16  ;;  %v3463_v5 = vshll.u32 %v3385_v63, 16  ;;  %v3436_v12 = vor.u32 %v3435_v1, %v3432_v34  ;;  %v3451_v38 = vrot.slane %v3449_v15, 5  ;;  %v2406_v52 = vld [vmem:[#allocation2 + $0x100] sm:$0x8]  ;;  %v14454_v32 = vpop.f32.mrf.mxu0 }
  0xea   : > { %13015 = vmatprep.mubr.msk.bf16.mxu0 %vm1158_vm7, %v11945_v62  ;;  %v3467_v31 = vshrl.u32 %v3385_v63, 16  ;;  %v3473_v51 = vshll.u32 %v3386_v17, 16  ;;  %v3446_v48 = vor.u32 %v3445_v43, %v3441_v28  ;;  %v3456_v53 = vrot.slane %v3454_v45, 4  ;;  %v14442_v47 = vld [vmem:[#allocation2 + $0x104] sm:$0xf] }
  0xeb   : > { %v3459_v44 = vrot.slane %v3457_v46, 5  ;;  %v3465_v54 = vrot.slane %v3463_v5, 5  ;;  %v2740_v7 = vshrl.u32 %v2406_v52, 16  ;;  %v3437_v13 = vrot.slane %v3436_v12, 4  ;;  %v3388_v1 = vld [vmem:[#allocation2 + $0x38] sm:$0xf]  ;;  %v14466_v12 = vpop.f32.mrf.mxu0 }
  0xec   : > { %v3469_v24 = vrot.slane %v3467_v31, 4  ;;  %v3475_v56 = vrot.slane %v3473_v51, 5  ;;  %v14446_v18 = vld [vmem:[#allocation2 + $0x108] sm:$0xf]  ;;  %v2745_v62 = vshrl.u32 %v14442_v47, 16  ;;  %v2748_v23 = vshll.u32 %v14442_v47, 16 }
  0xed   : > { %v3447_v25 = vrot.slane %v3446_v48, 4  ;;  %v3460_v26 = vor.u32 %v3459_v44, %v3456_v53  ;;  %v11910_v11 = vrot.slane %v2740_v7, 11  ;;  %v2754_v59 = vshrl.u32 %v14446_v18, 16  ;;  %v13732_v43 = vld [vmem:[#allocation2 + $0x48] sm:$0xf] }
  0xee   : > { %v2757_v29 = vshll.u32 %v14446_v18, 16  ;;  %v3442_v63 = vsel %vm14157_vm13, %v3437_v13, %v3441_v28  ;;  %v2747_v33 = vrot.slane %v2745_v62, 7  ;;  %v3470_v17 = vor.u32 %v3469_v24, %v3465_v54  ;;  %v3389_v46 = vld [vmem:[#allocation2 + $0x3c] sm:$0x1]  ;;  %v14464_v28 = vld [vmem:[%s18262_s1 + $0x20] sm:$0xf]  ;;  %v14476_v13 = vpop.f32.mrf.mxu0  ;;  %v14478_v24 = vpop.f32.mrf.mxu1 }
  0xef   : > { %v3452_v34 = vsel %vm14157_vm13, %v3447_v25, %v3451_v38  ;;  %v3461_v35 = vrot.slane %v3460_v26, 4  ;;  %v2756_v15 = vrot.slane %v2754_v59, 7  ;;  %v11948_v45 = vcombine.low %v14458_v55, %v13732_v43  ;;  %18293 = vst [vmem:[#allocation7_spill] sm:$0xff] %v14476_v13  ;;  %v3390_v62 = vld [vmem:[#allocation2 + $0x44] sm:$0xf] }
  0xf0   : > { %v11978_v39 = vcombine.low %v3442_v63, %v3452_v34  ;;  %v3478_v5 = vshrl.u32 %v3387_v50, 16  ;;  %v2750_v38 = vor.u32 %v2748_v23, %v2747_v33  ;;  %v2752_v31 = vrot.slane %v2747_v33, 4  ;;  %v3391_v23 = vld [vmem:[#allocation2 + $0x48] sm:$0xf]  ;;  %v3392_v26 = vld [vmem:[#allocation2 + $0x4c] sm:$0x1]  ;;  %v14490_v59 = vpop.f32.mrf.mxu0 }
  0xf1   : > { %13016 = vmatmul.mubr.msk.bf16.vlgmr.msra.gmra.mxu0 %vm1158_vm7, %v11946_v8  ;;  %v3466_v51 = vsel %vm14157_vm13, %v3461_v35, %v3465_v54  ;;  %v3471_v52 = vrot.slane %v3470_v17, 4  ;;  %v2759_v48 = vor.u32 %v2757_v29, %v2756_v15  ;;  %v3481_v44 = vshll.u32 %v3387_v50, 16  ;;  %v13733_v33 = vld [vmem:[#allocation2 + $0x54] sm:$0xf]  ;;  %v13734_v34 = vld [vmem:[#allocation2 + $0x58] sm:$0xf] }
  0xf2   : > { %13082 = vmatpush3.bf16.msra.mxu0 %v14432_v14  ;;  %13019 = vmatprep.mubr.msk.bf16.mxu0 %vm1158_vm7, %v11947_v42  ;;  %v3480_v53 = vrot.slane %v3478_v5, 4  ;;  %v3487_v7 = vshll.u32 %v3388_v1, 16  ;;  %v2751_v0 = vsel %vm13892_vm8, %v11910_v11, %v2750_v38  ;;  %v3491_v8 = vshrl.u32 %v3388_v1, 16  ;;  %v14492_v11 = vpop.f32.mrf.mxu1  ;;  %v3393_v43 = vld [vmem:[#allocation2 + $0x54] sm:$0xf] }
  0xf3   : > { %v3476_v3 = vsel %vm14157_vm13, %v3471_v52, %v3475_v56  ;;  %v3497_v54 = vshll.u32 %v3389_v46, 16  ;;  %13497 = vmatprep.subr.msk.bf16.mxu0 %vm1207_vm0, %v14464_v28  ;;  %v2760_v14 = vsel %vm13892_vm8, %v2752_v31, %v2759_v48  ;;  %v3483_v50 = vrot.slane %v3481_v44, 5  ;;  %v14494_v46 = vpop.f32.mrf.mxu0  ;;  %v14499_v52 = vld [vmem:[#allocation2 + $0x64] sm:$0xf]  ;;  %v13736_v48 = vld [vmem:[#allocation2 + $0x68] sm:$0xf] }
  0xf4   : > { %v14488_v42 = vcombine.low %v3466_v51, %v3476_v3  ;;  %v3489_v25 = vrot.slane %v3487_v7, 5  ;;  %v11927_v56 = vcombine.low %v2751_v0, %v2760_v14  ;;  %v3493_v29 = vrot.slane %v3491_v8, 4  ;;  %v14496_v5 = vpop.f32.mrf.mxu1  ;;  %v3394_v7 = vld [vmem:[#allocation2 + $0x58] sm:$0xf] }
  0xf5   : > { %v3499_v63 = vrot.slane %v3497_v54, 5  ;;  %v11949_v35 = vcombine.low %v13733_v33, %v13734_v34  ;;  %v3484_v17 = vor.u32 %v3483_v50, %v3480_v53  ;;  %v3502_v1 = vshrl.u32 %v3390_v62, 16  ;;  %v14503_v54 = vpop.f32.mrf.mxu0 }
  0xf6   : > { %v3505_v15 = vshll.u32 %v3390_v62, 16  ;;  %v3511_v55 = vshll.u32 %v3391_v23, 16  ;;  %13010 = vmatmul.mubr.msk.bf16.gmra.mxu1 %vm1158_vm7, %v11927_v56  ;;  %v3494_v38 = vor.u32 %v3493_v29, %v3489_v25  ;;  %v3515_v31 = vshrl.u32 %v3391_v23, 16  ;;  %v14505_v62 = vpop.f32.mrf.mxu1  ;;  %v3395_v29 = vld [vmem:[#allocation2 + $0x5c] sm:$0x1] }
  0xf7   : > { %v3521_v51 = vshll.u32 %v3392_v26, 16  ;;  %v11950_v44 = vcombine.low %v14499_v52, %v13736_v48  ;;  %13049 = vmatprep.mubr.msk.bf16.mxu1 %vm1158_vm7, %v11978_v39  ;;  %v3485_v53 = vrot.slane %v3484_v17, 4  ;;  %v3504_v0 = vrot.slane %v3502_v1, 4  ;;  %18294 = vst [vmem:[#allocation8_spill] sm:$0xff] %v14505_v62  ;;  %v14511_v17 = vpop.f32.mrf.mxu0  ;;  %v13738_v62 = vld [vmem:[#allocation2 + $0x78] sm:$0xf] }
  0xf8   : > { %v3507_v3 = vrot.slane %v3505_v15, 5  ;;  %v3513_v8 = vrot.slane %v3511_v55, 5  ;;  %v3495_v23 = vrot.slane %v3494_v38, 4  ;;  %v3517_v14 = vrot.slane %v3515_v31, 4  ;;  %18295 = vst [vmem:[#allocation9_spill] sm:$0xff] %v14511_v17  ;;  %v14513_v1 = vpop.f32.mrf.mxu1 }
  0xf9   : > { %13020 = vmatmul.mubr.msk.bf16.gmra.mxu0 %vm1158_vm7, %v11948_v45  ;;  %v3523_v50 = vrot.slane %v3521_v51, 5  ;;  %v3526_v26 = vshrl.u32 %v3393_v43, 16  ;;  %v3490_v56 = vsel %vm14157_vm13, %v3485_v53, %v3489_v25  ;;  %v3529_v33 = vshll.u32 %v3393_v43, 16  ;;  %v3396_v31 = vld [vmem:[#allocation2 + $0x64] sm:$0xf]  ;;  %v14517_v53 = vpop.f32.mrf.mxu0 }
  0xfa   : > { %13023 = vmatprep.mubr.msk.bf16.mxu0 %vm1158_vm7, %v11949_v35  ;;  %v3508_v39 = vor.u32 %v3507_v3, %v3504_v0  ;;  %v3535_v34 = vshll.u32 %v3394_v7, 16  ;;  %v3500_v45 = vsel %vm14157_vm13, %v3495_v23, %v3499_v63  ;;  %v3518_v15 = vor.u32 %v3517_v14, %v3513_v8  ;;  %v3397_v35 = vld [vmem:[#allocation2 + $0x68] sm:$0xf]  ;;  %18296 = vst [vmem:[#allocation10_spill] sm:$0xff] %v14517_v53  ;;  %v14519_v43 = vpop.f32.mrf.mxu1  ;;  %v13737_v17 = vld [vmem:[#allocation2 + $0x74] sm:$0xf] }
  0xfb   : > { %v3528_v55 = vrot.slane %v3526_v26, 4  ;;  %v3539_v38 = vshrl.u32 %v3394_v7, 16  ;;  %v11980_v51 = vcombine.low %v3490_v56, %v3500_v45  ;;  %v3531_v25 = vrot.slane %v3529_v33, 5  ;;  %v3398_v23 = vld [vmem:[#allocation2 + $0x6c] sm:$0x1]  ;;  %v14523_v56 = vpop.f32.mrf.mxu0 }
  0xfc   : > { %v3509_v52 = vrot.slane %v3508_v39, 4  ;;  %v3537_v48 = vrot.slane %v3535_v34, 5  ;;  %v3519_v0 = vrot.slane %v3518_v15, 4  ;;  %v3545_v2 = vshll.u32 %v3395_v29, 16  ;;  %18297 = vst [vmem:[#allocation11_spill] sm:$0xff] %v14523_v56  ;;  %v14525_v39 = vpop.f32.mrf.mxu1 }
  0xfd   : > { %v3541_v3 = vrot.slane %v3539_v38, 4  ;;  %v11951_v13 = vcombine.low %v13737_v17, %v13738_v62  ;;  %v3532_v7 = vor.u32 %v3531_v25, %v3528_v55  ;;  %v3550_v14 = vshrl.u32 %v3396_v31, 16  ;;  %v3399_v17 = vld [vmem:[#allocation2 + $0x74] sm:$0xf]  ;;  %v14532_v38 = vpop.f32.mrf.mxu0 }
  0xfe   : > { %v3514_v63 = vsel %vm14157_vm13, %v3509_v52, %v3513_v8  ;;  %v3553_v26 = vshll.u32 %v3396_v31, 16  ;;  %13050 = vmatmul.mubr.msk.bf16.vlgmr.msra.gmra.mxu1 %vm1158_vm7, %v14488_v42  ;;  %v3524_v29 = vsel %vm14157_vm13, %v3519_v0, %v3523_v50  ;;  %v3547_v34 = vrot.slane %v3545_v2, 5  ;;  %18298 = vst [vmem:[#allocation12_spill] sm:$0xff] %v14532_v38  ;;  %v14534_v31 = vpop.f32.mrf.mxu1  ;;  %v3400_v0 = vld [vmem:[#allocation2 + $0x78] sm:$0xf] }
  0xff   : > { %v3542_v33 = vor.u32 %v3541_v3, %v3537_v48  ;;  %v3559_v62 = vshll.u32 %v3397_v35, 16  ;;  %13053 = vmatprep.mubr.msk.bf16.mxu1 %vm1158_vm7, %v11980_v51  ;;  %v11981_v8 = vcombine.low %v3514_v63, %v3524_v29  ;;  %v3533_v45 = vrot.slane %v3532_v7, 4  ;;  %18299 = vst [vmem:[#allocation13_spill] sm:$0xff] %v14534_v31  ;;  %v13739_v3 = vld [vmem:[#allocation2 + $0x84] sm:$0xf]  ;;  %v14540_v29 = vpop.f32.mrf.mxu0 }
 0x100   : > { %v3552_v15 = vrot.slane %v3550_v14, 4  ;;  %v3555_v55 = vrot.slane %v3553_v26, 5  ;;  %v3563_v25 = vshrl.u32 %v3397_v35, 16  ;;  %v3569_v50 = vshll.u32 %v3398_v23, 16  ;;  %v13740_v63 = vld [vmem:[#allocation2 + $0x88] sm:$0xf]  ;;  %v14542_v31 = vpop.f32.mrf.mxu1 }
 0x101   : > { %13024 = vmatmul.mubr.msk.bf16.gmra.mxu0 %vm1158_vm7, %v11950_v44  ;;  %v3543_v42 = vrot.slane %v3542_v33, 4  ;;  %v3561_v52 = vrot.slane %v3559_v62, 5  ;;  %v3538_v2 = vsel %vm14157_vm13, %v3533_v45, %v3537_v48  ;;  %v11952_v7 = vcombine.low %v13739_v3, %v13740_v63  ;;  %v3401_v14 = vld [vmem:[#allocation2 + $0x7c] sm:$0x1]  ;;  %18300 = vst [vmem:[#allocation14_spill] sm:$0xff] %v14540_v29 }
 0x102   : > { %13027 = vmatprep.mubr.msk.bf16.mxu0 %vm1158_vm7, %v11951_v13  ;;  %v3556_v51 = vor.u32 %v3555_v55, %v3552_v15  ;;  %v3574_v26 = vshrl.u32 %v3399_v17, 16  ;;  %v3565_v35 = vrot.slane %v3563_v25, 4  ;;  %v3571_v23 = vrot.slane %v3569_v50, 5  ;;  %v3402_v62 = vld [vmem:[#allocation2 + $0x84] sm:$0xf]  ;;  %v14546_v55 = vpop.f32.mrf.mxu0  ;;  %v14548_v53 = vpop.f32.mrf.mxu1 }
 0x103   : > { %v3548_v44 = vsel %vm14157_vm13, %v3543_v42, %v3547_v34  ;;  %v3577_v33 = vshll.u32 %v3399_v17, 16  ;;  %v3583_v15 = vshll.u32 %v3400_v0, 16  ;;  %v3587_v38 = vshrl.u32 %v3400_v0, 16  ;;  %v3403_v29 = vld [vmem:[#allocation2 + $0x88] sm:$0xf] }
 0x104   : > { %v11982_v48 = vcombine.low %v3538_v2, %v3548_v44  ;;  %v3557_v45 = vrot.slane %v3556_v51, 4  ;;  %v3576_v13 = vrot.slane %v3574_v26, 4  ;;  %v3566_v3 = vor.u32 %v3565_v35, %v3561_v52  ;;  %v3404_v25 = vld [vmem:[#allocation2 + $0x8c] sm:$0x1]  ;;  %v14554_v2 = vpop.f32.mrf.mxu0 }
 0x105   : > { %v3579_v63 = vrot.slane %v3577_v33, 5  ;;  %v3593_v56 = vshll.u32 %v3401_v14, 16  ;;  %v3585_v42 = vrot.slane %v3583_v15, 5  ;;  %v11953_v17 = vcombine.low %v14270_v21, %v14274_v37  ;;  %18301 = vst [vmem:[#allocation15_spill] sm:$0xff] %v14554_v2 }
 0x106   : > { %v3562_v34 = vsel %vm14157_vm13, %v3557_v45, %v3561_v52  ;;  %v3598_v50 = vshrl.u32 %v3402_v62, 16  ;;  %13054 = vmatmul.mubr.msk.bf16.gmra.mxu1 %vm1158_vm7, %v11981_v8  ;;  %v3567_v51 = vrot.slane %v3566_v3, 4  ;;  %v3589_v0 = vrot.slane %v3587_v38, 4  ;;  %v14558_v45 = vpop.f32.mrf.mxu0  ;;  %v3405_v3 = vld [vmem:[#allocation2 + $0x94] sm:$0xf]  ;;  %v14563_v38 = vpop.f32.mrf.mxu1 }
 0x107   : > { %v3580_v26 = vor.u32 %v3579_v63, %v3576_v13  ;;  %v3595_v14 = vrot.slane %v3593_v56, 5  ;;  %13057 = vmatprep.mubr.msk.bf16.mxu1 %vm1158_vm7, %v11982_v48  ;;  %v3601_v35 = vshll.u32 %v3402_v62, 16  ;;  %v3607_v33 = vshll.u32 %v3403_v29, 16  ;;  %18302 = vst [vmem:[#allocation16_spill] sm:$0xff] %v14558_v45  ;;  %v3406_v13 = vld [vmem:[#allocation2 + $0x98] sm:$0xf] }
 0x108   : > { %v3600_v44 = vrot.slane %v3598_v50, 4  ;;  %v3611_v52 = vshrl.u32 %v3403_v29, 16  ;;  %v3572_v21 = vsel %vm14157_vm13, %v3567_v51, %v3571_v23  ;;  %v3590_v15 = vor.u32 %v3589_v0, %v3585_v42  ;;  %v3407_v63 = vld [vmem:[#allocation2 + $0x9c] sm:$0x1]  ;;  %v14574_v2 = vpop.f32.mrf.mxu1 }
 0x109   : > { %13028 = vmatmul.mubr.msk.bf16.gmra.mxu0 %vm1158_vm7, %v11952_v7  ;;  %v3581_v37 = vrot.slane %v3580_v26, 4  ;;  %v3617_v8 = vshll.u32 %v3404_v25, 16  ;;  %v11983_v56 = vcombine.low %v3562_v34, %v3572_v21  ;;  %v3603_v62 = vrot.slane %v3601_v35, 5  ;;  %v14570_v25 = vpop.f32.mrf.mxu0  ;;  %v3408_v21 = vld [vmem:[#allocation2 + $0xa4] sm:$0xf]  ;;  %18304 = vst [vmem:[#allocation18_spill] sm:$0xff] %v14574_v2 }
 0x10a   : > { %13031 = vmatprep.mubr.msk.bf16.mxu0 %vm1158_vm7, %v11953_v17  ;;  %v3609_v48 = vrot.slane %v3607_v33, 5  ;;  %v3613_v29 = vrot.slane %v3611_v52, 4  ;;  %v3591_v23 = vrot.slane %v3590_v15, 4  ;;  %v11954_v7 = vcombine.low %v14290_v16, %v14294_v27  ;;  %18303 = vst [vmem:[#allocation17_spill] sm:$0xff] %v14570_v25  ;;  %v3409_v16 = vld [vmem:[#allocation2 + $0xa8] sm:$0xf] }
 0x10b   : > { %v3586_v50 = vsel %vm14157_vm13, %v3581_v37, %v3585_v42  ;;  %v3619_v51 = vrot.slane %v3617_v8, 5  ;;  %v3604_v26 = vor.u32 %v3603_v62, %v3600_v44  ;;  %v3622_v45 = vshrl.u32 %v3405_v3, 16 }
 0x10c   : > { %v3614_v0 = vor.u32 %v3613_v29, %v3609_v48  ;;  %v3625_v34 = vshll.u32 %v3405_v3, 16  ;;  %v3596_v17 = vsel %vm14157_vm13, %v3591_v23, %v3595_v14  ;;  %v3631_v35 = vshll.u32 %v3406_v13, 16  ;;  %v3410_v29 = vld [vmem:[#allocation2 + $0xac] sm:$0x1]  ;;  %v14577_v25 = vpop.f32.mrf.mxu0 }
 0x10d   : > { %v3635_v33 = vshrl.u32 %v3406_v13, 16  ;;  %v3641_v52 = vshll.u32 %v3407_v63, 16  ;;  %v11984_v42 = vcombine.low %v3586_v50, %v3596_v17  ;;  %v3605_v37 = vrot.slane %v3604_v26, 4  ;;  %18305 = vst [vmem:[#allocation19_spill] sm:$0xff] %v14577_v25  ;;  %v4147_v25 = vld [vmem:[#allocation2 + $0xf0] sm:$0x8] }
 0x10e   : > { %v3615_v15 = vrot.slane %v3614_v0, 4  ;;  %v3624_v8 = vrot.slane %v3622_v45, 4  ;;  %13058 = vmatmul.mubr.msk.bf16.gmra.mxu1 %vm1158_vm7, %v11983_v56  ;;  %v3627_v27 = vrot.slane %v3625_v34, 5  ;;  %v3633_v44 = vrot.slane %v3631_v35, 5  ;;  %v3411_v0 = vld [vmem:[#allocation2 + $0xb4] sm:$0xf]  ;;  %v14587_v34 = vpop.f32.mrf.mxu1  ;;  %v14589_v17 = vpop.f32.mrf.mxu0 }
 0x10f   : > { %v3637_v62 = vrot.slane %v3635_v33, 4  ;;  %v3643_v3 = vrot.slane %v3641_v52, 5  ;;  %13061 = vmatprep.mubr.msk.bf16.mxu1 %vm1158_vm7, %v11984_v42  ;;  %v3610_v14 = vsel %vm14157_vm13, %v3605_v37, %v3609_v48  ;;  %v11955_v45 = vcombine.low %v14310_v22, %v14314_v57  ;;  %18306 = vst [vmem:[#allocation20_spill] sm:$0xff] %v14589_v17  ;;  %v3412_v42 = vld [vmem:[#allocation2 + $0xb8] sm:$0xf] }
 0x110   : > { %v3620_v13 = vsel %vm14157_vm13, %v3615_v15, %v3619_v51  ;;  %v3646_v63 = vshrl.u32 %v3408_v21, 16  ;;  %v3628_v50 = vor.u32 %v3627_v27, %v3624_v8  ;;  %v3649_v26 = vshll.u32 %v3408_v21, 16  ;;  %v14594_v37 = vpop.f32.mrf.mxu1  ;;  %v14596_v21 = vpop.f32.mrf.mxu0  ;;  %v4146_v17 = vld [vmem:[#allocation2 + $0xe8] sm:$0xf] }
 0x111   : > { %v11985_v56 = vcombine.low %v3610_v14, %v3620_v13  ;;  %13032 = vmatmul.mubr.msk.bf16.gmra.mxu0 %vm1158_vm7, %v11954_v7  ;;  %v3638_v23 = vor.u32 %v3637_v62, %v3633_v44  ;;  %v3655_v35 = vshll.u32 %v3409_v16, 16  ;;  %v3659_v51 = vshrl.u32 %v3409_v16, 16  ;;  %18307 = vst [vmem:[#allocation21_spill] sm:$0xff] %v14596_v21  ;;  %v3413_v62 = vld [vmem:[#allocation2 + $0xbc] sm:$0x1] }
 0x112   : > { %13035 = vmatprep.mubr.msk.bf16.mxu0 %vm1158_vm7, %v11955_v45  ;;  %v3648_v48 = vrot.slane %v3646_v63, 4  ;;  %v3665_v33 = vshll.u32 %v3410_v29, 16  ;;  %v3629_v52 = vrot.slane %v3628_v50, 4  ;;  %v3651_v57 = vrot.slane %v3649_v26, 5  ;;  %v3414_v63 = vld [vmem:[#allocation2 + $0xc4] sm:$0xf] }
 0x113   : > { %v3639_v22 = vrot.slane %v3638_v23, 4  ;;  %v11956_v7 = vcombine.low %v14330_v41, %v14334_v49  ;;  %v3657_v15 = vrot.slane %v3655_v35, 5  ;;  %v3661_v8 = vrot.slane %v3659_v51, 4  ;;  %v14602_v41 = vpop.f32.mrf.mxu1  ;;  %v14604_v49 = vpop.f32.mrf.mxu0 }
 0x114   : > { %v3667_v27 = vrot.slane %v3665_v33, 5  ;;  %v3670_v14 = vshrl.u32 %v3411_v0, 16  ;;  %v3634_v16 = vsel %vm14157_vm13, %v3629_v52, %v3633_v44  ;;  %v3652_v13 = vor.u32 %v3651_v57, %v3648_v48  ;;  %18308 = vst [vmem:[#allocation22_spill] sm:$0xff] %v14604_v49  ;;  %v3415_v52 = vld [vmem:[#allocation2 + $0xc8] sm:$0xf] }
 0x115   : > { %v3644_v29 = vsel %vm14157_vm13, %v3639_v22, %v3643_v3  ;;  %v3673_v45 = vshll.u32 %v3411_v0, 16  ;;  %v3662_v23 = vor.u32 %v3661_v8, %v3657_v15  ;;  %v3679_v35 = vshll.u32 %v3412_v42, 16  ;;  %v14607_v21 = vpop.f32.mrf.mxu1  ;;  %v14609_v3 = vpop.f32.mrf.mxu0 }
 0x116   : > { %v11986_v50 = vcombine.low %v3634_v16, %v3644_v29  ;;  %v3672_v26 = vrot.slane %v3670_v14, 4  ;;  %13062 = vmatmul.mubr.msk.bf16.gmra.mxu1 %vm1158_vm7, %v11985_v56  ;;  %v3653_v51 = vrot.slane %v3652_v13, 4  ;;  %v3683_v2 = vshrl.u32 %v3412_v42, 16  ;;  %18309 = vst [vmem:[#allocation23_spill] sm:$0xff] %v14607_v21  ;;  %18310 = vst [vmem:[#allocation24_spill] sm:$0xff] %v14609_v3 }
 0x117   : > { %v3675_v33 = vrot.slane %v3673_v45, 5  ;;  %v3689_v44 = vshll.u32 %v3413_v62, 16  ;;  %v3663_v0 = vrot.slane %v3662_v23, 4  ;;  %v3681_v48 = vrot.slane %v3679_v35, 5  ;;  %v3416_v14 = vld [vmem:[#allocation2 + $0xcc] sm:$0x1]  ;;  %v14617_v16 = vpop.f32.mrf.mxu1  ;;  %v14619_v29 = vpop.f32.mrf.mxu0 }
 0x118   : > { %13065 = vmatprep.mubr.msk.bf16.mxu1 %vm1158_vm7, %v11986_v50  ;;  %v11957_v22 = vcombine.low %v14350_v4, %v14354_v36  ;;  %v3694_v57 = vshrl.u32 %v3414_v63, 16  ;;  %v3658_v56 = vsel %vm14157_vm13, %v3653_v51, %v3657_v15  ;;  %v3685_v8 = vrot.slane %v3683_v2, 4  ;;  %18311 = vst [vmem:[#allocation25_spill] sm:$0xff] %v14617_v16  ;;  %18312 = vst [vmem:[#allocation26_spill] sm:$0xff] %v14619_v29  ;;  %v3417_v50 = vld [vmem:[#allocation2 + $0xd4] sm:$0xf] }
 0x119   : > { %13036 = vmatmul.mubr.msk.bf16.gmra.mxu0 %vm1158_vm7, %v11956_v7  ;;  %v3676_v42 = vor.u32 %v3675_v33, %v3672_v26  ;;  %v3691_v62 = vrot.slane %v3689_v44, 5  ;;  %v3668_v13 = vsel %vm14157_vm13, %v3663_v0, %v3667_v27  ;;  %v3697_v36 = vshll.u32 %v3414_v63, 16  ;;  %v3418_v2 = vld [vmem:[#allocation2 + $0xd8] sm:$0xf]  ;;  %v14624_v35 = vpop.f32.mrf.mxu1  ;;  %v14626_v51 = vpop.f32.mrf.mxu0 }
 0x11a   : > { %13039 = vmatprep.mubr.msk.bf16.mxu0 %vm1158_vm7, %v11957_v22  ;;  %v3696_v4 = vrot.slane %v3694_v57, 4  ;;  %v3703_v45 = vshll.u32 %v3415_v52, 16  ;;  %v11987_v15 = vcombine.low %v3658_v56, %v3668_v13  ;;  %v3686_v7 = vor.u32 %v3685_v8, %v3681_v48  ;;  %18313 = vst [vmem:[#allocation27_spill] sm:$0xff] %v14624_v35  ;;  %18314 = vst [vmem:[#allocation28_spill] sm:$0xff] %v14626_v51  ;;  %v3419_v13 = vld [vmem:[#allocation2 + $0xdc] sm:$0x1] }
 0x11b   : > { %v3677_v23 = vrot.slane %v3676_v42, 4  ;;  %v3707_v26 = vshrl.u32 %v3415_v52, 16  ;;  %v3699_v33 = vrot.slane %v3697_v36, 5  ;;  %v3713_v49 = vshll.u32 %v3416_v14, 16  ;;  %v14632_v56 = vpop.f32.mrf.mxu1  ;;  %v14634_v52 = vpop.f32.mrf.mxu0  ;;  %v4145_v35 = vld [vmem:[#allocation2 + $0xe4] sm:$0xf] }
 0x11c   : > { %v3705_v44 = vrot.slane %v3703_v45, 5  ;;  %v11958_v27 = vcombine.low %v14370_v19, %v14374_v30  ;;  %v3687_v0 = vrot.slane %v3686_v7, 4  ;;  %v3718_v57 = vshrl.u32 %v3417_v50, 16  ;;  %18315 = vst [vmem:[#allocation29_spill] sm:$0xff] %v14632_v56  ;;  %18316 = vst [vmem:[#allocation30_spill] sm:$0xff] %v14634_v52 }
 0x11d   : > { %v3682_v63 = vsel %vm14157_vm13, %v3677_v23, %v3681_v48  ;;  %v3709_v22 = vrot.slane %v3707_v26, 4  ;;  %v3700_v42 = vor.u32 %v3699_v33, %v3696_v4  ;;  %v3715_v8 = vrot.slane %v3713_v49, 5  ;;  %v3420_v45 = vld [vmem:[#allocation2 + $0xe4] sm:$0xf]  ;;  %v14639_v23 = vpop.f32.mrf.mxu1  ;;  %v14641_v7 = vpop.f32.mrf.mxu0  ;;  %v3421_v33 = vld [vmem:[#allocation2 + $0xe8] sm:$0xf] }
 0x11e   : > { %v3721_v21 = vshll.u32 %v3417_v50, 16  ;;  %v3727_v36 = vshll.u32 %v3418_v2, 16  ;;  %13066 = vmatmul.mubr.msk.bf16.gmra.mxu1 %vm1158_vm7, %v11987_v15  ;;  %v3692_v19 = vsel %vm14157_vm13, %v3687_v0, %v3691_v62  ;;  %v3720_v14 = vrot.slane %v3718_v57, 4  ;;  %18317 = vst [vmem:[#allocation31_spill] sm:$0xff] %v14639_v23  ;;  %18318 = vst [vmem:[#allocation32_spill] sm:$0xff] %v14641_v7 }
 0x11f   : > { %v3710_v30 = vor.u32 %v3709_v22, %v3705_v44  ;;  %v3731_v48 = vshrl.u32 %v3418_v2, 16  ;;  %v11988_v26 = vcombine.low %v3682_v63, %v3692_v19  ;;  %v3701_v52 = vrot.slane %v3700_v42, 4  ;;  %v14646_v0 = vpop.f32.mrf.mxu1  ;;  %v14648_v2 = vpop.f32.mrf.mxu0  ;;  %v3422_v22 = vld [vmem:[#allocation2 + $0xec] sm:$0x1]  ;;  %v4140_v56 = vld [vmem:[#allocation2 + $0xc8] sm:$0xf] }
 0x120   : > { %v3723_v4 = vrot.slane %v3721_v21, 5  ;;  %v3729_v49 = vrot.slane %v3727_v36, 5  ;;  %v3737_v51 = vshll.u32 %v3419_v13, 16  ;;  %v11959_v62 = vcombine.low %v14390_v58, %v14394_v20  ;;  %18319 = vst [vmem:[#allocation33_spill] sm:$0xff] %v14646_v0  ;;  %18320 = vst [vmem:[#allocation34_spill] sm:$0xff] %v14648_v2 }
 0x121   : > { %v3711_v50 = vrot.slane %v3710_v30, 4  ;;  %13040 = vmatmul.mubr.msk.bf16.gmra.mxu0 %vm1158_vm7, %v11958_v27  ;;  %v3733_v15 = vrot.slane %v3731_v48, 4  ;;  %13069 = vmatprep.mubr.msk.bf16.mxu1 %vm1158_vm7, %v11988_v26  ;;  %v3706_v63 = vsel %vm14157_vm13, %v3701_v52, %v3705_v44  ;;  %v3742_v57 = vshrl.u32 %v3420_v45, 16  ;;  %v3423_v20 = vld [vmem:[#allocation2 + $0xf4] sm:$0xf]  ;;  %v14656_v19 = vpop.f32.mrf.mxu1  ;;  %v14658_v30 = vpop.f32.mrf.mxu0 }
 0x122   : > { %v3724_v21 = vor.u32 %v3723_v4, %v3720_v14  ;;  %v3745_v42 = vshll.u32 %v3420_v45, 16  ;;  %v3739_v36 = vrot.slane %v3737_v51, 5  ;;  %13043 = vmatprep.mubr.msk.bf16.mxu0 %vm1158_vm7, %v11959_v62  ;;  %v3751_v58 = vshll.u32 %v3421_v33, 16  ;;  %18321 = vst [vmem:[#allocation35_spill] sm:$0xff] %v14656_v19  ;;  %18322 = vst [vmem:[#allocation36_spill] sm:$0xff] %v14658_v30 }
 0x123   : > { %v3716_v27 = vsel %vm14157_vm13, %v3711_v50, %v3715_v8  ;;  %v3734_v13 = vor.u32 %v3733_v15, %v3729_v49  ;;  %v3744_v44 = vrot.slane %v3742_v57, 4  ;;  %v3755_v45 = vshrl.u32 %v3421_v33, 16  ;;  %v3424_v2 = vld [vmem:[#allocation2 + $0xf8] sm:$0xf]  ;;  %v14660_v8 = vpop.f32.mrf.mxu1  ;;  %v14662_v51 = vpop.f32.mrf.mxu0  ;;  %v3427_v30 = vld [vmem:[#allocation2 + $0x108] sm:$0xf] }
 0x124   : > { %v11989_v48 = vcombine.low %v3706_v63, %v3716_v27  ;;  %v3725_v26 = vrot.slane %v3724_v21, 4  ;;  %v3747_v52 = vrot.slane %v3745_v42, 5  ;;  %v3753_v4 = vrot.slane %v3751_v58, 5  ;;  %18323 = vst [vmem:[#allocation37_spill] sm:$0xff] %v14660_v8  ;;  %18324 = vst [vmem:[#allocation38_spill] sm:$0xff] %v14662_v51 }
 0x125   : > { %v3735_v14 = vrot.slane %v3734_v13, 4  ;;  %v3761_v23 = vshll.u32 %v3422_v22, 16  ;;  %v11960_v62 = vcombine.low %v14442_v47, %v14446_v18  ;;  %v3425_v63 = vld [vmem:[#allocation2 + $0xfc] sm:$0x1]  ;;  %v3766_v21 = vshrl.u32 %v3423_v20, 16  ;;  %v14671_v13 = vpop.f32.mrf.mxu1 }
 0x126   : > { %v3730_v50 = vsel %vm14157_vm13, %v3725_v26, %v3729_v49  ;;  %v3748_v15 = vor.u32 %v3747_v52, %v3744_v44  ;;  %13070 = vmatmul.mubr.msk.bf16.gmra.mxu1 %vm1158_vm7, %v11989_v48  ;;  %v3757_v22 = vrot.slane %v3755_v45, 4  ;;  %v3769_v42 = vshll.u32 %v3423_v20, 16  ;;  %v348_v27 = vld [vmem:[#allocation2 + $0x10c] sm:$0x1]  ;;  %18325 = vst [vmem:[#allocation39_spill] sm:$0xff] %v14671_v13 }
 0x127   : > { %v3740_v33 = vsel %vm14157_vm13, %v3735_v14, %v3739_v36  ;;  %v3763_v57 = vrot.slane %v3761_v23, 5  ;;  %v3768_v49 = vrot.slane %v3766_v21, 4  ;;  %v3775_v26 = vshll.u32 %v3424_v2, 16  ;;  %v3426_v44 = vld [vmem:[#allocation2 + $0x104] sm:$0xf]  ;;  %v14674_v7 = vpop.f32.mrf.mxu1  ;;  %v14676_v36 = vpop.f32.mrf.mxu0 }
 0x128   : > { %v11990_v58 = vcombine.low %v3730_v50, %v3740_v33  ;;  %v3749_v51 = vrot.slane %v3748_v15, 4  ;;  %v3758_v52 = vor.u32 %v3757_v22, %v3753_v4  ;;  %v3771_v47 = vrot.slane %v3769_v42, 5  ;;  %18326 = vst [vmem:[#allocation40_spill] sm:$0xff] %v14674_v7  ;;  %18327 = vst [vmem:[#allocation41_spill] sm:$0xff] %v14676_v36  ;;  %v4108_v50 = vld [vmem:[#allocation2 + $0x20] sm:$0x8] }
 0x129   : > { %13044 = vmatmul.mubr.msk.bf16.gmra.mxu0 %vm1158_vm7, %v11960_v62  ;;  %v3779_v18 = vshrl.u32 %v3424_v2, 16  ;;  %v3785_v48 = vshll.u32 %v3425_v63, 16  ;;  %v3777_v20 = vrot.slane %v3775_v26, 5  ;;  %v4933_v14 = vsel %vm1207_vm0, %v14407_v40, 0  ;;  %v14685_v21 = vpop.f32.mrf.mxu1  ;;  %v14689_v26 = vld [vmem:[#allocation2 + $0x24] sm:$0xf] }
 0x12a   : > { %13073 = vmatprep.mubr.msk.bf16.mxu1 %vm1158_vm7, %v11990_v58  ;;  %v3754_v23 = vsel %vm14157_vm13, %v3749_v51, %v3753_v4  ;;  %v349_v45 = vsel %vm14053_vm10, 0, %v348_v27  ;;  %v3759_v2 = vrot.slane %v3758_v52, 4  ;;  %v3772_v15 = vor.u32 %v3771_v47, %v3768_v49  ;;  %13116 = vmatpush3.bf16.msra.mxu1 %v4933_v14  ;;  %18328 = vst [vmem:[#allocation42_spill] sm:$0xff] %v14685_v21  ;;  %v14691_v27 = vld [vmem:[#allocation2 + $0x28] sm:$0xf]  ;;  %v14693_v52 = vpop.f32.mrf.mxu0 }
 0x12b   : > { %v3781_v62 = vrot.slane %v3779_v18, 4  ;;  %v3787_v63 = vrot.slane %v3785_v48, 5  ;;  %350 = vst [vmem:[#allocation2 + $0x10c] sm:$0x1] %v349_v45  ;;  %v3790_v33 = vshrl.u32 %v3426_v44, 16  ;;  %v3793_v22 = vshll.u32 %v3426_v44, 16 }
 0x12c   : > { %v3799_v42 = vshll.u32 %v3427_v30, 16  ;;  %v3803_v4 = vshrl.u32 %v3427_v30, 16  ;;  %v3764_v51 = vsel %vm14157_vm13, %v3759_v2, %v3763_v57  ;;  %v3773_v40 = vrot.slane %v3772_v15, 4  ;;  %18329 = vst [vmem:[#allocation43_spill] sm:$0xff] %v14693_v52  ;;  %v4111_v45 = vld [vmem:[#allocation2 + $0x30] sm:$0x8]  ;;  %v14697_v2 = vpop.f32.mrf.mxu1 }
 0x12d   : > { %v3782_v58 = vor.u32 %v3781_v62, %v3777_v20  ;;  %v4157_v49 = vshrl.u32 %v4108_v50, 16  ;;  %v11991_v47 = vcombine.low %v3754_v23, %v3764_v51  ;;  %v3792_v18 = vrot.slane %v3790_v33, 4  ;;  %18330 = vst [vmem:[#allocation44_spill] sm:$0xff] %v14697_v2  ;;  %v14703_v33 = vld [vmem:[#allocation2 + $0x34] sm:$0xf] }
 0x12e   : > { %v3795_v48 = vrot.slane %v3793_v22, 5  ;;  %v3801_v14 = vrot.slane %v3799_v42, 5  ;;  %v3778_v30 = vsel %vm14157_vm13, %v3773_v40, %v3777_v20  ;;  %v3805_v13 = vrot.slane %v3803_v4, 4  ;;  %v14708_v4 = vld [vmem:[#allocation2 + $0x38] sm:$0xf]  ;;  %v14710_v40 = vpop.f32.mrf.mxu0  ;;  %v14713_v21 = vpop.f32.mrf.mxu1 }
 0x12f   : > { %v3783_v44 = vrot.slane %v3782_v58, 4  ;;  %v12010_v57 = vrot.slane %v4157_v49, 11  ;;  %13074 = vmatmul.mubr.msk.bf16.gmra.mxu1 %vm1158_vm7, %v11991_v47  ;;  %v4162_v50 = vshrl.u32 %v14689_v26, 16  ;;  %v4165_v62 = vshll.u32 %v14689_v26, 16  ;;  %18331 = vst [vmem:[#allocation45_spill] sm:$0xff] %v14710_v40  ;;  %18332 = vst [vmem:[#allocation46_spill] sm:$0xff] %v14713_v21 }
 0x130   : > { %v3796_v15 = vor.u32 %v3795_v48, %v3792_v18  ;;  %v4171_v23 = vshrl.u32 %v14691_v27, 16  ;;  %v3806_v20 = vor.u32 %v3805_v13, %v3801_v14  ;;  %v4174_v42 = vshll.u32 %v14691_v27, 16  ;;  %v4128_v8 = vld [vmem:[#allocation2 + $0x88] sm:$0xf] }
 0x131   : > { %v3788_v22 = vsel %vm14157_vm13, %v3783_v44, %v3787_v63  ;;  %v4179_v51 = vshrl.u32 %v4111_v45, 16  ;;  %v4164_v18 = vrot.slane %v4162_v50, 7  ;;  %v4184_v36 = vshrl.u32 %v14703_v33, 16  ;;  %v4134_v19 = vld [vmem:[#allocation2 + $0xa8] sm:$0xf] }
 0x132   : > { %v11992_v58 = vcombine.low %v3778_v30, %v3788_v22  ;;  %v3428_v49 = vld [vmem:[#allocation2 + $0x10c] sm:$0x1]  ;;  %v3797_v47 = vrot.slane %v3796_v15, 4  ;;  %v4173_v48 = vrot.slane %v4171_v23, 7  ;;  %v3807_v52 = vrot.slane %v3806_v20, 4  ;;  %v14720_v23 = vpop.f32.mrf.mxu0 }
 0x133   : > { %v3809_v10 = vshll.u32 %v3428_v49, 16  ;;  %v12011_v2 = vrot.slane %v4179_v51, 11  ;;  %v4167_v63 = vor.u32 %v4165_v62, %v4164_v18  ;;  %v4169_v45 = vrot.slane %v4164_v18, 4  ;;  %18333 = vst [vmem:[#allocation47_spill] sm:$0xff] %v14720_v23  ;;  %v14727_v62 = vld [vmem:[#allocation2 + $0x44] sm:$0xf]  ;;  %v14735_v18 = vpop.f32.mrf.mxu1 }
 0x134   : > { %13077 = vmatprep.mubr.msk.bf16.mxu1 %vm1158_vm7, %v11992_v58  ;;  %v3802_v13 = vsel %vm14157_vm13, %v3797_v47, %v3801_v14  ;;  %v4176_v44 = vor.u32 %v4174_v42, %v4173_v48  ;;  %v4186_v22 = vrot.slane %v4184_v36, 7  ;;  %v4187_v15 = vshll.u32 %v14703_v33, 16  ;;  %v4114_v14 = vld [vmem:[#allocation2 + $0x40] sm:$0x8]  ;;  %v14733_v47 = vld [vmem:[#allocation2 + $0x48] sm:$0xf] }
 0x135   : > { %v3811_v30 = vrot.slane %v3809_v10, 5  ;;  %v4193_v50 = vshrl.u32 %v14708_v4, 16  ;;  %v4168_v20 = vsel %vm13892_vm8, %v12010_v57, %v4167_v63  ;;  %v4196_v58 = vshll.u32 %v14708_v4, 16  ;;  %18334 = vst [vmem:[#allocation48_spill] sm:$0xff] %v14735_v18  ;;  %v14739_v23 = vld [vmem:[#allocation2 + $0x54] sm:$0xf] }
 0x136   : > { %v4177_v51 = vsel %vm13892_vm8, %v4169_v45, %v4176_v44  ;;  %v4189_v42 = vor.u32 %v4187_v15, %v4186_v22  ;;  %v5659_v49 = vsel %vm1207_vm0, %v14464_v28, 0  ;;  %v4191_v48 = vrot.slane %v4186_v22, 4  ;;  %v4117_v44 = vld [vmem:[#allocation2 + $0x50] sm:$0x8] }
 0x137   : > { %v3812_v10 = vsel %vm14157_vm13, %v3807_v52, %v3811_v30  ;;  %v12027_v36 = vcombine.low %v4168_v20, %v4177_v51  ;;  %v4195_v63 = vrot.slane %v4193_v50, 7  ;;  %v12060_v45 = vcombine.low %v14689_v26, %v14691_v27  ;;  %v14746_v20 = vld [vmem:[#allocation2 + $0x58] sm:$0xf] }
 0x138   : > { %v11993_v57 = vcombine.low %v3802_v13, %v3812_v10  ;;  %v4190_v52 = vsel %vm13892_vm8, %v12011_v2, %v4189_v42  ;;  %v4201_v30 = vshrl.u32 %v4114_v14, 16  ;;  %v4206_v28 = vshrl.u32 %v14727_v62, 16 }
 0x139   : > { %13083 = vmatprep.mubr.msk.bf16.mxu0 %vm1158_vm7, %v12027_v36  ;;  %v4209_v15 = vshll.u32 %v14727_v62, 16  ;;  %v14748_v13 = vpop.f32.mrf.mxu0  ;;  %v4198_v26 = vor.u32 %v4196_v58, %v4195_v63  ;;  %v4215_v27 = vshrl.u32 %v14733_v47, 16  ;;  %v4218_v22 = vshll.u32 %v14733_v47, 16  ;;  %v14757_v36 = vpop.f32.mrf.mxu1 }
 0x13a   : > { %13078 = vmatmul.mubr.msk.bf16.gmra.mxu1 %vm1158_vm7, %v11993_v57  ;;  %v12061_v50 = vcombine.low %v14703_v33, %v14708_v4  ;;  %v12012_v2 = vrot.slane %v4201_v30, 11  ;;  %v4208_v51 = vrot.slane %v4206_v28, 7  ;;  %v4223_v14 = vshrl.u32 %v4117_v44, 16  ;;  %18335 = vst [vmem:[#allocation49_spill] sm:$0xff] %v14757_v36  ;;  %v4120_v36 = vld [vmem:[#allocation2 + $0x60] sm:$0x8] }
 0x13b   : > { %13117 = vmatprep.mubr.msk.bf16.mxu1 %vm1158_vm7, %v12060_v45  ;;  %v4228_v10 = vshrl.u32 %v14739_v23, 16  ;;  %v4199_v42 = vsel %vm13892_vm8, %v4191_v48, %v4198_v26  ;;  %v4217_v58 = vrot.slane %v4215_v27, 7  ;;  %v4231_v57 = vshll.u32 %v14739_v23, 16  ;;  %v14763_v45 = vpop.f32.mrf.mxu0  ;;  %v14769_v26 = vld [vmem:[#allocation2 + $0x64] sm:$0xf]  ;;  %v14771_v27 = vpop.f32.mrf.mxu1 }
 0x13c   : > { %v4237_v63 = vshrl.u32 %v14746_v20, 16  ;;  %v12028_v21 = vcombine.low %v4190_v52, %v4199_v42  ;;  %v4211_v40 = vor.u32 %v4209_v15, %v4208_v51  ;;  %v4213_v33 = vrot.slane %v4208_v51, 4  ;;  %18336 = vst [vmem:[#allocation50_spill] sm:$0xff] %v14771_v27 }
 0x13d   : > { %v12013_v4 = vrot.slane %v4223_v14, 11  ;;  %v4220_v30 = vor.u32 %v4218_v22, %v4217_v58  ;;  %v4230_v44 = vrot.slane %v4228_v10, 7  ;;  %v4240_v18 = vshll.u32 %v14746_v20, 16  ;;  %v4122_v14 = vld [vmem:[#allocation2 + $0x68] sm:$0xf] }
 0x13e   : > { %v4239_v28 = vrot.slane %v4237_v63, 7  ;;  %13084 = vmatmul.mubr.msk.bf16.vlgmr.msra.gmra.mxu0 %vm1158_vm7, %v12028_v21  ;;  %v4212_v48 = vsel %vm13892_vm8, %v12012_v2, %v4211_v40  ;;  %v12062_v42 = vcombine.low %v14727_v62, %v14733_v47  ;;  %v4245_v21 = vshrl.u32 %v4120_v36, 16  ;;  %v4123_v58 = vld [vmem:[#allocation2 + $0x70] sm:$0x8]  ;;  %v14777_v63 = vld [vmem:[#allocation2 + $0x74] sm:$0xf]  ;;  %v14779_v40 = vpop.f32.mrf.mxu0 }
 0x13f   : > { %13150 = vmatpush3.bf16.msra.mxu0 %v5659_v49  ;;  %v4221_v52 = vsel %vm13892_vm8, %v4213_v33, %v4220_v30  ;;  %v4233_v15 = vor.u32 %v4231_v57, %v4230_v44  ;;  %v4235_v22 = vrot.slane %v4230_v44, 4  ;;  %v4253_v57 = vshll.u32 %v14769_v26, 16  ;;  %v14788_v33 = vld [vmem:[#allocation2 + $0x78] sm:$0xf]  ;;  %v14792_v30 = vpop.f32.mrf.mxu1 }
 0x140   : > { %v4242_v51 = vor.u32 %v4240_v18, %v4239_v28  ;;  %v12029_v10 = vcombine.low %v4212_v48, %v4221_v52  ;;  %v4250_v18 = vshrl.u32 %v14769_v26, 16  ;;  %v12014_v47 = vrot.slane %v4245_v21, 11  ;;  %18337 = vst [vmem:[#allocation51_spill] sm:$0xff] %v14792_v30 }
 0x141   : > { %v4234_v49 = vsel %vm13892_vm8, %v12013_v4, %v4233_v15  ;;  %v4259_v36 = vshrl.u32 %v4122_v14, 16  ;;  %v12063_v44 = vcombine.low %v14739_v23, %v14746_v20  ;;  %v4267_v28 = vshrl.u32 %v4123_v58, 16  ;;  %v4126_v20 = vld [vmem:[#allocation2 + $0x80] sm:$0x8]  ;;  %v4127_v58 = vld [vmem:[#allocation2 + $0x84] sm:$0xf]  ;;  %v14803_v30 = vpop.f32.mrf.mxu1 }
 0x142   : > { %13118 = vmatmul.mubr.msk.bf16.vlgmr.msra.gmra.mxu1 %vm1158_vm7, %v12061_v50  ;;  %v4243_v2 = vsel %vm13892_vm8, %v4235_v22, %v4242_v51  ;;  %13087 = vmatprep.mubr.msk.bf16.mxu0 %vm1158_vm7, %v12029_v10  ;;  %v4262_v50 = vshll.u32 %v4122_v14, 16  ;;  %v4252_v4 = vrot.slane %v4250_v18, 7  ;;  %v4272_v48 = vshrl.u32 %v14777_v63, 16  ;;  %v14800_v10 = vpop.f32.mrf.mxu0 }
 0x143   : > { %v12030_v62 = vcombine.low %v4234_v49, %v4243_v2  ;;  %13121 = vmatprep.mubr.msk.bf16.mxu1 %vm1158_vm7, %v12062_v42  ;;  %v4261_v52 = vrot.slane %v4259_v36, 7  ;;  %v4275_v15 = vshll.u32 %v14777_v63, 16  ;;  %v4281_v22 = vshrl.u32 %v14788_v33, 16  ;;  %18338 = vst [vmem:[#allocation52_spill] sm:$0xff] %v14800_v10 }
 0x144   : > { %v4284_v51 = vshll.u32 %v14788_v33, 16  ;;  %v4255_v42 = vor.u32 %v4253_v57, %v4252_v4  ;;  %v4257_v21 = vrot.slane %v4252_v4, 4  ;;  %v12015_v49 = vrot.slane %v4267_v28, 11 }
 0x145   : > { %v4274_v2 = vrot.slane %v4272_v48, 7  ;;  %v4264_v18 = vor.u32 %v4262_v50, %v4261_v52  ;;  %v4283_v23 = vrot.slane %v4281_v22, 7  ;;  %v12064_v28 = vcombine.low %v14769_v26, %v4122_v14 }
 0x146   : > { %13088 = vmatmul.mubr.msk.bf16.gmra.mxu0 %vm1158_vm7, %v12030_v62  ;;  %v4256_v36 = vsel %vm13892_vm8, %v12014_v47, %v4255_v42  ;;  %v4289_v52 = vshrl.u32 %v4126_v20, 16  ;;  %v4294_v22 = vshrl.u32 %v4127_v58, 16  ;;  %v4129_v47 = vld [vmem:[#allocation2 + $0x90] sm:$0x8]  ;;  %v4303_v26 = vshrl.u32 %v4128_v8, 16 }
 0x147   : > { %v4277_v27 = vor.u32 %v4275_v15, %v4274_v2  ;;  %v4279_v7 = vrot.slane %v4274_v2, 4  ;;  %v4265_v57 = vsel %vm13892_vm8, %v4257_v21, %v4264_v18  ;;  %v4286_v4 = vor.u32 %v4284_v51, %v4283_v23  ;;  %v14815_v15 = vld [vmem:[#allocation2 + $0x94] sm:$0xf]  ;;  %v14820_v21 = vld [vmem:[#allocation2 + $0x98] sm:$0xf]  ;;  %v14822_v2 = vpop.f32.mrf.mxu1 }
 0x148   : > { %v12031_v62 = vcombine.low %v4256_v36, %v4265_v57  ;;  %v4297_v51 = vshll.u32 %v4127_v58, 16  ;;  %v4306_v14 = vshll.u32 %v4128_v8, 16  ;;  %v12065_v18 = vcombine.low %v14777_v63, %v14788_v33  ;;  %v4132_v63 = vld [vmem:[#allocation2 + $0xa0] sm:$0x8] }
 0x149   : > { %v14810_v48 = vpop.f32.mrf.mxu0  ;;  %v4278_v50 = vsel %vm13892_vm8, %v12015_v49, %v4277_v27  ;;  %v4287_v42 = vsel %vm13892_vm8, %v4279_v7, %v4286_v4  ;;  %v4296_v49 = vrot.slane %v4294_v22, 7  ;;  %v4305_v23 = vrot.slane %v4303_v26, 7  ;;  %v14834_v33 = vpop.f32.mrf.mxu1  ;;  %v4133_v26 = vld [vmem:[#allocation2 + $0xa4] sm:$0xf] }
 0x14a   : > { %13122 = vmatmul.mubr.msk.bf16.gmra.mxu1 %vm1158_vm7, %v12063_v44  ;;  %13091 = vmatprep.mubr.msk.bf16.mxu0 %vm1158_vm7, %v12031_v62  ;;  %v12032_v27 = vcombine.low %v4278_v50, %v4287_v42  ;;  %v12016_v44 = vrot.slane %v4289_v52, 11  ;;  %v4311_v20 = vshrl.u32 %v4129_v47, 16  ;;  %v4316_v7 = vshrl.u32 %v14815_v15, 16 }
 0x14b   : > { %13125 = vmatprep.mubr.msk.bf16.mxu1 %vm1158_vm7, %v12064_v28  ;;  %v4319_v36 = vshll.u32 %v14815_v15, 16  ;;  %v14829_v57 = vpop.f32.mrf.mxu0  ;;  %v4299_v4 = vor.u32 %v4297_v51, %v4296_v49  ;;  %v4301_v28 = vrot.slane %v4296_v49, 4  ;;  %v4325_v10 = vshrl.u32 %v14820_v21, 16 }
 0x14c   : > { %v4328_v62 = vshll.u32 %v14820_v21, 16  ;;  %v4308_v50 = vor.u32 %v4306_v14, %v4305_v23  ;;  %v12017_v52 = vrot.slane %v4311_v20, 11  ;;  %v4318_v22 = vrot.slane %v4316_v7, 7  ;;  %v4135_v20 = vld [vmem:[#allocation2 + $0xb0] sm:$0x8] }
 0x14d   : > { %v4300_v47 = vsel %vm13892_vm8, %v12016_v44, %v4299_v4  ;;  %v4327_v42 = vrot.slane %v4325_v10, 7  ;;  %v12066_v0 = vcombine.low %v4127_v58, %v4128_v8  ;;  %v14840_v3 = vpop.f32.mrf.mxu0  ;;  %v4333_v23 = vshrl.u32 %v4132_v63, 16  ;;  %v14843_v7 = vld [vmem:[#allocation2 + $0xb4] sm:$0xf]  ;;  %v14850_v8 = vpop.f32.mrf.mxu1 }
 0x14e   : > { %13092 = vmatmul.mubr.msk.bf16.gmra.mxu0 %vm1158_vm7, %v12032_v27  ;;  %v4309_v51 = vsel %vm13892_vm8, %v4301_v28, %v4308_v50  ;;  %v4321_v49 = vor.u32 %v4319_v36, %v4318_v22  ;;  %v4323_v29 = vrot.slane %v4318_v22, 4  ;;  %v4338_v44 = vshrl.u32 %v4133_v26, 16  ;;  %v14848_v28 = vld [vmem:[#allocation2 + $0xb8] sm:$0xf]  ;;  %18339 = vst [vmem:[#allocation53_spill] sm:$0xff] %v14850_v8 }
 0x14f   : > { %v12033_v14 = vcombine.low %v4300_v47, %v4309_v51  ;;  %v4330_v27 = vor.u32 %v4328_v62, %v4327_v42  ;;  %v4341_v4 = vshll.u32 %v4133_v26, 16  ;;  %v4347_v36 = vshrl.u32 %v4134_v19, 16  ;;  %v14857_v47 = vpop.f32.mrf.mxu0 }
 0x150   : > { %v4322_v10 = vsel %vm13892_vm8, %v12017_v52, %v4321_v49  ;;  %v4350_v62 = vshll.u32 %v4134_v19, 16  ;;  %v12067_v50 = vcombine.low %v14815_v15, %v14820_v21  ;;  %v4340_v22 = vrot.slane %v4338_v44, 7  ;;  %18340 = vst [vmem:[#allocation54_spill] sm:$0xff] %v14857_v47  ;;  %v14864_v15 = vld [vmem:[#allocation2 + $0xc4] sm:$0xf] }
 0x151   : > { %13095 = vmatprep.mubr.msk.bf16.mxu0 %vm1158_vm7, %v12033_v14  ;;  %v4331_v58 = vsel %vm13892_vm8, %v4323_v29, %v4330_v27  ;;  %v4355_v63 = vshrl.u32 %v4135_v20, 16  ;;  %v4360_v42 = vshrl.u32 %v14843_v7, 16  ;;  %v4363_v51 = vshll.u32 %v14843_v7, 16  ;;  %v14866_v21 = vpop.f32.mrf.mxu1 }
 0x152   : > { %13126 = vmatmul.mubr.msk.bf16.gmra.mxu1 %vm1158_vm7, %v12065_v18  ;;  %v12018_v18 = vrot.slane %v4333_v23, 11  ;;  %v12034_v52 = vcombine.low %v4322_v10, %v4331_v58  ;;  %v4369_v49 = vshrl.u32 %v14848_v28, 16  ;;  %v4372_v14 = vshll.u32 %v14848_v28, 16 }
 0x153   : > { %13129 = vmatprep.mubr.msk.bf16.mxu1 %vm1158_vm7, %v12066_v0  ;;  %v4349_v0 = vrot.slane %v4347_v36, 7  ;;  %v4343_v29 = vor.u32 %v4341_v4, %v4340_v22  ;;  %v4345_v27 = vrot.slane %v4340_v22, 4  ;;  %v12019_v20 = vrot.slane %v4355_v63, 11  ;;  %v4138_v36 = vld [vmem:[#allocation2 + $0xc0] sm:$0x8] }
 0x154   : > { %v4362_v10 = vrot.slane %v4360_v42, 7  ;;  %v4371_v44 = vrot.slane %v4369_v49, 7  ;;  %v12068_v8 = vcombine.low %v4133_v26, %v4134_v19  ;;  %v14875_v63 = vld [vmem:[#allocation2 + $0xd4] sm:$0xf]  ;;  %v4377_v42 = vshrl.u32 %v4138_v36, 16  ;;  %v14880_v19 = vpop.f32.mrf.mxu1 }
 0x155   : > { %v4352_v23 = vor.u32 %v4350_v62, %v4349_v0  ;;  %v4344_v58 = vsel %vm13892_vm8, %v12018_v18, %v4343_v29  ;;  %v4382_v18 = vshrl.u32 %v14864_v15, 16  ;;  %v4385_v49 = vshll.u32 %v14864_v15, 16  ;;  %v4141_v29 = vld [vmem:[#allocation2 + $0xd0] sm:$0x8] }
 0x156   : > { %13096 = vmatmul.mubr.msk.bf16.gmra.mxu0 %vm1158_vm7, %v12034_v52  ;;  %v4365_v62 = vor.u32 %v4363_v51, %v4362_v10  ;;  %v4367_v22 = vrot.slane %v4362_v10, 4  ;;  %v4374_v0 = vor.u32 %v4372_v14, %v4371_v44  ;;  %v4394_v51 = vshll.u32 %v4140_v56, 16  ;;  %v14887_v14 = vld [vmem:[#allocation2 + $0xd8] sm:$0xf] }
 0x157   : > { %v4353_v47 = vsel %vm13892_vm8, %v4345_v27, %v4352_v23  ;;  %v12020_v27 = vrot.slane %v4377_v42, 11  ;;  %v4384_v23 = vrot.slane %v4382_v18, 7  ;;  %v12069_v10 = vcombine.low %v14843_v7, %v14848_v28  ;;  %v14898_v18 = vpop.f32.mrf.mxu1 }
 0x158   : > { %v12035_v4 = vcombine.low %v4344_v58, %v4353_v47  ;;  %v4366_v26 = vsel %vm13892_vm8, %v12019_v20, %v4365_v62  ;;  %v4391_v47 = vshrl.u32 %v4140_v56, 16  ;;  %v4399_v58 = vshrl.u32 %v4141_v29, 16 }
 0x159   : > { %v14872_v52 = vpop.f32.mrf.mxu0  ;;  %v4407_v20 = vshll.u32 %v14875_v63, 16  ;;  %v4387_v62 = vor.u32 %v4385_v49, %v4384_v23  ;;  %v4416_v42 = vshll.u32 %v14887_v14, 16  ;;  %v14976_v6 = vadd.f32 %v14496_v5, %v14466_v12 }
 0x15a   : > { %13130 = vmatmul.mubr.msk.bf16.gmra.mxu1 %vm1158_vm7, %v12067_v50  ;;  %13099 = vmatprep.mubr.msk.bf16.mxu0 %vm1158_vm7, %v12035_v4  ;;  %v4375_v50 = vsel %vm13892_vm8, %v4367_v22, %v4374_v0  ;;  %v4393_v36 = vrot.slane %v4391_v47, 7  ;;  %v4404_v4 = vshrl.u32 %v14875_v63, 16  ;;  %v4389_v22 = vrot.slane %v4384_v23, 4 }
 0x15b   : > { %13133 = vmatprep.mubr.msk.bf16.mxu1 %vm1158_vm7, %v12068_v8  ;;  %v12036_v8 = vcombine.low %v4366_v26, %v4375_v50  ;;  %v14891_v44 = vpop.f32.mrf.mxu0  ;;  %v4413_v0 = vshrl.u32 %v14887_v14, 16  ;;  %v12021_v7 = vrot.slane %v4399_v58, 11  ;;  %v4144_v50 = vld [vmem:[#allocation2 + $0xe0] sm:$0x8]  ;;  %v4388_v29 = vsel %vm13892_vm8, %v12020_v27, %v4387_v62  ;;  %v14910_v27 = vpop.f32.mrf.mxu1 }
 0x15c   : > { %18341 = vst [vmem:[#allocation55_spill] sm:$0xff] %v14891_v44  ;;  %v4396_v26 = vor.u32 %v4394_v51, %v4393_v36  ;;  %v4406_v28 = vrot.slane %v4404_v4, 7  ;;  %v12070_v51 = vcombine.low %v14864_v15, %v4140_v56  ;;  %v4421_v4 = vshrl.u32 %v4144_v50, 16  ;;  %v14908_v44 = vld [vmem:[#allocation2 + $0xf4] sm:$0xf]  ;;  %18342 = vst [vmem:[#allocation56_spill] sm:$0xff] %v14910_v27 }
 0x15d   : > { %v4415_v47 = vrot.slane %v4413_v0, 7  ;;  %v14902_v16 = vpop.f32.mrf.mxu0  ;;  %v4429_v0 = vshll.u32 %v4145_v35, 16  ;;  %v14987_v12 = vadd.f32 %v14513_v1, %v14490_v59  ;;  %v14991_v5 = vadd.f32 %v14519_v43, %v14494_v46 }
 0x15e   : > { %13100 = vmatmul.mubr.msk.bf16.gmra.mxu0 %vm1158_vm7, %v12036_v8  ;;  %v4397_v49 = vsel %vm13892_vm8, %v4389_v22, %v4396_v26  ;;  %v4409_v8 = vor.u32 %v4407_v20, %v4406_v28  ;;  %v4411_v23 = vrot.slane %v4406_v28, 4  ;;  %v4426_v22 = vshrl.u32 %v4145_v35, 16  ;;  %v14915_v20 = vld [vmem:[#allocation2 + $0xf8] sm:$0xf] }
 0x15f   : > { %v12037_v36 = vcombine.low %v4388_v29, %v4397_v49  ;;  %v4418_v58 = vor.u32 %v4416_v42, %v4415_v47  ;;  %v12022_v15 = vrot.slane %v4421_v4, 11  ;;  %v4438_v42 = vshll.u32 %v4146_v17, 16  ;;  %v14922_v28 = vpop.f32.mrf.mxu0  ;;  %v4150_v4 = vld [vmem:[#allocation2 + $0x100] sm:$0x8] }
 0x160   : > { %v4410_v62 = vsel %vm13892_vm8, %v12021_v7, %v4409_v8  ;;  %v12071_v26 = vcombine.low %v14875_v63, %v14887_v14  ;;  %18343 = vst [vmem:[#allocation57_spill] sm:$0xff] %v14922_v28  ;;  %v4428_v50 = vrot.slane %v4426_v22, 7  ;;  %v4443_v47 = vshrl.u32 %v4147_v25, 16  ;;  %v14931_v25 = vld [vmem:[#allocation2 + $0x104] sm:$0xf] }
 0x161   : > { %13103 = vmatprep.mubr.msk.bf16.mxu0 %vm1158_vm7, %v12037_v36  ;;  %v4419_v56 = vsel %vm13892_vm8, %v4411_v23, %v4418_v58  ;;  %v4448_v49 = vshrl.u32 %v14908_v44, 16  ;;  %v4451_v8 = vshll.u32 %v14908_v44, 16  ;;  %v4460_v36 = vshll.u32 %v14915_v20, 16  ;;  %v14928_v23 = vpop.f32.mrf.mxu1 }
 0x162   : > { %13134 = vmatmul.mubr.msk.bf16.gmra.mxu1 %vm1158_vm7, %v12069_v10  ;;  %v4435_v10 = vshrl.u32 %v4146_v17, 16  ;;  %v12038_v7 = vcombine.low %v4410_v62, %v4419_v56  ;;  %18344 = vst [vmem:[#allocation58_spill] sm:$0xff] %v14928_v23  ;;  %v4431_v58 = vor.u32 %v4429_v0, %v4428_v50  ;;  %v4433_v63 = vrot.slane %v4428_v50, 4  ;;  %v4152_v0 = vld [vmem:[#allocation2 + $0x108] sm:$0xf] }
 0x163   : > { %13137 = vmatprep.mubr.msk.bf16.mxu1 %vm1158_vm7, %v12070_v51  ;;  %v4457_v51 = vshrl.u32 %v14915_v20, 16  ;;  %v12023_v62 = vrot.slane %v4443_v47, 11  ;;  %v4450_v22 = vrot.slane %v4448_v49, 7  ;;  %v297_v49 = vld [vmem:[#allocation2 + $0x110] sm:$0x8]  ;;  %v4470_v23 = vshrl.u32 %v14931_v25, 16 }
 0x164   : > { %v4437_v29 = vrot.slane %v4435_v10, 7  ;;  %v4432_v27 = vsel %vm13892_vm8, %v12022_v15, %v4431_v58  ;;  %v4473_v15 = vshll.u32 %v14931_v25, 16  ;;  %v14945_v58 = vld [vmem:[#allocation2 + $0x114] sm:$0xf]  ;;  %vm6746_vm14 = vcmask 1041408  }
 0x165   : > { %v4459_v10 = vrot.slane %v4457_v51, 7  ;;  %v14940_v51 = vpop.f32.mrf.mxu1  ;;  %vm354_vm15 = vcmask 27648   ;;  %vm370_vm0 = vcmask 27651   ;;  %vm6697_vm2 = vcmask 31744  }
 0x166   : > { %13104 = vmatmul.mubr.msk.bf16.gmra.mxu0 %vm1158_vm7, %v12038_v7  ;;  %v4440_v14 = vor.u32 %v4438_v42, %v4437_v29  ;;  %v12072_v7 = vcombine.low %v4145_v35, %v4146_v17  ;;  %v4453_v42 = vor.u32 %v4451_v8, %v4450_v22  ;;  %v4455_v29 = vrot.slane %v4450_v22, 4  ;;  %vm15482_vm1 = vmand %vm370_vm0, %vm244_vm4 }
 0x167   : > { %v4462_v47 = vor.u32 %v4460_v36, %v4459_v10  ;;  %v14960_v22 = vadd.f32 %v14478_v24, %v14444_v61  ;;  %v298_v10 = vsel %vm13835_vm5, 0, %v297_v49  ;;  %v14972_v61 = vadd.f32 %v14492_v11, %v14454_v32  ;;  %v5129_v11 = vld [vmem:[#allocation2 + $0x28] sm:$0xf] }
 0x168   : > { %v4441_v28 = vsel %vm13892_vm8, %v4433_v63, %v4440_v14  ;;  %v4454_v17 = vsel %vm13892_vm8, %v12023_v62, %v4453_v42  ;;  %v4472_v14 = vrot.slane %v4470_v23, 7  ;;  %299 = vst [vmem:[#allocation2 + $0x110] sm:$0x8] %v298_v10  ;;  %v4495_v23 = vshll.u32 %v14945_v58, 16 }
 0x169   : > { %v14933_v56 = vpop.f32.mrf.mxu0  ;;  %v12039_v50 = vcombine.low %v4432_v27, %v4441_v28  ;;  %v4463_v35 = vsel %vm13892_vm8, %v4455_v29, %v4462_v47  ;;  %v4479_v27 = vshrl.u32 %v4152_v0, 16  ;;  %v14952_v28 = vld [vmem:[#allocation2 + $0x118] sm:$0xf]  ;;  %v5128_v29 = vld [vmem:[#allocation2 + $0x24] sm:$0xf]  ;;  %v12074_v32 = vcombine.low %v14931_v25, %v4152_v0 }
 0x16a   : > { %18345 = vst [vmem:[#allocation59_spill] sm:$0xff] %v14933_v56  ;;  %13138 = vmatmul.mubr.msk.bf16.gmra.mxu1 %vm1158_vm7, %v12071_v26  ;;  %v4465_v56 = vshrl.u32 %v4150_v4, 16  ;;  %v4482_v26 = vshll.u32 %v4152_v0, 16  ;;  %v12040_v36 = vcombine.low %v4454_v17, %v4463_v35  ;;  %v12073_v4 = vcombine.low %v14908_v44, %v14915_v20  ;;  %v5130_v35 = vld [vmem:[#allocation2 + $0x2c] sm:$0x1] }
 0x16b   : > { %13141 = vmatprep.mubr.msk.bf16.mxu1 %vm1158_vm7, %v12072_v7  ;;  %13107 = vmatprep.mubr.msk.bf16.mxu0 %vm1158_vm7, %v12039_v50  ;;  %v14954_v8 = vpop.f32.mrf.mxu0  ;;  %v4481_v62 = vrot.slane %v4479_v27, 7  ;;  %v4492_v7 = vshrl.u32 %v14945_v58, 16  ;;  %v14965_v50 = vpop.f32.mrf.mxu1  ;;  %v4475_v42 = vor.u32 %v4473_v15, %v4472_v14  ;;  %v4501_v44 = vshrl.u32 %v14952_v28, 16 }
 0x16c   : > { %v12024_v63 = vrot.slane %v4465_v56, 11  ;;  %v4477_v56 = vrot.slane %v4472_v14, 4  ;;  %v4504_v17 = vshll.u32 %v14952_v28, 16  ;;  %v14995_v27 = vadd.f32 %v14525_v39, %v14503_v54 }
 0x16d   : > { %v4484_v24 = vor.u32 %v4482_v26, %v4481_v62  ;;  %v4494_v20 = vrot.slane %v4492_v7, 7  ;;  %v14978_v47 = vpop.f32.mrf.mxu0  ;;  %v4503_v15 = vrot.slane %v4501_v44, 7  ;;  %v5177_v59 = vshrl.u32 %v5128_v29, 16  ;;  %v5132_v62 = vld [vmem:[#allocation2 + $0x38] sm:$0xf] }
 0x16e   : > { %13108 = vmatmul.mubr.msk.bf16.gmra.mxu0 %vm1158_vm7, %v12040_v36  ;;  %v4476_v49 = vsel %vm13892_vm8, %v12024_v63, %v4475_v42  ;;  %v5131_v36 = vld [vmem:[#allocation2 + $0x34] sm:$0xf]  ;;  %v14999_v63 = vpop.f32.mrf.mxu1  ;;  %v5180_v1 = vshll.u32 %v5128_v29, 16  ;;  %v5190_v46 = vshrl.u32 %v5129_v11, 16  ;;  %v5196_v43 = vshll.u32 %v5130_v35, 16 }
 0x16f   : > { %v4485_v26 = vsel %vm13892_vm8, %v4477_v56, %v4484_v24  ;;  %18346 = vst [vmem:[#allocation60_spill] sm:$0xff] %v14999_v63  ;;  %v4497_v0 = vor.u32 %v4495_v23, %v4494_v20  ;;  %v4499_v14 = vrot.slane %v4494_v20, 4  ;;  %v15002_v10 = vpop.f32.mrf.mxu0  ;;  %v4506_v54 = vor.u32 %v4504_v17, %v4503_v15  ;;  %v5133_v42 = vld [vmem:[#allocation2 + $0x3c] sm:$0x1]  ;;  %v4153_v23 = vld [vmem:[#allocation2 + $0x110] sm:$0x8] }
 0x170   : > { %v12041_v25 = vcombine.low %v4476_v49, %v4485_v26  ;;  %18347 = vst [vmem:[#allocation61_spill] sm:$0xff] %v15002_v10  ;;  %v12075_v39 = vcombine.low %v14945_v58, %v14952_v28  ;;  %v5179_v7 = vrot.slane %v5177_v59, 4  ;;  %v5201_v56 = vshrl.u32 %v5131_v36, 16 }
 0x171   : > { %v5182_v44 = vrot.slane %v5180_v1, 5  ;;  %v5192_v20 = vrot.slane %v5190_v46, 4  ;;  %v5198_v29 = vrot.slane %v5196_v43, 5  ;;  %v15007_v49 = vpop.f32.mrf.mxu1  ;;  %v5204_v35 = vshll.u32 %v5131_v36, 16 }
 0x172   : > { %13142 = vmatmul.mubr.msk.bf16.gmra.mxu1 %vm1158_vm7, %v12073_v4  ;;  %v5186_v4 = vshll.u32 %v5129_v11, 16  ;;  %13111 = vmatprep.mubr.msk.bf16.mxu0 %vm1158_vm7, %v12041_v25  ;;  %v5203_v11 = vrot.slane %v5201_v56, 4  ;;  %v5210_v26 = vshll.u32 %v5132_v62, 16  ;;  %v5214_v15 = vshrl.u32 %v5132_v62, 16 }
 0x173   : > { %13145 = vmatprep.mubr.msk.bf16.mxu1 %vm1158_vm7, %v12074_v32  ;;  %v4487_v32 = vshrl.u32 %v4153_v23, 16  ;;  %v5183_v63 = vor.u32 %v5182_v44, %v5179_v7  ;;  %v5220_v17 = vshll.u32 %v5133_v42, 16  ;;  %v4507_v28 = vsel %vm13892_vm8, %v4499_v14, %v4506_v54  ;;  %v15018_v56 = vpop.f32.mrf.mxu1 }
 0x174   : > { %v5188_v24 = vrot.slane %v5186_v4, 5  ;;  %v5206_v59 = vrot.slane %v5204_v35, 5  ;;  %v5212_v1 = vrot.slane %v5210_v26, 5  ;;  %v18348_v4 = vld [vmem:[#allocation10_spill] sm:$0xff]  ;;  %v5216_v7 = vrot.slane %v5214_v15, 4  ;;  %v18349_v35 = vld [vmem:[#allocation11_spill] sm:$0xff] }
 0x175   : > { %v12025_v58 = vrot.slane %v4487_v32, 11  ;;  %v15016_v46 = vadd.f32 %v14542_v31, %v18348_v4  ;;  %v5184_v36 = vrot.slane %v5183_v63, 4  ;;  %v2331_v42 = vadd.f32 %v14748_v13, %v14960_v22  ;;  %v18350_v26 = vld [vmem:[#allocation12_spill] sm:$0xff] }
 0x176   : > { %v5193_v25 = vor.u32 %v5192_v20, %v5188_v24  ;;  %v5207_v14 = vor.u32 %v5206_v59, %v5203_v11  ;;  %v5222_v54 = vrot.slane %v5220_v17, 5  ;;  %v5217_v63 = vor.u32 %v5216_v7, %v5212_v1  ;;  %v5135_v20 = vld [vmem:[#allocation2 + $0x48] sm:$0xf]  ;;  %v5139_v7 = vld [vmem:[#allocation2 + $0x5c] sm:$0x1] }
 0x177   : > { %v4498_v62 = vsel %vm13892_vm8, %v12025_v58, %v4497_v0  ;;  %v5189_v44 = vsel %vm14157_vm13, %v5184_v36, %v5188_v24  ;;  %v15032_v0 = vadd.f32 %v14548_v53, %v18349_v35  ;;  %v15036_v13 = vadd.f32 %v14563_v38, %v18350_v26  ;;  %v5137_v58 = vld [vmem:[#allocation2 + $0x54] sm:$0xf]  ;;  %v15044_v53 = vpop.f32.mrf.mxu1  ;;  %v5138_v36 = vld [vmem:[#allocation2 + $0x58] sm:$0xf] }
 0x178   : > { %v5194_v43 = vrot.slane %v5193_v25, 4  ;;  %v12042_v23 = vcombine.low %v4498_v62, %v4507_v28  ;;  %v5208_v11 = vrot.slane %v5207_v14, 4  ;;  %v5136_v25 = vld [vmem:[#allocation2 + $0x4c] sm:$0x1]  ;;  %v5218_v24 = vrot.slane %v5217_v63, 4 }
 0x179   : > { %v15009_v10 = vpop.f32.mrf.mxu0  ;;  %v15042_v15 = vadd.f32 %v14803_v30, %v2331_v42  ;;  %v5234_v59 = vshll.u32 %v5135_v20, 16  ;;  %v5238_v4 = vshrl.u32 %v5135_v20, 16  ;;  %v5258_v63 = vshll.u32 %v5138_v36, 16  ;;  %v15055_v20 = vpop.f32.mrf.mxu1 }
 0x17a   : > { %13146 = vmatmul.mubr.msk.bf16.gmra.mxu1 %vm1158_vm7, %v12075_v39  ;;  %v5134_v39 = vld [vmem:[#allocation2 + $0x44] sm:$0xf]  ;;  %v5199_v31 = vsel %vm14157_vm13, %v5194_v43, %v5198_v29  ;;  %13112 = vmatmul.mubr.msk.bf16.gmra.mxu0 %vm1158_vm7, %v12042_v23  ;;  %v2329_v29 = vadd.f32 %v14763_v45, %v14972_v61  ;;  %v5213_v38 = vsel %vm14157_vm13, %v5208_v11, %v5212_v1  ;;  %v5244_v61 = vshll.u32 %v5136_v25, 16 }
 0x17b   : > { %v15028_v32 = vpop.f32.mrf.mxu0  ;;  %v12093_v22 = vcombine.low %v5189_v44, %v5199_v31  ;;  %v5225_v17 = vshrl.u32 %v5134_v39, 16  ;;  %v5228_v28 = vshll.u32 %v5134_v39, 16  ;;  %v5223_v43 = vsel %vm14157_vm13, %v5218_v24, %v5222_v54  ;;  %18351 = vst [vmem:[#allocation10_spill] sm:$0xff] %v15055_v20 }
 0x17c   : > { %v2332_v45 = vadd.f32 %v14779_v40, %v14976_v6  ;;  %v12094_v42 = vcombine.low %v5213_v38, %v5223_v43  ;;  %v5236_v23 = vrot.slane %v5234_v59, 5  ;;  %v5240_v44 = vrot.slane %v5238_v4, 4  ;;  %v18353_v59 = vld [vmem:[#allocation15_spill] sm:$0xff]  ;;  %v5140_v43 = vld [vmem:[#allocation2 + $0x64] sm:$0xf] }
 0x17d   : > { %13151 = vmatprep.mubr.msk.bf16.mxu0 %vm1158_vm7, %v12093_v22  ;;  %v5227_v30 = vrot.slane %v5225_v17, 4  ;;  %v15053_v62 = vpop.f32.mrf.mxu0  ;;  %v5230_v14 = vrot.slane %v5228_v28, 5  ;;  %v5246_v1 = vrot.slane %v5244_v61, 5  ;;  %v5249_v39 = vshrl.u32 %v5137_v58, 16 }
 0x17e   : > { %v5252_v31 = vshll.u32 %v5137_v58, 16  ;;  %v5241_v54 = vor.u32 %v5240_v44, %v5236_v23  ;;  %v5262_v26 = vshrl.u32 %v5138_v36, 16  ;;  %v5268_v22 = vshll.u32 %v5139_v7, 16 }
 0x17f   : > { %v5231_v35 = vor.u32 %v5230_v14, %v5227_v30  ;;  %v5251_v40 = vrot.slane %v5249_v39, 4  ;;  %v5260_v11 = vrot.slane %v5258_v63, 5  ;;  %v15058_v25 = vadd.f32 %v14822_v2, %v2329_v29  ;;  %v15060_v24 = vpop.f32.mrf.mxu0  ;;  %v5141_v30 = vld [vmem:[#allocation2 + $0x68] sm:$0xf]  ;;  %v5143_v63 = vld [vmem:[#allocation2 + $0x74] sm:$0xf] }
 0x180   : > { %v5254_v6 = vrot.slane %v5252_v31, 5  ;;  %18352 = vst [vmem:[#allocation11_spill] sm:$0xff] %v15060_v24  ;;  %v15064_v17 = vadd.f32 %v14587_v34, %v14546_v55  ;;  %v5242_v38 = vrot.slane %v5241_v54, 4  ;;  %v5264_v28 = vrot.slane %v5262_v26, 4  ;;  %v240_v24 = vld [vmem:[#allocation2 + $0x11c] sm:$0x1] }
 0x181   : > { %v5232_v58 = vrot.slane %v5231_v35, 4  ;;  %v15068_v4 = vadd.f32 %v14594_v37, %v18353_v59  ;;  %v2335_v36 = vadd.f32 %v14810_v48, %v14987_v12  ;;  %v15074_v29 = vadd.f32 %v14834_v33, %v2332_v45  ;;  %v15076_v55 = vpop.f32.mrf.mxu1 }
 0x182   : > { %13152 = vmatmul.mubr.msk.bf16.vlgmr.msra.gmra.mxu0 %vm1158_vm7, %v12094_v42  ;;  %v5255_v2 = vor.u32 %v5254_v6, %v5251_v40  ;;  %v5247_v37 = vsel %vm14157_vm13, %v5242_v38, %v5246_v1  ;;  %v5265_v61 = vor.u32 %v5264_v28, %v5260_v11  ;;  %v5270_v7 = vrot.slane %v5268_v22, 5  ;;  %v5142_v42 = vld [vmem:[#allocation2 + $0x6c] sm:$0x1] }
 0x183   : > { %v5237_v34 = vsel %vm14157_vm13, %v5232_v58, %v5236_v23  ;;  %v2333_v48 = vadd.f32 %v14829_v57, %v14991_v5  ;;  %v15085_v33 = vadd.f32 %v14866_v21, %v2335_v36  ;;  %v5273_v39 = vshrl.u32 %v5140_v43, 16  ;;  %v5144_v5 = vld [vmem:[#allocation2 + $0x78] sm:$0xf]  ;;  %v15094_v21 = vpop.f32.mrf.mxu1  ;;  %v5145_v58 = vld [vmem:[#allocation2 + $0x7c] sm:$0x1] }
 0x184   : > { %v12095_v14 = vcombine.low %v5237_v34, %v5247_v37  ;;  %v5256_v44 = vrot.slane %v5255_v2, 4  ;;  %v5266_v45 = vrot.slane %v5265_v61, 4  ;;  %v5276_v31 = vshll.u32 %v5140_v43, 16 }
 0x185   : > { %v5282_v23 = vshll.u32 %v5141_v30, 16  ;;  %v2336_v35 = vadd.f32 %v14840_v3, %v14995_v27  ;;  %v5286_v54 = vshrl.u32 %v5141_v30, 16  ;;  %v5292_v57 = vshll.u32 %v5142_v42, 16 }
 0x186   : > { %13155 = vmatprep.mubr.msk.bf16.mxu0 %vm1158_vm7, %v12095_v14  ;;  %v5261_v1 = vsel %vm14157_vm13, %v5256_v44, %v5260_v11  ;;  %v5271_v26 = vsel %vm14157_vm13, %v5266_v45, %v5270_v7  ;;  %v5275_v22 = vrot.slane %v5273_v39, 4  ;;  %v5278_v40 = vrot.slane %v5276_v31, 5  ;;  %v15104_v7 = vpop.f32.mrf.mxu1  ;;  %v18354_v39 = vld [vmem:[#allocation16_spill] sm:$0xff] }
 0x187   : > { %v5284_v6 = vrot.slane %v5282_v23, 5  ;;  %v12096_v38 = vcombine.low %v5261_v1, %v5271_v26  ;;  %v5288_v28 = vrot.slane %v5286_v54, 4  ;;  %v5294_v59 = vrot.slane %v5292_v57, 5  ;;  %v5146_v54 = vld [vmem:[#allocation2 + $0x84] sm:$0xf] }
 0x188   : > { %v5297_v36 = vshrl.u32 %v5143_v63, 16  ;;  %v5279_v2 = vor.u32 %v5278_v40, %v5275_v22  ;;  %v5300_v3 = vshll.u32 %v5143_v63, 16  ;;  %v5306_v27 = vshll.u32 %v5144_v5, 16  ;;  %v5147_v22 = vld [vmem:[#allocation2 + $0x88] sm:$0xf] }
 0x189   : > { %v15087_v12 = vpop.f32.mrf.mxu0  ;;  %v5310_v43 = vshrl.u32 %v5144_v5, 16  ;;  %v5289_v30 = vor.u32 %v5288_v28, %v5284_v6  ;;  %v5316_v37 = vshll.u32 %v5145_v58, 16  ;;  %v15102_v61 = vadd.f32 %v14880_v19, %v2333_v48  ;;  %v5148_v40 = vld [vmem:[#allocation2 + $0x8c] sm:$0x1]  ;;  %v18355_v58 = vld [vmem:[#allocation55_spill] sm:$0xff] }
 0x18a   : > { %13156 = vmatmul.mubr.msk.bf16.gmra.mxu0 %vm1158_vm7, %v12096_v38  ;;  %v5299_v34 = vrot.slane %v5297_v36, 4  ;;  %v5280_v42 = vrot.slane %v5279_v2, 4  ;;  %v5302_v14 = vrot.slane %v5300_v3, 5  ;;  %v5308_v44 = vrot.slane %v5306_v27, 5  ;;  %v15128_v38 = vpop.f32.mrf.mxu1  ;;  %v5149_v3 = vld [vmem:[#allocation2 + $0x94] sm:$0xf] }
 0x18b   : > { %v15098_v11 = vpop.f32.mrf.mxu0  ;;  %v5312_v45 = vrot.slane %v5310_v43, 4  ;;  %v15108_v31 = vadd.f32 %v14602_v41, %v18354_v39  ;;  %v5290_v23 = vrot.slane %v5289_v30, 4  ;;  %v2339_v63 = vadd.f32 %v14872_v52, %v15016_v46  ;;  %v18356_v46 = vld [vmem:[#allocation58_spill] sm:$0xff]  ;;  %18357 = vst [vmem:[#allocation12_spill] sm:$0xff] %v15128_v38 }
 0x18c   : > { %v15113_v1 = vadd.f32 %v14898_v18, %v2336_v35  ;;  %v5285_v48 = vsel %vm14157_vm13, %v5280_v42, %v5284_v6  ;;  %v5303_v57 = vor.u32 %v5302_v14, %v5299_v34  ;;  %v5318_v26 = vrot.slane %v5316_v37, 5  ;;  %v5150_v34 = vld [vmem:[#allocation2 + $0x98] sm:$0xf] }
 0x18d   : > { %v15115_v19 = vpop.f32.mrf.mxu0  ;;  %v5313_v5 = vor.u32 %v5312_v45, %v5308_v44  ;;  %v5295_v41 = vsel %vm14157_vm13, %v5290_v23, %v5294_v59  ;;  %v2337_v52 = vadd.f32 %v18355_v58, %v15032_v0  ;;  %v2340_v18 = vadd.f32 %v14902_v16, %v15036_v13  ;;  %v18359_v42 = vld [vmem:[#allocation59_spill] sm:$0xff] }
 0x18e   : > { %v15126_v35 = vadd.f32 %v18356_v46, %v2339_v63  ;;  %v12097_v6 = vcombine.low %v5285_v48, %v5295_v41  ;;  %v5304_v28 = vrot.slane %v5303_v57, 4  ;;  %v5321_v2 = vshrl.u32 %v5146_v54, 16  ;;  %v5151_v45 = vld [vmem:[#allocation2 + $0x9c] sm:$0x1] }
 0x18f   : > { %v5314_v36 = vrot.slane %v5313_v5, 4  ;;  %v5324_v27 = vshll.u32 %v5146_v54, 16  ;;  %v5330_v43 = vshll.u32 %v5147_v22, 16  ;;  %v5334_v30 = vshrl.u32 %v5147_v22, 16  ;;  %v15130_v37 = vpop.f32.mrf.mxu0 }
 0x190   : > { %v5340_v59 = vshll.u32 %v5148_v40, 16  ;;  %18358 = vst [vmem:[#allocation15_spill] sm:$0xff] %v15130_v37  ;;  %13159 = vmatprep.mubr.msk.bf16.mxu0 %vm1158_vm7, %v12097_v6  ;;  %v5309_v16 = vsel %vm14157_vm13, %v5304_v28, %v5308_v44  ;;  %v5323_v13 = vrot.slane %v5321_v2, 4  ;;  %v2343_v14 = vadd.f32 %v18359_v42, %v15064_v17  ;;  %v18360_v2 = vld [vmem:[#allocation19_spill] sm:$0xff] }
 0x191   : > { %v5319_v0 = vsel %vm14157_vm13, %v5314_v36, %v5318_v26  ;;  %v5326_v23 = vrot.slane %v5324_v27, 5  ;;  %v5332_v63 = vrot.slane %v5330_v43, 5  ;;  %v5336_v54 = vrot.slane %v5334_v30, 4  ;;  %v15139_v48 = vpop.f32.mrf.mxu1  ;;  %v18361_v27 = vld [vmem:[#allocation25_spill] sm:$0xff] }
 0x192   : > { %v12098_v39 = vcombine.low %v5309_v16, %v5319_v0  ;;  %v5342_v57 = vrot.slane %v5340_v59, 5  ;;  %v5345_v5 = vshrl.u32 %v5149_v3, 16  ;;  %v5348_v22 = vshll.u32 %v5149_v3, 16  ;;  %v18362_v0 = vld [vmem:[#allocation20_spill] sm:$0xff] }
 0x193   : > { %v5354_v40 = vshll.u32 %v5150_v34, 16  ;;  %v5327_v44 = vor.u32 %v5326_v23, %v5323_v13  ;;  %v5337_v41 = vor.u32 %v5336_v54, %v5332_v63  ;;  %v5358_v26 = vshrl.u32 %v5150_v34, 16  ;;  %v15149_v16 = vpop.f32.mrf.mxu1  ;;  %v18363_v13 = vld [vmem:[#allocation27_spill] sm:$0xff]  ;;  %v5152_v23 = vld [vmem:[#allocation2 + $0xa4] sm:$0xf] }
 0x194   : > { %13160 = vmatmul.mubr.msk.bf16.gmra.mxu0 %vm1158_vm7, %v12098_v39  ;;  %v5364_v58 = vshll.u32 %v5151_v45, 16  ;;  %v5347_v17 = vrot.slane %v5345_v5, 4  ;;  %v5350_v6 = vrot.slane %v5348_v22, 5  ;;  %v15145_v36 = vadd.f32 %v14940_v51, %v2337_v52  ;;  %v5153_v51 = vld [vmem:[#allocation2 + $0xa8] sm:$0xf] }
 0x195   : > { %v5356_v28 = vrot.slane %v5354_v40, 5  ;;  %v1578_v43 = vadd.f32 %v18361_v27, %v18360_v2  ;;  %v5328_v30 = vrot.slane %v5327_v44, 4  ;;  %v5338_v3 = vrot.slane %v5337_v41, 4  ;;  %v5154_v40 = vld [vmem:[#allocation2 + $0xac] sm:$0x1]  ;;  %v15171_v2 = vpop.f32.mrf.mxu1 }
 0x196   : > { %v5360_v59 = vrot.slane %v5358_v26, 4  ;;  %v15153_v34 = vadd.f32 %v18363_v13, %v18362_v0  ;;  %v5351_v42 = vor.u32 %v5350_v6, %v5347_v17  ;;  %v5366_v45 = vrot.slane %v5364_v58, 5 }
 0x197   : > { %v15156_v39 = vadd.f32 %v14965_v50, %v2340_v18  ;;  %v5333_v52 = vsel %vm14157_vm13, %v5328_v30, %v5332_v63  ;;  %v5343_v54 = vsel %vm14157_vm13, %v5338_v3, %v5342_v57  ;;  %v2341_v22 = vadd.f32 %v14954_v8, %v15068_v4  ;;  %v5155_v57 = vld [vmem:[#allocation2 + $0xb4] sm:$0xf] }
 0x198   : > { %v5361_v5 = vor.u32 %v5360_v59, %v5356_v28  ;;  %v12099_v41 = vcombine.low %v5333_v52, %v5343_v54  ;;  %v5352_v26 = vrot.slane %v5351_v42, 4  ;;  %v2344_v50 = vadd.f32 %v14978_v47, %v15108_v31  ;;  %v5156_v47 = vld [vmem:[#allocation2 + $0xb8] sm:$0xf]  ;;  %v5157_v59 = vld [vmem:[#allocation2 + $0xbc] sm:$0x1] }
 0x199   : > { %v15142_v46 = vpop.f32.mrf.mxu0  ;;  %v15169_v18 = vadd.f32 %v15007_v49, %v2343_v14  ;;  %v5369_v63 = vshrl.u32 %v5152_v23, 16  ;;  %v5372_v17 = vshll.u32 %v5152_v23, 16  ;;  %v5378_v6 = vshll.u32 %v5153_v51, 16 }
 0x19a   : > { %v5362_v58 = vrot.slane %v5361_v5, 4  ;;  %13163 = vmatprep.mubr.msk.bf16.mxu0 %vm1158_vm7, %v12099_v41  ;;  %v5357_v8 = vsel %vm14157_vm13, %v5352_v26, %v5356_v28  ;;  %v5382_v4 = vshrl.u32 %v5153_v51, 16  ;;  %v5388_v27 = vshll.u32 %v5154_v40, 16  ;;  %v15181_v40 = vpop.f32.mrf.mxu1 }
 0x19b   : > { %v15164_v44 = vpop.f32.mrf.mxu0  ;;  %v2347_v30 = vadd.f32 %v15009_v10, %v1578_v43  ;;  %v5371_v31 = vrot.slane %v5369_v63, 4  ;;  %v5374_v14 = vrot.slane %v5372_v17, 5  ;;  %v5380_v3 = vrot.slane %v5378_v6, 5  ;;  %18364 = vst [vmem:[#allocation16_spill] sm:$0xff] %v15181_v40 }
 0x19c   : > { %v5367_v49 = vsel %vm14157_vm13, %v5362_v58, %v5366_v45  ;;  %v5384_v42 = vrot.slane %v5382_v4, 4  ;;  %v5390_v23 = vrot.slane %v5388_v27, 5  ;;  %v5393_v52 = vshrl.u32 %v5155_v57, 16  ;;  %v18368_v27 = vld [vmem:[#allocation24_spill] sm:$0xff] }
 0x19d   : > { %v15179_v0 = vpop.f32.mrf.mxu0  ;;  %v12100_v13 = vcombine.low %v5357_v8, %v5367_v49  ;;  %v5375_v54 = vor.u32 %v5374_v14, %v5371_v31  ;;  %v5396_v28 = vshll.u32 %v5155_v57, 16  ;;  %v5402_v51 = vshll.u32 %v5156_v47, 16  ;;  %v18366_v8 = vld [vmem:[#allocation21_spill] sm:$0xff] }
 0x19e   : > { %v5406_v5 = vshrl.u32 %v5156_v47, 16  ;;  %v5385_v10 = vor.u32 %v5384_v42, %v5380_v3  ;;  %v5395_v43 = vrot.slane %v5393_v52, 4  ;;  %v5412_v45 = vshll.u32 %v5157_v59, 16  ;;  %v18367_v57 = vld [vmem:[#allocation29_spill] sm:$0xff]  ;;  %v5158_v59 = vld [vmem:[#allocation2 + $0xc4] sm:$0xf] }
 0x19f   : > { %13164 = vmatmul.mubr.msk.bf16.gmra.mxu0 %vm1158_vm7, %v12100_v13  ;;  %v15185_v41 = vadd.f32 %v15018_v56, %v2341_v22  ;;  %v5376_v26 = vrot.slane %v5375_v54, 4  ;;  %v5398_v58 = vrot.slane %v5396_v28, 5  ;;  %v5404_v63 = vrot.slane %v5402_v51, 5  ;;  %v15187_v6 = vpop.f32.mrf.mxu0  ;;  %v18369_v47 = vld [vmem:[#allocation33_spill] sm:$0xff] }
 0x1a0   : > { %v5408_v17 = vrot.slane %v5406_v5, 4  ;;  %18365 = vst [vmem:[#allocation55_spill] sm:$0xff] %v15187_v6  ;;  %v1581_v4 = vadd.f32 %v18367_v57, %v18366_v8  ;;  %v1594_v49 = vadd.f32 %v18369_v47, %v18368_v27  ;;  %v5386_v31 = vrot.slane %v5385_v10, 4  ;;  %v5159_v52 = vld [vmem:[#allocation2 + $0xc8] sm:$0xf] }
 0x1a1   : > { %v15194_v14 = vadd.f32 %v15044_v53, %v2344_v50  ;;  %v5381_v56 = vsel %vm14157_vm13, %v5376_v26, %v5380_v3  ;;  %v5399_v22 = vor.u32 %v5398_v58, %v5395_v43  ;;  %v5414_v42 = vrot.slane %v5412_v45, 5  ;;  %v5160_v54 = vld [vmem:[#allocation2 + $0xcc] sm:$0x1]  ;;  %v15198_v28 = vpop.f32.mrf.mxu1  ;;  %v5161_v45 = vld [vmem:[#allocation2 + $0xd4] sm:$0xf] }
 0x1a2   : > { %v5409_v13 = vor.u32 %v5408_v17, %v5404_v63  ;;  %v5391_v51 = vsel %vm14157_vm13, %v5386_v31, %v5390_v23  ;;  %v2345_v5 = vadd.f32 %v15028_v32, %v15153_v34  ;;  %v2348_v53 = vadd.f32 %v15053_v62, %v1581_v4  ;;  %v5162_v23 = vld [vmem:[#allocation2 + $0xd8] sm:$0xf] }
 0x1a3   : > { %v15206_v50 = vadd.f32 %v15076_v55, %v2347_v30  ;;  %v12101_v10 = vcombine.low %v5381_v56, %v5391_v51  ;;  %v5400_v3 = vrot.slane %v5399_v22, 4  ;;  %v5417_v26 = vshrl.u32 %v5158_v59, 16  ;;  %v5163_v30 = vld [vmem:[#allocation2 + $0xdc] sm:$0x1]  ;;  %v15216_v4 = vpop.f32.mrf.mxu1 }
 0x1a4   : > { %v5410_v43 = vrot.slane %v5409_v13, 4  ;;  %v5420_v17 = vshll.u32 %v5158_v59, 16  ;;  %v5426_v8 = vshll.u32 %v5159_v52, 16  ;;  %v5430_v57 = vshrl.u32 %v5159_v52, 16 }
 0x1a5   : > { %v5436_v27 = vshll.u32 %v5160_v54, 16  ;;  %13167 = vmatprep.mubr.msk.bf16.mxu0 %vm1158_vm7, %v12101_v10  ;;  %v5405_v32 = vsel %vm14157_vm13, %v5400_v3, %v5404_v63  ;;  %v5419_v55 = vrot.slane %v5417_v26, 4  ;;  %v2351_v34 = vadd.f32 %v15087_v12, %v1594_v49 }
 0x1a6   : > { %v5415_v62 = vsel %vm14157_vm13, %v5410_v43, %v5414_v42  ;;  %v5422_v59 = vrot.slane %v5420_v17, 5  ;;  %v5428_v56 = vrot.slane %v5426_v8, 5  ;;  %v5432_v22 = vrot.slane %v5430_v57, 4  ;;  %v15226_v17 = vpop.f32.mrf.mxu1  ;;  %v18372_v57 = vld [vmem:[#allocation35_spill] sm:$0xff] }
 0x1a7   : > { %v12102_v31 = vcombine.low %v5405_v32, %v5415_v62  ;;  %v5438_v13 = vrot.slane %v5436_v27, 5  ;;  %v5441_v52 = vshrl.u32 %v5161_v45, 16  ;;  %v5444_v54 = vshll.u32 %v5161_v45, 16  ;;  %v18371_v45 = vld [vmem:[#allocation26_spill] sm:$0xff] }
 0x1a8   : > { %v5450_v51 = vshll.u32 %v5162_v23, 16  ;;  %v5423_v42 = vor.u32 %v5422_v59, %v5419_v55  ;;  %v5433_v10 = vor.u32 %v5432_v22, %v5428_v56  ;;  %v5454_v12 = vshrl.u32 %v5162_v23, 16  ;;  %v18373_v55 = vld [vmem:[#allocation28_spill] sm:$0xff]  ;;  %v18374_v59 = vld [vmem:[#allocation37_spill] sm:$0xff] }
 0x1a9   : > { %v15208_v58 = vpop.f32.mrf.mxu0  ;;  %13168 = vmatmul.mubr.msk.bf16.gmra.mxu0 %vm1158_vm7, %v12102_v31  ;;  %v5460_v49 = vshll.u32 %v5163_v30, 16  ;;  %v5443_v3 = vrot.slane %v5441_v52, 4  ;;  %v5446_v43 = vrot.slane %v5444_v54, 5  ;;  %v15224_v32 = vadd.f32 %v15094_v21, %v2345_v5  ;;  %v18375_v30 = vld [vmem:[#allocation32_spill] sm:$0xff] }
 0x1aa   : > { %v5452_v26 = vrot.slane %v5450_v51, 5  ;;  %v1586_v27 = vadd.f32 %v18372_v57, %v18371_v45  ;;  %v5424_v62 = vrot.slane %v5423_v42, 4  ;;  %v5434_v40 = vrot.slane %v5433_v10, 4  ;;  %v18376_v22 = vld [vmem:[#allocation40_spill] sm:$0xff]  ;;  %v5165_v51 = vld [vmem:[#allocation2 + $0xe8] sm:$0xf] }
 0x1ab   : > { %v15218_v47 = vpop.f32.mrf.mxu0  ;;  %v5456_v31 = vrot.slane %v5454_v12, 4  ;;  %v1597_v23 = vadd.f32 %v18374_v59, %v18373_v55  ;;  %v1610_v52 = vadd.f32 %v18376_v22, %v18375_v30  ;;  %v5447_v54 = vor.u32 %v5446_v43, %v5443_v3  ;;  %v5164_v5 = vld [vmem:[#allocation2 + $0xe4] sm:$0xf]  ;;  %v5166_v57 = vld [vmem:[#allocation2 + $0xec] sm:$0x1] }
 0x1ac   : > { %v15237_v21 = vadd.f32 %v15104_v7, %v2348_v53  ;;  %v5429_v45 = vsel %vm14157_vm13, %v5424_v62, %v5428_v56  ;;  %v5439_v42 = vsel %vm14157_vm13, %v5434_v40, %v5438_v13  ;;  %v5462_v12 = vrot.slane %v5460_v49, 5  ;;  %v15249_v53 = vpop.f32.mrf.mxu1 }
 0x1ad   : > { %v15220_v63 = vpop.f32.mrf.mxu0  ;;  %v5457_v10 = vor.u32 %v5456_v31, %v5452_v26  ;;  %v12103_v55 = vcombine.low %v5429_v45, %v5439_v42  ;;  %v5448_v59 = vrot.slane %v5447_v54, 4  ;;  %v2349_v3 = vadd.f32 %v15098_v11, %v1586_v27  ;;  %18377 = vst [vmem:[#allocation59_spill] sm:$0xff] %v15249_v53  ;;  %v5169_v45 = vld [vmem:[#allocation2 + $0xfc] sm:$0x1] }
 0x1ae   : > { %v15247_v7 = vadd.f32 %v15139_v48, %v2351_v34  ;;  %v5465_v22 = vshrl.u32 %v5164_v5, 16  ;;  %v5468_v56 = vshll.u32 %v5164_v5, 16  ;;  %v5474_v62 = vshll.u32 %v5165_v51, 16  ;;  %v5168_v48 = vld [vmem:[#allocation2 + $0xf8] sm:$0xf] }
 0x1af   : > { %v15228_v8 = vpop.f32.mrf.mxu0  ;;  %v5458_v30 = vrot.slane %v5457_v10, 4  ;;  %13171 = vmatprep.mubr.msk.bf16.mxu0 %vm1158_vm7, %v12103_v55  ;;  %v5453_v40 = vsel %vm14157_vm13, %v5448_v59, %v5452_v26  ;;  %v2352_v13 = vadd.f32 %v15115_v19, %v1597_v23  ;;  %v5478_v11 = vshrl.u32 %v5165_v51, 16 }
 0x1b0   : > { %18370 = vst [vmem:[#allocation58_spill] sm:$0xff] %v15228_v8  ;;  %v5167_v8 = vld [vmem:[#allocation2 + $0xf4] sm:$0xf]  ;;  %v5484_v49 = vshll.u32 %v5166_v57, 16  ;;  %v5467_v31 = vrot.slane %v5465_v22, 4  ;;  %v5470_v54 = vrot.slane %v5468_v56, 5  ;;  %v15267_v22 = vadd.f32 %v15149_v16, %v2349_v3 }
 0x1b1   : > { %v15239_v38 = vpop.f32.mrf.mxu0  ;;  %v5463_v27 = vsel %vm14157_vm13, %v5458_v30, %v5462_v12  ;;  %v5476_v5 = vrot.slane %v5474_v62, 5  ;;  %v5480_v10 = vrot.slane %v5478_v11, 4  ;;  %v5489_v53 = vshrl.u32 %v5167_v8, 16 }
 0x1b2   : > { %v12104_v42 = vcombine.low %v5453_v40, %v5463_v27  ;;  %v5486_v55 = vrot.slane %v5484_v49, 5  ;;  %v5471_v19 = vor.u32 %v5470_v54, %v5467_v31  ;;  %v5492_v23 = vshll.u32 %v5167_v8, 16  ;;  %v5170_v54 = vld [vmem:[#allocation2 + $0x104] sm:$0xf] }
 0x1b3   : > { %v15251_v43 = vpop.f32.mrf.mxu0  ;;  %v5498_v51 = vshll.u32 %v5168_v48, 16  ;;  %v5502_v57 = vshrl.u32 %v5168_v48, 16  ;;  %v5481_v59 = vor.u32 %v5480_v10, %v5476_v5  ;;  %v5491_v12 = vrot.slane %v5489_v53, 4 }
 0x1b4   : > { %13172 = vmatmul.mubr.msk.bf16.gmra.mxu0 %vm1158_vm7, %v12104_v42  ;;  %v5508_v30 = vshll.u32 %v5169_v45, 16  ;;  %v5472_v40 = vrot.slane %v5471_v19, 4  ;;  %v5494_v11 = vrot.slane %v5492_v23, 5  ;;  %v2355_v8 = vadd.f32 %v15142_v46, %v1610_v52  ;;  %v5171_v19 = vld [vmem:[#allocation2 + $0x108] sm:$0xf]  ;;  %v18382_v52 = vld [vmem:[#allocation48_spill] sm:$0xff] }
 0x1b5   : > { %v15257_v34 = vpop.f32.mrf.mxu0  ;;  %v5500_v49 = vrot.slane %v5498_v51, 5  ;;  %v5504_v27 = vrot.slane %v5502_v57, 4  ;;  %v5482_v31 = vrot.slane %v5481_v59, 4  ;;  %v15275_v48 = vadd.f32 %v15171_v2, %v2352_v13  ;;  %v5172_v23 = vld [vmem:[#allocation2 + $0x10c] sm:$0x1]  ;;  %v18379_v51 = vld [vmem:[#allocation34_spill] sm:$0xff] }
 0x1b6   : > { %v15261_v20 = vpop.f32.mrf.mxu1  ;;  %v5477_v16 = vsel %vm14157_vm13, %v5472_v40, %v5476_v5  ;;  %v5495_v3 = vor.u32 %v5494_v11, %v5491_v12  ;;  %v5510_v10 = vrot.slane %v5508_v30, 5  ;;  %v18380_v57 = vld [vmem:[#allocation42_spill] sm:$0xff]  ;;  %v18381_v46 = vld [vmem:[#allocation41_spill] sm:$0xff]  ;;  %v5513_v11 = vshrl.u32 %v5170_v54, 16 }
 0x1b7   : > { %v15263_v26 = vpop.f32.mrf.mxu0  ;;  %v5505_v42 = vor.u32 %v5504_v27, %v5500_v49  ;;  %v1602_v59 = vadd.f32 %v18380_v57, %v18379_v51  ;;  %v1626_v2 = vadd.f32 %v18382_v52, %v18381_v46  ;;  %v5487_v13 = vsel %vm14157_vm13, %v5482_v31, %v5486_v55 }
 0x1b8   : > { %18378 = vst [vmem:[#allocation19_spill] sm:$0xff] %v15263_v26  ;;  %v15269_v56 = vpop.f32.mrf.mxu1  ;;  %v15290_v26 = vadd.f32 %v15198_v28, %v2355_v8  ;;  %v12105_v12 = vcombine.low %v5477_v16, %v5487_v13  ;;  %v5496_v30 = vrot.slane %v5495_v3, 4  ;;  %v5516_v27 = vshll.u32 %v5170_v54, 16  ;;  %v18386_v13 = vld [vmem:[#allocation36_spill] sm:$0xff] }
 0x1b9   : > { %v15271_v62 = vpop.f32.mrf.mxu0  ;;  %v5506_v40 = vrot.slane %v5505_v42, 4  ;;  %v5522_v37 = vshll.u32 %v5171_v19, 16  ;;  %v5526_v51 = vshrl.u32 %v5171_v19, 16  ;;  %v5532_v57 = vshll.u32 %v5172_v23, 16 }
 0x1ba   : > { %v15277_v53 = vpop.f32.mrf.mxu1  ;;  %13175 = vmatprep.mubr.msk.bf16.mxu0 %vm1158_vm7, %v12105_v12  ;;  %v5501_v28 = vsel %vm14157_vm13, %v5496_v30, %v5500_v49  ;;  %v5515_v31 = vrot.slane %v5513_v11, 4  ;;  %v2359_v8 = vadd.f32 %v15208_v58, %v1626_v2  ;;  %v5518_v16 = vrot.slane %v5516_v27, 5  ;;  %v5173_v2 = vld [vmem:[#allocation2 + $0x114] sm:$0xf] }
 0x1bb   : > { %v15279_v45 = vpop.f32.mrf.mxu0  ;;  %v5511_v55 = vsel %vm14157_vm13, %v5506_v40, %v5510_v10  ;;  %v5524_v3 = vrot.slane %v5522_v37, 5  ;;  %v5528_v42 = vrot.slane %v5526_v51, 4  ;;  %v2353_v12 = vadd.f32 %v15164_v44, %v1602_v59  ;;  %v5174_v37 = vld [vmem:[#allocation2 + $0x118] sm:$0xf]  ;;  %v18391_v59 = vld [vmem:[#allocation49_spill] sm:$0xff] }
 0x1bc   : > { %v15292_v6 = vpop.f32.mrf.mxu1  ;;  %v12106_v54 = vcombine.low %v5501_v28, %v5511_v55  ;;  %v241_v49 = vsel %vm14053_vm10, 0, %v240_v24  ;;  %v5519_v10 = vor.u32 %v5518_v16, %v5515_v31  ;;  %v5534_v58 = vrot.slane %v5532_v57, 5  ;;  %v18390_v44 = vld [vmem:[#allocation43_spill] sm:$0xff]  ;;  %v18392_v24 = vld [vmem:[#allocation45_spill] sm:$0xff]  ;;  %v18393_v28 = vld [vmem:[#allocation50_spill] sm:$0xff] }
 0x1bd   : > { %18383 = vst [vmem:[#allocation25_spill] sm:$0xff] %v15292_v6  ;;  %v15294_v5 = vpop.f32.mrf.mxu0  ;;  %v5529_v30 = vor.u32 %v5528_v42, %v5524_v3  ;;  %242 = vst [vmem:[#allocation2 + $0x11c] sm:$0x1] %v241_v49  ;;  %v15318_v51 = vadd.f32 %v15216_v4, %v2353_v12  ;;  %v1629_v55 = vadd.f32 %v18393_v28, %v18392_v24  ;;  %v5537_v42 = vshrl.u32 %v5173_v2, 16 }
 0x1be   : > { %v15296_v46 = vpop.f32.mrf.mxu1  ;;  %13176 = vmatmul.mubr.msk.bf16.gmra.mxu0 %vm1158_vm7, %v12106_v54  ;;  %v5520_v31 = vrot.slane %v5519_v10, 4  ;;  %v5546_v49 = vshll.u32 %v5174_v37, 16  ;;  %v15373_v24 = vadd.f32 %v15279_v45, %v15102_v61  ;;  %v12174_v61 = vld [vmem:[%s18264_s3 + $0x2] sm:$0x3]  ;;  %vm358_vm4 = vcmask 24576  }
 0x1bf   : > { %18384 = vst [vmem:[#allocation20_spill] sm:$0xff] %v15296_v46  ;;  %v15298_v52 = vpop.f32.mrf.mxu0  ;;  %v5530_v54 = vrot.slane %v5529_v30, 4  ;;  %v2360_v12 = vadd.f32 %v15220_v63, %v1629_v55  ;;  %13498 = vmatprep.subr.msk.bf16.mxu1 %vm6746_vm14, %v12174_v61  ;;  %vm15543_vm5 = vmand %vm358_vm4, %vm231_vm3 }
 0x1c0   : > { %18385 = vst [vmem:[#allocation27_spill] sm:$0xff] %v15298_v52  ;;  %v15306_v19 = vpop.f32.mrf.mxu1  ;;  %v18387_v52 = vld [vmem:[#allocation44_spill] sm:$0xff] }
 0x1c1   : > { %v13025_v23 = vpop.f32.mrf.mxu0  ;;  %v1613_v46 = vadd.f32 %v18387_v52, %v18386_v13  ;;  %v1618_v52 = vadd.f32 %v18391_v59, %v18390_v44  ;;  %v5540_v13 = vshll.u32 %v5173_v2, 16  ;;  %v5535_v4 = vsel %vm14157_vm13, %v5530_v54, %v5534_v58 }
 0x1c2   : > { %v15314_v40 = vpop.f32.mrf.mxu1  ;;  %v5550_v2 = vshrl.u32 %v5174_v37, 16  ;;  %v15340_v59 = vadd.f32 %v15261_v20, %v2359_v8  ;;  %v15354_v63 = vadd.f32 %v15277_v53, %v2360_v12  ;;  %v5539_v8 = vrot.slane %v5537_v42, 4 }
 0x1c3   : > { %18389 = vst [vmem:[#allocation21_spill] sm:$0xff] %v15314_v40  ;;  %v3254_v11 = vpop.f32.mrf.mxu0  ;;  %v2356_v27 = vadd.f32 %v15179_v0, %v1613_v46  ;;  %v5525_v0 = vsel %vm14157_vm13, %v5520_v31, %v5524_v3  ;;  %v2357_v46 = vadd.f32 %v15218_v47, %v1618_v52  ;;  %v15351_v47 = vadd.f32 %v15251_v43, %v15058_v25 }
 0x1c4   : > { %v15324_v57 = vpop.f32.mrf.mxu1  ;;  %v12107_v44 = vcombine.low %v5525_v0, %v5535_v4  ;;  %v351_v20 = vld [vmem:[#allocation2 + $0x11c] sm:$0x1]  ;;  %v15367_v25 = vadd.f32 %v15271_v62, %v15085_v33  ;;  %v5548_v53 = vrot.slane %v5546_v49, 5  ;;  %v5552_v52 = vrot.slane %v5550_v2, 4 }
 0x1c5   : > { %v13026_v16 = vpop.f32.mrf.mxu0  ;;  %v15327_v40 = vadd.f32 %v15226_v17, %v2356_v27  ;;  %v15344_v17 = vadd.f32 %v15239_v38, %v15042_v15  ;;  %v15347_v3 = vadd.f32 %v15269_v56, %v2357_v46  ;;  %v5542_v27 = vrot.slane %v5540_v13, 5 }
 0x1c6   : > { %v15335_v10 = vpop.f32.mrf.mxu1  ;;  %13179 = vmatprep.mubr.msk.bf16.mxu0 %vm1158_vm7, %v12107_v44  ;;  %v15361_v15 = vadd.f32 %v15257_v34, %v15074_v29  ;;  %v352_v38 = vsel %vm14053_vm10, 0, %v351_v20  ;;  %v15377_v29 = vadd.f32 %v15294_v5, %v15113_v1  ;;  %v15380_v6 = vadd.f32 %v13025_v23, %v15126_v35 }
 0x1c7   : > { %v15337_v30 = vpop.f32.mrf.mxu0  ;;  %353 = vst [vmem:[#allocation2 + $0x11c] sm:$0x1] %v352_v38  ;;  %v15383_v33 = vadd.f32 %v3254_v11, %v15145_v36  ;;  %v5543_v28 = vor.u32 %v5542_v27, %v5539_v8  ;;  %v15388_v55 = vadd.f32 %v13026_v16, %v15156_v39  ;;  %v5553_v23 = vor.u32 %v5552_v52, %v5548_v53 }
 0x1c8   : > { %v15356_v58 = vpop.f32.mrf.mxu1  ;;  %v6748_v31 = vsel %vm6746_vm14, %v12174_v61, 0  ;;  %v18394_v54 = vmov 0  }
 0x1c9   : > { %v13029_v37 = vpop.f32.mrf.mxu0  ;;  %355 = vst.msk [vmem:[#allocation3] sm:$0xf] %vm354_vm15, %v18394_v54  ;;  %356 = vst.msk [vmem:[#allocation3 + $0x4] sm:$0xf] %vm354_vm15, %v18394_v54  ;;  %13184 = vmatpush3.bf16.msra.mxu1 %v6748_v31  ;;  %v5554_v13 = vrot.slane %v5553_v23, 4 }
 0x1ca   : > { %v15369_v43 = vpop.f32.mrf.mxu1  ;;  %v3363_v1 = vadd.f32 %v13029_v37, %v15169_v18  ;;  %357 = vst.msk [vmem:[#allocation3 + $0x8] sm:$0xf] %vm354_vm15, %v18394_v54  ;;  %364 = vst.msk [vmem:[#allocation3 + $0x110] sm:$0xf] %vm354_vm15, %v18394_v54  ;;  %v5544_v18 = vrot.slane %v5543_v28, 4 }
 0x1cb   : > { %v3270_v56 = vpop.f32.mrf.mxu0  ;;  %365 = vst.msk [vmem:[#allocation3 + $0x114] sm:$0xf] %vm354_vm15, %v18394_v54  ;;  %366 = vst.msk [vmem:[#allocation3 + $0x118] sm:$0xf] %vm354_vm15, %v18394_v54 }
 0x1cc   : > { %v15385_v34 = vpop.f32.mrf.mxu1  ;;  %v3361_v35 = vadd.f32 %v3270_v56, %v15185_v41  ;;  %v5549_v12 = vsel %vm14157_vm13, %v5544_v18, %v5548_v53 }
 0x1cd   : > { %v13030_v62 = vpop.f32.mrf.mxu0 }
 0x1ce   : > { %v15393_v45 = vpop.f32.mrf.mxu1  ;;  %v3364_v36 = vadd.f32 %v13030_v62, %v15194_v14  ;;  %v5175_v14 = vld [vmem:[#allocation2 + $0x11c] sm:$0x1] }
 0x1cf   : > { %v15398_v5 = vpop.f32.mrf.mxu0  ;;  %v5556_v49 = vshll.u32 %v5175_v14, 16 }
 0x1d0   : > { %v15400_v11 = vpop.f32.mrf.mxu1 }
 0x1d1   : > { %v13033_v39 = vpop.f32.mrf.mxu0  ;;  %v5558_v44 = vrot.slane %v5556_v49, 5 }
 0x1d2   : > { %v3367_v41 = vadd.f32 %v13033_v39, %v15206_v50  ;;  %v15417_v16 = vpop.f32.mrf.mxu1 }
 0x1d3   : > { %v3286_v42 = vpop.f32.mrf.mxu0  ;;  %v5559_v20 = vsel %vm14157_vm13, %v5554_v13, %v5558_v44 }
 0x1d4   : > { %v3365_v0 = vadd.f32 %v3286_v42, %v15224_v32  ;;  %v15420_v4 = vpop.f32.mrf.mxu1  ;;  %v12108_v27 = vcombine.low %v5549_v12, %v5559_v20 }
 0x1d5   : > { %v13034_v46 = vpop.f32.mrf.mxu0 }
 0x1d6   : > { %v3368_v2 = vadd.f32 %v13034_v46, %v15237_v21  ;;  %v13063_v37 = vpop.f32.mrf.mxu1  ;;  %13180 = vmatmul.mubr.msk.bf16.gmra.mxu0 %vm1158_vm7, %v12108_v27 }
 0x1d7   : > { %v15425_v50 = vpop.f32.mrf.mxu0  ;;  %v15429_v8 = vadd.f32 %v13063_v37, %v3363_v1 }
 0x1d8   : > { %v3996_v38 = vpop.f32.mrf.mxu1 }
 0x1d9   : > { %v13037_v32 = vpop.f32.mrf.mxu0  ;;  %v15431_v56 = vadd.f32 %v3996_v38, %v3361_v35 }
 0x1da   : > { %v3371_v52 = vadd.f32 %v13037_v32, %v15247_v7  ;;  %v13064_v53 = vpop.f32.mrf.mxu1 }
 0x1db   : > { %v3302_v62 = vpop.f32.mrf.mxu0  ;;  %v15435_v21 = vadd.f32 %v13064_v53, %v3364_v36 }
 0x1dc   : > { %v3369_v28 = vadd.f32 %v3302_v62, %v15267_v22  ;;  %v15438_v61 = vpop.f32.mrf.mxu1 }
 0x1dd   : > { %v13038_v23 = vpop.f32.mrf.mxu0 }
 0x1de   : > { %v3372_v1 = vadd.f32 %v13038_v23, %v15275_v48  ;;  %v13067_v39 = vpop.f32.mrf.mxu1 }
 0x1df   : > { %v15441_v31 = vpop.f32.mrf.mxu0  ;;  %v15443_v35 = vadd.f32 %v13067_v39, %v3367_v41 }
 0x1e0   : > { %v4012_v54 = vpop.f32.mrf.mxu1 }
 0x1e1   : > { %v13041_v7 = vpop.f32.mrf.mxu0  ;;  %v15445_v18 = vadd.f32 %v4012_v54, %v3365_v0 }
 0x1e2   : > { %v3375_v14 = vadd.f32 %v13041_v7, %v15290_v26  ;;  %v13068_v36 = vpop.f32.mrf.mxu1 }
 0x1e3   : > { %v3318_v42 = vpop.f32.mrf.mxu0  ;;  %v15448_v13 = vadd.f32 %v13068_v36, %v3368_v2 }
 0x1e4   : > { %v3373_v22 = vadd.f32 %v3318_v42, %v15318_v51  ;;  %v15451_v49 = vpop.f32.mrf.mxu1 }
 0x1e5   : > { %v13042_v48 = vpop.f32.mrf.mxu0 }
 0x1e6   : > { %v3376_v46 = vadd.f32 %v13042_v48, %v15327_v40  ;;  %v13071_v12 = vpop.f32.mrf.mxu1 }
 0x1e7   : > { %v15454_v41 = vpop.f32.mrf.mxu0  ;;  %v15456_v44 = vadd.f32 %v13071_v12, %v3371_v52  ;;  %v378_v12 = vld [vmem:[#allocation3 + $0x20] sm:$0x8] }
 0x1e8   : > { %v4028_v0 = vpop.f32.mrf.mxu1 }
 0x1e9   : > { %v13045_v37 = vpop.f32.mrf.mxu0  ;;  %v15458_v20 = vadd.f32 %v4028_v0, %v3369_v28 }
 0x1ea   : > { %v3379_v26 = vadd.f32 %v13045_v37, %v15340_v59  ;;  %v13072_v2 = vpop.f32.mrf.mxu1  ;;  %v379_v37 = vsel %vm15482_vm1, 0, %v378_v12 }
 0x1eb   : > { %v3334_v27 = vpop.f32.mrf.mxu0  ;;  %v15461_v38 = vadd.f32 %v13072_v2, %v3372_v1  ;;  %v375_v2 = vld [vmem:[#allocation3 + $0x10] sm:$0x8]  ;;  %380 = vst [vmem:[#allocation3 + $0x20] sm:$0x8] %v379_v37 }
 0x1ec   : > { %v3377_v51 = vadd.f32 %v3334_v27, %v15347_v3  ;;  %v15464_v32 = vpop.f32.mrf.mxu1 }
 0x1ed   : > { %v13046_v40 = vpop.f32.mrf.mxu0 }
 0x1ee   : > { %v3380_v53 = vadd.f32 %v13046_v40, %v15354_v63  ;;  %v18397_v63 = vmov 0 }
 0x1ef   : > { %v13075_v62 = vpop.f32.mrf.mxu1  ;;  %v15475_v7 = vpop.f32.mrf.mxu0  ;;  %v18398_v63 = vsel %vm15482_vm1, 4294967295, %v18397_v63 }
 0x1f0   : > { %v15467_v52 = vadd.f32 %v13075_v62, %v3375_v14  ;;  %18399 = vst [vmem:[#allocation33_spill] sm:$0xff] %v18398_v63  ;;  %v372_v62 = vld [vmem:[#allocation3] sm:$0x8] }
 0x1f1   : > { %v4044_v23 = vpop.f32.mrf.mxu1 }
 0x1f2   : > { %v15469_v39 = vadd.f32 %v4044_v23, %v3373_v22 }
 0x1f3   : > { %v13076_v28 = vpop.f32.mrf.mxu1 }
 0x1f4   : > { %v15471_v54 = vadd.f32 %v13076_v28, %v3376_v46  ;;  %v373_v28 = vsel %vm15482_vm1, 0, %v372_v62 }
 0x1f5   : > { %v15473_v59 = vpop.f32.mrf.mxu1  ;;  %374 = vst [vmem:[#allocation3] sm:$0x8] %v373_v28  ;;  %v6215_v28 = vld [vmem:[#allocation3 + $0x4] sm:$0xf] }
 0x1fa   : > { %v13079_v1 = vpop.f32.mrf.mxu1 }
 0x1fb   : > { %v15477_v3 = vadd.f32 %v13079_v1, %v3379_v26 }
 0x1fc   : > { %v4060_v36 = vpop.f32.mrf.mxu1 }
 0x1fd   : > { %18395 = vst [vmem:[#allocation29_spill] sm:$0xff] %v15477_v3  ;;  %v15479_v42 = vadd.f32 %v4060_v36, %v3377_v51  ;;  %v376_v51 = vsel %vm15482_vm1, 0, %v375_v2 }
 0x1fe   : > { %v13080_v14 = vpop.f32.mrf.mxu1  ;;  %v15486_v22 = vpop.f32.mrf.mxu0  ;;  %377 = vst [vmem:[#allocation3 + $0x10] sm:$0x8] %v376_v51  ;;  %v381_v51 = vld [vmem:[#allocation3 + $0x30] sm:$0x8] }
 0x1ff   : > { %18396 = vst [vmem:[#allocation24_spill] sm:$0xff] %v15479_v42  ;;  %v15488_v48 = vadd.f32 %v13080_v14, %v3380_v53  ;;  %v384_v14 = vld [vmem:[#allocation3 + $0x40] sm:$0x8]  ;;  %v382_v62 = vsel %vm15482_vm1, 0, %v381_v51  ;;  %v6216_v42 = vld [vmem:[#allocation3 + $0x8] sm:$0xf] }
 0x200   : > { %v15490_v46 = vpop.f32.mrf.mxu1  ;;  %v15492_v0 = vpop.f32.mrf.mxu0  ;;  %v385_v37 = vsel %vm15482_vm1, 0, %v384_v14  ;;  %383 = vst [vmem:[#allocation3 + $0x30] sm:$0x8] %v382_v62 }
 0x201   : > { %18400 = vst [vmem:[#allocation26_spill] sm:$0xff] %v15488_v48  ;;  %18401 = vst [vmem:[#allocation35_spill] sm:$0xff] %v15490_v46 }
 0x202   : > { %v15496_v26 = vpop.f32.mrf.mxu1  ;;  %v15498_v27 = vpop.f32.mrf.mxu0  ;;  %386 = vst [vmem:[#allocation3 + $0x40] sm:$0x8] %v385_v37 }
 0x203   : > { %18402 = vst [vmem:[#allocation28_spill] sm:$0xff] %v15496_v26 }
 0x204   : > { %v15502_v40 = vpop.f32.mrf.mxu1  ;;  %v15504_v53 = vpop.f32.mrf.mxu0 }
 0x205   : > { %18403 = vst [vmem:[#allocation37_spill] sm:$0xff] %v15502_v40  ;;  %18404 = vst [vmem:[#allocation32_spill] sm:$0xff] %v15504_v53  ;;  %v6271_v40 = vshll.u32 %v6215_v28, 16 }
 0x206   : > { %v15506_v23 = vpop.f32.mrf.mxu1  ;;  %v15510_v1 = vpop.f32.mrf.mxu0 }
 0x207   : > { %18405 = vst [vmem:[#allocation40_spill] sm:$0xff] %v15506_v23  ;;  %18406 = vst [vmem:[#allocation34_spill] sm:$0xff] %v15510_v1  ;;  %v12175_v23 = vcombine.low %v6215_v28, %v6216_v42 }
 0x208   : > { %v15512_v36 = vpop.f32.mrf.mxu1  ;;  %v15514_v12 = vpop.f32.mrf.mxu0 }
 0x209   : > { %18407 = vst [vmem:[#allocation42_spill] sm:$0xff] %v15512_v36  ;;  %18408 = vst [vmem:[#allocation41_spill] sm:$0xff] %v15514_v12  ;;  %v6268_v36 = vshrl.u32 %v6215_v28, 16  ;;  %v6277_v12 = vshrl.u32 %v6216_v42, 16  ;;  %13185 = vmatprep.mubr.msk.bf16.mxu1 %vm6697_vm2, %v12175_v23  ;;  %v18418_v23 = vmov 0 }
 0x20a   : > { %v15518_v2 = vpop.f32.mrf.mxu1  ;;  %v15520_v9 = vpop.f32.mrf.mxu0  ;;  %v18419_v23 = vsel %vm15543_vm5, 4294967295, %v18418_v23 }
 0x20b   : > { %18409 = vst [vmem:[#allocation48_spill] sm:$0xff] %v15518_v2  ;;  %18410 = vst [vmem:[#allocation36_spill] sm:$0xff] %v15520_v9  ;;  %v6214_v2 = vld [vmem:[#allocation3] sm:$0x8]  ;;  %v6270_v9 = vrot.slane %v6268_v36, 7  ;;  %v6279_v1 = vrot.slane %v6277_v12, 7 }
 0x20c   : > { %v15524_v48 = vpop.f32.mrf.mxu1  ;;  %v15526_v3 = vpop.f32.mrf.mxu0  ;;  %v6263_v62 = vshrl.u32 %v6214_v2, 16  ;;  %18420 = vst [vmem:[#allocation63_spill] sm:$0xff] %v18419_v23  ;;  %v18456_v23 = vld [vmem:[#allocation39_spill] sm:$0xff] }
 0x20d   : > { %18411 = vst [vmem:[#allocation44_spill] sm:$0xff] %v15524_v48  ;;  %18412 = vst [vmem:[#allocation5_spill] sm:$0xff] %v15526_v3  ;;  %v6280_v48 = vshll.u32 %v6216_v42, 16  ;;  %v6273_v26 = vor.u32 %v6271_v40, %v6270_v9  ;;  %v6275_v53 = vrot.slane %v6270_v9, 4  ;;  %v429_v42 = vld [vmem:[#allocation3 + $0x1c] sm:$0x1] }
 0x20e   : > { %v15528_v14 = vpop.f32.mrf.mxu1  ;;  %v15530_v37 = vpop.f32.mrf.mxu0  ;;  %v12158_v36 = vrot.slane %v6263_v62, 11  ;;  %v390_v40 = vld [vmem:[#allocation3 + $0x60] sm:$0x8]  ;;  %v430_v2 = vsel %vm15543_vm5, 0, %v429_v42 }
 0x20f   : > { %18413 = vst [vmem:[#allocation43_spill] sm:$0xff] %v15528_v14  ;;  %18414 = vst [vmem:[#allocation49_spill] sm:$0xff] %v15530_v37  ;;  %v6614_v37 = vld [vmem:[%s18264_s3] sm:$0x3]  ;;  %v6282_v28 = vor.u32 %v6280_v48, %v6279_v1 }
 0x210   : > { %v15533_v51 = vpop.f32.mrf.mxu1  ;;  %v15535_v3 = vpop.f32.mrf.mxu0  ;;  %13499 = vmatprep.subr.msk.bf16.mxu0 %vm6746_vm14, %v6614_v37  ;;  %v7008_v9 = vsel %vm6746_vm14, %v6614_v37, 0  ;;  %v6274_v48 = vsel %vm13892_vm8, %v12158_v36, %v6273_v26  ;;  %431 = vst [vmem:[#allocation3 + $0x1c] sm:$0x1] %v430_v2  ;;  %v391_v37 = vsel %vm15482_vm1, 0, %v390_v40 }
 0x211   : > { %18415 = vst [vmem:[#allocation45_spill] sm:$0xff] %v15533_v51  ;;  %18416 = vst [vmem:[#allocation50_spill] sm:$0xff] %v15535_v3  ;;  %13218 = vmatpush3.bf16.msra.mxu0 %v7008_v9  ;;  %v6283_v1 = vsel %vm13892_vm8, %v6275_v53, %v6282_v28  ;;  %v387_v51 = vld [vmem:[#allocation3 + $0x50] sm:$0x8] }
 0x212   : > { %v15537_v46 = vpop.f32.mrf.mxu1  ;;  %v15547_v12 = vpop.f32.mrf.mxu0  ;;  %v388_v42 = vsel %vm15482_vm1, 0, %v387_v51  ;;  %392 = vst [vmem:[#allocation3 + $0x60] sm:$0x8] %v391_v37  ;;  %v15581_v51 = vld [vmem:[%s18264_s3 + $0x4] sm:$0x3] }
 0x213   : > { %18417 = vst [vmem:[#allocation62_spill] sm:$0xff] %v15537_v46  ;;  %18421 = vst [vmem:[#allocation64_spill] sm:$0xff] %v15547_v12  ;;  %v12207_v12 = vcombine.low %v6274_v48, %v6283_v1  ;;  %13500 = vmatprep.subr.msk.bf16.mxu1 %vm6746_vm14, %v15581_v51 }
 0x214   : > { %v15553_v46 = vpop.f32.mrf.mxu1  ;;  %v15559_v62 = vpop.f32.mrf.mxu0  ;;  %389 = vst [vmem:[#allocation3 + $0x50] sm:$0x8] %v388_v42  ;;  %18429 = vst [vmem:[#allocation72_spill] sm:$0xff] %v15581_v51 }
 0x215   : > { %18422 = vst [vmem:[#allocation65_spill] sm:$0xff] %v15553_v46  ;;  %18423 = vst [vmem:[#allocation66_spill] sm:$0xff] %v15559_v62  ;;  %13219 = vmatprep.mubr.msk.bf16.mxu0 %vm6697_vm2, %v12207_v12 }
 0x216   : > { %v15563_v3 = vpop.f32.mrf.mxu1  ;;  %v13097_v9 = vpop.f32.mrf.mxu0 }
 0x217   : > { %18424 = vst [vmem:[#allocation67_spill] sm:$0xff] %v15563_v3  ;;  %v15569_v26 = vadd.f32 %v13097_v9, %v15429_v8  ;;  %v18458_v3 = vld [vmem:[#allocation46_spill] sm:$0xff] }
 0x218   : > { %v15571_v53 = vpop.f32.mrf.mxu1  ;;  %v4691_v36 = vpop.f32.mrf.mxu0 }
 0x219   : > { %18425 = vst [vmem:[#allocation68_spill] sm:$0xff] %v15569_v26  ;;  %18426 = vst [vmem:[#allocation69_spill] sm:$0xff] %v15571_v53  ;;  %v15574_v28 = vadd.f32 %v4691_v36, %v15431_v56  ;;  %v18453_v26 = vld [vmem:[#allocation22_spill] sm:$0xff] }
 0x21a   : > { %v15576_v40 = vpop.f32.mrf.mxu1  ;;  %v13098_v2 = vpop.f32.mrf.mxu0  ;;  %v18457_v53 = vld [vmem:[#allocation38_spill] sm:$0xff] }
 0x21b   : > { %18427 = vst [vmem:[#allocation70_spill] sm:$0xff] %v15574_v28  ;;  %18428 = vst [vmem:[#allocation71_spill] sm:$0xff] %v15576_v40  ;;  %v15586_v8 = vadd.f32 %v13098_v2, %v15435_v21  ;;  %v396_v21 = vld [vmem:[#allocation3 + $0x80] sm:$0x8] }
 0x21c   : > { %v15588_v12 = vpop.f32.mrf.mxu1  ;;  %v15590_v48 = vpop.f32.mrf.mxu0  ;;  %v18449_v28 = vld [vmem:[#allocation52_spill] sm:$0xff] }
 0x21d   : > { %18430 = vst [vmem:[#allocation73_spill] sm:$0xff] %v15586_v8  ;;  %18431 = vst [vmem:[#allocation74_spill] sm:$0xff] %v15588_v12  ;;  %v397_v8 = vsel %vm15482_vm1, 0, %v396_v21  ;;  %v18448_v12 = vld [vmem:[#allocation18_spill] sm:$0xff] }
 0x21e   : > { %18432 = vst [vmem:[#allocation75_spill] sm:$0xff] %v15590_v48  ;;  %v15592_v56 = vpop.f32.mrf.mxu1  ;;  %v13101_v1 = vpop.f32.mrf.mxu0  ;;  %398 = vst [vmem:[#allocation3 + $0x80] sm:$0x8] %v397_v8  ;;  %v18454_v48 = vld [vmem:[#allocation31_spill] sm:$0xff] }
 0x21f   : > { %18433 = vst [vmem:[#allocation76_spill] sm:$0xff] %v15592_v56  ;;  %v15595_v37 = vadd.f32 %v13101_v1, %v15443_v35  ;;  %v393_v35 = vld [vmem:[#allocation3 + $0x70] sm:$0x8] }
 0x220   : > { %v15597_v42 = vpop.f32.mrf.mxu1  ;;  %v4707_v9 = vpop.f32.mrf.mxu0 }
 0x221   : > { %18434 = vst [vmem:[#allocation77_spill] sm:$0xff] %v15595_v37  ;;  %18435 = vst [vmem:[#allocation78_spill] sm:$0xff] %v15597_v42  ;;  %v15600_v36 = vadd.f32 %v4707_v9, %v15445_v18  ;;  %v394_v18 = vsel %vm15482_vm1, 0, %v393_v35  ;;  %v18451_v35 = vld [vmem:[#allocation17_spill] sm:$0xff] }
 0x222   : > { %v15602_v60 = vpop.f32.mrf.mxu1  ;;  %v13102_v2 = vpop.f32.mrf.mxu0  ;;  %395 = vst [vmem:[#allocation3 + $0x70] sm:$0x8] %v394_v18 }
 0x223   : > { %18436 = vst [vmem:[#allocation79_spill] sm:$0xff] %v15600_v36  ;;  %18437 = vst [vmem:[#allocation80_spill] sm:$0xff] %v15602_v60  ;;  %v15607_v51 = vadd.f32 %v13102_v2, %v15448_v13  ;;  %v18442_v36 = vld [vmem:[#allocation7_spill] sm:$0xff]  ;;  %v18443_v60 = vld [vmem:[#allocation8_spill] sm:$0xff] }
 0x224   : > { %v15609_v56 = vpop.f32.mrf.mxu1  ;;  %v15611_v1 = vpop.f32.mrf.mxu0  ;;  %v1509_v37 = vadd.f32 %v18443_v60, %v18442_v36  ;;  %v18445_v13 = vld [vmem:[#allocation9_spill] sm:$0xff]  ;;  %v1573_v60 = vadd.f32 %v18454_v48, %v18453_v26  ;;  %v18455_v36 = vld [vmem:[#allocation30_spill] sm:$0xff] }
 0x225   : > { %18438 = vst [vmem:[#allocation81_spill] sm:$0xff] %v15607_v51  ;;  %18439 = vst [vmem:[#allocation82_spill] sm:$0xff] %v15609_v56  ;;  %v18446_v2 = vld [vmem:[#allocation13_spill] sm:$0xff]  ;;  %v18447_v56 = vld [vmem:[#allocation14_spill] sm:$0xff] }
 0x226   : > { %18440 = vst [vmem:[#allocation83_spill] sm:$0xff] %v15611_v1  ;;  %v15615_v9 = vpop.f32.mrf.mxu1  ;;  %v13105_v42 = vpop.f32.mrf.mxu0  ;;  %v1525_v51 = vadd.f32 %v18446_v2, %v18445_v13  ;;  %v1541_v8 = vadd.f32 %v18448_v12, %v18447_v56  ;;  %v2330_v1 = vadd.f32 %v18449_v28, %v1509_v37  ;;  %v1605_v13 = vadd.f32 %v18458_v3, %v18457_v53  ;;  %v402_v12 = vld [vmem:[#allocation3 + $0xa0] sm:$0x8]  ;;  %v18460_v28 = vld [vmem:[#allocation47_spill] sm:$0xff]  ;;  %v18462_v37 = vld [vmem:[#allocation53_spill] sm:$0xff] }
 0x227   : > { %18441 = vst [vmem:[#allocation84_spill] sm:$0xff] %v15615_v9  ;;  %v15627_v40 = vadd.f32 %v13105_v42, %v15456_v44  ;;  %v18452_v9 = vld [vmem:[#allocation23_spill] sm:$0xff]  ;;  %v403_v26 = vsel %vm15482_vm1, 0, %v402_v12  ;;  %v18463_v48 = vld [vmem:[#allocation54_spill] sm:$0xff]  ;;  %v18465_v3 = vld [vmem:[#allocation61_spill] sm:$0xff] }
 0x228   : > { %v15619_v21 = vpop.f32.mrf.mxu1  ;;  %v1557_v18 = vadd.f32 %v18452_v9, %v18451_v35  ;;  %v4723_v2 = vpop.f32.mrf.mxu0  ;;  %v18461_v56 = vld [vmem:[#allocation51_spill] sm:$0xff]  ;;  %v3024_v42 = vadd.f32 %v18462_v37, %v2330_v1  ;;  %v18464_v35 = vld [vmem:[#allocation57_spill] sm:$0xff]  ;;  %404 = vst [vmem:[#allocation3 + $0xa0] sm:$0x8] %v403_v26 }
 0x229   : > { %18444 = vst [vmem:[#allocation7_spill] sm:$0xff] %v15619_v21  ;;  %18450 = vst [vmem:[#allocation8_spill] sm:$0xff] %v15627_v40  ;;  %v1589_v21 = vadd.f32 %v18456_v23, %v18455_v36  ;;  %v1621_v44 = vadd.f32 %v18461_v56, %v18460_v28  ;;  %v15643_v9 = vadd.f32 %v4723_v2, %v15458_v20  ;;  %v18466_v40 = vld [vmem:[#allocation11_spill] sm:$0xff]  ;;  %v399_v28 = vld [vmem:[#allocation3 + $0x90] sm:$0x8] }
 0x22a   : > { %v15637_v46 = vpop.f32.mrf.mxu1  ;;  %v2334_v23 = vadd.f32 %v18463_v48, %v1525_v51  ;;  %v2338_v36 = vadd.f32 %v18464_v35, %v1541_v8  ;;  %v2342_v53 = vadd.f32 %v18465_v3, %v1557_v18  ;;  %v13106_v62 = vpop.f32.mrf.mxu0  ;;  %v18468_v1 = vld [vmem:[#allocation15_spill] sm:$0xff]  ;;  %v400_v51 = vsel %vm15482_vm1, 0, %v399_v28  ;;  %v18471_v8 = vld [vmem:[#allocation56_spill] sm:$0xff]  ;;  %v18474_v35 = vld [vmem:[#allocation58_spill] sm:$0xff] }
 0x22b   : > { %18459 = vst [vmem:[#allocation9_spill] sm:$0xff] %v15637_v46  ;;  %v2346_v46 = vadd.f32 %v18466_v40, %v1573_v60  ;;  %v2350_v56 = vadd.f32 %v18468_v1, %v1589_v21  ;;  %v18469_v20 = vld [vmem:[#allocation55_spill] sm:$0xff]  ;;  %v15656_v37 = vadd.f32 %v13106_v62, %v15461_v38  ;;  %v18472_v18 = vld [vmem:[#allocation60_spill] sm:$0xff]  ;;  %v18473_v40 = vld [vmem:[#allocation10_spill] sm:$0xff]  ;;  %v2358_v3 = vadd.f32 %v18474_v35, %v1621_v44 }
 0x22c   : > { %v15651_v14 = vpop.f32.mrf.mxu1  ;;  %v2354_v2 = vadd.f32 %v18469_v20, %v1605_v13  ;;  %v3028_v12 = vadd.f32 %v18471_v8, %v2334_v23  ;;  %v3032_v48 = vadd.f32 %v18472_v18, %v2338_v36  ;;  %v3036_v60 = vadd.f32 %v18473_v40, %v2342_v53  ;;  %401 = vst [vmem:[#allocation3 + $0x90] sm:$0x8] %v400_v51  ;;  %v18475_v21 = vld [vmem:[#allocation12_spill] sm:$0xff]  ;;  %v18477_v1 = vld [vmem:[#allocation59_spill] sm:$0xff]  ;;  %v18479_v23 = vld [vmem:[#allocation25_spill] sm:$0xff] }
 0x22d   : > { %18467 = vst [vmem:[#allocation13_spill] sm:$0xff] %v15651_v14  ;;  %18470 = vst [vmem:[#allocation14_spill] sm:$0xff] %v15656_v37  ;;  %v15664_v14 = vpop.f32.mrf.mxu0  ;;  %v3040_v13 = vadd.f32 %v18475_v21, %v2346_v46  ;;  %v18476_v38 = vld [vmem:[#allocation16_spill] sm:$0xff]  ;;  %v18478_v28 = vld [vmem:[#allocation19_spill] sm:$0xff]  ;;  %v3052_v8 = vadd.f32 %v18479_v23, %v2358_v3  ;;  %v4075_v44 = vadd.f32 %v15306_v19, %v15351_v47 }
 0x22e   : > { %v15666_v26 = vpop.f32.mrf.mxu1  ;;  %v3044_v62 = vadd.f32 %v18476_v38, %v2350_v56  ;;  %v3048_v20 = vadd.f32 %v18477_v1, %v2354_v2  ;;  %v3350_v37 = vadd.f32 %v18478_v28, %v3024_v42  ;;  %v18480_v36 = vld [vmem:[#allocation20_spill] sm:$0xff]  ;;  %v18481_v18 = vld [vmem:[#allocation27_spill] sm:$0xff]  ;;  %v18482_v46 = vld [vmem:[#allocation21_spill] sm:$0xff]  ;;  %v4081_v42 = vadd.f32 %v15335_v10, %v15367_v25 }
 0x22f   : > { %v4077_v53 = vadd.f32 %v18480_v36, %v15344_v17  ;;  %v3354_v40 = vadd.f32 %v18481_v18, %v3028_v12  ;;  %v13109_v35 = vpop.f32.mrf.mxu0  ;;  %v4078_v56 = vadd.f32 %v18482_v46, %v15361_v15  ;;  %v4079_v17 = vadd.f32 %v15356_v58, %v15373_v24  ;;  %v6223_v1 = vld [vmem:[#allocation3 + $0x30] sm:$0x8] }
 0x230   : > { %v15678_v51 = vpop.f32.mrf.mxu1  ;;  %v4076_v2 = vadd.f32 %v15324_v57, %v3350_v37  ;;  %v15686_v3 = vadd.f32 %v13109_v35, %v15467_v52  ;;  %v4082_v19 = vadd.f32 %v15369_v43, %v15377_v29  ;;  %v3358_v12 = vadd.f32 %v15337_v30, %v3032_v48  ;;  %v408_v57 = vld [vmem:[#allocation3 + $0xc0] sm:$0x8]  ;;  %v6217_v37 = vld [vmem:[#allocation3 + $0x10] sm:$0x8] }
 0x231   : > { %v4080_v47 = vadd.f32 %v15385_v34, %v3354_v40  ;;  %v4739_v21 = vpop.f32.mrf.mxu0  ;;  %v4085_v10 = vadd.f32 %v15393_v45, %v15380_v6  ;;  %v3362_v25 = vadd.f32 %v15398_v5, %v3036_v60  ;;  %v409_v58 = vsel %vm15482_vm1, 0, %v408_v57  ;;  %v405_v6 = vld [vmem:[#allocation3 + $0xb0] sm:$0x8]  ;;  %v6220_v48 = vld [vmem:[#allocation3 + $0x20] sm:$0x8] }
 0x232   : > { %v15694_v15 = vpop.f32.mrf.mxu1  ;;  %v15700_v52 = vadd.f32 %v4739_v21, %v15469_v39  ;;  %v4083_v43 = vadd.f32 %v15400_v11, %v15383_v33  ;;  %v4086_v30 = vadd.f32 %v15417_v16, %v15388_v55  ;;  %v3366_v24 = vadd.f32 %v15425_v50, %v3040_v13  ;;  %410 = vst [vmem:[#allocation3 + $0xc0] sm:$0x8] %v409_v58  ;;  %v6226_v60 = vld [vmem:[#allocation3 + $0x40] sm:$0x8]  ;;  %v18491_v40 = vld [vmem:[#allocation42_spill] sm:$0xff] }
 0x233   : > { %v3370_v29 = vadd.f32 %v15441_v31, %v3044_v62  ;;  %v13110_v34 = vpop.f32.mrf.mxu0  ;;  %v4084_v45 = vadd.f32 %v15420_v4, %v3358_v12  ;;  %v3374_v5 = vadd.f32 %v15454_v41, %v3048_v20  ;;  %v406_v33 = vsel %vm15482_vm1, 0, %v405_v6  ;;  %v18485_v20 = vld [vmem:[#allocation28_spill] sm:$0xff]  ;;  %v18492_v12 = vld [vmem:[#allocation5_spill] sm:$0xff]  ;;  %v18495_v6 = vld [vmem:[#allocation43_spill] sm:$0xff] }
 0x234   : > { %v15713_v39 = vadd.f32 %v13110_v34, %v15471_v54  ;;  %v4088_v55 = vadd.f32 %v15438_v61, %v3362_v25  ;;  %v15719_v11 = vadd.f32 %v15451_v49, %v3366_v24  ;;  %v3378_v4 = vadd.f32 %v15475_v7, %v3052_v8  ;;  %v15725_v50 = vpop.f32.mrf.mxu1  ;;  %407 = vst [vmem:[#allocation3 + $0xb0] sm:$0x8] %v406_v33  ;;  %v18483_v49 = vld [vmem:[#allocation35_spill] sm:$0xff]  ;;  %v18487_v8 = vld [vmem:[#allocation37_spill] sm:$0xff]  ;;  %v6229_v24 = vld [vmem:[#allocation3 + $0x50] sm:$0x8] }
 0x235   : > { %v15722_v16 = vadd.f32 %v15464_v32, %v3370_v29  ;;  %v15728_v31 = vadd.f32 %v15473_v59, %v3374_v5  ;;  %v4772_v41 = vadd.f32 %v15486_v22, %v4077_v53  ;;  %v4770_v54 = vadd.f32 %v15492_v0, %v4075_v44  ;;  %v18484_v32 = vld [vmem:[#allocation32_spill] sm:$0xff]  ;;  %v18486_v59 = vld [vmem:[#allocation34_spill] sm:$0xff]  ;;  %v15758_v25 = vpop.f32.mrf.mxu0  ;;  %v18496_v33 = vld [vmem:[#allocation49_spill] sm:$0xff] }
 0x236   : > { %v4773_v61 = vadd.f32 %v15498_v27, %v4078_v56  ;;  %v15734_v13 = vadd.f32 %v18483_v49, %v3378_v4  ;;  %v4771_v38 = vadd.f32 %v18484_v32, %v4076_v2  ;;  %v6285_v62 = vshrl.u32 %v6217_v37, 16  ;;  %v18488_v0 = vld [vmem:[#allocation40_spill] sm:$0xff]  ;;  %v18489_v27 = vld [vmem:[#allocation41_spill] sm:$0xff]  ;;  %v15752_v46 = vpop.f32.mrf.mxu1 }
 0x237   : > { %v6307_v7 = vshrl.u32 %v6220_v48, 16  ;;  %v15738_v28 = vadd.f32 %v18485_v20, %v4772_v41  ;;  %v4776_v23 = vadd.f32 %v18486_v59, %v4081_v42  ;;  %v15742_v22 = vadd.f32 %v18487_v8, %v4770_v54  ;;  %v18490_v44 = vld [vmem:[#allocation36_spill] sm:$0xff]  ;;  %v411_v48 = vld [vmem:[#allocation3 + $0xd0] sm:$0x8] }
 0x238   : > { %v15745_v36 = vadd.f32 %v18488_v0, %v4773_v61  ;;  %v4774_v53 = vadd.f32 %v18489_v27, %v4079_v17  ;;  %v4777_v18 = vadd.f32 %v18490_v44, %v4082_v19  ;;  %v15750_v35 = vadd.f32 %v18491_v40, %v4771_v38  ;;  %v414_v2 = vld [vmem:[#allocation3 + $0xe0] sm:$0x8]  ;;  %v18497_v41 = vld [vmem:[#allocation50_spill] sm:$0xff]  ;;  %v18498_v61 = vld [vmem:[#allocation45_spill] sm:$0xff] }
 0x239   : > { %v6351_v56 = vshrl.u32 %v6226_v60, 16  ;;  %v4775_v21 = vadd.f32 %v18492_v12, %v4080_v47  ;;  %v18493_v42 = vld [vmem:[#allocation48_spill] sm:$0xff]  ;;  %v6329_v58 = vshrl.u32 %v6223_v1, 16  ;;  %v415_v17 = vsel %vm15482_vm1, 0, %v414_v2  ;;  %v18500_v1 = vld [vmem:[#allocation66_spill] sm:$0xff]  ;;  %v18507_v2 = vld [vmem:[#allocation29_spill] sm:$0xff] }
 0x23a   : > { %v15756_v57 = vadd.f32 %v18493_v42, %v4776_v23  ;;  %v6232_v29 = vld [vmem:[#allocation3 + $0x60] sm:$0x8]  ;;  %v15766_v5 = vadd.f32 %v18495_v6, %v4777_v18  ;;  %v15768_v37 = vrot.slane %v6285_v62, 11  ;;  %v15770_v47 = vrot.slane %v6307_v7, 11  ;;  %416 = vst [vmem:[#allocation3 + $0xe0] sm:$0x8] %v415_v17  ;;  %v15781_v62 = vpop.f32.mrf.mxu1  ;;  %v13113_v0 = vpop.f32.mrf.mxu0 }
 0x23b   : > { %v18494_v19 = vld [vmem:[#allocation44_spill] sm:$0xff]  ;;  %v4780_v4 = vadd.f32 %v18496_v33, %v4085_v10  ;;  %v4778_v54 = vadd.f32 %v18497_v41, %v4083_v43  ;;  %v15775_v60 = vadd.f32 %v18498_v61, %v4775_v21  ;;  %v412_v49 = vsel %vm15482_vm1, 0, %v411_v48  ;;  %v18501_v23 = vld [vmem:[#allocation62_spill] sm:$0xff]  ;;  %v18502_v10 = vld [vmem:[#allocation65_spill] sm:$0xff] }
 0x23c   : > { %v15763_v34 = vadd.f32 %v18494_v19, %v4774_v53  ;;  %v18499_v32 = vld [vmem:[#allocation64_spill] sm:$0xff]  ;;  %v4779_v20 = vadd.f32 %v18500_v1, %v4084_v45  ;;  %v6373_v7 = vshrl.u32 %v6229_v24, 16  ;;  %v6395_v59 = vshrl.u32 %v6232_v29, 16  ;;  %413 = vst [vmem:[#allocation3 + $0xd0] sm:$0x8] %v412_v49  ;;  %v18506_v45 = vld [vmem:[#allocation69_spill] sm:$0xff]  ;;  %v4755_v41 = vpop.f32.mrf.mxu0 }
 0x23d   : > { %v4781_v38 = vadd.f32 %v18499_v32, %v4086_v30  ;;  %v15784_v8 = vadd.f32 %v18501_v23, %v4780_v4  ;;  %v15787_v43 = vadd.f32 %v18502_v10, %v4778_v54  ;;  %v15789_v27 = vrot.slane %v6329_v58, 11  ;;  %v360_v44 = vld [vmem:[#allocation3 + $0xc] sm:$0x1]  ;;  %v18505_v30 = vld [vmem:[#allocation67_spill] sm:$0xff]  ;;  %v6235_v21 = vld [vmem:[#allocation3 + $0x70] sm:$0x8] }
 0x23e   : > { %v15791_v53 = vrot.slane %v6351_v56, 11  ;;  %v15797_v40 = vadd.f32 %v18506_v45, %v4779_v20  ;;  %v15800_v12 = vadd.f32 %v13113_v0, %v18507_v2  ;;  %v6238_v42 = vld [vmem:[#allocation3 + $0x80] sm:$0x8]  ;;  %v361_v29 = vsel %vm15543_vm5, 0, %v360_v44  ;;  %v18509_v17 = vld [vmem:[#allocation75_spill] sm:$0xff]  ;;  %v18512_v48 = vld [vmem:[#allocation70_spill] sm:$0xff]  ;;  %v13147_v20 = vpop.f32.mrf.mxu1 }
 0x23f   : > { %18503 = vst [vmem:[#allocation18_spill] sm:$0xff] %v15789_v27  ;;  %v15794_v18 = vadd.f32 %v18505_v30, %v4781_v38  ;;  %v4783_v58 = vadd.f32 %v18509_v17, %v4088_v55  ;;  %v18510_v19 = vld [vmem:[#allocation68_spill] sm:$0xff]  ;;  %v18511_v56 = vld [vmem:[#allocation71_spill] sm:$0xff]  ;;  %v18513_v33 = vld [vmem:[#allocation74_spill] sm:$0xff]  ;;  %v15824_v23 = vrot.slane %v6373_v7, 11  ;;  %v15826_v10 = vrot.slane %v6395_v59, 11 }
 0x240   : > { %18504 = vst [vmem:[#allocation52_spill] sm:$0xff] %v15791_v53  ;;  %v15807_v6 = vadd.f32 %v18511_v56, %v18510_v19  ;;  %v15811_v4 = vadd.f32 %v18513_v33, %v18512_v48  ;;  %v18514_v54 = vld [vmem:[#allocation72_spill] sm:$0xff]  ;;  %362 = vst [vmem:[#allocation3 + $0xc] sm:$0x1] %v361_v29  ;;  %v18515_v49 = vld [vmem:[#allocation73_spill] sm:$0xff]  ;;  %v13114_v29 = vpop.f32.mrf.mxu0  ;;  %v6417_v17 = vshrl.u32 %v6235_v21, 16 }
 0x241   : > { %v15815_v61 = vsel %vm6746_vm14, %v18514_v54, 0  ;;  %v18516_v32 = vld [vmem:[#allocation76_spill] sm:$0xff]  ;;  %18518 = vst [vmem:[#allocation17_spill] sm:$0xff] %v15824_v23  ;;  %18519 = vst [vmem:[#allocation23_spill] sm:$0xff] %v15826_v10  ;;  %v18520_v44 = vld [vmem:[#allocation78_spill] sm:$0xff]  ;;  %v6439_v19 = vshrl.u32 %v6238_v42, 16 }
 0x242   : > { %v15819_v38 = vadd.f32 %v18516_v32, %v18515_v49  ;;  %v18517_v1 = vld [vmem:[#allocation24_spill] sm:$0xff]  ;;  %v15829_v30 = vadd.f32 %v18520_v44, %v4783_v58  ;;  %v18521_v45 = vld [vmem:[#allocation83_spill] sm:$0xff]  ;;  %v6241_v56 = vld [vmem:[#allocation3 + $0x90] sm:$0x8]  ;;  %v4758_v53 = vpop.f32.mrf.mxu0 }
 0x243   : > { %v15822_v55 = vadd.f32 %v4755_v41, %v18517_v1  ;;  %v6244_v0 = vld [vmem:[#allocation3 + $0xa0] sm:$0x8]  ;;  %v4787_v2 = vadd.f32 %v18521_v45, %v15719_v11  ;;  %v18522_v33 = vld [vmem:[#allocation77_spill] sm:$0xff]  ;;  %v18524_v7 = vld [vmem:[#allocation79_spill] sm:$0xff] }
 0x244   : > { %v6250_v48 = vld [vmem:[#allocation3 + $0xc0] sm:$0x8]  ;;  %v18525_v49 = vld [vmem:[#allocation82_spill] sm:$0xff]  ;;  %v18526_v32 = vld [vmem:[#allocation81_spill] sm:$0xff]  ;;  %v6483_v27 = vshrl.u32 %v6244_v0, 16 }
 0x245   : > { %v18523_v41 = vld [vmem:[#allocation80_spill] sm:$0xff]  ;;  %v15839_v59 = vadd.f32 %v18525_v49, %v18524_v7  ;;  %v18528_v44 = vld [vmem:[#allocation26_spill] sm:$0xff]  ;;  %v432_v21 = vld [vmem:[#allocation3 + $0x2c] sm:$0x1]  ;;  %v4791_v7 = vadd.f32 %v15664_v14, %v15722_v16  ;;  %v15872_v16 = vrot.slane %v6439_v19, 11  ;;  %v15888_v19 = vadd.f32 %v15725_v50, %v15700_v52 }
 0x246   : > { %v15835_v54 = vadd.f32 %v18523_v41, %v18522_v33  ;;  %v18527_v1 = vld [vmem:[#allocation84_spill] sm:$0xff]  ;;  %v4801_v10 = vadd.f32 %v13114_v29, %v18528_v44  ;;  %v6247_v11 = vld [vmem:[#allocation3 + $0xb0] sm:$0x8]  ;;  %v18529_v42 = vld [vmem:[#allocation7_spill] sm:$0xff]  ;;  %v433_v41 = vsel %vm15543_vm5, 0, %v432_v21  ;;  %v13153_v21 = vpop.f32.mrf.mxu0 }
 0x247   : > { %v15843_v58 = vadd.f32 %v18527_v1, %v18526_v32  ;;  %v417_v45 = vld [vmem:[#allocation3 + $0xf0] sm:$0x8]  ;;  %v15847_v23 = vadd.f32 %v18529_v42, %v4787_v2  ;;  %v18530_v49 = vld [vmem:[#allocation8_spill] sm:$0xff]  ;;  %v18531_v32 = vld [vmem:[#allocation9_spill] sm:$0xff]  ;;  %v5081_v2 = vpop.f32.mrf.mxu1  ;;  %v6461_v42 = vshrl.u32 %v6241_v56, 16  ;;  %v15879_v56 = vadd.f32 %v15694_v15, %v15686_v3 }
 0x248   : > { %v418_v33 = vsel %vm15482_vm1, 0, %v417_v45  ;;  %v15857_v29 = vadd.f32 %v18531_v32, %v18530_v49  ;;  %v18532_v1 = vld [vmem:[#allocation13_spill] sm:$0xff]  ;;  %434 = vst [vmem:[#allocation3 + $0x2c] sm:$0x1] %v433_v41  ;;  %v18533_v0 = vld [vmem:[#allocation14_spill] sm:$0xff]  ;;  %v6505_v49 = vshrl.u32 %v6247_v11, 16 }
 0x249   : > { %v15861_v44 = vadd.f32 %v18532_v1, %v15643_v9  ;;  %419 = vst [vmem:[#allocation3 + $0xf0] sm:$0x8] %v418_v33  ;;  %v15865_v45 = vadd.f32 %v15666_v26, %v18533_v0  ;;  %v15870_v14 = vld [vmem:[%s18263_s2] ss:$0 sm:$0xff]  ;;  %v6527_v32 = vshrl.u32 %v6250_v48, 16  ;;  %v15875_v9 = vadd.f32 %v15678_v51, %v4791_v7  ;;  %v5695_v48 = vpop.f32.mrf.mxu0  ;;  %v13148_v50 = vpop.f32.mrf.mxu1 }
 0x24a   : > { %v5824_v26 = vadd.f32 %v13153_v21, %v15738_v28  ;;  %v15882_v33 = vrot.slane %v6417_v17, 11  ;;  %v6256_v41 = vld [vmem:[#allocation3 + $0xe0] sm:$0x8]  ;;  %v426_v1 = vld [vmem:[#allocation3 + $0xc] sm:$0x1]  ;;  %v4795_v0 = vadd.f32 %v15758_v25, %v15728_v31  ;;  %v15890_v51 = vrot.slane %v6483_v27, 11 }
 0x24b   : > { %v15895_v3 = vld [vmem:[%s18264_s3 + $0x6] sm:$0x3]  ;;  %v427_v15 = vsel %vm15543_vm5, 0, %v426_v1  ;;  %v15901_v28 = vadd.f32 %v15752_v46, %v15713_v39  ;;  %v5822_v52 = vadd.f32 %v5695_v48, %v15742_v22  ;;  %v15907_v25 = vrot.slane %v6461_v42, 11  ;;  %v6253_v27 = vld [vmem:[#allocation3 + $0xd0] sm:$0x8]  ;;  %v13154_v11 = vpop.f32.mrf.mxu0 }
 0x24c   : > { %18534 = vst [vmem:[#allocation22_spill] sm:$0xff] %v15890_v51  ;;  %v15904_v31 = vadd.f32 %v15870_v14, %v5824_v26  ;;  %13501 = vmatprep.subr.msk.bf16.mxu0 %vm6746_vm14, %v15895_v3  ;;  %428 = vst [vmem:[#allocation3 + $0xc] sm:$0x1] %v427_v15  ;;  %v15912_v17 = vadd.f32 %v15781_v62, %v4795_v0  ;;  %v15914_v7 = vrot.slane %v6505_v49, 11  ;;  %v15916_v39 = vrot.slane %v6527_v32, 11  ;;  %v5084_v15 = vpop.f32.mrf.mxu1 }
 0x24d   : > { %18535 = vst [vmem:[#allocation31_spill] sm:$0xff] %v15907_v25  ;;  %v6571_v46 = vshrl.u32 %v6256_v41, 16  ;;  %v15919_v21 = vadd.f32 %v13147_v20, %v15800_v12  ;;  %v15923_v42 = vadd.f32 %v15870_v14, %v5822_v52  ;;  %v5825_v26 = vadd.f32 %v13154_v11, %v15745_v36  ;;  %v5698_v32 = vpop.f32.mrf.mxu0  ;;  %v7171_v41 = vld [vmem:[#allocation3 + $0x4] sm:$0xf]  ;;  %v7172_v48 = vld [vmem:[#allocation3 + $0x8] sm:$0xf] }
 0x24e   : > { %18536 = vst [vmem:[#allocation30_spill] sm:$0xff] %v15914_v7  ;;  %18537 = vst [vmem:[#allocation39_spill] sm:$0xff] %v15916_v39  ;;  %v5895_v22 = vmul.f32 0.5, %v15904_v31  ;;  %v4799_v1 = vadd.f32 %v4758_v53, %v15734_v13  ;;  %v15928_v62 = vadd.f32 %v5081_v2, %v15822_v55  ;;  %v15930_v49 = vadd.f32 %v13148_v50, %v4801_v10  ;;  %v7897_v52 = vld [vmem:[#allocation3 + $0x10] sm:$0x8] }
 0x24f   : > { %v6549_v0 = vshrl.u32 %v6253_v27, 16  ;;  %v5893_v12 = vmul.f32 0.5, %v15923_v42  ;;  %v15934_v20 = vadd.f32 %v15870_v14, %v5825_v26  ;;  %v5823_v36 = vadd.f32 %v5698_v32, %v15750_v35  ;;  %v13157_v13 = vpop.f32.mrf.mxu0 }
 0x250   : > { %13597 = vtanh.f32 %v5895_v22  ;;  %v15937_v53 = vrot.slane %v6571_v46, 11  ;;  %v7220_v55 = vshrl.u32 %v7171_v41, 16  ;;  %v7223_v10 = vshll.u32 %v7171_v41, 16 }
 0x251   : > { %v7229_v2 = vshll.u32 %v7172_v48, 16  ;;  %13599 = vtanh.f32 %v5893_v12  ;;  %v5896_v50 = vmul.f32 0.5, %v15934_v20  ;;  %v15941_v27 = vadd.f32 %v15870_v14, %v5823_v36  ;;  %v5711_v26 = vpop.f32.mrf.mxu0 }
 0x252   : > { %18538 = vst [vmem:[#allocation38_spill] sm:$0xff] %v15937_v53  ;;  %v5828_v11 = vadd.f32 %v13157_v13, %v15756_v57  ;;  %v15944_v22 = vadd.f32 %v5084_v15, %v4799_v1  ;;  %v7222_v35 = vrot.slane %v7220_v55, 4  ;;  %v7225_v32 = vrot.slane %v7223_v10, 5  ;;  %v6259_v53 = vld [vmem:[#allocation3 + $0xf0] sm:$0x8] }
 0x253   : > { %v7173_v63 = vld [vmem:[#allocation3 + $0xc] sm:$0x1]  ;;  %v7946_v39 = vshrl.u32 %v7897_v52, 16  ;;  %13601 = vtanh.f32 %v5896_v50  ;;  %v5894_v46 = vmul.f32 0.5, %v15941_v27  ;;  %v5826_v12 = vadd.f32 %v5711_v26, %v15763_v34  ;;  %v13158_v36 = vpop.f32.mrf.mxu0 }
 0x254   : > { %v15948_v41 = vadd.f32 %v15870_v14, %v5828_v11  ;;  %v7226_v7 = vor.u32 %v7225_v32, %v7222_v35  ;;  %v15951_v51 = vrot.slane %v7229_v2, 5  ;;  %v7233_v57 = vshrl.u32 %v7172_v48, 16  ;;  %v7176_v11 = vld [vmem:[#allocation3 + $0x1c] sm:$0x1]  ;;  %v7179_v35 = vld [vmem:[#allocation3 + $0x2c] sm:$0x1] }
 0x255   : > { %v7239_v1 = vshll.u32 %v7173_v63, 16  ;;  %13603 = vtanh.f32 %v5894_v46  ;;  %v15955_v52 = vadd.f32 %v15870_v14, %v5826_v12  ;;  %v5829_v13 = vadd.f32 %v13158_v36, %v15766_v5  ;;  %v5714_v55 = vpop.f32.mrf.mxu0  ;;  %v438_v32 = vld [vmem:[#allocation3 + $0x4c] sm:$0x1] }
 0x256   : > { %v5899_v15 = vmul.f32 0.5, %v15948_v41  ;;  %v15958_v10 = vrot.slane %v6549_v0, 11  ;;  %v6593_v50 = vshrl.u32 %v6259_v53, 16  ;;  %v7235_v34 = vrot.slane %v7233_v57, 4 }
 0x257   : > { %v15960_v26 = vrot.slane %v7946_v39, 11  ;;  %v5897_v48 = vmul.f32 0.5, %v15955_v52  ;;  %v15964_v63 = vadd.f32 %v15870_v14, %v5829_v13  ;;  %v5827_v2 = vadd.f32 %v5714_v55, %v15775_v60  ;;  %v435_v39 = vld [vmem:[#allocation3 + $0x3c] sm:$0x1]  ;;  %v13161_v60 = vpop.f32.mrf.mxu0 }
 0x258   : > { %18539 = vst [vmem:[#allocation46_spill] sm:$0xff] %v15958_v10  ;;  %13605 = vtanh.f32 %v5899_v15  ;;  %v15969_v5 = vsel %vm6746_vm14, %v15895_v3, 0  ;;  %v7227_v0 = vrot.slane %v7226_v7, 4  ;;  %v7236_v53 = vor.u32 %v7235_v34, %v15951_v51  ;;  %v7900_v15 = vld [vmem:[#allocation3 + $0x20] sm:$0x8] }
 0x259   : > { %18540 = vst [vmem:[#allocation47_spill] sm:$0xff] %v15960_v26  ;;  %v7241_v46 = vrot.slane %v7239_v1, 5  ;;  %13607 = vtanh.f32 %v5897_v48  ;;  %v5900_v12 = vmul.f32 0.5, %v15964_v63  ;;  %v15974_v36 = vadd.f32 %v15870_v14, %v5827_v2  ;;  %v15979_v3 = vld [vmem:[%s18264_s3 + $0x8] sm:$0x3]  ;;  %v5727_v10 = vpop.f32.mrf.mxu0 }
 0x25a   : > { %v7263_v57 = vshll.u32 %v7176_v11, 16  ;;  %v7237_v13 = vrot.slane %v7236_v53, 4  ;;  %v7287_v7 = vshll.u32 %v7179_v35, 16  ;;  %v436_v1 = vsel %vm15543_vm5, 0, %v435_v39  ;;  %v7903_v2 = vld [vmem:[#allocation3 + $0x30] sm:$0x8] }
 0x25b   : > { %v439_v55 = vsel %vm15543_vm5, 0, %v438_v32  ;;  %13609 = vtanh.f32 %v5900_v12  ;;  %v5898_v34 = vmul.f32 0.5, %v15974_v36  ;;  %v5832_v11 = vadd.f32 %v13161_v60, %v15784_v8  ;;  %437 = vst [vmem:[#allocation3 + $0x3c] sm:$0x1] %v436_v1  ;;  %v7906_v53 = vld [vmem:[#allocation3 + $0x40] sm:$0x8]  ;;  %v13162_v1 = vpop.f32.mrf.mxu0 }
 0x25c   : > { %v15987_v48 = vrot.slane %v6593_v50, 11  ;;  %440 = vst [vmem:[#allocation3 + $0x4c] sm:$0x1] %v439_v55  ;;  %v7232_v39 = vsel %vm14157_vm13, %v7227_v0, %v15951_v51  ;;  %v7242_v32 = vsel %vm14157_vm13, %v7237_v13, %v7241_v46  ;;  %v7968_v12 = vshrl.u32 %v7900_v15, 16 }
 0x25d   : > { %v13598_v26 = vpop.eup %13597  ;;  %v7990_v24 = vshrl.u32 %v7903_v2, 16  ;;  %13611 = vtanh.f32 %v5898_v34  ;;  %v15995_v8 = vadd.f32 %v15870_v14, %v5832_v11  ;;  %v5830_v50 = vadd.f32 %v5727_v10, %v15787_v43  ;;  %v5730_v10 = vpop.f32.mrf.mxu0 }
 0x25e   : > { %18541 = vst [vmem:[#allocation51_spill] sm:$0xff] %v15987_v48  ;;  %v5959_v25 = vmul.f32 0.5, %v13598_v26  ;;  %v13600_v60 = vpop.eup %13599  ;;  %v15998_v55 = vrot.slane %v7263_v57, 5  ;;  %v16002_v48 = vsel %vm6746_vm14, %v15979_v3, 0  ;;  %v16004_v51 = vrot.slane %v7287_v7, 5 }
 0x25f   : > { %v8012_v0 = vshrl.u32 %v7906_v53, 16  ;;  %v5957_v15 = vmul.f32 0.5, %v13600_v60  ;;  %v5903_v26 = vmul.f32 0.5, %v15995_v8  ;;  %v16008_v13 = vadd.f32 %v15870_v14, %v5830_v50 }
 0x260   : > { %18543 = vst [vmem:[#allocation53_spill] sm:$0xff] %v16004_v51  ;;  %v5991_v46 = vadd.f32 0.5, %v5959_v25  ;;  %v13602_v34 = vpop.eup %13601  ;;  %v5833_v43 = vadd.f32 %v13162_v1, %v15794_v18  ;;  %v16011_v57 = vcombine.low %v7232_v39, %v7242_v32  ;;  %v16013_v11 = vrot.slane %v7968_v12, 11 }
 0x261   : > { %v16015_v2 = vrot.slane %v7990_v24, 11  ;;  %v5989_v53 = vadd.f32 0.5, %v5957_v15  ;;  %v5960_v25 = vmul.f32 0.5, %v13602_v34  ;;  %13613 = vtanh.f32 %v5903_v26 }
 0x262   : > { %v6023_v7 = vmul.f32 %v5991_v46, %v15904_v31  ;;  %v13604_v60 = vpop.eup %13603  ;;  %v5901_v51 = vmul.f32 0.5, %v16008_v13  ;;  %v16020_v50 = vadd.f32 %v15870_v14, %v5833_v43  ;;  %v5831_v18 = vadd.f32 %v5730_v10, %v15797_v40  ;;  %v7182_v1 = vld [vmem:[#allocation3 + $0x3c] sm:$0x1]  ;;  %v13165_v10 = vpop.f32.mrf.mxu0 }
 0x263   : > { %18544 = vst [vmem:[#allocation54_spill] sm:$0xff] %v16015_v2  ;;  %v16023_v39 = vrot.slane %v8012_v0, 11  ;;  %v6021_v24 = vmul.f32 %v5989_v53, %v15923_v42  ;;  %v5992_v12 = vadd.f32 0.5, %v5960_v25  ;;  %v5958_v2 = vmul.f32 0.5, %v13604_v60 }
 0x264   : > { %v12541_v32 = vpack.c.bf16 %v6023_v7, %v6023_v7  ;;  %13615 = vtanh.f32 %v5901_v51  ;;  %v5904_v46 = vmul.f32 0.5, %v16020_v50  ;;  %v16028_v15 = vadd.f32 %v15870_v14, %v5831_v18  ;;  %v7185_v7 = vld [vmem:[#allocation3 + $0x4c] sm:$0x1] }
 0x265   : > { %v13606_v31 = vpop.eup %13605  ;;  %v7311_v26 = vshll.u32 %v7182_v1, 16  ;;  %v12539_v34 = vpack.c.bf16 %v6021_v24, %v6021_v24  ;;  %v6024_v40 = vmul.f32 %v5992_v12, %v15934_v20  ;;  %v5990_v0 = vadd.f32 0.5, %v5958_v2  ;;  %v5743_v20 = vpop.f32.mrf.mxu0 }
 0x266   : > { %6184 = vst.msk [vmem:[#allocation3 + $0x24] sm:$0xf] %vm354_vm15, %v12541_v32  ;;  %v5963_v43 = vmul.f32 0.5, %v13606_v31  ;;  %v13608_v42 = vpop.eup %13607  ;;  %13617 = vtanh.f32 %v5904_v46  ;;  %v5902_v53 = vmul.f32 0.5, %v16028_v15  ;;  %v5836_v51 = vadd.f32 %v13165_v10, %v15807_v6 }
 0x267   : > { %v16034_v25 = vrot.slane %v7311_v26, 5  ;;  %6182 = vst.msk [vmem:[#allocation3 + $0x14] sm:$0xf] %vm354_vm15, %v12539_v34  ;;  %v12542_v60 = vpack.c.bf16 %v6024_v40, %v6024_v40  ;;  %v6022_v18 = vmul.f32 %v5990_v0, %v15941_v27  ;;  %v5961_v32 = vmul.f32 0.5, %v13608_v42  ;;  %v13166_v40 = vpop.f32.mrf.mxu0 }
 0x268   : > { %v5995_v1 = vadd.f32 0.5, %v5963_v43  ;;  %v13610_v2 = vpop.eup %13609  ;;  %13619 = vtanh.f32 %v5902_v53  ;;  %v16039_v24 = vadd.f32 %v15870_v14, %v5836_v51  ;;  %v5834_v12 = vadd.f32 %v5743_v20, %v15811_v4 }
 0x269   : > { %v7335_v31 = vshll.u32 %v7185_v7, 16  ;;  %6185 = vst.msk [vmem:[#allocation3 + $0x28] sm:$0xf] %vm354_vm15, %v12542_v60  ;;  %v12540_v6 = vpack.c.bf16 %v6022_v18, %v6022_v18  ;;  %v5993_v26 = vadd.f32 0.5, %v5961_v32  ;;  %v5964_v34 = vmul.f32 0.5, %v13610_v2  ;;  %v5746_v51 = vpop.f32.mrf.mxu0 }
 0x26a   : > { %v6027_v46 = vmul.f32 %v5995_v1, %v15948_v41  ;;  %v13612_v27 = vpop.eup %13611  ;;  %v5907_v0 = vmul.f32 0.5, %v16039_v24  ;;  %v16046_v43 = vadd.f32 %v15870_v14, %v5834_v12  ;;  %v5837_v10 = vadd.f32 %v13166_v40, %v15819_v38 }
 0x26b   : > { %v16049_v42 = vrot.slane %v7335_v31, 5  ;;  %6183 = vst.msk [vmem:[#allocation3 + $0x18] sm:$0xf] %vm354_vm15, %v12540_v6  ;;  %v6025_v7 = vmul.f32 %v5993_v26, %v15955_v52  ;;  %v5996_v53 = vadd.f32 0.5, %v5964_v34  ;;  %v5962_v41 = vmul.f32 0.5, %v13612_v27  ;;  %v13169_v40 = vpop.f32.mrf.mxu0 }
 0x26c   : > { %v12545_v4 = vpack.c.bf16 %v6027_v46, %v6027_v46  ;;  %13621 = vtanh.f32 %v5907_v0  ;;  %v5905_v60 = vmul.f32 0.5, %v16046_v43  ;;  %v16055_v18 = vadd.f32 %v15870_v14, %v5837_v10 }
 0x26d   : > { %v5835_v1 = vadd.f32 %v5746_v51, %v15829_v30  ;;  %v16058_v32 = vld [vmem:[#allocation3 + $0x24] sm:$0xf]  ;;  %v12543_v38 = vpack.c.bf16 %v6025_v7, %v6025_v7  ;;  %v6028_v20 = vmul.f32 %v5996_v53, %v15964_v63  ;;  %v5994_v2 = vadd.f32 0.5, %v5962_v41  ;;  %v5759_v51 = vpop.f32.mrf.mxu0 }
 0x26e   : > { %6188 = vst.msk [vmem:[#allocation3 + $0x44] sm:$0xf] %vm354_vm15, %v12545_v4  ;;  %v6312_v52 = vshrl.u32 %v16058_v32, 16  ;;  %v13614_v12 = vpop.eup %13613  ;;  %13623 = vtanh.f32 %v5905_v60  ;;  %v5908_v31 = vmul.f32 0.5, %v16055_v18  ;;  %v16067_v46 = vld [vmem:[#allocation3 + $0x14] sm:$0xf]  ;;  %v5840_v10 = vadd.f32 %v13169_v40, %v15835_v54 }
 0x26f   : > { %v16065_v6 = vadd.f32 %v15870_v14, %v5835_v1  ;;  %6186 = vst.msk [vmem:[#allocation3 + $0x34] sm:$0xf] %vm354_vm15, %v12543_v38  ;;  %v12546_v26 = vpack.c.bf16 %v6028_v20, %v6028_v20  ;;  %v6026_v34 = vmul.f32 %v5994_v2, %v15974_v36  ;;  %v5967_v63 = vmul.f32 0.5, %v13614_v12 }
 0x270   : > { %v6290_v27 = vshrl.u32 %v16067_v46, 16  ;;  %13625 = vtanh.f32 %v5908_v31  ;;  %v6293_v4 = vshll.u32 %v16067_v46, 16  ;;  %v16079_v36 = vrot.slane %v6312_v52, 7  ;;  %v16087_v2 = vld [vmem:[#allocation3 + $0x28] sm:$0xf] }
 0x271   : > { %v5906_v0 = vmul.f32 0.5, %v16065_v6  ;;  %v13616_v7 = vpop.eup %13615  ;;  %6189 = vst.msk [vmem:[#allocation3 + $0x48] sm:$0xf] %vm354_vm15, %v12546_v26  ;;  %v12544_v53 = vpack.c.bf16 %v6026_v34, %v6026_v34  ;;  %v5999_v41 = vadd.f32 0.5, %v5967_v63  ;;  %v16082_v38 = vadd.f32 %v15870_v14, %v5840_v10  ;;  %v13170_v26 = vpop.f32.mrf.mxu0 }
 0x272   : > { %v16077_v60 = vrot.slane %v6290_v27, 7  ;;  %v5965_v1 = vmul.f32 0.5, %v13616_v7  ;;  %v5838_v20 = vadd.f32 %v5759_v51, %v15839_v59  ;;  %v16085_v54 = vld [vmem:[#allocation3 + $0x18] sm:$0xf]  ;;  %v6321_v51 = vshrl.u32 %v16087_v2, 16 }
 0x273   : > { %13627 = vtanh.f32 %v5906_v0  ;;  %v13618_v12 = vpop.eup %13617  ;;  %6187 = vst.msk [vmem:[#allocation3 + $0x38] sm:$0xf] %vm354_vm15, %v12544_v53  ;;  %v6031_v31 = vmul.f32 %v5999_v41, %v15995_v8  ;;  %v6299_v52 = vshrl.u32 %v16085_v54, 16  ;;  %v6302_v34 = vshll.u32 %v16085_v54, 16  ;;  %v5762_v8 = vpop.f32.mrf.mxu0 }
 0x274   : > { %v12176_v63 = vcombine.low %v16067_v46, %v16085_v54  ;;  %v5997_v40 = vadd.f32 0.5, %v5965_v1  ;;  %v5968_v27 = vmul.f32 0.5, %v13618_v12  ;;  %v5911_v59 = vmul.f32 0.5, %v16082_v38 }
 0x275   : > { %v16097_v0 = vadd.f32 %v15870_v14, %v5838_v20  ;;  %v13620_v10 = vpop.eup %13619  ;;  %v12549_v7 = vpack.c.bf16 %v6031_v31, %v6031_v31  ;;  %v5841_v53 = vadd.f32 %v13170_v26, %v15843_v58  ;;  %v6301_v41 = vrot.slane %v6299_v52, 7 }
 0x276   : > { %13186 = vmatmul.mubr.msk.bf16.vlgmr.msra.gmra.mxu1 %vm6697_vm2, %v12176_v63  ;;  %v6029_v30 = vmul.f32 %v5997_v40, %v16008_v13  ;;  %v6000_v46 = vadd.f32 0.5, %v5968_v27  ;;  %v5966_v1 = vmul.f32 0.5, %v13620_v10  ;;  %13629 = vtanh.f32 %v5911_v59 }
 0x277   : > { %13252 = vmatpush3.bf16.msra.mxu1 %v15815_v61  ;;  %6192 = vst.msk [vmem:[#allocation3 + $0x64] sm:$0xf] %vm354_vm15, %v12549_v7  ;;  %v5909_v20 = vmul.f32 0.5, %v16097_v0  ;;  %v16107_v54 = vadd.f32 %v15870_v14, %v5841_v53  ;;  %v5839_v58 = vadd.f32 %v5762_v8, %v15847_v23  ;;  %v16110_v12 = vrot.slane %v6321_v51, 7  ;;  %v16129_v51 = vld [vmem:[#allocation3 + $0x34] sm:$0xf] }
 0x278   : > { %13502 = vmatprep.subr.msk.bf16.mxu1 %vm6746_vm14, %v15979_v3  ;;  %v12547_v13 = vpack.c.bf16 %v6029_v30, %v6029_v30  ;;  %v6032_v31 = vmul.f32 %v6000_v46, %v16020_v50  ;;  %v5998_v26 = vadd.f32 0.5, %v5966_v1  ;;  %v6324_v61 = vshll.u32 %v16087_v2, 16  ;;  %v13173_v50 = vpop.f32.mrf.mxu0 }
 0x279   : > { %v13622_v52 = vpop.eup %13621  ;;  %13631 = vtanh.f32 %v5909_v20  ;;  %v5912_v63 = vmul.f32 0.5, %v16107_v54  ;;  %v16118_v40 = vadd.f32 %v15870_v14, %v5839_v58  ;;  %v12177_v23 = vcombine.low %v16058_v32, %v16087_v2 }
 0x27a   : > { %6190 = vst.msk [vmem:[#allocation3 + $0x54] sm:$0xf] %vm354_vm15, %v12547_v13  ;;  %v12550_v27 = vpack.c.bf16 %v6032_v31, %v6032_v31  ;;  %v6030_v3 = vmul.f32 %v5998_v26, %v16028_v15  ;;  %v5971_v30 = vmul.f32 0.5, %v13622_v52  ;;  %v6295_v59 = vor.u32 %v6293_v4, %v16077_v60  ;;  %v5775_v20 = vpop.f32.mrf.mxu0 }
 0x27b   : > { %v13624_v10 = vpop.eup %13623  ;;  %13633 = vtanh.f32 %v5912_v63  ;;  %v5910_v7 = vmul.f32 0.5, %v16118_v40  ;;  %v5844_v53 = vadd.f32 %v13173_v50, %v15857_v29  ;;  %13189 = vmatprep.mubr.msk.bf16.mxu1 %vm6697_vm2, %v12177_v23  ;;  %v6297_v8 = vrot.slane %v16077_v60, 4 }
 0x27c   : > { %6193 = vst.msk [vmem:[#allocation3 + $0x68] sm:$0xf] %vm354_vm15, %v12550_v27  ;;  %v12548_v46 = vpack.c.bf16 %v6030_v3, %v6030_v3  ;;  %v6003_v15 = vadd.f32 0.5, %v5971_v30  ;;  %v5969_v1 = vmul.f32 0.5, %v13624_v10  ;;  %v6296_v58 = vsel %vm13892_vm8, %v15768_v37, %v6295_v59  ;;  %v13174_v23 = vpop.f32.mrf.mxu0 }
 0x27d   : > { %v13626_v13 = vpop.eup %13625  ;;  %13635 = vtanh.f32 %v5910_v7  ;;  %v16136_v29 = vadd.f32 %v15870_v14, %v5844_v53  ;;  %v5842_v31 = vadd.f32 %v5775_v20, %v15861_v44  ;;  %v6304_v60 = vor.u32 %v6302_v34, %v6301_v41  ;;  %v16157_v20 = vld [vmem:[#allocation3 + $0x38] sm:$0xf] }
 0x27e   : > { %6191 = vst.msk [vmem:[#allocation3 + $0x58] sm:$0xf] %vm354_vm15, %v12548_v46  ;;  %v6035_v26 = vmul.f32 %v6003_v15, %v16039_v24  ;;  %v6001_v52 = vadd.f32 0.5, %v5969_v1  ;;  %v5972_v63 = vmul.f32 0.5, %v13626_v13  ;;  %v6334_v27 = vshrl.u32 %v16129_v51, 16  ;;  %v5778_v10 = vpop.f32.mrf.mxu0 }
 0x27f   : > { %v5915_v37 = vmul.f32 0.5, %v16136_v29  ;;  %v16144_v30 = vadd.f32 %v15870_v14, %v5842_v31  ;;  %v5845_v50 = vadd.f32 %v13174_v23, %v15865_v45  ;;  %v6305_v44 = vsel %vm13892_vm8, %v6297_v8, %v6304_v60 }
 0x280   : > { %v13628_v3 = vpop.eup %13627  ;;  %v12553_v34 = vpack.c.bf16 %v6035_v26, %v6035_v26  ;;  %v6033_v41 = vmul.f32 %v6001_v52, %v16046_v43  ;;  %v6004_v24 = vadd.f32 0.5, %v5972_v63  ;;  %v5843_v46 = vadd.f32 %v5778_v10, %v15875_v9 }
 0x281   : > { %v5970_v59 = vmul.f32 0.5, %v13628_v3  ;;  %13637 = vtanh.f32 %v5915_v37  ;;  %v5913_v7 = vmul.f32 0.5, %v16144_v30  ;;  %v16152_v53 = vadd.f32 %v15870_v14, %v5845_v50 }
 0x282   : > { %6196 = vst.msk [vmem:[#allocation3 + $0x84] sm:$0xf] %vm354_vm15, %v12553_v34  ;;  %v12551_v45 = vpack.c.bf16 %v6033_v41, %v6033_v41  ;;  %v6036_v15 = vmul.f32 %v6004_v24, %v16055_v18  ;;  %v12208_v1 = vcombine.low %v6296_v58, %v6305_v44  ;;  %v16161_v31 = vadd.f32 %v15870_v14, %v5843_v46  ;;  %v13177_v18 = vpop.f32.mrf.mxu0 }
 0x283   : > { %v6002_v8 = vadd.f32 0.5, %v5970_v59  ;;  %v13630_v43 = vpop.eup %13629  ;;  %13639 = vtanh.f32 %v5913_v7  ;;  %v5916_v13 = vmul.f32 0.5, %v16152_v53  ;;  %v16163_v60 = vrot.slane %v6334_v27, 7 }
 0x284   : > { %6194 = vst.msk [vmem:[#allocation3 + $0x74] sm:$0xf] %vm354_vm15, %v12551_v45  ;;  %v12554_v9 = vpack.c.bf16 %v6036_v15, %v6036_v15  ;;  %v5975_v52 = vmul.f32 0.5, %v13630_v43  ;;  %13220 = vmatmul.mubr.msk.bf16.vlgmr.msra.gmra.mxu0 %vm6697_vm2, %v12208_v1  ;;  %v6337_v58 = vshll.u32 %v16129_v51, 16  ;;  %v5914_v63 = vmul.f32 0.5, %v16161_v31  ;;  %v5791_v50 = vpop.f32.mrf.mxu0 }
 0x285   : > { %v6034_v26 = vmul.f32 %v6002_v8, %v16065_v6  ;;  %13641 = vtanh.f32 %v5916_v13  ;;  %v5848_v23 = vadd.f32 %v13177_v18, %v15879_v56  ;;  %v6343_v3 = vshrl.u32 %v16157_v20, 16  ;;  %13286 = vmatpush3.bf16.msra.mxu0 %v15969_v5 }
 0x286   : > { %v13632_v27 = vpop.eup %13631  ;;  %6197 = vst.msk [vmem:[#allocation3 + $0x88] sm:$0xf] %vm354_vm15, %v12554_v9  ;;  %v6007_v6 = vadd.f32 0.5, %v5975_v52  ;;  %v6346_v44 = vshll.u32 %v16157_v20, 16  ;;  %v12178_v34 = vcombine.low %v16129_v51, %v16157_v20  ;;  %13643 = vtanh.f32 %v5914_v63  ;;  %v13178_v10 = vpop.f32.mrf.mxu0 }
 0x287   : > { %v12552_v37 = vpack.c.bf16 %v6034_v26, %v6034_v26  ;;  %v5973_v41 = vmul.f32 0.5, %v13632_v27  ;;  %v16178_v24 = vadd.f32 %v15870_v14, %v5848_v23  ;;  %v5846_v56 = vadd.f32 %v5791_v50, %v15888_v19  ;;  %v16202_v23 = vld [vmem:[#allocation3 + $0x44] sm:$0xf] }
 0x288   : > { %v13634_v59 = vpop.eup %13633  ;;  %v6039_v5 = vmul.f32 %v6007_v6, %v16082_v38  ;;  %v16183_v7 = vrot.slane %v6343_v3, 7  ;;  %13190 = vmatmul.mubr.msk.bf16.gmra.mxu1 %vm6697_vm2, %v12178_v34  ;;  %v18546_v46 = vshll.u32 %v16058_v32, 16  ;;  %v6319_v15 = vrot.slane %v16079_v36, 4 }
 0x289   : > { %6195 = vst.msk [vmem:[#allocation3 + $0x78] sm:$0xf] %vm354_vm15, %v12552_v37  ;;  %v6005_v8 = vadd.f32 0.5, %v5973_v41  ;;  %v5976_v1 = vmul.f32 0.5, %v13634_v59  ;;  %v5919_v19 = vmul.f32 0.5, %v16178_v24  ;;  %v16192_v43 = vadd.f32 %v15870_v14, %v5846_v56 }
 0x28a   : > { %v6317_v45 = vor.u32 %v18546_v46, %v16079_v36  ;;  %v13636_v13 = vpop.eup %13635  ;;  %v12557_v38 = vpack.c.bf16 %v6039_v5, %v6039_v5  ;;  %v5849_v9 = vadd.f32 %v13178_v10, %v15901_v28  ;;  %v6326_v32 = vor.u32 %v6324_v61, %v16110_v12  ;;  %v5794_v36 = vpop.f32.mrf.mxu0  ;;  %v16213_v37 = vld [vmem:[#allocation3 + $0x48] sm:$0xf] }
 0x28b   : > { %v6037_v52 = vmul.f32 %v6005_v8, %v16097_v0  ;;  %v6008_v18 = vadd.f32 0.5, %v5976_v1  ;;  %v5974_v63 = vmul.f32 0.5, %v13636_v13  ;;  %13645 = vtanh.f32 %v5919_v19 }
 0x28c   : > { %v6318_v26 = vsel %vm13892_vm8, %v15770_v47, %v6317_v45  ;;  %6200 = vst.msk [vmem:[#allocation3 + $0xa4] sm:$0xf] %vm354_vm15, %v12557_v38  ;;  %v5917_v28 = vmul.f32 0.5, %v16192_v43  ;;  %v16207_v3 = vadd.f32 %v15870_v14, %v5849_v9  ;;  %v6327_v47 = vsel %vm13892_vm8, %v6319_v15, %v6326_v32 }
 0x28d   : > { %v5847_v2 = vadd.f32 %v5794_v36, %v15912_v17  ;;  %v12555_v12 = vpack.c.bf16 %v6037_v52, %v6037_v52  ;;  %v6040_v0 = vmul.f32 %v6008_v18, %v16107_v54  ;;  %v6006_v61 = vadd.f32 0.5, %v5974_v63  ;;  %v6231_v63 = vld [vmem:[#allocation3 + $0x58] sm:$0xf] }
 0x28e   : > { %v12209_v27 = vcombine.low %v6318_v26, %v6327_v47  ;;  %v13638_v6 = vpop.eup %13637  ;;  %13647 = vtanh.f32 %v5917_v28  ;;  %v5920_v50 = vmul.f32 0.5, %v16207_v3  ;;  %v6356_v41 = vshrl.u32 %v16202_v23, 16  ;;  %v18547_v47 = vld [vmem:[#allocation18_spill] sm:$0xff] }
 0x28f   : > { %v16217_v34 = vadd.f32 %v15870_v14, %v5847_v2  ;;  %6198 = vst.msk [vmem:[#allocation3 + $0x94] sm:$0xf] %vm354_vm15, %v12555_v12  ;;  %v12558_v56 = vpack.c.bf16 %v6040_v0, %v6040_v0  ;;  %v6038_v17 = vmul.f32 %v6006_v61, %v16118_v40  ;;  %v5979_v59 = vmul.f32 0.5, %v13638_v6  ;;  %v16228_v40 = vld [vmem:[#allocation3 + $0x54] sm:$0xf] }
 0x290   : > { %13223 = vmatprep.mubr.msk.bf16.mxu0 %vm6697_vm2, %v12209_v27  ;;  %v6359_v54 = vshll.u32 %v16202_v23, 16  ;;  %v13640_v5 = vpop.eup %13639  ;;  %13649 = vtanh.f32 %v5920_v50  ;;  %v6358_v46 = vrot.slane %v6356_v41, 7  ;;  %v6365_v45 = vshrl.u32 %v16213_v37, 16  ;;  %v16252_v41 = vld [vmem:[#allocation3 + $0x64] sm:$0xf] }
 0x291   : > { %v5918_v10 = vmul.f32 0.5, %v16217_v34  ;;  %6201 = vst.msk [vmem:[#allocation3 + $0xa8] sm:$0xf] %vm354_vm15, %v12558_v56  ;;  %v12556_v15 = vpack.c.bf16 %v6038_v17, %v6038_v17  ;;  %v6011_v8 = vadd.f32 0.5, %v5979_v59  ;;  %v5977_v1 = vmul.f32 0.5, %v13640_v5 }
 0x292   : > { %v6368_v19 = vshll.u32 %v16213_v37, 16  ;;  %v13642_v13 = vpop.eup %13641  ;;  %v6367_v38 = vrot.slane %v6365_v45, 7  ;;  %v12179_v9 = vcombine.low %v16202_v23, %v16213_v37  ;;  %v6339_v26 = vor.u32 %v6337_v58, %v16163_v60  ;;  %v16254_v56 = vld [vmem:[#allocation3 + $0x68] sm:$0xf] }
 0x293   : > { %13651 = vtanh.f32 %v5918_v10  ;;  %6199 = vst.msk [vmem:[#allocation3 + $0x98] sm:$0xf] %vm354_vm15, %v12556_v15  ;;  %v6043_v32 = vmul.f32 %v6011_v8, %v16136_v29  ;;  %v6009_v36 = vadd.f32 0.5, %v5977_v1  ;;  %v5980_v52 = vmul.f32 0.5, %v13642_v13  ;;  %v13644_v28 = vpop.eup %13643  ;;  %v18548_v1 = vld [vmem:[#allocation52_spill] sm:$0xff] }
 0x294   : > { %v6341_v18 = vrot.slane %v16163_v60, 4  ;;  %13193 = vmatprep.mubr.msk.bf16.mxu1 %vm6697_vm2, %v12179_v9  ;;  %v6340_v23 = vsel %vm13892_vm8, %v18547_v47, %v6339_v26  ;;  %v6348_v51 = vor.u32 %v6346_v44, %v16183_v7  ;;  %v6378_v58 = vshrl.u32 %v16228_v40, 16 }
 0x295   : > { %v6381_v29 = vshll.u32 %v16228_v40, 16  ;;  %v12561_v2 = vpack.c.bf16 %v6043_v32, %v6043_v32  ;;  %v6041_v12 = vmul.f32 %v6009_v36, %v16144_v30  ;;  %v6012_v60 = vadd.f32 0.5, %v5980_v52 }
 0x296   : > { %v5978_v0 = vmul.f32 0.5, %v13644_v28  ;;  %v6349_v61 = vsel %vm13892_vm8, %v6341_v18, %v6348_v51  ;;  %v6380_v27 = vrot.slane %v6378_v58, 7  ;;  %v6387_v37 = vshrl.u32 %v6231_v63, 16  ;;  %v13181_v36 = vpop.f32.mrf.mxu0 }
 0x297   : > { %v6390_v6 = vshll.u32 %v6231_v63, 16  ;;  %6204 = vst.msk [vmem:[#allocation3 + $0xc4] sm:$0xf] %vm354_vm15, %v12561_v2  ;;  %v12559_v50 = vpack.c.bf16 %v6041_v12, %v6041_v12  ;;  %v6044_v20 = vmul.f32 %v6012_v60, %v16152_v53  ;;  %v12210_v7 = vcombine.low %v6340_v23, %v6349_v61 }
 0x298   : > { %v6010_v44 = vadd.f32 0.5, %v5978_v0  ;;  %v13646_v30 = vpop.eup %13645  ;;  %v6389_v17 = vrot.slane %v6387_v37, 7  ;;  %v12180_v59 = vcombine.low %v16228_v40, %v6231_v63  ;;  %v6361_v5 = vor.u32 %v6359_v54, %v6358_v46  ;;  %v5807_v60 = vpop.f32.mrf.mxu0 }
 0x299   : > { %v6363_v10 = vrot.slane %v6358_v46, 4  ;;  %6202 = vst.msk [vmem:[#allocation3 + $0xb4] sm:$0xf] %vm354_vm15, %v12559_v50  ;;  %v12562_v45 = vpack.c.bf16 %v6044_v20, %v6044_v20  ;;  %v5983_v8 = vmul.f32 0.5, %v13646_v30  ;;  %13224 = vmatmul.mubr.msk.bf16.gmra.mxu0 %vm6697_vm2, %v12210_v7  ;;  %v6370_v53 = vor.u32 %v6368_v19, %v6367_v38 }
 0x29a   : > { %v6042_v15 = vmul.f32 %v6010_v44, %v16161_v31  ;;  %13194 = vmatmul.mubr.msk.bf16.gmra.mxu1 %vm6697_vm2, %v12180_v59  ;;  %v6362_v13 = vsel %vm13892_vm8, %v18548_v1, %v6361_v5  ;;  %v6400_v9 = vshrl.u32 %v16252_v41, 16  ;;  %v6403_v54 = vshll.u32 %v16252_v41, 16  ;;  %v6236_v44 = vld [vmem:[#allocation3 + $0x74] sm:$0xf] }
 0x29b   : > { %v6409_v46 = vshrl.u32 %v16254_v56, 16  ;;  %v13648_v40 = vpop.eup %13647  ;;  %6205 = vst.msk [vmem:[#allocation3 + $0xc8] sm:$0xf] %vm354_vm15, %v12562_v45  ;;  %v6015_v26 = vadd.f32 0.5, %v5983_v8  ;;  %v6371_v19 = vsel %vm13892_vm8, %v6363_v10, %v6370_v53  ;;  %v6412_v38 = vshll.u32 %v16254_v56, 16 }
 0x29c   : > { %v12560_v31 = vpack.c.bf16 %v6042_v15, %v6042_v15  ;;  %v5981_v32 = vmul.f32 0.5, %v13648_v40  ;;  %v12211_v52 = vcombine.low %v6362_v13, %v6371_v19  ;;  %v16271_v18 = vrot.slane %v6400_v9, 7  ;;  %v6237_v53 = vld [vmem:[#allocation3 + $0x78] sm:$0xf]  ;;  %v13741_v19 = vld [vmem:[%s18263_s2] ss:$0 sm:$0xff] }
 0x29d   : > { %v16273_v63 = vrot.slane %v6409_v46, 7  ;;  %v13650_v28 = vpop.eup %13649  ;;  %v6047_v47 = vmul.f32 %v6015_v26, %v16178_v24  ;;  %v5852_v23 = vadd.f32 %v13181_v36, %v15919_v21  ;;  %v12181_v51 = vcombine.low %v16252_v41, %v16254_v56  ;;  %v18549_v21 = vld [vmem:[#allocation17_spill] sm:$0xff] }
 0x29e   : > { %6203 = vst.msk [vmem:[#allocation3 + $0xb8] sm:$0xf] %vm354_vm15, %v12560_v31  ;;  %v6383_v58 = vor.u32 %v6381_v29, %v6380_v27  ;;  %v6013_v2 = vadd.f32 0.5, %v5981_v32  ;;  %v5984_v12 = vmul.f32 0.5, %v13650_v28  ;;  %13227 = vmatprep.mubr.msk.bf16.mxu0 %vm6697_vm2, %v12211_v52  ;;  %v6385_v0 = vrot.slane %v6380_v27, 4  ;;  %v13182_v27 = vpop.f32.mrf.mxu0 }
 0x29f   : > { %v6392_v61 = vor.u32 %v6390_v6, %v6389_v17  ;;  %v12565_v50 = vpack.c.bf16 %v6047_v47, %v6047_v47  ;;  %v16282_v20 = vadd.f32 %v15870_v14, %v5852_v23  ;;  %v5850_v24 = vadd.f32 %v5807_v60, %v15928_v62  ;;  %13197 = vmatprep.mubr.msk.bf16.mxu1 %vm6697_vm2, %v12181_v51  ;;  %v6240_v47 = vld [vmem:[#allocation3 + $0x88] sm:$0xf] }
 0x2a0   : > { %v13652_v37 = vpop.eup %13651  ;;  %v6384_v29 = vsel %vm13892_vm8, %v18549_v21, %v6383_v58  ;;  %v6045_v7 = vmul.f32 %v6013_v2, %v16192_v43  ;;  %v6016_v30 = vadd.f32 0.5, %v5984_v12  ;;  %v5853_v5 = vadd.f32 %v13182_v27, %v15930_v49  ;;  %v5810_v8 = vpop.f32.mrf.mxu0  ;;  %v18550_v2 = vld [vmem:[#allocation23_spill] sm:$0xff] }
 0x2a1   : > { %v5982_v59 = vmul.f32 0.5, %v13652_v37  ;;  %v6393_v6 = vsel %vm13892_vm8, %v6385_v0, %v6392_v61  ;;  %6208 = vst.msk [vmem:[#allocation3 + $0xe4] sm:$0xf] %vm354_vm15, %v12565_v50  ;;  %v5923_v17 = vmul.f32 0.5, %v16282_v20  ;;  %v16295_v62 = vadd.f32 %v15870_v14, %v5850_v24  ;;  %v6242_v0 = vld [vmem:[#allocation3 + $0x94] sm:$0xf] }
 0x2a2   : > { %v12212_v10 = vcombine.low %v6384_v29, %v6393_v6  ;;  %v12563_v45 = vpack.c.bf16 %v6045_v7, %v6045_v7  ;;  %v6048_v15 = vmul.f32 %v6016_v30, %v16207_v3  ;;  %v6422_v1 = vshrl.u32 %v6236_v44, 16 }
 0x2a3   : > { %v6014_v43 = vadd.f32 0.5, %v5982_v59  ;;  %13653 = vtanh.f32 %v5923_v17  ;;  %v5921_v13 = vmul.f32 0.5, %v16295_v62  ;;  %v16301_v9 = vadd.f32 %v15870_v14, %v5853_v5  ;;  %v6246_v5 = vld [vmem:[#allocation3 + $0xa8] sm:$0xf] }
 0x2a4   : > { %v5851_v46 = vadd.f32 %v5810_v8, %v15944_v22  ;;  %13228 = vmatmul.mubr.msk.bf16.gmra.mxu0 %vm6697_vm2, %v12212_v10  ;;  %6206 = vst.msk [vmem:[#allocation3 + $0xd4] sm:$0xf] %vm354_vm15, %v12563_v45  ;;  %v12566_v49 = vpack.c.bf16 %v6048_v15, %v6048_v15  ;;  %v6424_v3 = vrot.slane %v6422_v1, 7  ;;  %v6425_v31 = vshll.u32 %v6236_v44, 16  ;;  %v6239_v22 = vld [vmem:[#allocation3 + $0x84] sm:$0xf] }
 0x2a5   : > { %v6046_v40 = vmul.f32 %v6014_v43, %v16217_v34  ;;  %13655 = vtanh.f32 %v5921_v13  ;;  %v5924_v26 = vmul.f32 0.5, %v16301_v9  ;;  %v6431_v32 = vshrl.u32 %v6237_v53, 16 }
 0x2a6   : > { %v16311_v14 = vadd.f32 %v13741_v19, %v5851_v46  ;;  %6209 = vst.msk [vmem:[#allocation3 + $0xe8] sm:$0xf] %vm354_vm15, %v12566_v49  ;;  %v6434_v52 = vshll.u32 %v6237_v53, 16  ;;  %v12182_v28 = vcombine.low %v6236_v44, %v6237_v53  ;;  %v6405_v34 = vor.u32 %v6403_v54, %v16271_v18 }
 0x2a7   : > { %v12564_v36 = vpack.c.bf16 %v6046_v40, %v6046_v40  ;;  %13657 = vtanh.f32 %v5924_v26  ;;  %v6433_v51 = vrot.slane %v6431_v32, 7  ;;  %v6407_v58 = vrot.slane %v16271_v18, 4  ;;  %v6243_v18 = vld [vmem:[#allocation3 + $0x98] sm:$0xf] }
 0x2a8   : > { %v5922_v23 = vmul.f32 0.5, %v16311_v14  ;;  %13198 = vmatmul.mubr.msk.bf16.gmra.mxu1 %vm6697_vm2, %v12182_v28  ;;  %v6406_v12 = vsel %vm13892_vm8, %v18550_v2, %v6405_v34  ;;  %v6414_v41 = vor.u32 %v6412_v38, %v16273_v63  ;;  %v6444_v54 = vshrl.u32 %v6239_v22, 16  ;;  %v6245_v63 = vld [vmem:[#allocation3 + $0xa4] sm:$0xf] }
 0x2a9   : > { %6207 = vst.msk [vmem:[#allocation3 + $0xd8] sm:$0xf] %vm354_vm15, %v12564_v36  ;;  %v6447_v60 = vshll.u32 %v6239_v22, 16  ;;  %v6453_v61 = vshrl.u32 %v6240_v47, 16  ;;  %v6456_v37 = vshll.u32 %v6240_v47, 16  ;;  %v12183_v50 = vcombine.low %v6239_v22, %v6240_v47 }
 0x2aa   : > { %13659 = vtanh.f32 %v5922_v23  ;;  %v6415_v24 = vsel %vm13892_vm8, %v6407_v58, %v6414_v41  ;;  %v6446_v21 = vrot.slane %v6444_v54, 7  ;;  %v6427_v29 = vor.u32 %v6425_v31, %v6424_v3  ;;  %v6249_v36 = vld [vmem:[#allocation3 + $0xb8] sm:$0xf] }
 0x2ab   : > { %v6429_v44 = vrot.slane %v6424_v3, 4  ;;  %v12213_v7 = vcombine.low %v6406_v12, %v6415_v24  ;;  %v6455_v30 = vrot.slane %v6453_v61, 7  ;;  %13201 = vmatprep.mubr.msk.bf16.mxu1 %vm6697_vm2, %v12183_v50  ;;  %v6436_v56 = vor.u32 %v6434_v52, %v6433_v51  ;;  %v16339_v3 = vld [vmem:[#allocation3 + $0xb4] sm:$0xf]  ;;  %v18551_v23 = vld [vmem:[#allocation31_spill] sm:$0xff] }
 0x2ac   : > { %v6466_v38 = vshrl.u32 %v6242_v0, 16  ;;  %v6428_v59 = vsel %vm13892_vm8, %v15882_v33, %v6427_v29  ;;  %v6469_v27 = vshll.u32 %v6242_v0, 16  ;;  %v6475_v6 = vshrl.u32 %v6243_v18, 16 }
 0x2ad   : > { %v6478_v17 = vshll.u32 %v6243_v18, 16  ;;  %13231 = vmatprep.mubr.msk.bf16.mxu0 %vm6697_vm2, %v12213_v7  ;;  %v6437_v10 = vsel %vm13892_vm8, %v6429_v44, %v6436_v56  ;;  %v12184_v15 = vcombine.low %v6242_v0, %v6243_v18  ;;  %v6449_v43 = vor.u32 %v6447_v60, %v6446_v21 }
 0x2ae   : > { %v6468_v45 = vrot.slane %v6466_v38, 7  ;;  %v12214_v8 = vcombine.low %v6428_v59, %v6437_v10  ;;  %v6477_v53 = vrot.slane %v6475_v6, 7  ;;  %v6451_v1 = vrot.slane %v6446_v21, 4 }
 0x2af   : > { %v6458_v13 = vor.u32 %v6456_v37, %v6455_v30  ;;  %v6450_v33 = vsel %vm13892_vm8, %v15872_v16, %v6449_v43  ;;  %v6488_v46 = vshrl.u32 %v6245_v63, 16  ;;  %v6491_v49 = vshll.u32 %v6245_v63, 16  ;;  %v6251_v30 = vld [vmem:[#allocation3 + $0xc4] sm:$0xf] }
 0x2b0   : > { %v6497_v40 = vshrl.u32 %v6246_v5, 16  ;;  %v13654_v31 = vpop.eup %13653  ;;  %13232 = vmatmul.mubr.msk.bf16.gmra.mxu0 %vm6697_vm2, %v12214_v8  ;;  %13202 = vmatmul.mubr.msk.bf16.gmra.mxu1 %vm6697_vm2, %v12184_v15  ;;  %v6500_v19 = vshll.u32 %v6246_v5, 16  ;;  %v12185_v32 = vcombine.low %v6245_v63, %v6246_v5  ;;  %v6471_v22 = vor.u32 %v6469_v27, %v6468_v45 }
 0x2b1   : > { %v6459_v26 = vsel %vm13892_vm8, %v6451_v1, %v6458_v13  ;;  %v5987_v52 = vmul.f32 0.5, %v13654_v31  ;;  %v6490_v16 = vrot.slane %v6488_v46, 7  ;;  %v6473_v58 = vrot.slane %v6468_v45, 4  ;;  %v6252_v45 = vld [vmem:[#allocation3 + $0xc8] sm:$0xf] }
 0x2b2   : > { %v12215_v28 = vcombine.low %v6450_v33, %v6459_v26  ;;  %v6499_v34 = vrot.slane %v6497_v40, 7  ;;  %v13656_v47 = vpop.eup %13655  ;;  %13205 = vmatprep.mubr.msk.bf16.mxu1 %vm6697_vm2, %v12185_v32  ;;  %v6472_v51 = vsel %vm13892_vm8, %v18551_v23, %v6471_v22  ;;  %v6480_v2 = vor.u32 %v6478_v17, %v6477_v53  ;;  %v6254_v46 = vld [vmem:[#allocation3 + $0xd4] sm:$0xf]  ;;  %v6255_v26 = vld [vmem:[#allocation3 + $0xd8] sm:$0xf] }
 0x2b3   : > { %v6510_v12 = vshrl.u32 %v16339_v3, 16  ;;  %v6019_v41 = vadd.f32 0.5, %v5987_v52  ;;  %v5985_v54 = vmul.f32 0.5, %v13656_v47  ;;  %v6513_v60 = vshll.u32 %v16339_v3, 16  ;;  %v18553_v47 = vld [vmem:[#allocation30_spill] sm:$0xff] }
 0x2b4   : > { %13235 = vmatprep.mubr.msk.bf16.mxu0 %vm6697_vm2, %v12215_v28  ;;  %v6519_v0 = vshrl.u32 %v6249_v36, 16  ;;  %v13658_v61 = vpop.eup %13657  ;;  %v6481_v37 = vsel %vm13892_vm8, %v6473_v58, %v6480_v2  ;;  %v6522_v18 = vshll.u32 %v6249_v36, 16  ;;  %v12186_v24 = vcombine.low %v16339_v3, %v6249_v36  ;;  %v6258_v2 = vld [vmem:[#allocation3 + $0xe8] sm:$0xf] }
 0x2b5   : > { %v6512_v50 = vrot.slane %v6510_v12, 7  ;;  %v6051_v21 = vmul.f32 %v6019_v41, %v16282_v20  ;;  %v6017_v29 = vadd.f32 0.5, %v5985_v54  ;;  %v5988_v44 = vmul.f32 0.5, %v13658_v61  ;;  %v18552_v20 = vld [vmem:[#allocation22_spill] sm:$0xff] }
 0x2b6   : > { %v12216_v7 = vcombine.low %v6472_v51, %v6481_v37  ;;  %v6521_v38 = vrot.slane %v6519_v0, 7  ;;  %v6493_v63 = vor.u32 %v6491_v49, %v6490_v16  ;;  %v6495_v59 = vrot.slane %v6490_v16, 4 }
 0x2b7   : > { %v13660_v56 = vpop.eup %13659  ;;  %v6502_v27 = vor.u32 %v6500_v19, %v6499_v34  ;;  %v12569_v6 = vpack.c.bf16 %v6051_v21, %v6051_v21  ;;  %v6049_v17 = vmul.f32 %v6017_v29, %v16295_v62  ;;  %v6020_v5 = vadd.f32 0.5, %v5988_v44 }
 0x2b8   : > { %v5986_v10 = vmul.f32 0.5, %v13660_v56  ;;  %13236 = vmatmul.mubr.msk.bf16.gmra.mxu0 %vm6697_vm2, %v12216_v7  ;;  %13206 = vmatmul.mubr.msk.bf16.gmra.mxu1 %vm6697_vm2, %v12186_v24  ;;  %v6494_v15 = vsel %vm13892_vm8, %v18552_v20, %v6493_v63  ;;  %v6532_v8 = vshrl.u32 %v6251_v30, 16  ;;  %v6535_v53 = vshll.u32 %v6251_v30, 16  ;;  %v7174_v7 = vld [vmem:[#allocation3 + $0x14] sm:$0xf] }
 0x2b9   : > { %v6503_v43 = vsel %vm13892_vm8, %v6495_v59, %v6502_v27  ;;  %6212 = vst.msk [vmem:[#allocation3 + $0x104] sm:$0xf] %vm354_vm15, %v12569_v6  ;;  %v12567_v1 = vpack.c.bf16 %v6049_v17, %v6049_v17  ;;  %v6052_v62 = vmul.f32 %v6020_v5, %v16301_v9  ;;  %v6541_v40 = vshrl.u32 %v6252_v45, 16  ;;  %v7175_v59 = vld [vmem:[#allocation3 + $0x18] sm:$0xf]  ;;  %v18555_v20 = vld [vmem:[#allocation46_spill] sm:$0xff] }
 0x2ba   : > { %v6018_v13 = vadd.f32 0.5, %v5986_v10  ;;  %v12217_v33 = vcombine.low %v6494_v15, %v6503_v43  ;;  %v6534_v49 = vrot.slane %v6532_v8, 7  ;;  %v6544_v3 = vshll.u32 %v6252_v45, 16  ;;  %v12354_v27 = vld [vmem:[%s18264_s3 + $0xa] sm:$0x3] }
 0x2bb   : > { %v12187_v31 = vcombine.low %v6251_v30, %v6252_v45  ;;  %6210 = vst.msk [vmem:[#allocation3 + $0xf4] sm:$0xf] %vm354_vm15, %v12567_v1  ;;  %v12570_v19 = vpack.c.bf16 %v6052_v62, %v6052_v62  ;;  %v6515_v22 = vor.u32 %v6513_v60, %v6512_v50  ;;  %v6517_v36 = vrot.slane %v6512_v50, 4  ;;  %13503 = vmatprep.subr.msk.bf16.mxu0 %vm6746_vm14, %v12354_v27 }
 0x2bc   : > { %v6050_v32 = vmul.f32 %v6018_v13, %v16311_v14  ;;  %13239 = vmatprep.mubr.msk.bf16.mxu0 %vm6697_vm2, %v12217_v33  ;;  %v6543_v52 = vrot.slane %v6541_v40, 7  ;;  %v6524_v9 = vor.u32 %v6522_v18, %v6521_v38  ;;  %v6554_v28 = vshrl.u32 %v6254_v46, 16  ;;  %v6257_v14 = vld [vmem:[#allocation3 + $0xe4] sm:$0xf]  ;;  %v18554_v18 = vld [vmem:[#allocation39_spill] sm:$0xff] }
 0x2bd   : > { %13209 = vmatprep.mubr.msk.bf16.mxu1 %vm6697_vm2, %v12187_v31  ;;  %v6557_v16 = vshll.u32 %v6254_v46, 16  ;;  %6213 = vst.msk [vmem:[#allocation3 + $0x108] sm:$0xf] %vm354_vm15, %v12570_v19  ;;  %v6516_v23 = vsel %vm13892_vm8, %v18553_v47, %v6515_v22  ;;  %v6563_v51 = vshrl.u32 %v6255_v26, 16  ;;  %v6566_v58 = vshll.u32 %v6255_v26, 16  ;;  %v18556_v19 = vld [vmem:[#allocation38_spill] sm:$0xff] }
 0x2be   : > { %v12568_v34 = vpack.c.bf16 %v6050_v32, %v6050_v32  ;;  %v6525_v12 = vsel %vm13892_vm8, %v6517_v36, %v6524_v9  ;;  %v6556_v41 = vrot.slane %v6554_v28, 7  ;;  %v12188_v54 = vcombine.low %v6254_v46, %v6255_v26  ;;  %v7899_v47 = vld [vmem:[#allocation3 + $0x18] sm:$0xf] }
 0x2bf   : > { %v6537_v60 = vor.u32 %v6535_v53, %v6534_v49  ;;  %v12218_v0 = vcombine.low %v6516_v23, %v6525_v12  ;;  %v6565_v61 = vrot.slane %v6563_v51, 7  ;;  %v6539_v37 = vrot.slane %v6534_v49, 4 }
 0x2c0   : > { %6211 = vst.msk [vmem:[#allocation3 + $0xf8] sm:$0xf] %vm354_vm15, %v12568_v34  ;;  %v6546_v50 = vor.u32 %v6544_v3, %v6543_v52  ;;  %13210 = vmatmul.mubr.msk.bf16.gmra.mxu1 %vm6697_vm2, %v12188_v54  ;;  %v6576_v21 = vshrl.u32 %v6257_v14, 16  ;;  %v6579_v29 = vshll.u32 %v6257_v14, 16  ;;  %v6585_v44 = vshrl.u32 %v6258_v2, 16 }
 0x2c1   : > { %v6538_v24 = vsel %vm13892_vm8, %v18554_v18, %v6537_v60  ;;  %13240 = vmatmul.mubr.msk.bf16.gmra.mxu0 %vm6697_vm2, %v12218_v0  ;;  %v6588_v56 = vshll.u32 %v6258_v2, 16  ;;  %v12189_v38 = vcombine.low %v6257_v14, %v6258_v2  ;;  %v6559_v63 = vor.u32 %v6557_v16, %v6556_v41  ;;  %v7898_v52 = vld [vmem:[#allocation3 + $0x14] sm:$0xf]  ;;  %v7177_v2 = vld [vmem:[#allocation3 + $0x24] sm:$0xf] }
 0x2c2   : > { %v6547_v30 = vsel %vm13892_vm8, %v6539_v37, %v6546_v50  ;;  %v6578_v17 = vrot.slane %v6576_v21, 7  ;;  %v6587_v5 = vrot.slane %v6585_v44, 7  ;;  %v6561_v10 = vrot.slane %v6556_v41, 4  ;;  %v6260_v45 = vld [vmem:[#allocation3 + $0xf4] sm:$0xf] }
 0x2c3   : > { %v12219_v6 = vcombine.low %v6538_v24, %v6547_v30  ;;  %13213 = vmatprep.mubr.msk.bf16.mxu1 %vm6697_vm2, %v12189_v38  ;;  %v6560_v15 = vsel %vm13892_vm8, %v18555_v20, %v6559_v63  ;;  %v6568_v43 = vor.u32 %v6566_v58, %v6565_v61  ;;  %v6598_v8 = vshrl.u32 %v6260_v45, 16  ;;  %v7178_v0 = vld [vmem:[#allocation3 + $0x28] sm:$0xf]  ;;  %v18557_v61 = vld [vmem:[#allocation51_spill] sm:$0xff] }
 0x2c4   : > { %v6601_v53 = vshll.u32 %v6260_v45, 16  ;;  %v6581_v1 = vor.u32 %v6579_v29, %v6578_v17  ;;  %v6583_v62 = vrot.slane %v6578_v17, 4  ;;  %v6590_v13 = vor.u32 %v6588_v56, %v6587_v5  ;;  %v7901_v5 = vld [vmem:[#allocation3 + $0x24] sm:$0xf] }
 0x2c5   : > { %13243 = vmatprep.mubr.msk.bf16.mxu0 %vm6697_vm2, %v12219_v6  ;;  %v7244_v33 = vshrl.u32 %v7174_v7, 16  ;;  %v6569_v46 = vsel %vm13892_vm8, %v6561_v10, %v6568_v43  ;;  %v6600_v49 = vrot.slane %v6598_v8, 7  ;;  %v7247_v40 = vshll.u32 %v7174_v7, 16  ;;  %v18558_v8 = vld [vmem:[#allocation47_spill] sm:$0xff] }
 0x2c6   : > { %v7253_v3 = vshll.u32 %v7175_v59, 16  ;;  %v12220_v31 = vcombine.low %v6560_v15, %v6569_v46  ;;  %v6582_v32 = vsel %vm13892_vm8, %v18556_v19, %v6581_v1  ;;  %v6591_v22 = vsel %vm13892_vm8, %v6583_v62, %v6590_v13  ;;  %v7902_v15 = vld [vmem:[#allocation3 + $0x28] sm:$0xf] }
 0x2c7   : > { %v6261_v26 = vld [vmem:[#allocation3 + $0xf8] sm:$0xf]  ;;  %v7246_v36 = vrot.slane %v7244_v33, 4  ;;  %v12221_v34 = vcombine.low %v6582_v32, %v6591_v22  ;;  %v6603_v23 = vor.u32 %v6601_v53, %v6600_v49  ;;  %v6605_v51 = vrot.slane %v6600_v49, 4 }
 0x2c8   : > { %v6607_v9 = vshrl.u32 %v6261_v26, 16  ;;  %v6610_v28 = vshll.u32 %v6261_v26, 16  ;;  %v12190_v16 = vcombine.low %v6260_v45, %v6261_v26  ;;  %v7249_v58 = vrot.slane %v7247_v40, 5  ;;  %v7180_v40 = vld [vmem:[#allocation3 + $0x34] sm:$0xf] }
 0x2c9   : > { %v7255_v14 = vrot.slane %v7253_v3, 5  ;;  %13244 = vmatmul.mubr.msk.bf16.gmra.mxu0 %vm6697_vm2, %v12220_v31  ;;  %v7257_v41 = vshrl.u32 %v7175_v59, 16  ;;  %v7951_v54 = vshrl.u32 %v7898_v52, 16  ;;  %v7954_v60 = vshll.u32 %v7898_v52, 16  ;;  %v7181_v32 = vld [vmem:[#allocation3 + $0x38] sm:$0xf] }
 0x2ca   : > { %v6609_v12 = vrot.slane %v6607_v9, 7  ;;  %13214 = vmatmul.mubr.msk.bf16.gmra.mxu1 %vm6697_vm2, %v12190_v16  ;;  %13247 = vmatprep.mubr.msk.bf16.mxu0 %vm6697_vm2, %v12221_v34  ;;  %v6604_v37 = vsel %vm13892_vm8, %v18557_v61, %v6603_v23  ;;  %v7250_v50 = vor.u32 %v7249_v58, %v7246_v36  ;;  %v7960_v18 = vshrl.u32 %v7899_v47, 16  ;;  %v12403_v23 = vld [vmem:[%s18264_s3 + $0xc] sm:$0x3] }
 0x2cb   : > { %13253 = vmatprep.mubr.msk.bf16.mxu1 %vm6697_vm2, %v16011_v57  ;;  %v7963_v24 = vshll.u32 %v7899_v47, 16  ;;  %v7259_v29 = vrot.slane %v7257_v41, 4  ;;  %v7953_v44 = vrot.slane %v7951_v54, 7  ;;  %v7268_v7 = vshrl.u32 %v7177_v2, 16 }
 0x2cc   : > { %v6612_v21 = vor.u32 %v6610_v28, %v6609_v12  ;;  %v7251_v30 = vrot.slane %v7250_v50, 4  ;;  %v7962_v56 = vrot.slane %v7960_v18, 7  ;;  %v7271_v38 = vshll.u32 %v7177_v2, 16  ;;  %v7904_v2 = vld [vmem:[#allocation3 + $0x34] sm:$0xf] }
 0x2cd   : > { %v7277_v63 = vshll.u32 %v7178_v0, 16  ;;  %v7260_v27 = vor.u32 %v7259_v29, %v7255_v14  ;;  %v7956_v6 = vor.u32 %v7954_v60, %v7953_v44  ;;  %v7958_v17 = vrot.slane %v7953_v44, 4  ;;  %v7183_v44 = vld [vmem:[#allocation3 + $0x44] sm:$0xf] }
 0x2ce   : > { %v6613_v59 = vsel %vm13892_vm8, %v6605_v51, %v6612_v21  ;;  %v7256_v57 = vsel %vm14157_vm13, %v7251_v30, %v7255_v14  ;;  %v7965_v45 = vor.u32 %v7963_v24, %v7962_v56  ;;  %v7270_v20 = vrot.slane %v7268_v7, 4  ;;  %v18559_v7 = vld [vmem:[#allocation53_spill] sm:$0xff] }
 0x2cf   : > { %v12222_v10 = vcombine.low %v6604_v37, %v6613_v59  ;;  %v7261_v43 = vrot.slane %v7260_v27, 4  ;;  %v7957_v53 = vsel %vm13892_vm8, %v18558_v8, %v7956_v6  ;;  %v7273_v1 = vrot.slane %v7271_v38, 5  ;;  %v7184_v59 = vld [vmem:[#allocation3 + $0x48] sm:$0xf] }
 0x2d0   : > { %v7279_v62 = vrot.slane %v7277_v63, 5  ;;  %v7966_v13 = vsel %vm13892_vm8, %v7958_v17, %v7965_v45  ;;  %v7281_v33 = vshrl.u32 %v7178_v0, 16  ;;  %v7973_v46 = vshrl.u32 %v7901_v5, 16  ;;  %v7905_v0 = vld [vmem:[#allocation3 + $0x38] sm:$0xf] }
 0x2d1   : > { %v7976_v49 = vshll.u32 %v7901_v5, 16  ;;  %13248 = vmatmul.mubr.msk.bf16.gmra.mxu0 %vm6697_vm2, %v12222_v10  ;;  %v7266_v3 = vsel %vm14157_vm13, %v7261_v43, %v15998_v55  ;;  %v12289_v31 = vcombine.low %v7957_v53, %v7966_v13  ;;  %v7274_v26 = vor.u32 %v7273_v1, %v7270_v20  ;;  %v7907_v20 = vld [vmem:[#allocation3 + $0x44] sm:$0xf] }
 0x2d2   : > { %v7982_v19 = vshrl.u32 %v7902_v15, 16  ;;  %v12241_v22 = vcombine.low %v7256_v57, %v7266_v3  ;;  %v7283_v36 = vrot.slane %v7281_v33, 4  ;;  %v7975_v52 = vrot.slane %v7973_v46, 7  ;;  %v441_v46 = vld [vmem:[#allocation3 + $0x5c] sm:$0x1] }
 0x2d3   : > { %v7985_v9 = vshll.u32 %v7902_v15, 16  ;;  %13287 = vmatprep.mubr.msk.bf16.mxu0 %vm6697_vm2, %v12289_v31  ;;  %v7275_v28 = vrot.slane %v7274_v26, 4  ;;  %v7292_v34 = vshrl.u32 %v7180_v40, 16  ;;  %v7295_v47 = vshll.u32 %v7180_v40, 16  ;;  %v7908_v26 = vld [vmem:[#allocation3 + $0x48] sm:$0xf] }
 0x2d4   : > { %v7984_v16 = vrot.slane %v7982_v19, 7  ;;  %13254 = vmatmul.mubr.msk.bf16.vlgmr.msra.gmra.mxu1 %vm6697_vm2, %v12241_v22  ;;  %v7284_v55 = vor.u32 %v7283_v36, %v7279_v62  ;;  %v7978_v51 = vor.u32 %v7976_v49, %v7975_v52  ;;  %v7980_v58 = vrot.slane %v7975_v52, 4  ;;  %v18560_v49 = vld [vmem:[#allocation54_spill] sm:$0xff] }
 0x2d5   : > { %v7301_v14 = vshll.u32 %v7181_v32, 16  ;;  %13320 = vmatpush3.bf16.msra.mxu1 %v16002_v48  ;;  %v7280_v12 = vsel %vm14157_vm13, %v7275_v28, %v7279_v62  ;;  %v7294_v54 = vrot.slane %v7292_v34, 4  ;;  %v7297_v60 = vrot.slane %v7295_v47, 5 }
 0x2d6   : > { %v7987_v41 = vor.u32 %v7985_v9, %v7984_v16  ;;  %v7285_v61 = vrot.slane %v7284_v55, 4  ;;  %v7979_v37 = vsel %vm13892_vm8, %v16013_v11, %v7978_v51  ;;  %v7305_v18 = vshrl.u32 %v7181_v32, 16  ;;  %13504 = vmatprep.subr.msk.bf16.mxu1 %vm6746_vm14, %v12403_v23  ;;  %v7186_v9 = vld [vmem:[#allocation3 + $0x54] sm:$0xf]  ;;  %v7187_v23 = vld [vmem:[#allocation3 + $0x58] sm:$0xf] }
 0x2d7   : > { %v7303_v50 = vrot.slane %v7301_v14, 5  ;;  %v7298_v48 = vor.u32 %v7297_v60, %v7294_v54  ;;  %v7995_v21 = vshrl.u32 %v7904_v2, 16  ;;  %v7998_v29 = vshll.u32 %v7904_v2, 16  ;;  %v7909_v60 = vld [vmem:[#allocation3 + $0x50] sm:$0x8] }
 0x2d8   : > { %v7988_v24 = vsel %vm13892_vm8, %v7980_v58, %v7987_v41  ;;  %v7290_v30 = vsel %vm14157_vm13, %v7285_v61, %v18559_v7  ;;  %v7307_v38 = vrot.slane %v7305_v18, 4  ;;  %v8004_v63 = vshrl.u32 %v7905_v0, 16  ;;  %v7910_v18 = vld [vmem:[#allocation3 + $0x54] sm:$0xf]  ;;  %v16957_v14 = vld [vmem:[#allocation3 + $0x48] sm:$0xf] }
 0x2d9   : > { %v12290_v56 = vcombine.low %v7979_v37, %v7988_v24  ;;  %v12242_v11 = vcombine.low %v7280_v12, %v7290_v30  ;;  %v7299_v27 = vrot.slane %v7298_v48, 4  ;;  %v7997_v6 = vrot.slane %v7995_v21, 7 }
 0x2da   : > { %v8007_v17 = vshll.u32 %v7905_v0, 16  ;;  %v7308_v5 = vor.u32 %v7307_v38, %v7303_v50  ;;  %v8006_v10 = vrot.slane %v8004_v63, 7  ;;  %v7316_v57 = vshrl.u32 %v7183_v44, 16  ;;  %v7911_v38 = vld [vmem:[#allocation3 + $0x58] sm:$0xf] }
 0x2db   : > { %13288 = vmatmul.mubr.msk.bf16.vlgmr.msra.gmra.mxu0 %vm6697_vm2, %v12290_v56  ;;  %v7319_v45 = vshll.u32 %v7183_v44, 16  ;;  %13257 = vmatprep.mubr.msk.bf16.mxu1 %vm6697_vm2, %v12242_v11  ;;  %v7304_v15 = vsel %vm14157_vm13, %v7299_v27, %v7303_v50  ;;  %v8000_v43 = vor.u32 %v7998_v29, %v7997_v6  ;;  %v8002_v8 = vrot.slane %v7997_v6, 4  ;;  %v444_v44 = vld [vmem:[#allocation3 + $0x6c] sm:$0x1] }
 0x2dc   : > { %v7325_v53 = vshll.u32 %v7184_v59, 16  ;;  %v7309_v1 = vrot.slane %v7308_v5, 4  ;;  %v8009_v62 = vor.u32 %v8007_v17, %v8006_v10  ;;  %v7318_v13 = vrot.slane %v7316_v57, 4  ;;  %v7189_v17 = vld [vmem:[#allocation3 + $0x64] sm:$0xf] }
 0x2dd   : > { %v7321_v33 = vrot.slane %v7319_v45, 5  ;;  %v8001_v40 = vsel %vm13892_vm8, %v18560_v49, %v8000_v43  ;;  %v7329_v31 = vshrl.u32 %v7184_v59, 16  ;;  %v8017_v19 = vshrl.u32 %v7907_v20, 16 }
 0x2de   : > { %v7327_v3 = vrot.slane %v7325_v53, 5  ;;  %v7314_v32 = vsel %vm14157_vm13, %v7309_v1, %v16034_v25  ;;  %v8010_v22 = vsel %vm13892_vm8, %v8002_v8, %v8009_v62  ;;  %v8020_v52 = vshll.u32 %v7907_v20, 16  ;;  %v7190_v8 = vld [vmem:[#allocation3 + $0x68] sm:$0xf]  ;;  %v7912_v53 = vld [vmem:[#allocation3 + $0x60] sm:$0x8] }
 0x2df   : > { %v7322_v36 = vor.u32 %v7321_v33, %v7318_v13  ;;  %v12243_v28 = vcombine.low %v7304_v15, %v7314_v32  ;;  %v12291_v16 = vcombine.low %v8001_v40, %v8010_v22  ;;  %v7331_v34 = vrot.slane %v7329_v31, 4  ;;  %v7913_v31 = vld [vmem:[#allocation3 + $0x64] sm:$0xf] }
 0x2e0   : > { %v8019_v47 = vrot.slane %v8017_v19, 7  ;;  %v8026_v51 = vshrl.u32 %v7908_v26, 16  ;;  %v8029_v58 = vshll.u32 %v7908_v26, 16  ;;  %v442_v2 = vsel %vm15543_vm5, 0, %v441_v46 }
 0x2e1   : > { %v7323_v55 = vrot.slane %v7322_v36, 4  ;;  %13258 = vmatmul.mubr.msk.bf16.gmra.mxu1 %vm6697_vm2, %v12243_v28  ;;  %13291 = vmatprep.mubr.msk.bf16.mxu0 %vm6697_vm2, %v12291_v16  ;;  %v7332_v25 = vor.u32 %v7331_v34, %v7327_v3  ;;  %443 = vst [vmem:[#allocation3 + $0x5c] sm:$0x1] %v442_v2  ;;  %v7340_v54 = vshrl.u32 %v7186_v9, 16  ;;  %v7343_v37 = vshll.u32 %v7186_v9, 16 }
 0x2e2   : > { %v8022_v12 = vor.u32 %v8020_v52, %v8019_v47  ;;  %v8024_v41 = vrot.slane %v8019_v47, 4  ;;  %v8028_v61 = vrot.slane %v8026_v51, 7  ;;  %v7349_v50 = vshll.u32 %v7187_v23, 16  ;;  %v447_v16 = vld [vmem:[#allocation3 + $0x7c] sm:$0x1] }
 0x2e3   : > { %v7328_v0 = vsel %vm14157_vm13, %v7323_v55, %v7327_v3  ;;  %v7333_v24 = vrot.slane %v7332_v25, 4  ;;  %v7342_v21 = vrot.slane %v7340_v54, 4  ;;  %v7353_v29 = vshrl.u32 %v7187_v23, 16  ;;  %v7914_v23 = vld [vmem:[#allocation3 + $0x68] sm:$0xf] }
 0x2e4   : > { %v8023_v48 = vsel %vm13892_vm8, %v16023_v39, %v8022_v12  ;;  %v8031_v7 = vor.u32 %v8029_v58, %v8028_v61  ;;  %v7345_v30 = vrot.slane %v7343_v37, 5  ;;  %v7351_v56 = vrot.slane %v7349_v50, 5 }
 0x2e5   : > { %v8034_v63 = vshrl.u32 %v7909_v60, 16  ;;  %v7338_v59 = vsel %vm14157_vm13, %v7333_v24, %v16049_v42  ;;  %v7355_v11 = vrot.slane %v7353_v29, 4  ;;  %v8039_v27 = vshrl.u32 %v7910_v18, 16 }
 0x2e6   : > { %v8042_v6 = vshll.u32 %v7910_v18, 16  ;;  %v12244_v5 = vcombine.low %v7328_v0, %v7338_v59  ;;  %v8032_v39 = vsel %vm13892_vm8, %v8024_v41, %v8031_v7  ;;  %v7346_v10 = vor.u32 %v7345_v30, %v7342_v21  ;;  %v7192_v41 = vld [vmem:[#allocation3 + $0x74] sm:$0xf]  ;;  %v7915_v21 = vld [vmem:[#allocation3 + $0x70] sm:$0x8] }
 0x2e7   : > { %v12276_v57 = vrot.slane %v8034_v63, 11  ;;  %v12292_v45 = vcombine.low %v8023_v48, %v8032_v39  ;;  %v7356_v20 = vor.u32 %v7355_v11, %v7351_v56  ;;  %v8041_v15 = vrot.slane %v8039_v27, 7  ;;  %v7193_v48 = vld [vmem:[#allocation3 + $0x78] sm:$0xf]  ;;  %v7916_v27 = vld [vmem:[#allocation3 + $0x74] sm:$0xf] }
 0x2e8   : > { %v8048_v43 = vshrl.u32 %v7911_v38, 16  ;;  %13261 = vmatprep.mubr.msk.bf16.mxu1 %vm6697_vm2, %v12244_v5  ;;  %v7188_v1 = vld [vmem:[#allocation3 + $0x5c] sm:$0x1]  ;;  %v7347_v42 = vrot.slane %v7346_v10, 4  ;;  %v8051_v62 = vshll.u32 %v7911_v38, 16  ;;  %v445_v13 = vsel %vm15543_vm5, 0, %v444_v44 }
 0x2e9   : > { %v7364_v33 = vshrl.u32 %v7189_v17, 16  ;;  %13292 = vmatmul.mubr.msk.bf16.gmra.mxu0 %vm6697_vm2, %v12292_v45  ;;  %v7357_v46 = vrot.slane %v7356_v20, 4  ;;  %v7359_v49 = vshll.u32 %v7188_v1, 16  ;;  %v8044_v40 = vor.u32 %v8042_v6, %v8041_v15  ;;  %446 = vst [vmem:[#allocation3 + $0x6c] sm:$0x1] %v445_v13 }
 0x2ea   : > { %v8046_v3 = vrot.slane %v8041_v15, 4  ;;  %v7352_v26 = vsel %vm14157_vm13, %v7347_v42, %v7351_v56  ;;  %v8050_v19 = vrot.slane %v8048_v43, 7  ;;  %v7367_v22 = vshll.u32 %v7189_v17, 16  ;;  %v450_v15 = vld [vmem:[#allocation3 + $0x8c] sm:$0x1] }
 0x2eb   : > { %v7366_v32 = vrot.slane %v7364_v33, 4  ;;  %v7361_v36 = vrot.slane %v7359_v49, 5  ;;  %v8045_v52 = vsel %vm13892_vm8, %v12276_v57, %v8044_v40  ;;  %v7373_v9 = vshll.u32 %v7190_v8, 16  ;;  %v7195_v49 = vld [vmem:[#allocation3 + $0x84] sm:$0xf] }
 0x2ec   : > { %v7377_v28 = vshrl.u32 %v7190_v8, 16  ;;  %v8053_v34 = vor.u32 %v8051_v62, %v8050_v19  ;;  %v7369_v47 = vrot.slane %v7367_v22, 5  ;;  %v8056_v55 = vshrl.u32 %v7912_v53, 16  ;;  %v7917_v53 = vld [vmem:[#allocation3 + $0x78] sm:$0xf] }
 0x2ed   : > { %v8061_v51 = vshrl.u32 %v7913_v31, 16  ;;  %v7362_v58 = vsel %vm14157_vm13, %v7357_v46, %v7361_v36  ;;  %v7375_v2 = vrot.slane %v7373_v9, 5  ;;  %v8064_v12 = vshll.u32 %v7913_v31, 16  ;;  %v7918_v9 = vld [vmem:[#allocation3 + $0x80] sm:$0x8] }
 0x2ee   : > { %v7379_v25 = vrot.slane %v7377_v28, 4  ;;  %v12245_v54 = vcombine.low %v7352_v26, %v7362_v58  ;;  %v8054_v60 = vsel %vm13892_vm8, %v8046_v3, %v8053_v34  ;;  %v7370_v0 = vor.u32 %v7369_v47, %v7366_v32 }
 0x2ef   : > { %v12277_v61 = vrot.slane %v8056_v55, 11  ;;  %v12293_v37 = vcombine.low %v8045_v52, %v8054_v60  ;;  %v8063_v18 = vrot.slane %v8061_v51, 7  ;;  %v8070_v24 = vshrl.u32 %v7914_v23, 16  ;;  %v7196_v52 = vld [vmem:[#allocation3 + $0x88] sm:$0xf] }
 0x2f0   : > { %v7380_v50 = vor.u32 %v7379_v25, %v7375_v2  ;;  %13262 = vmatmul.mubr.msk.bf16.gmra.mxu1 %vm6697_vm2, %v12245_v54  ;;  %v7191_v29 = vld [vmem:[#allocation3 + $0x6c] sm:$0x1]  ;;  %v7371_v44 = vrot.slane %v7370_v0, 4  ;;  %v8073_v7 = vshll.u32 %v7914_v23, 16  ;;  %v448_v30 = vsel %vm15543_vm5, 0, %v447_v16 }
 0x2f1   : > { %v7388_v56 = vshrl.u32 %v7192_v41, 16  ;;  %13295 = vmatprep.mubr.msk.bf16.mxu0 %vm6697_vm2, %v12293_v37  ;;  %v7383_v63 = vshll.u32 %v7191_v29, 16  ;;  %v8066_v59 = vor.u32 %v8064_v12, %v8063_v18  ;;  %v8068_v11 = vrot.slane %v8063_v18, 4  ;;  %449 = vst [vmem:[#allocation3 + $0x7c] sm:$0x1] %v448_v30 }
 0x2f2   : > { %v7381_v38 = vrot.slane %v7380_v50, 4  ;;  %v7376_v6 = vsel %vm14157_vm13, %v7371_v44, %v7375_v2  ;;  %v8072_v17 = vrot.slane %v8070_v24, 7  ;;  %v7391_v39 = vshll.u32 %v7192_v41, 16  ;;  %v7919_v25 = vld [vmem:[#allocation3 + $0x84] sm:$0xf] }
 0x2f3   : > { %v7390_v5 = vrot.slane %v7388_v56, 4  ;;  %v7385_v10 = vrot.slane %v7383_v63, 5  ;;  %v8067_v57 = vsel %vm13892_vm8, %v12277_v61, %v8066_v59  ;;  %v7397_v45 = vshll.u32 %v7193_v48, 16  ;;  %v453_v18 = vld [vmem:[#allocation3 + $0x9c] sm:$0x1] }
 0x2f4   : > { %v7401_v20 = vshrl.u32 %v7193_v48, 16  ;;  %v8075_v43 = vor.u32 %v8073_v7, %v8072_v17  ;;  %v7393_v8 = vrot.slane %v7391_v39, 5  ;;  %v8078_v1 = vshrl.u32 %v7915_v21, 16  ;;  %v16496_v21 = vld [vmem:[#allocation3 + $0x88] sm:$0xf] }
 0x2f5   : > { %v8083_v42 = vshrl.u32 %v7916_v27, 16  ;;  %v7386_v62 = vsel %vm14157_vm13, %v7381_v38, %v7385_v10  ;;  %v7399_v13 = vrot.slane %v7397_v45, 5  ;;  %v8086_v46 = vshll.u32 %v7916_v27, 16  ;;  %v7198_v63 = vld [vmem:[#allocation3 + $0x94] sm:$0xf] }
 0x2f6   : > { %v7403_v33 = vrot.slane %v7401_v20, 4  ;;  %v12246_v40 = vcombine.low %v7376_v6, %v7386_v62  ;;  %v8076_v3 = vsel %vm13892_vm8, %v8068_v11, %v8075_v43  ;;  %v7394_v31 = vor.u32 %v7393_v8, %v7390_v5  ;;  %v7921_v45 = vld [vmem:[#allocation3 + $0x90] sm:$0x8] }
 0x2f7   : > { %v12278_v26 = vrot.slane %v8078_v1, 11  ;;  %v12294_v19 = vcombine.low %v8067_v57, %v8076_v3  ;;  %v8085_v22 = vrot.slane %v8083_v42, 7  ;;  %v8092_v36 = vshrl.u32 %v7917_v53, 16  ;;  %v7199_v57 = vld [vmem:[#allocation3 + $0x98] sm:$0xf] }
 0x2f8   : > { %v7404_v32 = vor.u32 %v7403_v33, %v7399_v13  ;;  %13265 = vmatprep.mubr.msk.bf16.mxu1 %vm6697_vm2, %v12246_v40  ;;  %v7194_v28 = vld [vmem:[#allocation3 + $0x7c] sm:$0x1]  ;;  %v7395_v16 = vrot.slane %v7394_v31, 4  ;;  %v8095_v34 = vshll.u32 %v7917_v53, 16  ;;  %v451_v47 = vsel %vm15543_vm5, 0, %v450_v15 }
 0x2f9   : > { %v7412_v23 = vshrl.u32 %v7195_v49, 16  ;;  %13296 = vmatmul.mubr.msk.bf16.gmra.mxu0 %vm6697_vm2, %v12294_v19  ;;  %v7407_v51 = vshll.u32 %v7194_v28, 16  ;;  %v8088_v58 = vor.u32 %v8086_v46, %v8085_v22  ;;  %v8090_v2 = vrot.slane %v8085_v22, 4  ;;  %452 = vst [vmem:[#allocation3 + $0x8c] sm:$0x1] %v451_v47 }
 0x2fa   : > { %v7405_v55 = vrot.slane %v7404_v32, 4  ;;  %v7400_v12 = vsel %vm14157_vm13, %v7395_v16, %v7399_v13  ;;  %v8094_v41 = vrot.slane %v8092_v36, 7  ;;  %v7415_v60 = vshll.u32 %v7195_v49, 16  ;;  %v16508_v33 = vld [vmem:[#allocation3 + $0x94] sm:$0xf] }
 0x2fb   : > { %v7414_v54 = vrot.slane %v7412_v23, 4  ;;  %v7409_v0 = vrot.slane %v7407_v51, 5  ;;  %v8089_v61 = vsel %vm13892_vm8, %v12278_v26, %v8088_v58  ;;  %v7421_v37 = vshll.u32 %v7196_v52, 16  ;;  %v456_v22 = vld [vmem:[#allocation3 + $0xac] sm:$0x1] }
 0x2fc   : > { %v7425_v50 = vshrl.u32 %v7196_v52, 16  ;;  %v8097_v24 = vor.u32 %v8095_v34, %v8094_v41  ;;  %v7417_v48 = vrot.slane %v7415_v60, 5  ;;  %v8100_v29 = vshrl.u32 %v7918_v9, 16  ;;  %v16514_v9 = vld [vmem:[#allocation3 + $0x98] sm:$0xf] }
 0x2fd   : > { %v8105_v44 = vshrl.u32 %v7919_v25, 16  ;;  %v7410_v7 = vsel %vm14157_vm13, %v7405_v55, %v7409_v0  ;;  %v7423_v30 = vrot.slane %v7421_v37, 5  ;;  %v8108_v38 = vshll.u32 %v7919_v25, 16  ;;  %v7201_v51 = vld [vmem:[#allocation3 + $0xa4] sm:$0xf] }
 0x2fe   : > { %v7427_v56 = vrot.slane %v7425_v50, 4  ;;  %v12247_v59 = vcombine.low %v7400_v12, %v7410_v7  ;;  %v8098_v11 = vsel %vm13892_vm8, %v8090_v2, %v8097_v24  ;;  %v7418_v27 = vor.u32 %v7417_v48, %v7414_v54  ;;  %v7924_v37 = vld [vmem:[#allocation3 + $0xa0] sm:$0x8] }
 0x2ff   : > { %v12279_v6 = vrot.slane %v8100_v29, 11  ;;  %v12295_v17 = vcombine.low %v8089_v61, %v8098_v11  ;;  %v8107_v39 = vrot.slane %v8105_v44, 7  ;;  %v8114_v10 = vshrl.u32 %v16496_v21, 16  ;;  %v7202_v61 = vld [vmem:[#allocation3 + $0xa8] sm:$0xf] }
 0x300   : > { %v7428_v5 = vor.u32 %v7427_v56, %v7423_v30  ;;  %13266 = vmatmul.mubr.msk.bf16.gmra.mxu1 %vm6697_vm2, %v12247_v59  ;;  %v7197_v20 = vld [vmem:[#allocation3 + $0x8c] sm:$0x1]  ;;  %v7419_v15 = vrot.slane %v7418_v27, 4  ;;  %v8117_v43 = vshll.u32 %v16496_v21, 16  ;;  %v454_v8 = vsel %vm15543_vm5, 0, %v453_v18 }
 0x301   : > { %v7436_v53 = vshrl.u32 %v7198_v63, 16  ;;  %13299 = vmatprep.mubr.msk.bf16.mxu0 %vm6697_vm2, %v12295_v17  ;;  %v7431_v42 = vshll.u32 %v7197_v20, 16  ;;  %v8110_v62 = vor.u32 %v8108_v38, %v8107_v39  ;;  %v8112_v13 = vrot.slane %v8107_v39, 4  ;;  %455 = vst [vmem:[#allocation3 + $0x9c] sm:$0x1] %v454_v8 }
 0x302   : > { %v7429_v1 = vrot.slane %v7428_v5, 4  ;;  %v7424_v46 = vsel %vm14157_vm13, %v7419_v15, %v7423_v30  ;;  %v8116_v49 = vrot.slane %v8114_v10, 7  ;;  %v7439_v3 = vshll.u32 %v7198_v63, 16  ;;  %v16528_v38 = vld [vmem:[#allocation3 + $0xa4] sm:$0xf] }
 0x303   : > { %v7438_v40 = vrot.slane %v7436_v53, 4  ;;  %v7433_v31 = vrot.slane %v7431_v42, 5  ;;  %v8111_v26 = vsel %vm13892_vm8, %v12279_v6, %v8110_v62  ;;  %v7445_v19 = vshll.u32 %v7199_v57, 16  ;;  %v459_v10 = vld [vmem:[#allocation3 + $0xbc] sm:$0x1] }
 0x304   : > { %v7449_v32 = vshrl.u32 %v7199_v57, 16  ;;  %v8119_v36 = vor.u32 %v8117_v43, %v8116_v49  ;;  %v7441_v52 = vrot.slane %v7439_v3, 5  ;;  %v8122_v28 = vshrl.u32 %v7921_v45, 16  ;;  %v16534_v20 = vld [vmem:[#allocation3 + $0xa8] sm:$0xf] }
 0x305   : > { %v8127_v16 = vshrl.u32 %v16508_v33, 16  ;;  %v7434_v34 = vsel %vm14157_vm13, %v7429_v1, %v7433_v31  ;;  %v7447_v47 = vrot.slane %v7445_v19, 5  ;;  %v8130_v55 = vshll.u32 %v16508_v33, 16  ;;  %v7204_v62 = vld [vmem:[#allocation3 + $0xb4] sm:$0xf] }
 0x306   : > { %v7451_v23 = vrot.slane %v7449_v32, 4  ;;  %v12248_v58 = vcombine.low %v7424_v46, %v7434_v34  ;;  %v8120_v2 = vsel %vm13892_vm8, %v8112_v13, %v8119_v36  ;;  %v7442_v25 = vor.u32 %v7441_v52, %v7438_v40  ;;  %v7205_v32 = vld [vmem:[#allocation3 + $0xb8] sm:$0xf] }
 0x307   : > { %v12280_v12 = vrot.slane %v8122_v28, 11  ;;  %v12296_v41 = vcombine.low %v8111_v26, %v8120_v2  ;;  %v8129_v60 = vrot.slane %v8127_v16, 7  ;;  %v8136_v0 = vshrl.u32 %v16514_v9, 16 }
 0x308   : > { %v7452_v54 = vor.u32 %v7451_v23, %v7447_v47  ;;  %13269 = vmatprep.mubr.msk.bf16.mxu1 %vm6697_vm2, %v12248_v58  ;;  %v7200_v50 = vld [vmem:[#allocation3 + $0x9c] sm:$0x1]  ;;  %v7443_v18 = vrot.slane %v7442_v25, 4  ;;  %v8139_v24 = vshll.u32 %v16514_v9, 16  ;;  %v457_v48 = vsel %vm15543_vm5, 0, %v456_v22 }
 0x309   : > { %v7460_v29 = vshrl.u32 %v7201_v51, 16  ;;  %13300 = vmatmul.mubr.msk.bf16.gmra.mxu0 %vm6697_vm2, %v12296_v41  ;;  %v7455_v7 = vshll.u32 %v7200_v50, 16  ;;  %v8132_v30 = vor.u32 %v8130_v55, %v8129_v60  ;;  %v8134_v56 = vrot.slane %v8129_v60, 4  ;;  %458 = vst [vmem:[#allocation3 + $0xac] sm:$0x1] %v457_v48 }
 0x30a   : > { %v7453_v44 = vrot.slane %v7452_v54, 4  ;;  %v7448_v63 = vsel %vm14157_vm13, %v7443_v18, %v7447_v47  ;;  %v8138_v59 = vrot.slane %v8136_v0, 7  ;;  %v7463_v27 = vshll.u32 %v7201_v51, 16  ;;  %v7927_v22 = vld [vmem:[#allocation3 + $0xb0] sm:$0x8] }
 0x30b   : > { %v7462_v11 = vrot.slane %v7460_v29, 4  ;;  %v7457_v6 = vrot.slane %v7455_v7, 5  ;;  %v8133_v17 = vsel %vm13892_vm8, %v12280_v12, %v8132_v30  ;;  %v7469_v5 = vshll.u32 %v7202_v61, 16  ;;  %v16548_v58 = vld [vmem:[#allocation3 + $0xb4] sm:$0xf] }
 0x30c   : > { %v7473_v39 = vshrl.u32 %v7202_v61, 16  ;;  %v8141_v57 = vor.u32 %v8139_v24, %v8138_v59  ;;  %v7465_v45 = vrot.slane %v7463_v27, 5  ;;  %v8144_v15 = vshrl.u32 %v7924_v37, 16  ;;  %v462_v37 = vld [vmem:[#allocation3 + $0xcc] sm:$0x1] }
 0x30d   : > { %v8149_v43 = vshrl.u32 %v16528_v38, 16  ;;  %v7458_v8 = vsel %vm14157_vm13, %v7453_v44, %v7457_v6  ;;  %v7471_v53 = vrot.slane %v7469_v5, 5  ;;  %v8152_v42 = vshll.u32 %v16528_v38, 16  ;;  %v16554_v24 = vld [vmem:[#allocation3 + $0xb8] sm:$0xf] }
 0x30e   : > { %v7475_v1 = vrot.slane %v7473_v39, 4  ;;  %v12249_v13 = vcombine.low %v7448_v63, %v7458_v8  ;;  %v8142_v46 = vsel %vm13892_vm8, %v8134_v56, %v8141_v57  ;;  %v7466_v49 = vor.u32 %v7465_v45, %v7462_v11  ;;  %v7207_v63 = vld [vmem:[#allocation3 + $0xc4] sm:$0xf]  ;;  %v7208_v57 = vld [vmem:[#allocation3 + $0xc8] sm:$0xf] }
 0x30f   : > { %v12281_v40 = vrot.slane %v8144_v15, 11  ;;  %v12297_v3 = vcombine.low %v8133_v17, %v8142_v46  ;;  %v8151_v26 = vrot.slane %v8149_v43, 7  ;;  %v8158_v19 = vshrl.u32 %v16534_v20, 16  ;;  %v7930_v45 = vld [vmem:[#allocation3 + $0xc0] sm:$0x8] }
 0x310   : > { %v7476_v31 = vor.u32 %v7475_v1, %v7471_v53  ;;  %13270 = vmatmul.mubr.msk.bf16.gmra.mxu1 %vm6697_vm2, %v12249_v13  ;;  %v7203_v36 = vld [vmem:[#allocation3 + $0xac] sm:$0x1]  ;;  %v7467_v52 = vrot.slane %v7466_v49, 4  ;;  %v8161_v28 = vshll.u32 %v16534_v20, 16  ;;  %v460_v16 = vsel %vm15543_vm5, 0, %v459_v10 }
 0x311   : > { %v7484_v34 = vshrl.u32 %v7204_v62, 16  ;;  %13303 = vmatprep.mubr.msk.bf16.mxu0 %vm6697_vm2, %v12297_v3  ;;  %v7479_v23 = vshll.u32 %v7203_v36, 16  ;;  %v8154_v55 = vor.u32 %v8152_v42, %v8151_v26  ;;  %v8156_v51 = vrot.slane %v8151_v26, 4  ;;  %461 = vst [vmem:[#allocation3 + $0xbc] sm:$0x1] %v460_v16 }
 0x312   : > { %v7477_v47 = vrot.slane %v7476_v31, 4  ;;  %v7472_v2 = vsel %vm14157_vm13, %v7467_v52, %v7471_v53  ;;  %v8160_v25 = vrot.slane %v8158_v19, 7  ;;  %v7487_v41 = vshll.u32 %v7204_v62, 16  ;;  %v16568_v49 = vld [vmem:[#allocation3 + $0xc4] sm:$0xf] }
 0x313   : > { %v7486_v12 = vrot.slane %v7484_v34, 4  ;;  %v7481_v54 = vrot.slane %v7479_v23, 5  ;;  %v8155_v60 = vsel %vm13892_vm8, %v12281_v40, %v8154_v55  ;;  %v7493_v0 = vshll.u32 %v7205_v32, 16  ;;  %v16574_v52 = vld [vmem:[#allocation3 + $0xc8] sm:$0xf] }
 0x314   : > { %v7497_v61 = vshrl.u32 %v7205_v32, 16  ;;  %v8163_v50 = vor.u32 %v8161_v28, %v8160_v25  ;;  %v7489_v18 = vrot.slane %v7487_v41, 5  ;;  %v8166_v48 = vshrl.u32 %v7927_v22, 16  ;;  %v465_v23 = vld [vmem:[#allocation3 + $0xdc] sm:$0x1] }
 0x315   : > { %v8171_v29 = vshrl.u32 %v16548_v58, 16  ;;  %v7482_v44 = vsel %vm14157_vm13, %v7477_v47, %v7481_v54  ;;  %v7495_v7 = vrot.slane %v7493_v0, 5  ;;  %v8174_v56 = vshll.u32 %v16548_v58, 16 }
 0x316   : > { %v7499_v30 = vrot.slane %v7497_v61, 4  ;;  %v12250_v59 = vcombine.low %v7472_v2, %v7482_v44  ;;  %v8164_v11 = vsel %vm13892_vm8, %v8156_v51, %v8163_v50  ;;  %v7490_v27 = vor.u32 %v7489_v18, %v7486_v12  ;;  %v7210_v12 = vld [vmem:[#allocation3 + $0xd4] sm:$0xf] }
 0x317   : > { %v12282_v6 = vrot.slane %v8166_v48, 11  ;;  %v12298_v17 = vcombine.low %v8155_v60, %v8164_v11  ;;  %v8173_v39 = vrot.slane %v8171_v29, 7  ;;  %v8180_v10 = vshrl.u32 %v16554_v24, 16  ;;  %v7211_v48 = vld [vmem:[#allocation3 + $0xd8] sm:$0xf] }
 0x318   : > { %v7500_v5 = vor.u32 %v7499_v30, %v7495_v7  ;;  %13273 = vmatprep.mubr.msk.bf16.mxu1 %vm6697_vm2, %v12250_v59  ;;  %v7206_v15 = vld [vmem:[#allocation3 + $0xbc] sm:$0x1]  ;;  %v7491_v43 = vrot.slane %v7490_v27, 4  ;;  %v8183_v8 = vshll.u32 %v16554_v24, 16  ;;  %v463_v53 = vsel %vm15543_vm5, 0, %v462_v37 }
 0x319   : > { %v7508_v1 = vshrl.u32 %v7207_v63, 16  ;;  %13304 = vmatmul.mubr.msk.bf16.gmra.mxu0 %vm6697_vm2, %v12298_v17  ;;  %v7503_v62 = vshll.u32 %v7206_v15, 16  ;;  %v8176_v13 = vor.u32 %v8174_v56, %v8173_v39  ;;  %v8178_v46 = vrot.slane %v8173_v39, 4  ;;  %464 = vst [vmem:[#allocation3 + $0xcc] sm:$0x1] %v463_v53 }
 0x31a   : > { %v7501_v42 = vrot.slane %v7500_v5, 4  ;;  %v7496_v40 = vsel %vm14157_vm13, %v7491_v43, %v7495_v7  ;;  %v8182_v3 = vrot.slane %v8180_v10, 7  ;;  %v7511_v26 = vshll.u32 %v7207_v63, 16  ;;  %v7933_v29 = vld [vmem:[#allocation3 + $0xd0] sm:$0x8] }
 0x31b   : > { %v7510_v31 = vrot.slane %v7508_v1, 4  ;;  %v7505_v19 = vrot.slane %v7503_v62, 5  ;;  %v8177_v32 = vsel %vm13892_vm8, %v12282_v6, %v8176_v13  ;;  %v7517_v22 = vshll.u32 %v7208_v57, 16  ;;  %v16588_v17 = vld [vmem:[#allocation3 + $0xd4] sm:$0xf] }
 0x31c   : > { %v7521_v36 = vshrl.u32 %v7208_v57, 16  ;;  %v8185_v28 = vor.u32 %v8183_v8, %v8182_v3  ;;  %v7513_v16 = vrot.slane %v7511_v26, 5  ;;  %v8188_v34 = vshrl.u32 %v7930_v45, 16  ;;  %v468_v53 = vld [vmem:[#allocation3 + $0xec] sm:$0x1] }
 0x31d   : > { %v8193_v47 = vshrl.u32 %v16568_v49, 16  ;;  %v7506_v55 = vsel %vm14157_vm13, %v7501_v42, %v7505_v19  ;;  %v7519_v51 = vrot.slane %v7517_v22, 5  ;;  %v8196_v25 = vshll.u32 %v16568_v49, 16  ;;  %v16594_v62 = vld [vmem:[#allocation3 + $0xd8] sm:$0xf] }
 0x31e   : > { %v7523_v2 = vrot.slane %v7521_v36, 4  ;;  %v12251_v41 = vcombine.low %v7496_v40, %v7506_v55  ;;  %v8186_v54 = vsel %vm13892_vm8, %v8178_v46, %v8185_v28  ;;  %v7514_v60 = vor.u32 %v7513_v16, %v7510_v31  ;;  %v7213_v19 = vld [vmem:[#allocation3 + $0xe4] sm:$0xf]  ;;  %v7214_v55 = vld [vmem:[#allocation3 + $0xe8] sm:$0xf] }
 0x31f   : > { %v12283_v0 = vrot.slane %v8188_v34, 11  ;;  %v12299_v61 = vcombine.low %v8177_v32, %v8186_v54  ;;  %v8195_v50 = vrot.slane %v8193_v47, 7  ;;  %v8202_v18 = vshrl.u32 %v16574_v52, 16 }
 0x320   : > { %v7524_v37 = vor.u32 %v7523_v2, %v7519_v51  ;;  %13274 = vmatmul.mubr.msk.bf16.gmra.mxu1 %vm6697_vm2, %v12251_v41  ;;  %v7209_v44 = vld [vmem:[#allocation3 + $0xcc] sm:$0x1]  ;;  %v7515_v7 = vrot.slane %v7514_v60, 4  ;;  %v8205_v30 = vshll.u32 %v16574_v52, 16  ;;  %v466_v56 = vsel %vm15543_vm5, 0, %v465_v23 }
 0x321   : > { %v7532_v63 = vshrl.u32 %v7210_v12, 16  ;;  %13307 = vmatprep.mubr.msk.bf16.mxu0 %vm6697_vm2, %v12299_v61  ;;  %v7527_v11 = vshll.u32 %v7209_v44, 16  ;;  %v8198_v27 = vor.u32 %v8196_v25, %v8195_v50  ;;  %v8200_v6 = vrot.slane %v8195_v50, 4  ;;  %467 = vst [vmem:[#allocation3 + $0xdc] sm:$0x1] %v466_v56 }
 0x322   : > { %v7525_v59 = vrot.slane %v7524_v37, 4  ;;  %v7520_v5 = vsel %vm14157_vm13, %v7515_v7, %v7519_v51  ;;  %v8204_v39 = vrot.slane %v8202_v18, 7  ;;  %v7535_v57 = vshll.u32 %v7210_v12, 16  ;;  %v16603_v51 = vld [vmem:[#allocation3 + $0xe4] sm:$0xf] }
 0x323   : > { %v7534_v10 = vrot.slane %v7532_v63, 4  ;;  %v7529_v45 = vrot.slane %v7527_v11, 5  ;;  %v8199_v15 = vsel %vm13892_vm8, %v12283_v0, %v8198_v27  ;;  %v7541_v43 = vshll.u32 %v7211_v48, 16  ;;  %v7936_v50 = vld [vmem:[#allocation3 + $0xe0] sm:$0x8] }
 0x324   : > { %v7545_v8 = vshrl.u32 %v7211_v48, 16  ;;  %v8207_v1 = vor.u32 %v8205_v30, %v8204_v39  ;;  %v7537_v42 = vrot.slane %v7535_v57, 5  ;;  %v8210_v13 = vshrl.u32 %v7933_v29, 16  ;;  %v471_v39 = vld [vmem:[#allocation3 + $0xfc] sm:$0x1] }
 0x325   : > { %v8215_v46 = vshrl.u32 %v16588_v17, 16  ;;  %v7530_v40 = vsel %vm14157_vm13, %v7525_v59, %v7529_v45  ;;  %v7543_v3 = vrot.slane %v7541_v43, 5  ;;  %v8218_v26 = vshll.u32 %v16588_v17, 16  ;;  %v16614_v59 = vld [vmem:[#allocation3 + $0xe8] sm:$0xf] }
 0x326   : > { %v7547_v31 = vrot.slane %v7545_v8, 4  ;;  %v12252_v32 = vcombine.low %v7520_v5, %v7530_v40  ;;  %v8208_v22 = vsel %vm13892_vm8, %v8200_v6, %v8207_v1  ;;  %v7538_v36 = vor.u32 %v7537_v42, %v7534_v10  ;;  %v7216_v43 = vld [vmem:[#allocation3 + $0xf4] sm:$0xf] }
 0x327   : > { %v12284_v28 = vrot.slane %v8210_v13, 11  ;;  %v12300_v16 = vcombine.low %v8199_v15, %v8208_v22  ;;  %v8217_v47 = vrot.slane %v8215_v46, 7  ;;  %v8224_v23 = vshrl.u32 %v16594_v62, 16 }
 0x328   : > { %v7548_v34 = vor.u32 %v7547_v31, %v7543_v3  ;;  %13277 = vmatprep.mubr.msk.bf16.mxu1 %vm6697_vm2, %v12252_v32  ;;  %v7212_v2 = vld [vmem:[#allocation3 + $0xdc] sm:$0x1]  ;;  %v7539_v25 = vrot.slane %v7538_v36, 4  ;;  %v8227_v12 = vshll.u32 %v16594_v62, 16  ;;  %v469_v41 = vsel %vm15543_vm5, 0, %v468_v53 }
 0x329   : > { %v7556_v54 = vshrl.u32 %v7213_v19, 16  ;;  %13308 = vmatmul.mubr.msk.bf16.gmra.mxu0 %vm6697_vm2, %v12300_v16  ;;  %v7551_v0 = vshll.u32 %v7212_v2, 16  ;;  %v8220_v61 = vor.u32 %v8218_v26, %v8217_v47  ;;  %v8222_v37 = vrot.slane %v8217_v47, 4  ;;  %470 = vst [vmem:[#allocation3 + $0xec] sm:$0x1] %v469_v41 }
 0x32a   : > { %v7549_v60 = vrot.slane %v7548_v34, 4  ;;  %v7544_v18 = vsel %vm14157_vm13, %v7539_v25, %v7543_v3  ;;  %v8226_v48 = vrot.slane %v8224_v23, 7  ;;  %v7559_v44 = vshll.u32 %v7213_v19, 16  ;;  %v7217_v31 = vld [vmem:[#allocation3 + $0xf8] sm:$0xf] }
 0x32b   : > { %v7558_v29 = vrot.slane %v7556_v54, 4  ;;  %v7553_v7 = vrot.slane %v7551_v0, 5  ;;  %v8221_v30 = vsel %vm13892_vm8, %v12284_v28, %v8220_v61  ;;  %v7565_v56 = vshll.u32 %v7214_v55, 16  ;;  %v7939_v26 = vld [vmem:[#allocation3 + $0xf0] sm:$0x8] }
 0x32c   : > { %v7569_v63 = vshrl.u32 %v7214_v55, 16  ;;  %v8229_v11 = vor.u32 %v8227_v12, %v8226_v48  ;;  %v7561_v27 = vrot.slane %v7559_v44, 5  ;;  %v8232_v6 = vshrl.u32 %v7936_v50, 16  ;;  %v16628_v55 = vld [vmem:[#allocation3 + $0xf4] sm:$0xf] }
 0x32d   : > { %v8237_v5 = vshrl.u32 %v16603_v51, 16  ;;  %v7554_v10 = vsel %vm14157_vm13, %v7549_v60, %v7553_v7  ;;  %v7567_v57 = vrot.slane %v7565_v56, 5  ;;  %v8240_v15 = vshll.u32 %v16603_v51, 16 }
 0x32e   : > { %v7571_v45 = vrot.slane %v7569_v63, 4  ;;  %v12253_v8 = vcombine.low %v7544_v18, %v7554_v10  ;;  %v8230_v53 = vsel %vm13892_vm8, %v8222_v37, %v8229_v11  ;;  %v7562_v1 = vor.u32 %v7561_v27, %v7558_v29  ;;  %v16634_v18 = vld [vmem:[#allocation3 + $0xf8] sm:$0xf] }
 0x32f   : > { %v12285_v42 = vrot.slane %v8232_v6, 11  ;;  %v12301_v13 = vcombine.low %v8221_v30, %v8230_v53  ;;  %v8239_v40 = vrot.slane %v8237_v5, 7  ;;  %v8246_v3 = vshrl.u32 %v16614_v59, 16  ;;  %v420_v5 = vld [vmem:[#allocation3 + $0x100] sm:$0x8] }
 0x330   : > { %v7572_v46 = vor.u32 %v7571_v45, %v7567_v57  ;;  %13278 = vmatmul.mubr.msk.bf16.gmra.mxu1 %vm6697_vm2, %v12253_v8  ;;  %v7215_v19 = vld [vmem:[#allocation3 + $0xec] sm:$0x1]  ;;  %v7563_v32 = vrot.slane %v7562_v1, 4  ;;  %v8249_v22 = vshll.u32 %v16614_v59, 16  ;;  %v472_v36 = vsel %vm15543_vm5, 0, %v471_v39 }
 0x331   : > { %v7580_v28 = vshrl.u32 %v7216_v43, 16  ;;  %13311 = vmatprep.mubr.msk.bf16.mxu0 %vm6697_vm2, %v12301_v13  ;;  %v7575_v34 = vshll.u32 %v7215_v19, 16  ;;  %v8242_v47 = vor.u32 %v8240_v15, %v8239_v40  ;;  %v8244_v23 = vrot.slane %v8239_v40, 4  ;;  %473 = vst [vmem:[#allocation3 + $0xfc] sm:$0x1] %v472_v36 }
 0x332   : > { %v7573_v16 = vrot.slane %v7572_v46, 4  ;;  %v7568_v2 = vsel %vm14157_vm13, %v7563_v32, %v7567_v57  ;;  %v8248_v25 = vrot.slane %v8246_v3, 7  ;;  %v7583_v41 = vshll.u32 %v7216_v43, 16  ;;  %v16642_v39 = vld [vmem:[#allocation3 + $0x104] sm:$0xf] }
 0x333   : > { %v7582_v12 = vrot.slane %v7580_v28, 4  ;;  %v7577_v54 = vrot.slane %v7575_v34, 5  ;;  %v8243_v60 = vsel %vm13892_vm8, %v12285_v42, %v8242_v47  ;;  %v7589_v0 = vshll.u32 %v7217_v31, 16  ;;  %v16645_v43 = vld [vmem:[#allocation3 + $0x108] sm:$0xf] }
 0x334   : > { %v7593_v61 = vshrl.u32 %v7217_v31, 16  ;;  %v8251_v37 = vor.u32 %v8249_v22, %v8248_v25  ;;  %v7585_v50 = vrot.slane %v7583_v41, 5  ;;  %v8254_v48 = vshrl.u32 %v7939_v26, 16  ;;  %v16650_v8 = vld [vmem:[%s18264_s3 + $0xe] sm:$0x3] }
 0x335   : > { %v8259_v29 = vshrl.u32 %v16628_v55, 16  ;;  %v7578_v44 = vsel %vm14157_vm13, %v7573_v16, %v7577_v54  ;;  %v7591_v7 = vrot.slane %v7589_v0, 5  ;;  %v8262_v56 = vshll.u32 %v16628_v55, 16  ;;  %v13742_v13 = vld [vmem:[#allocation3 + $0x14] sm:$0xf] }
 0x336   : > { %v7595_v30 = vrot.slane %v7593_v61, 4  ;;  %v12254_v63 = vcombine.low %v7568_v2, %v7578_v44  ;;  %v8252_v11 = vsel %vm13892_vm8, %v8244_v23, %v8251_v37  ;;  %v7586_v27 = vor.u32 %v7585_v50, %v7582_v12  ;;  %v13743_v46 = vld [vmem:[#allocation3 + $0x18] sm:$0xf]  ;;  %v13744_v3 = vld [vmem:[%s18264_s3 + $0xa] sm:$0x3]  ;;  %v16664_v2 = vpop.f32.mrf.mxu1 }
 0x337   : > { %v12286_v6 = vrot.slane %v8254_v48, 11  ;;  %v12302_v10 = vcombine.low %v8243_v60, %v8252_v11  ;;  %v8261_v45 = vrot.slane %v8259_v29, 7  ;;  %v8268_v15 = vshrl.u32 %v16634_v18, 16  ;;  %v8917_v23 = vld [vmem:[#allocation3 + $0x14] sm:$0xf] }
 0x338   : > { %v7596_v57 = vor.u32 %v7595_v30, %v7591_v7  ;;  %13281 = vmatprep.mubr.msk.bf16.mxu1 %vm6697_vm2, %v12254_v63  ;;  %v7218_v53 = vld [vmem:[#allocation3 + $0xfc] sm:$0x1]  ;;  %v7587_v1 = vrot.slane %v7586_v27, 4  ;;  %v8271_v42 = vshll.u32 %v16634_v18, 16  ;;  %v12322_v40 = vcombine.low %v13742_v13, %v13743_v46  ;;  %v16673_v37 = vld [vmem:[#allocation3 + $0x24] sm:$0xf] }
 0x339   : > { %v9448_v31 = vsel %vm6746_vm14, %v13744_v3, 0  ;;  %13312 = vmatmul.mubr.msk.bf16.gmra.mxu0 %vm6697_vm2, %v12302_v10  ;;  %v7599_v19 = vshll.u32 %v7218_v53, 16  ;;  %v8264_v32 = vor.u32 %v8262_v56, %v8261_v45  ;;  %v8266_v22 = vrot.slane %v8261_v45, 4  ;;  %v16675_v50 = vld [vmem:[#allocation3 + $0x28] sm:$0xf] }
 0x33a   : > { %v7597_v26 = vrot.slane %v7596_v57, 4  ;;  %v7592_v36 = vsel %vm14157_vm13, %v7587_v1, %v7591_v7  ;;  %v8270_v28 = vrot.slane %v8268_v15, 7  ;;  %13354 = vmatpush3.bf16.msra.mxu0 %v9448_v31  ;;  %v421_v34 = vsel %vm15482_vm1, 0, %v420_v5  ;;  %v8918_v29 = vld [vmem:[#allocation3 + $0x18] sm:$0xf]  ;;  %v16683_v57 = vpop.f32.mrf.mxu1 }
 0x33b   : > { %v8281_v47 = vshrl.u32 %v16642_v39, 16  ;;  %v7601_v25 = vrot.slane %v7599_v19, 5  ;;  %v8265_v12 = vsel %vm13892_vm8, %v12286_v6, %v8264_v32  ;;  %422 = vst [vmem:[#allocation3 + $0x100] sm:$0x8] %v421_v34  ;;  %v8284_v41 = vshll.u32 %v16642_v39, 16  ;;  %13505 = vmatprep.subr.msk.bf16.mxu0 %vm6746_vm14, %v16650_v8 }
 0x33c   : > { %v8290_v54 = vshrl.u32 %v16645_v43, 16  ;;  %v8273_v60 = vor.u32 %v8271_v42, %v8270_v28  ;;  %v8293_v61 = vshll.u32 %v16645_v43, 16  ;;  %v12323_v48 = vcombine.low %v16673_v37, %v16675_v50  ;;  %v8919_v30 = vld [vmem:[#allocation3 + $0x1c] sm:$0x1]  ;;  %v8920_v10 = vld [vmem:[#allocation3 + $0x24] sm:$0xf] }
 0x33d   : > { %v8283_v0 = vrot.slane %v8281_v47, 7  ;;  %v7602_v44 = vsel %vm14157_vm13, %v7597_v26, %v7601_v25  ;;  %v8966_v56 = vshrl.u32 %v8917_v23, 16  ;;  %v8969_v63 = vshll.u32 %v8917_v23, 16  ;;  %v13747_v3 = vld [vmem:[%s18264_s3 + $0xc] sm:$0x3] }
 0x33e   : > { %v8292_v7 = vrot.slane %v8290_v54, 7  ;;  %v12255_v11 = vcombine.low %v7592_v36, %v7602_v44  ;;  %v8274_v27 = vsel %vm13892_vm8, %v8266_v22, %v8273_v60  ;;  %v8975_v42 = vshll.u32 %v8918_v29, 16  ;;  %v8921_v26 = vld [vmem:[#allocation3 + $0x28] sm:$0xf]  ;;  %v13748_v22 = vld [vmem:[#allocation3 + $0x34] sm:$0xf]  ;;  %v16694_v60 = vpop.f32.mrf.mxu1 }
 0x33f   : > { %v8286_v6 = vor.u32 %v8284_v41, %v8283_v0  ;;  %v8288_v5 = vrot.slane %v8283_v0, 4  ;;  %v12303_v45 = vcombine.low %v8265_v12, %v8274_v27  ;;  %v8968_v53 = vrot.slane %v8966_v56, 4  ;;  %v13749_v36 = vld [vmem:[#allocation3 + $0x38] sm:$0xf]  ;;  %v8922_v34 = vld [vmem:[#allocation3 + $0x2c] sm:$0x1] }
 0x340   : > { %v8295_v15 = vor.u32 %v8293_v61, %v8292_v7  ;;  %v8971_v1 = vrot.slane %v8969_v63, 5  ;;  %13282 = vmatmul.mubr.msk.bf16.gmra.mxu1 %vm6697_vm2, %v12255_v11  ;;  %v8979_v13 = vshrl.u32 %v8918_v29, 16  ;;  %v8985_v46 = vshll.u32 %v8919_v30, 16  ;;  %v8923_v44 = vld [vmem:[#allocation3 + $0x34] sm:$0xf] }
 0x341   : > { %v10143_v31 = vsel %vm6746_vm14, %v13747_v3, 0  ;;  %13315 = vmatprep.mubr.msk.bf16.mxu0 %vm6697_vm2, %v12303_v45  ;;  %13321 = vmatprep.mubr.msk.bf16.mxu1 %vm6697_vm2, %v12322_v40  ;;  %v12324_v28 = vcombine.low %v13748_v22, %v13749_v36  ;;  %v8990_v47 = vshrl.u32 %v8920_v10, 16  ;;  %v8977_v25 = vrot.slane %v8975_v42, 5  ;;  %v8924_v11 = vld [vmem:[#allocation3 + $0x38] sm:$0xf] }
 0x342   : > { %v8296_v19 = vsel %vm13892_vm8, %v8288_v5, %v8295_v15  ;;  %v8972_v32 = vor.u32 %v8971_v1, %v8968_v53  ;;  %v7942_v23 = vld [vmem:[#allocation3 + $0x100] sm:$0x8]  ;;  %v8981_v12 = vrot.slane %v8979_v13, 4  ;;  %v8987_v41 = vrot.slane %v8985_v46, 5  ;;  %v16698_v15 = vld [vmem:[#allocation3 + $0x44] sm:$0xf] }
 0x343   : > { %v8993_v54 = vshll.u32 %v8920_v10, 16  ;;  %v8276_v0 = vshrl.u32 %v7942_v23, 16  ;;  %v8992_v29 = vrot.slane %v8990_v47, 4  ;;  %v8999_v40 = vshll.u32 %v8921_v26, 16  ;;  %v16700_v10 = vld [vmem:[#allocation3 + $0x48] sm:$0xf] }
 0x344   : > { %v8973_v61 = vrot.slane %v8972_v32, 4  ;;  %v8982_v7 = vor.u32 %v8981_v12, %v8977_v25  ;;  %v9003_v56 = vshrl.u32 %v8921_v26, 16  ;;  %v9009_v63 = vshll.u32 %v8922_v34, 16  ;;  %v8925_v3 = vld [vmem:[#allocation3 + $0x3c] sm:$0x1]  ;;  %v16704_v26 = vpop.f32.mrf.mxu1 }
 0x345   : > { %v8995_v30 = vrot.slane %v8993_v54, 5  ;;  %v12287_v27 = vrot.slane %v8276_v0, 11  ;;  %v9001_v45 = vrot.slane %v8999_v40, 5  ;;  %v12325_v53 = vcombine.low %v16698_v15, %v16700_v10  ;;  %v16711_v47 = vld [vmem:[%s18264_s3 + $0x10] sm:$0x3] }
 0x346   : > { %v8978_v5 = vsel %vm14157_vm13, %v8973_v61, %v8977_v25  ;;  %v8983_v1 = vrot.slane %v8982_v7, 4  ;;  %v9005_v13 = vrot.slane %v9003_v56, 4  ;;  %v9011_v46 = vrot.slane %v9009_v63, 5  ;;  %v13752_v7 = vld [vmem:[#allocation3 + $0x54] sm:$0xf] }
 0x347   : > { %v8996_v42 = vor.u32 %v8995_v30, %v8992_v29  ;;  %v8287_v32 = vsel %vm13892_vm8, %v12287_v27, %v8286_v6  ;;  %v9014_v22 = vshrl.u32 %v8923_v44, 16  ;;  %v9017_v36 = vshll.u32 %v8923_v44, 16  ;;  %v8926_v6 = vld [vmem:[#allocation3 + $0x44] sm:$0xf]  ;;  %v8927_v44 = vld [vmem:[#allocation3 + $0x48] sm:$0xf] }
 0x348   : > { %v9023_v34 = vshll.u32 %v8924_v11, 16  ;;  %v12304_v23 = vcombine.low %v8287_v32, %v8296_v19  ;;  %13322 = vmatmul.mubr.msk.bf16.vlgmr.msra.gmra.mxu1 %vm6697_vm2, %v12323_v48  ;;  %v8988_v25 = vsel %vm14157_vm13, %v8983_v1, %v8987_v41  ;;  %v9006_v54 = vor.u32 %v9005_v13, %v9001_v45  ;;  %v16720_v19 = vpop.f32.mrf.mxu0  ;;  %v13753_v30 = vld [vmem:[#allocation3 + $0x58] sm:$0xf]  ;;  %v8928_v63 = vld [vmem:[#allocation3 + $0x4c] sm:$0x1] }
 0x349   : > { %v8997_v12 = vrot.slane %v8996_v42, 4  ;;  %v12355_v0 = vcombine.low %v8978_v5, %v8988_v25  ;;  %13388 = vmatpush3.bf16.msra.mxu1 %v10143_v31  ;;  %13325 = vmatprep.mubr.msk.bf16.mxu1 %vm6697_vm2, %v12324_v28  ;;  %v9016_v61 = vrot.slane %v9014_v22, 4  ;;  %v9019_v29 = vrot.slane %v9017_v36, 5  ;;  %v16727_v31 = vpop.f32.mrf.mxu1  ;;  %v8929_v13 = vld [vmem:[#allocation3 + $0x54] sm:$0xf] }
 0x34a   : > { %v9025_v40 = vrot.slane %v9023_v34, 5  ;;  %13316 = vmatmul.mubr.msk.bf16.gmra.mxu0 %vm6697_vm2, %v12304_v23  ;;  %v9007_v50 = vrot.slane %v9006_v54, 4  ;;  %v9027_v48 = vshrl.u32 %v8924_v11, 16  ;;  %v9033_v41 = vshll.u32 %v8925_v3, 16  ;;  %13506 = vmatprep.subr.msk.bf16.mxu1 %vm6746_vm14, %v16711_v47  ;;  %v16732_v34 = vpop.f32.mrf.mxu0 }
 0x34b   : > { %v9002_v37 = vsel %vm14157_vm13, %v8997_v12, %v9001_v45  ;;  %13355 = vmatprep.mubr.msk.bf16.mxu0 %vm6697_vm2, %v12355_v0  ;;  %v9020_v28 = vor.u32 %v9019_v29, %v9016_v61  ;;  %v12326_v56 = vcombine.low %v13752_v7, %v13753_v30  ;;  %v9038_v27 = vshrl.u32 %v8926_v6, 16  ;;  %v8930_v0 = vld [vmem:[#allocation3 + $0x58] sm:$0xf]  ;;  %v16734_v61 = vpop.f32.mrf.mxu1  ;;  %v13754_v29 = vld [vmem:[#allocation3 + $0x64] sm:$0xf] }
 0x34c   : > { %v9041_v5 = vshll.u32 %v8926_v6, 16  ;;  %v9012_v45 = vsel %vm14157_vm13, %v9007_v50, %v9011_v46  ;;  %v9029_v1 = vrot.slane %v9027_v48, 4  ;;  %v9035_v11 = vrot.slane %v9033_v41, 5  ;;  %v13755_v50 = vld [vmem:[#allocation3 + $0x68] sm:$0xf] }
 0x34d   : > { %v9047_v42 = vshll.u32 %v8927_v44, 16  ;;  %v12356_v3 = vcombine.low %v9002_v37, %v9012_v45  ;;  %v9021_v32 = vrot.slane %v9020_v28, 4  ;;  %v9040_v22 = vrot.slane %v9038_v27, 4  ;;  %v8931_v37 = vld [vmem:[#allocation3 + $0x5c] sm:$0x1]  ;;  %v16743_v45 = vpop.f32.mrf.mxu0 }
 0x34e   : > { %v9043_v36 = vrot.slane %v9041_v5, 5  ;;  %v9030_v23 = vor.u32 %v9029_v1, %v9025_v40  ;;  %v9051_v12 = vshrl.u32 %v8927_v44, 16  ;;  %v9057_v54 = vshll.u32 %v8928_v63, 16 }
 0x34f   : > { %v9049_v25 = vrot.slane %v9047_v42, 5  ;;  %v9026_v46 = vsel %vm14157_vm13, %v9021_v32, %v9025_v40  ;;  %v12327_v48 = vcombine.low %v13754_v29, %v13755_v50  ;;  %v9062_v41 = vshrl.u32 %v8929_v13, 16  ;;  %v8932_v42 = vld [vmem:[#allocation3 + $0x64] sm:$0xf]  ;;  %v8933_v32 = vld [vmem:[#allocation3 + $0x68] sm:$0xf] }
 0x350   : > { %v9044_v6 = vor.u32 %v9043_v36, %v9040_v22  ;;  %13326 = vmatmul.mubr.msk.bf16.gmra.mxu1 %vm6697_vm2, %v12325_v53  ;;  %v9031_v28 = vrot.slane %v9030_v23, 4  ;;  %v9053_v44 = vrot.slane %v9051_v12, 4  ;;  %v9059_v7 = vrot.slane %v9057_v54, 5  ;;  %v16748_v22 = vpop.f32.mrf.mxu1  ;;  %v8934_v12 = vld [vmem:[#allocation3 + $0x6c] sm:$0x1] }
 0x351   : > { %v9065_v30 = vshll.u32 %v8929_v13, 16  ;;  %13329 = vmatprep.mubr.msk.bf16.mxu1 %vm6697_vm2, %v12326_v56  ;;  %v9064_v27 = vrot.slane %v9062_v41, 4  ;;  %v9071_v40 = vshll.u32 %v8930_v0, 16  ;;  %v9075_v5 = vshrl.u32 %v8930_v0, 16  ;;  %v13757_v29 = vld [vmem:[#allocation3 + $0x78] sm:$0xf] }
 0x352   : > { %v9045_v63 = vrot.slane %v9044_v6, 4  ;;  %13356 = vmatmul.mubr.msk.bf16.vlgmr.msra.gmra.mxu0 %vm6697_vm2, %v12356_v3  ;;  %v9036_v1 = vsel %vm14157_vm13, %v9031_v28, %v9035_v11  ;;  %v9054_v15 = vor.u32 %v9053_v44, %v9049_v25  ;;  %v9081_v53 = vshll.u32 %v8931_v37, 16  ;;  %v13756_v6 = vld [vmem:[#allocation3 + $0x74] sm:$0xf]  ;;  %v16753_v44 = vpop.f32.mrf.mxu0 }
 0x353   : > { %v9067_v10 = vrot.slane %v9065_v30, 5  ;;  %v12357_v13 = vcombine.low %v9026_v46, %v9036_v1  ;;  %v9073_v36 = vrot.slane %v9071_v40, 5  ;;  %v9077_v23 = vrot.slane %v9075_v5, 4  ;;  %v8935_v40 = vld [vmem:[#allocation3 + $0x74] sm:$0xf] }
 0x354   : > { %v9050_v56 = vsel %vm14157_vm13, %v9045_v63, %v9049_v25  ;;  %v9055_v54 = vrot.slane %v9054_v15, 4  ;;  %v9083_v3 = vrot.slane %v9081_v53, 5  ;;  %v12328_v11 = vcombine.low %v13756_v6, %v13757_v29  ;;  %v8936_v53 = vld [vmem:[#allocation3 + $0x78] sm:$0xf] }
 0x355   : > { %v9068_v0 = vor.u32 %v9067_v10, %v9064_v27  ;;  %13359 = vmatprep.mubr.msk.bf16.mxu0 %vm6697_vm2, %v12357_v13  ;;  %v9078_v50 = vor.u32 %v9077_v23, %v9073_v36  ;;  %v9086_v37 = vshrl.u32 %v8932_v42, 16  ;;  %v9089_v41 = vshll.u32 %v8932_v42, 16  ;;  %v16757_v27 = vpop.f32.mrf.mxu1 }
 0x356   : > { %v9095_v28 = vshll.u32 %v8933_v32, 16  ;;  %v9060_v25 = vsel %vm14157_vm13, %v9055_v54, %v9059_v7  ;;  %v9099_v30 = vshrl.u32 %v8933_v32, 16  ;;  %v9105_v63 = vshll.u32 %v8934_v12, 16  ;;  %v8937_v7 = vld [vmem:[#allocation3 + $0x7c] sm:$0x1] }
 0x357   : > { %v9069_v46 = vrot.slane %v9068_v0, 4  ;;  %v12358_v5 = vcombine.low %v9050_v56, %v9060_v25  ;;  %v9079_v1 = vrot.slane %v9078_v50, 4  ;;  %v9088_v15 = vrot.slane %v9086_v37, 4  ;;  %v13758_v56 = vld [vmem:[#allocation3 + $0x84] sm:$0xf] }
 0x358   : > { %v9091_v10 = vrot.slane %v9089_v41, 5  ;;  %13330 = vmatmul.mubr.msk.bf16.gmra.mxu1 %vm6697_vm2, %v12327_v48  ;;  %v9097_v13 = vrot.slane %v9095_v28, 5  ;;  %v9101_v23 = vrot.slane %v9099_v30, 4  ;;  %v9107_v6 = vrot.slane %v9105_v63, 5  ;;  %v8938_v41 = vld [vmem:[#allocation3 + $0x84] sm:$0xf] }
 0x359   : > { %v9074_v42 = vsel %vm14157_vm13, %v9069_v46, %v9073_v36  ;;  %v9084_v32 = vsel %vm14157_vm13, %v9079_v1, %v9083_v3  ;;  %13333 = vmatprep.mubr.msk.bf16.mxu1 %vm6697_vm2, %v12328_v11  ;;  %v12329_v54 = vcombine.low %v13758_v56, %v16496_v21  ;;  %v9110_v0 = vshrl.u32 %v8935_v40, 16  ;;  %v16766_v29 = vpop.f32.mrf.mxu0  ;;  %v8939_v30 = vld [vmem:[#allocation3 + $0x88] sm:$0xf] }
 0x35a   : > { %v9092_v12 = vor.u32 %v9091_v10, %v9088_v15  ;;  %13360 = vmatmul.mubr.msk.bf16.gmra.mxu0 %vm6697_vm2, %v12358_v5  ;;  %v12359_v48 = vcombine.low %v9074_v42, %v9084_v32  ;;  %v9102_v36 = vor.u32 %v9101_v23, %v9097_v13  ;;  %v9113_v50 = vshll.u32 %v8935_v40, 16  ;;  %v16769_v28 = vpop.f32.mrf.mxu1 }
 0x35b   : > { %v9119_v37 = vshll.u32 %v8936_v53, 16  ;;  %18563 = vst [vmem:[#allocation57_spill] sm:$0xff] %v16769_v28  ;;  %v9112_v3 = vrot.slane %v9110_v0, 4  ;;  %v9123_v46 = vshrl.u32 %v8936_v53, 16  ;;  %v9129_v11 = vshll.u32 %v8937_v7, 16  ;;  %v16771_v63 = vpop.f32.mrf.mxu0 }
 0x35c   : > { %v9093_v25 = vrot.slane %v9092_v12, 4  ;;  %13363 = vmatprep.mubr.msk.bf16.mxu0 %vm6697_vm2, %v12359_v48  ;;  %v9103_v21 = vrot.slane %v9102_v36, 4  ;;  %v9115_v1 = vrot.slane %v9113_v50, 5  ;;  %v12330_v5 = vcombine.low %v16508_v33, %v16514_v9  ;;  %v16776_v40 = vpop.f32.mrf.mxu1  ;;  %v8940_v53 = vld [vmem:[#allocation3 + $0x8c] sm:$0x1] }
 0x35d   : > { %v9121_v15 = vrot.slane %v9119_v37, 5  ;;  %18564 = vst [vmem:[#allocation61_spill] sm:$0xff] %v16776_v40  ;;  %v9125_v42 = vrot.slane %v9123_v46, 4  ;;  %v9131_v23 = vrot.slane %v9129_v11, 5  ;;  %v9134_v7 = vshrl.u32 %v8938_v41, 16  ;;  %v16780_v32 = vpop.f32.mrf.mxu0 }
 0x35e   : > { %v9098_v10 = vsel %vm14157_vm13, %v9093_v25, %v9097_v13  ;;  %v9108_v12 = vsel %vm14157_vm13, %v9103_v21, %v9107_v6  ;;  %v9116_v56 = vor.u32 %v9115_v1, %v9112_v3  ;;  %v9137_v0 = vshll.u32 %v8938_v41, 16  ;;  %v8941_v36 = vld [vmem:[#allocation3 + $0x94] sm:$0xf]  ;;  %v8942_v40 = vld [vmem:[#allocation3 + $0x98] sm:$0xf]  ;;  %v16787_v28 = vpop.f32.mrf.mxu1 }
 0x35f   : > { %v9143_v48 = vshll.u32 %v8939_v30, 16  ;;  %v12360_v50 = vcombine.low %v9098_v10, %v9108_v12  ;;  %v9126_v33 = vor.u32 %v9125_v42, %v9121_v15  ;;  %v9136_v9 = vrot.slane %v9134_v7, 4  ;;  %v16784_v16 = vpop.f32.mrf.mxu0  ;;  %v8943_v10 = vld [vmem:[#allocation3 + $0x9c] sm:$0x1] }
 0x360   : > { %v9147_v37 = vshrl.u32 %v8939_v30, 16  ;;  %13334 = vmatmul.mubr.msk.bf16.gmra.mxu1 %vm6697_vm2, %v12329_v54  ;;  %v9117_v13 = vrot.slane %v9116_v56, 4  ;;  %v9139_v25 = vrot.slane %v9137_v0, 5  ;;  %v9153_v11 = vshll.u32 %v8940_v53, 16  ;;  %v8944_v56 = vld [vmem:[#allocation3 + $0xa4] sm:$0xf] }
 0x361   : > { %v9145_v46 = vrot.slane %v9143_v48, 5  ;;  %v9127_v6 = vrot.slane %v9126_v33, 4  ;;  %13337 = vmatprep.mubr.msk.bf16.mxu1 %vm6697_vm2, %v12330_v5  ;;  %v12331_v3 = vcombine.low %v16528_v38, %v16534_v20  ;;  %v9158_v21 = vshrl.u32 %v8941_v36, 16  ;;  %v8945_v33 = vld [vmem:[#allocation3 + $0xa8] sm:$0xf] }
 0x362   : > { %v9149_v41 = vrot.slane %v9147_v37, 4  ;;  %13364 = vmatmul.mubr.msk.bf16.gmra.mxu0 %vm6697_vm2, %v12360_v50  ;;  %v9122_v54 = vsel %vm14157_vm13, %v9117_v13, %v9121_v15  ;;  %v9140_v30 = vor.u32 %v9139_v25, %v9136_v9  ;;  %v9155_v1 = vrot.slane %v9153_v11, 5  ;;  %v16799_v37 = vpop.f32.mrf.mxu1 }
 0x363   : > { %v9161_v42 = vshll.u32 %v8941_v36, 16  ;;  %v9132_v53 = vsel %vm14157_vm13, %v9127_v6, %v9131_v23  ;;  %v9160_v12 = vrot.slane %v9158_v21, 4  ;;  %v9167_v5 = vshll.u32 %v8942_v40, 16 }
 0x364   : > { %v9150_v7 = vor.u32 %v9149_v41, %v9145_v46  ;;  %v16797_v0 = vpop.f32.mrf.mxu0  ;;  %v12361_v38 = vcombine.low %v9122_v54, %v9132_v53  ;;  %v9141_v20 = vrot.slane %v9140_v30, 4  ;;  %v9171_v50 = vshrl.u32 %v8942_v40, 16  ;;  %v8946_v41 = vld [vmem:[#allocation3 + $0xac] sm:$0x1] }
 0x365   : > { %v9163_v48 = vrot.slane %v9161_v42, 5  ;;  %v9169_v9 = vrot.slane %v9167_v5, 5  ;;  %v9177_v13 = vshll.u32 %v8943_v10, 16  ;;  %v12332_v36 = vcombine.low %v16548_v58, %v16554_v24  ;;  %v8947_v42 = vld [vmem:[#allocation3 + $0xb4] sm:$0xf] }
 0x366   : > { %v9151_v15 = vrot.slane %v9150_v7, 4  ;;  %v16803_v23 = vpop.f32.mrf.mxu0  ;;  %13367 = vmatprep.mubr.msk.bf16.mxu0 %vm6697_vm2, %v12361_v38  ;;  %v9146_v25 = vsel %vm14157_vm13, %v9141_v20, %v9145_v46  ;;  %v9173_v6 = vrot.slane %v9171_v50, 4  ;;  %v9182_v40 = vshrl.u32 %v8944_v56, 16 }
 0x367   : > { %v9164_v11 = vor.u32 %v9163_v48, %v9160_v12  ;;  %v9179_v54 = vrot.slane %v9177_v13, 5  ;;  %v9185_v30 = vshll.u32 %v8944_v56, 16  ;;  %v9191_v10 = vshll.u32 %v8945_v33, 16  ;;  %v8948_v48 = vld [vmem:[#allocation3 + $0xb8] sm:$0xf] }
 0x368   : > { %v9156_v21 = vsel %vm14157_vm13, %v9151_v15, %v9155_v1  ;;  %13338 = vmatmul.mubr.msk.bf16.gmra.mxu1 %vm6697_vm2, %v12331_v3  ;;  %v9174_v24 = vor.u32 %v9173_v6, %v9169_v9  ;;  %v9184_v7 = vrot.slane %v9182_v40, 4  ;;  %v16811_v5 = vpop.f32.mrf.mxu1  ;;  %v16813_v46 = vpop.f32.mrf.mxu0  ;;  %v9195_v20 = vshrl.u32 %v8945_v33, 16  ;;  %v8949_v6 = vld [vmem:[#allocation3 + $0xbc] sm:$0x1] }
 0x369   : > { %v12362_v53 = vcombine.low %v9146_v25, %v9156_v21  ;;  %v9165_v58 = vrot.slane %v9164_v11, 4  ;;  %13341 = vmatprep.mubr.msk.bf16.mxu1 %vm6697_vm2, %v12332_v36  ;;  %v9187_v12 = vrot.slane %v9185_v30, 5  ;;  %v9193_v38 = vrot.slane %v9191_v10, 5  ;;  %v8950_v10 = vld [vmem:[#allocation3 + $0xc4] sm:$0xf] }
 0x36a   : > { %v9201_v1 = vshll.u32 %v8946_v41, 16  ;;  %v9175_v3 = vrot.slane %v9174_v24, 4  ;;  %v12333_v50 = vcombine.low %v16568_v49, %v16574_v52  ;;  %v9206_v15 = vshrl.u32 %v8947_v42, 16  ;;  %v16821_v13 = vpop.f32.mrf.mxu1 }
 0x36b   : > { %13368 = vmatmul.mubr.msk.bf16.gmra.mxu0 %vm6697_vm2, %v12362_v53  ;;  %v9170_v56 = vsel %vm14157_vm13, %v9165_v58, %v9169_v9  ;;  %v9188_v25 = vor.u32 %v9187_v12, %v9184_v7  ;;  %v9197_v11 = vrot.slane %v9195_v20, 4  ;;  %v9209_v40 = vshll.u32 %v8947_v42, 16  ;;  %v16827_v53 = vpop.f32.mrf.mxu0  ;;  %v8951_v7 = vld [vmem:[#allocation3 + $0xc8] sm:$0xf] }
 0x36c   : > { %v9203_v36 = vrot.slane %v9201_v1, 5  ;;  %v9180_v33 = vsel %vm14157_vm13, %v9175_v3, %v9179_v54  ;;  %v9208_v41 = vrot.slane %v9206_v15, 4  ;;  %v9215_v21 = vshll.u32 %v8948_v48, 16  ;;  %v16825_v9 = vpop.f32.mrf.mxu1 }
 0x36d   : > { %v9219_v30 = vshrl.u32 %v8948_v48, 16  ;;  %18565 = vst [vmem:[#allocation11_spill] sm:$0xff] %v16825_v9  ;;  %v12363_v49 = vcombine.low %v9170_v56, %v9180_v33  ;;  %v9189_v52 = vrot.slane %v9188_v25, 4  ;;  %v9198_v58 = vor.u32 %v9197_v11, %v9193_v38 }
 0x36e   : > { %v9211_v24 = vrot.slane %v9209_v40, 5  ;;  %v9217_v12 = vrot.slane %v9215_v21, 5  ;;  %v9225_v1 = vshll.u32 %v8949_v6, 16  ;;  %v12334_v42 = vcombine.low %v16588_v17, %v16594_v62  ;;  %v16831_v54 = vpop.f32.mrf.mxu1  ;;  %v8952_v40 = vld [vmem:[#allocation3 + $0xcc] sm:$0x1] }
 0x36f   : > { %v9221_v20 = vrot.slane %v9219_v30, 4  ;;  %18566 = vst [vmem:[#allocation15_spill] sm:$0xff] %v16831_v54  ;;  %13371 = vmatprep.mubr.msk.bf16.mxu0 %vm6697_vm2, %v12363_v49  ;;  %v9194_v48 = vsel %vm14157_vm13, %v9189_v52, %v9193_v38  ;;  %v9199_v3 = vrot.slane %v9198_v58, 4  ;;  %v9230_v56 = vshrl.u32 %v8950_v10, 16  ;;  %v8953_v49 = vld [vmem:[#allocation3 + $0xd4] sm:$0xf] }
 0x370   : > { %v9212_v15 = vor.u32 %v9211_v24, %v9208_v41  ;;  %13342 = vmatmul.mubr.msk.bf16.gmra.mxu1 %vm6697_vm2, %v12333_v50  ;;  %v9227_v11 = vrot.slane %v9225_v1, 5  ;;  %v9233_v33 = vshll.u32 %v8950_v10, 16  ;;  %v9239_v6 = vshll.u32 %v8951_v7, 16  ;;  %v16837_v21 = vpop.f32.mrf.mxu0  ;;  %v16839_v17 = vpop.f32.mrf.mxu1 }
 0x371   : > { %v9222_v25 = vor.u32 %v9221_v20, %v9217_v12  ;;  %18567 = vst [vmem:[#allocation55_spill] sm:$0xff] %v16839_v17  ;;  %v9204_v62 = vsel %vm14157_vm13, %v9199_v3, %v9203_v36  ;;  %13345 = vmatprep.mubr.msk.bf16.mxu1 %vm6697_vm2, %v12334_v42  ;;  %v9232_v38 = vrot.slane %v9230_v56, 4  ;;  %v9243_v41 = vshrl.u32 %v8951_v7, 16  ;;  %v8954_v20 = vld [vmem:[#allocation3 + $0xd8] sm:$0xf] }
 0x372   : > { %v9213_v30 = vrot.slane %v9212_v15, 4  ;;  %v12364_v52 = vcombine.low %v9194_v48, %v9204_v62  ;;  %v9235_v58 = vrot.slane %v9233_v33, 5  ;;  %v9241_v24 = vrot.slane %v9239_v6, 5  ;;  %v16844_v10 = vpop.f32.mrf.mxu0  ;;  %v16846_v1 = vpop.f32.mrf.mxu1  ;;  %v8955_v3 = vld [vmem:[#allocation3 + $0xdc] sm:$0x1] }
 0x373   : > { %v9223_v50 = vrot.slane %v9222_v25, 4  ;;  %18568 = vst [vmem:[#allocation56_spill] sm:$0xff] %v16846_v1  ;;  %v9245_v54 = vrot.slane %v9243_v41, 4  ;;  %v9249_v36 = vshll.u32 %v8952_v40, 16  ;;  %v12335_v42 = vcombine.low %v16603_v51, %v16614_v59  ;;  %v8957_v1 = vld [vmem:[#allocation3 + $0xe8] sm:$0xf] }
 0x374   : > { %v9218_v17 = vsel %vm14157_vm13, %v9213_v30, %v9217_v12  ;;  %13372 = vmatmul.mubr.msk.bf16.gmra.mxu0 %vm6697_vm2, %v12364_v52  ;;  %v9236_v48 = vor.u32 %v9235_v58, %v9232_v38  ;;  %v9254_v15 = vshrl.u32 %v8953_v49, 16  ;;  %v9257_v56 = vshll.u32 %v8953_v49, 16  ;;  %v16855_v25 = vpop.f32.mrf.mxu0  ;;  %v16857_v33 = vpop.f32.mrf.mxu1  ;;  %v8956_v30 = vld [vmem:[#allocation3 + $0xe4] sm:$0xf] }
 0x375   : > { %v9228_v7 = vsel %vm14157_vm13, %v9223_v50, %v9227_v11  ;;  %18569 = vst [vmem:[#allocation60_spill] sm:$0xff] %v16857_v33  ;;  %v9246_v12 = vor.u32 %v9245_v54, %v9241_v24  ;;  %v9251_v62 = vrot.slane %v9249_v36, 5  ;;  %v9263_v40 = vshll.u32 %v8954_v20, 16  ;;  %v8958_v36 = vld [vmem:[#allocation3 + $0xec] sm:$0x1] }
 0x376   : > { %v12365_v6 = vcombine.low %v9218_v17, %v9228_v7  ;;  %v9237_v41 = vrot.slane %v9236_v48, 4  ;;  %v9256_v51 = vrot.slane %v9254_v15, 4  ;;  %v9259_v59 = vrot.slane %v9257_v56, 5  ;;  %v16859_v9 = vpop.f32.mrf.mxu0  ;;  %v16861_v11 = vpop.f32.mrf.mxu1  ;;  %v8960_v33 = vld [vmem:[#allocation3 + $0xf8] sm:$0xf] }
 0x377   : > { %v9267_v52 = vshrl.u32 %v8954_v20, 16  ;;  %18570 = vst [vmem:[#allocation10_spill] sm:$0xff] %v16861_v11  ;;  %v9247_v38 = vrot.slane %v9246_v12, 4  ;;  %v9265_v49 = vrot.slane %v9263_v40, 5  ;;  %v9273_v50 = vshll.u32 %v8955_v3, 16 }
 0x378   : > { %13375 = vmatprep.mubr.msk.bf16.mxu0 %vm6697_vm2, %v12365_v6  ;;  %v12336_v54 = vcombine.low %v16628_v55, %v16634_v18  ;;  %v9242_v17 = vsel %vm14157_vm13, %v9237_v41, %v9241_v24  ;;  %13346 = vmatmul.mubr.msk.bf16.gmra.mxu1 %vm6697_vm2, %v12335_v42  ;;  %v9260_v58 = vor.u32 %v9259_v59, %v9256_v51  ;;  %v9278_v7 = vshrl.u32 %v8956_v30, 16  ;;  %v16869_v48 = vpop.f32.mrf.mxu0  ;;  %v16871_v15 = vpop.f32.mrf.mxu1  ;;  %v8959_v6 = vld [vmem:[#allocation3 + $0xf4] sm:$0xf] }
 0x379   : > { %v9269_v20 = vrot.slane %v9267_v52, 4  ;;  %18571 = vst [vmem:[#allocation58_spill] sm:$0xff] %v16871_v15  ;;  %v9252_v56 = vsel %vm14157_vm13, %v9247_v38, %v9251_v62  ;;  %v9275_v3 = vrot.slane %v9273_v50, 5  ;;  %v9281_v55 = vshll.u32 %v8956_v30, 16 }
 0x37a   : > { %13349 = vmatprep.mubr.msk.bf16.mxu1 %vm6697_vm2, %v12336_v54  ;;  %v9287_v18 = vshll.u32 %v8957_v1, 16  ;;  %v12366_v24 = vcombine.low %v9242_v17, %v9252_v56  ;;  %v9261_v12 = vrot.slane %v9260_v58, 4  ;;  %v9280_v40 = vrot.slane %v9278_v7, 4  ;;  %v16876_v41 = vpop.f32.mrf.mxu0  ;;  %v16878_v51 = vpop.f32.mrf.mxu1  ;;  %v9644_v54 = vld [vmem:[#allocation3 + $0x20] sm:$0x8] }
 0x37b   : > { %v9270_v42 = vor.u32 %v9269_v20, %v9265_v49  ;;  %18572 = vst [vmem:[#allocation12_spill] sm:$0xff] %v16876_v41  ;;  %18573 = vst [vmem:[#allocation16_spill] sm:$0xff] %v16878_v51  ;;  %v9283_v59 = vrot.slane %v9281_v55, 5  ;;  %v9291_v15 = vshrl.u32 %v8957_v1, 16  ;;  %v9297_v11 = vshll.u32 %v8958_v36, 16 }
 0x37c   : > { %v9289_v52 = vrot.slane %v9287_v18, 5  ;;  %13376 = vmatmul.mubr.msk.bf16.gmra.mxu0 %vm6697_vm2, %v12366_v24  ;;  %v9266_v62 = vsel %vm14157_vm13, %v9261_v12, %v9265_v49  ;;  %v12337_v38 = vcombine.low %v16642_v39, %v16645_v43  ;;  %v9302_v50 = vshrl.u32 %v8959_v6, 16  ;;  %v16885_v17 = vpop.f32.mrf.mxu0  ;;  %v16887_v58 = vpop.f32.mrf.mxu1  ;;  %v8961_v36 = vld [vmem:[#allocation3 + $0xfc] sm:$0x1]  ;;  %v16891_v12 = vld [vmem:[#allocation3 + $0x24] sm:$0xf] }
 0x37d   : > { %v9271_v30 = vrot.slane %v9270_v42, 4  ;;  %18574 = vst [vmem:[#allocation59_spill] sm:$0xff] %v16885_v17  ;;  %18575 = vst [vmem:[#allocation19_spill] sm:$0xff] %v16887_v58  ;;  %v9284_v20 = vor.u32 %v9283_v59, %v9280_v40  ;;  %v9293_v7 = vrot.slane %v9291_v15, 4  ;;  %v9299_v1 = vrot.slane %v9297_v11, 5 }
 0x37e   : > { %v9305_v56 = vshll.u32 %v8959_v6, 16  ;;  %v9304_v18 = vrot.slane %v9302_v50, 4  ;;  %v9311_v49 = vshll.u32 %v8960_v33, 16  ;;  %v9315_v24 = vshrl.u32 %v8960_v33, 16  ;;  %v16893_v39 = vpop.f32.mrf.mxu0  ;;  %v16895_v43 = vpop.f32.mrf.mxu1  ;;  %v16898_v59 = vld [vmem:[#allocation3 + $0x28] sm:$0xf] }
 0x37f   : > { %v9276_v55 = vsel %vm14157_vm13, %v9271_v30, %v9275_v3  ;;  %18576 = vst [vmem:[#allocation25_spill] sm:$0xff] %v16893_v39  ;;  %18577 = vst [vmem:[#allocation20_spill] sm:$0xff] %v16895_v43  ;;  %v9285_v51 = vrot.slane %v9284_v20, 4  ;;  %v9294_v58 = vor.u32 %v9293_v7, %v9289_v52  ;;  %v9321_v6 = vshll.u32 %v8961_v36, 16 }
 0x380   : > { %v12367_v42 = vcombine.low %v9266_v62, %v9276_v55  ;;  %v9307_v40 = vrot.slane %v9305_v56, 5  ;;  %13350 = vmatmul.mubr.msk.bf16.gmra.mxu1 %vm6697_vm2, %v12337_v38  ;;  %v9313_v11 = vrot.slane %v9311_v49, 5  ;;  %v9317_v15 = vrot.slane %v9315_v24, 4  ;;  %v16900_v30 = vpop.f32.mrf.mxu1  ;;  %v474_v56 = vld [vmem:[#allocation3 + $0x10c] sm:$0x1] }
 0x381   : > { %v9693_v3 = vshrl.u32 %v9644_v54, 16  ;;  %18578 = vst [vmem:[#allocation27_spill] sm:$0xff] %v16900_v30  ;;  %v9295_v33 = vrot.slane %v9294_v58, 4  ;;  %v9698_v43 = vshrl.u32 %v16891_v12, 16  ;;  %v16904_v62 = vpop.f32.mrf.mxu0  ;;  %v9290_v20 = vsel %vm14157_vm13, %v9285_v51, %v9289_v52  ;;  %v8962_v24 = vld [vmem:[#allocation3 + $0x104] sm:$0xf] }
 0x382   : > { %13379 = vmatprep.mubr.msk.bf16.mxu0 %vm6697_vm2, %v12367_v42  ;;  %v9308_v50 = vor.u32 %v9307_v40, %v9304_v18  ;;  %18579 = vst [vmem:[#allocation21_spill] sm:$0xff] %v16904_v62  ;;  %v9318_v38 = vor.u32 %v9317_v15, %v9313_v11  ;;  %v9323_v7 = vrot.slane %v9321_v6, 5  ;;  %v9701_v36 = vshll.u32 %v16891_v12, 16  ;;  %v16909_v55 = vpop.f32.mrf.mxu1  ;;  %v8963_v15 = vld [vmem:[#allocation3 + $0x108] sm:$0xf] }
 0x383   : > { %18580 = vst [vmem:[#allocation35_spill] sm:$0xff] %v16909_v55  ;;  %v9300_v54 = vsel %vm14157_vm13, %v9295_v33, %v9299_v1  ;;  %v9700_v58 = vrot.slane %v9698_v43, 7  ;;  %v9707_v18 = vshrl.u32 %v16898_v59, 16  ;;  %v16914_v42 = vpop.f32.mrf.mxu0  ;;  %v12387_v51 = vrot.slane %v9693_v3, 11 }
 0x384   : > { %v9309_v49 = vrot.slane %v9308_v50, 4  ;;  %18581 = vst [vmem:[#allocation32_spill] sm:$0xff] %v16914_v42  ;;  %v12368_v40 = vcombine.low %v9290_v20, %v9300_v54  ;;  %v9319_v30 = vrot.slane %v9318_v38, 4  ;;  %v10469_v52 = vsel %vm6746_vm14, %v16650_v8, 0  ;;  %v16918_v6 = vpop.f32.mrf.mxu1  ;;  %v9647_v50 = vld [vmem:[#allocation3 + $0x30] sm:$0x8] }
 0x385   : > { %18582 = vst [vmem:[#allocation28_spill] sm:$0xff] %v16918_v6  ;;  %v9703_v1 = vor.u32 %v9701_v36, %v9700_v58  ;;  %v9709_v33 = vrot.slane %v9707_v18, 7  ;;  %v9710_v43 = vshll.u32 %v16898_v59, 16  ;;  %13422 = vmatpush3.bf16.msra.mxu0 %v10469_v52  ;;  %v16923_v62 = vpop.f32.mrf.mxu0  ;;  %v475_v8 = vsel %vm15543_vm5, 0, %v474_v56  ;;  %v16930_v54 = vld [vmem:[#allocation3 + $0x34] sm:$0xf] }
 0x386   : > { %v9314_v55 = vsel %vm14157_vm13, %v9309_v49, %v9313_v11  ;;  %18583 = vst [vmem:[#allocation34_spill] sm:$0xff] %v16923_v62  ;;  %13380 = vmatmul.mubr.msk.bf16.gmra.mxu0 %vm6697_vm2, %v12368_v40  ;;  %v9324_v3 = vsel %vm14157_vm13, %v9319_v30, %v9323_v7  ;;  %v9326_v20 = vshrl.u32 %v8962_v24, 16  ;;  %v9329_v38 = vshll.u32 %v8962_v24, 16  ;;  %v16932_v11 = vpop.f32.mrf.mxu1  ;;  %476 = vst [vmem:[#allocation3 + $0x10c] sm:$0x1] %v475_v8 }
 0x387   : > { %18584 = vst [vmem:[#allocation37_spill] sm:$0xff] %v16932_v11  ;;  %v12369_v36 = vcombine.low %v9314_v55, %v9324_v3  ;;  %v9705_v49 = vrot.slane %v9700_v58, 4  ;;  %v9712_v18 = vor.u32 %v9710_v43, %v9709_v33  ;;  %v9335_v52 = vshll.u32 %v8963_v15, 16  ;;  %v16934_v6 = vpop.f32.mrf.mxu0  ;;  %v16936_v30 = vld [vmem:[#allocation3 + $0x38] sm:$0xf] }
 0x388   : > { %18585 = vst [vmem:[#allocation40_spill] sm:$0xff] %v16934_v6  ;;  %v9328_v40 = vrot.slane %v9326_v20, 4  ;;  %v9331_v62 = vrot.slane %v9329_v38, 5  ;;  %v9339_v42 = vshrl.u32 %v8963_v15, 16  ;;  %v9715_v7 = vshrl.u32 %v9647_v50, 16 }
 0x389   : > { %13383 = vmatprep.mubr.msk.bf16.mxu0 %vm6697_vm2, %v12369_v36  ;;  %v9704_v56 = vsel %vm13892_vm8, %v12387_v51, %v9703_v1  ;;  %v9713_v55 = vsel %vm13892_vm8, %v9705_v49, %v9712_v18  ;;  %v9337_v58 = vrot.slane %v9335_v52, 5  ;;  %v9720_v24 = vshrl.u32 %v16930_v54, 16  ;;  %v9650_v33 = vld [vmem:[#allocation3 + $0x40] sm:$0x8]  ;;  %v16944_v43 = vpop.f32.mrf.mxu0  ;;  %v16948_v50 = vld [vmem:[#allocation3 + $0x44] sm:$0xf] }
 0x38a   : > { %18586 = vst [vmem:[#allocation41_spill] sm:$0xff] %v16944_v43  ;;  %v16946_v3 = vpop.f32.mrf.mxu1  ;;  %v12404_v15 = vcombine.low %v9704_v56, %v9713_v55  ;;  %v9332_v8 = vor.u32 %v9331_v62, %v9328_v40  ;;  %v9341_v20 = vrot.slane %v9339_v42, 4  ;;  %v9723_v36 = vshll.u32 %v16930_v54, 16 }
 0x38b   : > { %18587 = vst [vmem:[#allocation36_spill] sm:$0xff] %v16946_v3  ;;  %v9722_v38 = vrot.slane %v9720_v24, 7  ;;  %v9729_v51 = vshrl.u32 %v16936_v30, 16  ;;  %v16952_v1 = vpop.f32.mrf.mxu0  ;;  %v12388_v52 = vrot.slane %v9715_v7, 11  ;;  %v9737_v56 = vshrl.u32 %v9650_v33, 16  ;;  %v18633_v4 = vld [vmem:[#allocation32_spill] sm:$0xff] }
 0x38c   : > { %18588 = vst [vmem:[#allocation42_spill] sm:$0xff] %v16952_v1  ;;  %v16954_v49 = vpop.f32.mrf.mxu1  ;;  %13389 = vmatprep.mubr.msk.bf16.mxu1 %vm6697_vm2, %v12404_v15  ;;  %v9342_v18 = vor.u32 %v9341_v20, %v9337_v58  ;;  %v9732_v40 = vshll.u32 %v16936_v30, 16  ;;  %v9742_v55 = vshrl.u32 %v16948_v50, 16  ;;  %v9653_v24 = vld [vmem:[#allocation3 + $0x50] sm:$0x8]  ;;  %v9745_v33 = vshll.u32 %v16948_v50, 16 }
 0x38d   : > { %18589 = vst [vmem:[#allocation5_spill] sm:$0xff] %v16954_v49  ;;  %v9725_v62 = vor.u32 %v9723_v36, %v9722_v38  ;;  %v9731_v42 = vrot.slane %v9729_v51, 7  ;;  %v16961_v3 = vpop.f32.mrf.mxu0  ;;  %v8964_v1 = vld [vmem:[#allocation3 + $0x10c] sm:$0x1]  ;;  %v9333_v49 = vrot.slane %v9332_v8, 4  ;;  %v9727_v15 = vrot.slane %v9722_v38, 4 }
 0x38e   : > { %18590 = vst [vmem:[#allocation48_spill] sm:$0xff] %v16961_v3  ;;  %v16963_v11 = vpop.f32.mrf.mxu1  ;;  %v9343_v43 = vrot.slane %v9342_v18, 4  ;;  %v9345_v20 = vshll.u32 %v8964_v1, 16  ;;  %v9744_v6 = vrot.slane %v9742_v55, 7  ;;  %v16966_v36 = vld [vmem:[#allocation3 + $0x54] sm:$0xf] }
 0x38f   : > { %18591 = vst [vmem:[#allocation44_spill] sm:$0xff] %v16963_v11  ;;  %v9734_v7 = vor.u32 %v9732_v40, %v9731_v42  ;;  %v16968_v51 = vpop.f32.mrf.mxu0  ;;  %v9726_v39 = vsel %vm13892_vm8, %v12388_v52, %v9725_v62  ;;  %v11195_v3 = vsel %vm6746_vm14, %v16711_v47, 0  ;;  %v12389_v11 = vrot.slane %v9737_v56, 11  ;;  %v16975_v18 = vld [vmem:[#allocation3 + $0x58] sm:$0xf] }
 0x390   : > { %18592 = vst [vmem:[#allocation43_spill] sm:$0xff] %v16968_v51  ;;  %v9751_v8 = vshrl.u32 %v16957_v14, 16  ;;  %v16977_v38 = vpop.f32.mrf.mxu1  ;;  %v9347_v1 = vrot.slane %v9345_v20, 5  ;;  %v9747_v40 = vor.u32 %v9745_v33, %v9744_v6  ;;  %v9754_v55 = vshll.u32 %v16957_v14, 16 }
 0x391   : > { %18593 = vst [vmem:[#allocation49_spill] sm:$0xff] %v16977_v38  ;;  %v9735_v42 = vsel %vm13892_vm8, %v9727_v15, %v9734_v7  ;;  %v16982_v51 = vpop.f32.mrf.mxu0  ;;  %v9759_v17 = vshrl.u32 %v9653_v24, 16  ;;  %v9764_v47 = vshrl.u32 %v16966_v36, 16  ;;  %v9338_v56 = vsel %vm14157_vm13, %v9333_v49, %v9337_v58  ;;  %v9656_v15 = vld [vmem:[#allocation3 + $0x60] sm:$0x8] }
 0x392   : > { %18594 = vst [vmem:[#allocation50_spill] sm:$0xff] %v16982_v51  ;;  %v12405_v52 = vcombine.low %v9726_v39, %v9735_v42  ;;  %v9753_v62 = vrot.slane %v9751_v8, 7  ;;  %v9348_v38 = vsel %vm14157_vm13, %v9343_v43, %v9347_v1  ;;  %v9749_v20 = vrot.slane %v9744_v6, 4  ;;  %v16994_v42 = vld [vmem:[#allocation3 + $0x64] sm:$0xf] }
 0x393   : > { %v9773_v41 = vshrl.u32 %v16975_v18, 16  ;;  %v16990_v7 = vpop.f32.mrf.mxu0  ;;  %v12370_v33 = vcombine.low %v9338_v56, %v9348_v38  ;;  %v9766_v8 = vrot.slane %v9764_v47, 7  ;;  %v9767_v24 = vshll.u32 %v16966_v36, 16  ;;  %v17001_v1 = vld [vmem:[#allocation3 + $0x68] sm:$0xf] }
 0x394   : > { %18595 = vst [vmem:[#allocation45_spill] sm:$0xff] %v16990_v7  ;;  %13390 = vmatmul.mubr.msk.bf16.vlgmr.msra.gmra.mxu1 %vm6697_vm2, %v12405_v52  ;;  %v9756_v39 = vor.u32 %v9754_v55, %v9753_v62  ;;  %v16996_v51 = vpop.f32.mrf.mxu1  ;;  %v12437_v58 = vcombine.low %v16891_v12, %v16898_v59  ;;  %v12390_v6 = vrot.slane %v9759_v17, 11  ;;  %v9776_v49 = vshll.u32 %v16975_v18, 16 }
 0x395   : > { %13456 = vmatpush3.bf16.msra.mxu1 %v11195_v3  ;;  %v9775_v43 = vrot.slane %v9773_v41, 7  ;;  %v17003_v38 = vpop.f32.mrf.mxu0  ;;  %13384 = vmatmul.mubr.msk.bf16.gmra.mxu0 %vm6697_vm2, %v12370_v33  ;;  %v9748_v55 = vsel %vm13892_vm8, %v12389_v11, %v9747_v40  ;;  %v9769_v62 = vor.u32 %v9767_v24, %v9766_v8  ;;  %v9781_v47 = vshrl.u32 %v9656_v15, 16  ;;  %v9659_v40 = vld [vmem:[#allocation3 + $0x70] sm:$0x8]  ;;  %v17025_v24 = vld [vmem:[#allocation3 + $0x78] sm:$0xf] }
 0x396   : > { %18596 = vst [vmem:[#allocation64_spill] sm:$0xff] %v17003_v38  ;;  %v9757_v52 = vsel %vm13892_vm8, %v9749_v20, %v9756_v39  ;;  %v17010_v12 = vpop.f32.mrf.mxu1  ;;  %13423 = vmatprep.mubr.msk.bf16.mxu0 %vm6697_vm2, %v12437_v58  ;;  %v9771_v17 = vrot.slane %v9766_v8, 4  ;;  %v9786_v3 = vshrl.u32 %v16994_v42, 16  ;;  %v9789_v33 = vshll.u32 %v16994_v42, 16  ;;  %v17018_v38 = vld [vmem:[#allocation3 + $0x74] sm:$0xf] }
 0x397   : > { %v12406_v41 = vcombine.low %v9748_v55, %v9757_v52  ;;  %v9778_v59 = vor.u32 %v9776_v49, %v9775_v43  ;;  %v17014_v56 = vpop.f32.mrf.mxu0  ;;  %v9795_v11 = vshrl.u32 %v17001_v1, 16  ;;  %v9770_v20 = vsel %vm13892_vm8, %v12390_v6, %v9769_v62 }
 0x398   : > { %18597 = vst [vmem:[#allocation66_spill] sm:$0xff] %v17014_v56  ;;  %v12391_v39 = vrot.slane %v9781_v47, 11  ;;  %v9788_v8 = vrot.slane %v9786_v3, 7  ;;  %v17027_v58 = vpop.f32.mrf.mxu1  ;;  %v9798_v55 = vshll.u32 %v17001_v1, 16  ;;  %v9803_v6 = vshrl.u32 %v9659_v40, 16 }
 0x399   : > { %13393 = vmatprep.mubr.msk.bf16.mxu1 %vm6697_vm2, %v12406_v41  ;;  %v9779_v15 = vsel %vm13892_vm8, %v9771_v17, %v9778_v59  ;;  %18598 = vst [vmem:[#allocation62_spill] sm:$0xff] %v17027_v58  ;;  %v9797_v49 = vrot.slane %v9795_v11, 7  ;;  %v12438_v41 = vcombine.low %v16930_v54, %v16936_v30  ;;  %v9808_v62 = vshrl.u32 %v17018_v38, 16  ;;  %v9662_v17 = vld [vmem:[#allocation3 + $0x80] sm:$0x8] }
 0x39a   : > { %v12407_v43 = vcombine.low %v9770_v20, %v9779_v15  ;;  %v9791_v56 = vor.u32 %v9789_v33, %v9788_v8  ;;  %v12439_v47 = vcombine.low %v16948_v50, %v16957_v14  ;;  %v9793_v59 = vrot.slane %v9788_v8, 4  ;;  %v17039_v20 = vld [vmem:[#allocation3 + $0x84] sm:$0xf]  ;;  %v17045_v40 = vld [vmem:[#allocation3 + $0x88] sm:$0xf] }
 0x39b   : > { %v17030_v52 = vpop.f32.mrf.mxu0  ;;  %v9800_v3 = vor.u32 %v9798_v55, %v9797_v49  ;;  %v9817_v11 = vshrl.u32 %v17025_v24, 16  ;;  %v9810_v54 = vrot.slane %v9808_v62, 7  ;;  %v9811_v30 = vshll.u32 %v17018_v38, 16 }
 0x39c   : > { %18599 = vst [vmem:[#allocation65_spill] sm:$0xff] %v17030_v52  ;;  %13394 = vmatmul.mubr.msk.bf16.gmra.mxu1 %vm6697_vm2, %v12407_v43  ;;  %v9792_v15 = vsel %vm13892_vm8, %v12391_v39, %v9791_v56  ;;  %v9820_v33 = vshll.u32 %v17025_v24, 16  ;;  %v17047_v43 = vpop.f32.mrf.mxu1  ;;  %v12392_v50 = vrot.slane %v9803_v6, 11  ;;  %v9825_v49 = vshrl.u32 %v9662_v17, 16  ;;  %v17057_v52 = vld [vmem:[#allocation3 + $0x94] sm:$0xf] }
 0x39d   : > { %18600 = vst [vmem:[#allocation67_spill] sm:$0xff] %v17047_v43  ;;  %13424 = vmatmul.mubr.msk.bf16.vlgmr.msra.gmra.mxu0 %vm6697_vm2, %v12438_v41  ;;  %v9801_v14 = vsel %vm13892_vm8, %v9793_v59, %v9800_v3  ;;  %v9819_v8 = vrot.slane %v9817_v11, 7  ;;  %v17052_v55 = vpop.f32.mrf.mxu0  ;;  %v9813_v39 = vor.u32 %v9811_v30, %v9810_v54  ;;  %v9830_v62 = vshrl.u32 %v17039_v20, 16  ;;  %v9665_v59 = vld [vmem:[#allocation3 + $0x90] sm:$0x8] }
 0x39e   : > { %18601 = vst [vmem:[#allocation69_spill] sm:$0xff] %v17052_v55  ;;  %13427 = vmatprep.mubr.msk.bf16.mxu0 %vm6697_vm2, %v12439_v47  ;;  %v12408_v56 = vcombine.low %v9792_v15, %v9801_v14  ;;  %v9815_v7 = vrot.slane %v9810_v54, 4  ;;  %v9839_v43 = vshrl.u32 %v17045_v40, 16  ;;  %v12393_v41 = vrot.slane %v9825_v49, 11  ;;  %v17068_v30 = vld [vmem:[#allocation3 + $0x98] sm:$0xf] }
 0x39f   : > { %v9822_v58 = vor.u32 %v9820_v33, %v9819_v8  ;;  %v9832_v6 = vrot.slane %v9830_v62, 7  ;;  %v9833_v17 = vshll.u32 %v17039_v20, 16  ;;  %v9814_v47 = vsel %vm13892_vm8, %v12392_v50, %v9813_v39  ;;  %v17070_v33 = vpop.f32.mrf.mxu0  ;;  %v9668_v50 = vld [vmem:[#allocation3 + $0xa0] sm:$0x8] }
 0x3a0   : > { %13397 = vmatprep.mubr.msk.bf16.mxu1 %vm6697_vm2, %v12408_v56  ;;  %v9841_v15 = vrot.slane %v9839_v43, 7  ;;  %v9842_v54 = vshll.u32 %v17045_v40, 16  ;;  %18602 = vst [vmem:[#allocation29_spill] sm:$0xff] %v17070_v33  ;;  %v17074_v14 = vadd.f32 %v16720_v19, %v16664_v2  ;;  %v12440_v8 = vcombine.low %v16966_v36, %v16975_v18  ;;  %v17079_v43 = vld [vmem:[#allocation3 + $0xa4] sm:$0xf] }
 0x3a1   : > { %v17061_v3 = vpop.f32.mrf.mxu1  ;;  %v9823_v11 = vsel %vm13892_vm8, %v9815_v7, %v9822_v58  ;;  %v9835_v56 = vor.u32 %v9833_v17, %v9832_v6  ;;  %v9837_v39 = vrot.slane %v9832_v6, 4  ;;  %v9847_v7 = vshrl.u32 %v9665_v59, 16  ;;  %v17090_v6 = vld [vmem:[#allocation3 + $0xa8] sm:$0xf] }
 0x3a2   : > { %v12409_v49 = vcombine.low %v9814_v47, %v9823_v11  ;;  %v9844_v62 = vor.u32 %v9842_v54, %v9841_v15  ;;  %v9852_v58 = vshrl.u32 %v17057_v52, 16  ;;  %v12441_v2 = vcombine.low %v16994_v42, %v17001_v1  ;;  %v17096_v15 = vpop.f32.mrf.mxu0 }
 0x3a3   : > { %v17081_v55 = vpop.f32.mrf.mxu1  ;;  %v9836_v19 = vsel %vm13892_vm8, %v12393_v41, %v9835_v56  ;;  %v9855_v36 = vshll.u32 %v17057_v52, 16  ;;  %v9861_v18 = vshrl.u32 %v17068_v30, 16  ;;  %v12394_v59 = vrot.slane %v9847_v7, 11  ;;  %18603 = vst [vmem:[#allocation75_spill] sm:$0xff] %v17096_v15 }
 0x3a4   : > { %13398 = vmatmul.mubr.msk.bf16.gmra.mxu1 %vm6697_vm2, %v12409_v49  ;;  %v9845_v17 = vsel %vm13892_vm8, %v9837_v39, %v9844_v62  ;;  %v9854_v47 = vrot.slane %v9852_v58, 7  ;;  %v9864_v11 = vshll.u32 %v17068_v30, 16  ;;  %v9869_v41 = vshrl.u32 %v9668_v50, 16  ;;  %v17109_v62 = vld [vmem:[#allocation3 + $0xb4] sm:$0xf] }
 0x3a5   : > { %13428 = vmatmul.mubr.msk.bf16.gmra.mxu0 %vm6697_vm2, %v12440_v8  ;;  %v12410_v42 = vcombine.low %v9836_v19, %v9845_v17  ;;  %v9863_v1 = vrot.slane %v9861_v18, 7  ;;  %v9874_v54 = vshrl.u32 %v17079_v43, 16  ;;  %v17102_v49 = vadd.f32 %v16732_v34, %v16683_v57  ;;  %v17111_v7 = vpop.f32.mrf.mxu1  ;;  %v9671_v57 = vld [vmem:[#allocation3 + $0xb0] sm:$0x8]  ;;  %v17120_v18 = vld [vmem:[#allocation3 + $0xb8] sm:$0xf] }
 0x3a6   : > { %13431 = vmatprep.mubr.msk.bf16.mxu0 %vm6697_vm2, %v12441_v2  ;;  %v17106_v8 = vadd.f32 %v16743_v45, %v16694_v60  ;;  %v9857_v56 = vor.u32 %v9855_v36, %v9854_v47  ;;  %v9883_v39 = vshrl.u32 %v17090_v6, 16  ;;  %v9859_v50 = vrot.slane %v9854_v47, 4 }
 0x3a7   : > { %13401 = vmatprep.mubr.msk.bf16.mxu1 %vm6697_vm2, %v12410_v42  ;;  %v9866_v58 = vor.u32 %v9864_v11, %v9863_v1  ;;  %v9876_v2 = vrot.slane %v9874_v54, 7  ;;  %v9877_v19 = vshll.u32 %v17079_v43, 16  ;;  %v17117_v34 = vadd.f32 %v16753_v44, %v16704_v26  ;;  %v17130_v15 = vpop.f32.mrf.mxu1 }
 0x3a8   : > { %v12395_v60 = vrot.slane %v9869_v41, 11  ;;  %v9885_v45 = vrot.slane %v9883_v39, 7  ;;  %v9886_v36 = vshll.u32 %v17090_v6, 16  ;;  %v12442_v47 = vcombine.low %v17018_v38, %v17025_v24  ;;  %v9674_v39 = vld [vmem:[#allocation3 + $0xc0] sm:$0x8]  ;;  %18605 = vst [vmem:[#allocation71_spill] sm:$0xff] %v17130_v15 }
 0x3a9   : > { %18604 = vst [vmem:[#allocation68_spill] sm:$0xff] %v17117_v34  ;;  %v17122_v17 = vpop.f32.mrf.mxu0  ;;  %v9858_v11 = vsel %vm13892_vm8, %v12394_v59, %v9857_v56  ;;  %v9867_v42 = vsel %vm13892_vm8, %v9859_v50, %v9866_v58  ;;  %v9879_v1 = vor.u32 %v9877_v19, %v9876_v2  ;;  %v9881_v44 = vrot.slane %v9876_v2, 4  ;;  %v17140_v56 = vld [vmem:[#allocation3 + $0xc4] sm:$0xf]  ;;  %v17142_v50 = vld [vmem:[#allocation3 + $0xc8] sm:$0xf] }
 0x3aa   : > { %v12411_v26 = vcombine.low %v9858_v11, %v9867_v42  ;;  %v9888_v41 = vor.u32 %v9886_v36, %v9885_v45  ;;  %v9891_v54 = vshrl.u32 %v9671_v57, 16  ;;  %v17134_v33 = vadd.f32 %v16766_v29, %v16727_v31  ;;  %v18625_v34 = vld [vmem:[#allocation10_spill] sm:$0xff] }
 0x3ab   : > { %v12443_v38 = vcombine.low %v17039_v20, %v17045_v40  ;;  %v9896_v24 = vshrl.u32 %v17109_v62, 16  ;;  %v9905_v59 = vshrl.u32 %v17120_v18, 16  ;;  %v9880_v58 = vsel %vm13892_vm8, %v12395_v60, %v9879_v1  ;;  %v17151_v40 = vpop.f32.mrf.mxu0 }
 0x3ac   : > { %13402 = vmatmul.mubr.msk.bf16.gmra.mxu1 %vm6697_vm2, %v12411_v26  ;;  %v9889_v31 = vsel %vm13892_vm8, %v9881_v44, %v9888_v41  ;;  %v12396_v29 = vrot.slane %v9891_v54, 11  ;;  %v9899_v20 = vshll.u32 %v17109_v62, 16  ;;  %v9908_v45 = vshll.u32 %v17120_v18, 16  ;;  %v17165_v54 = vld [vmem:[#allocation3 + $0xd4] sm:$0xf] }
 0x3ad   : > { %13432 = vmatmul.mubr.msk.bf16.gmra.mxu0 %vm6697_vm2, %v12442_v47  ;;  %v12412_v2 = vcombine.low %v9880_v58, %v9889_v31  ;;  %v9898_v19 = vrot.slane %v9896_v24, 7  ;;  %v9907_v57 = vrot.slane %v9905_v59, 7  ;;  %v17157_v36 = vadd.f32 %v16771_v63, %v16734_v61  ;;  %v17168_v59 = vpop.f32.mrf.mxu0 }
 0x3ae   : > { %13435 = vmatprep.mubr.msk.bf16.mxu0 %vm6697_vm2, %v12443_v38  ;;  %v9913_v60 = vshrl.u32 %v9674_v39, 16  ;;  %v9918_v47 = vshrl.u32 %v17140_v56, 16  ;;  %v9927_v11 = vshrl.u32 %v17142_v50, 16  ;;  %v9921_v41 = vshll.u32 %v17140_v56, 16  ;;  %v9677_v39 = vld [vmem:[#allocation3 + $0xd0] sm:$0x8] }
 0x3af   : > { %13405 = vmatprep.mubr.msk.bf16.mxu1 %vm6697_vm2, %v12412_v2  ;;  %v9901_v1 = vor.u32 %v9899_v20, %v9898_v19  ;;  %v9903_v26 = vrot.slane %v9898_v19, 4  ;;  %v9910_v44 = vor.u32 %v9908_v45, %v9907_v57  ;;  %v9930_v63 = vshll.u32 %v17142_v50, 16  ;;  %v17180_v19 = vld [vmem:[#allocation3 + $0xd8] sm:$0xf] }
 0x3b0   : > { %v17161_v42 = vpop.f32.mrf.mxu1  ;;  %v12397_v38 = vrot.slane %v9913_v60, 11  ;;  %v9920_v24 = vrot.slane %v9918_v47, 7  ;;  %v9929_v61 = vrot.slane %v9927_v11, 7  ;;  %v17172_v58 = vadd.f32 %v16780_v32, %v16748_v22 }
 0x3b1   : > { %v12444_v31 = vcombine.low %v17057_v52, %v17068_v30  ;;  %v9902_v20 = vsel %vm13892_vm8, %v12396_v29, %v9901_v1  ;;  %v9911_v2 = vsel %vm13892_vm8, %v9903_v26, %v9910_v44  ;;  %v17186_v22 = vadd.f32 %v16784_v16, %v16757_v27  ;;  %v9680_v29 = vld [vmem:[#allocation3 + $0xe0] sm:$0x8]  ;;  %v17191_v1 = vld [vmem:[#allocation3 + $0xe4] sm:$0xf]  ;;  %v18607_v26 = vld [vmem:[#allocation57_spill] sm:$0xff] }
 0x3b2   : > { %v12413_v57 = vcombine.low %v9902_v20, %v9911_v2  ;;  %v9923_v45 = vor.u32 %v9921_v41, %v9920_v24  ;;  %v9925_v60 = vrot.slane %v9920_v24, 4  ;;  %v9932_v47 = vor.u32 %v9930_v63, %v9929_v61  ;;  %v17182_v11 = vpop.f32.mrf.mxu1  ;;  %v17206_v41 = vpop.f32.mrf.mxu0 }
 0x3b3   : > { %18606 = vst [vmem:[#allocation70_spill] sm:$0xff] %v17186_v22  ;;  %v12445_v32 = vcombine.low %v17079_v43, %v17090_v6  ;;  %v9935_v52 = vshrl.u32 %v9677_v39, 16  ;;  %v9940_v30 = vshrl.u32 %v17165_v54, 16  ;;  %v17195_v44 = vadd.f32 %v16797_v0, %v18607_v26  ;;  %v17204_v6 = vld [vmem:[#allocation3 + $0xe8] sm:$0xf]  ;;  %18608 = vst [vmem:[#allocation74_spill] sm:$0xff] %v17206_v41 }
 0x3b4   : > { %13406 = vmatmul.mubr.msk.bf16.gmra.mxu1 %vm6697_vm2, %v12413_v57  ;;  %v9924_v16 = vsel %vm13892_vm8, %v12397_v38, %v9923_v45  ;;  %v9933_v27 = vsel %vm13892_vm8, %v9925_v60, %v9932_v47  ;;  %v9949_v43 = vshrl.u32 %v17180_v19, 16  ;;  %v9943_v61 = vshll.u32 %v17165_v54, 16  ;;  %v17212_v2 = vpop.f32.mrf.mxu1  ;;  %v18609_v57 = vld [vmem:[#allocation61_spill] sm:$0xff]  ;;  %v18623_v22 = vld [vmem:[#allocation59_spill] sm:$0xff] }
 0x3b5   : > { %13436 = vmatmul.mubr.msk.bf16.gmra.mxu0 %vm6697_vm2, %v12444_v31  ;;  %v12414_v0 = vcombine.low %v9924_v16, %v9933_v27  ;;  %v9942_v24 = vrot.slane %v9940_v30, 7  ;;  %v9952_v63 = vshll.u32 %v17180_v19, 16  ;;  %v12398_v39 = vrot.slane %v9935_v52, 11  ;;  %v17224_v52 = vld [vmem:[#allocation3 + $0xf4] sm:$0xf] }
 0x3b6   : > { %13439 = vmatprep.mubr.msk.bf16.mxu0 %vm6697_vm2, %v12445_v32  ;;  %v9951_v31 = vrot.slane %v9949_v43, 7  ;;  %v9957_v38 = vshrl.u32 %v9680_v29, 16  ;;  %v9962_v20 = vshrl.u32 %v17191_v1, 16  ;;  %v17216_v45 = vadd.f32 %v16803_v23, %v18609_v57  ;;  %v9683_v27 = vld [vmem:[#allocation3 + $0xf0] sm:$0x8] }
 0x3b7   : > { %v17220_v60 = vadd.f32 %v16813_v46, %v16787_v28  ;;  %13409 = vmatprep.mubr.msk.bf16.mxu1 %vm6697_vm2, %v12414_v0  ;;  %v9945_v47 = vor.u32 %v9943_v61, %v9942_v24  ;;  %v9971_v32 = vshrl.u32 %v17204_v6, 16  ;;  %v9947_v30 = vrot.slane %v9942_v24, 4  ;;  %v17232_v61 = vld [vmem:[#allocation3 + $0xf8] sm:$0xf] }
 0x3b8   : > { %v9954_v29 = vor.u32 %v9952_v63, %v9951_v31  ;;  %v9964_v26 = vrot.slane %v9962_v20, 7  ;;  %v9965_v16 = vshll.u32 %v17191_v1, 16  ;;  %v12446_v23 = vcombine.low %v17109_v62, %v17120_v18  ;;  %v17240_v20 = vpop.f32.mrf.mxu1 }
 0x3b9   : > { %v17227_v43 = vpop.f32.mrf.mxu0  ;;  %v12399_v28 = vrot.slane %v9957_v38, 11  ;;  %v9973_v46 = vrot.slane %v9971_v32, 7  ;;  %v9974_v0 = vshll.u32 %v17204_v6, 16  ;;  %v9946_v57 = vsel %vm13892_vm8, %v12398_v39, %v9945_v47  ;;  %18610 = vst [vmem:[#allocation72_spill] sm:$0xff] %v17240_v20  ;;  %v17242_v32 = vld [vmem:[#allocation3 + $0x104] sm:$0xf] }
 0x3ba   : > { %v9955_v24 = vsel %vm13892_vm8, %v9947_v30, %v9954_v29  ;;  %v12447_v63 = vcombine.low %v17140_v56, %v17142_v50  ;;  %v9967_v31 = vor.u32 %v9965_v16, %v9964_v26  ;;  %v9969_v62 = vrot.slane %v9964_v26, 4  ;;  %v9686_v47 = vld [vmem:[#allocation3 + $0x100] sm:$0x8]  ;;  %v17255_v30 = vld [vmem:[#allocation3 + $0x108] sm:$0xf]  ;;  %v18612_v20 = vld [vmem:[#allocation11_spill] sm:$0xff] }
 0x3bb   : > { %v12415_v41 = vcombine.low %v9946_v57, %v9955_v24  ;;  %v9976_v18 = vor.u32 %v9974_v0, %v9973_v46  ;;  %v9979_v38 = vshrl.u32 %v9683_v27, 16  ;;  %v17246_v15 = vadd.f32 %v16827_v53, %v16799_v37  ;;  %v17257_v29 = vpop.f32.mrf.mxu0 }
 0x3bc   : > { %v17250_v39 = vadd.f32 %v16837_v21, %v16811_v5  ;;  %v9984_v56 = vshrl.u32 %v17224_v52, 16  ;;  %v9993_v50 = vshrl.u32 %v17232_v61, 16  ;;  %v9968_v37 = vsel %vm13892_vm8, %v12399_v28, %v9967_v31 }
 0x3bd   : > { %18611 = vst [vmem:[#allocation73_spill] sm:$0xff] %v17246_v15  ;;  %13440 = vmatmul.mubr.msk.bf16.gmra.mxu0 %vm6697_vm2, %v12446_v23  ;;  %13410 = vmatmul.mubr.msk.bf16.gmra.mxu1 %vm6697_vm2, %v12415_v41  ;;  %v9977_v5 = vsel %vm13892_vm8, %v9969_v62, %v9976_v18  ;;  %v12400_v53 = vrot.slane %v9979_v38, 11  ;;  %v9987_v21 = vshll.u32 %v17224_v52, 16  ;;  %v9996_v23 = vshll.u32 %v17232_v61, 16  ;;  %v423_v18 = vld [vmem:[#allocation3 + $0x110] sm:$0x8]  ;;  %v17277_v38 = vpop.f32.mrf.mxu0 }
 0x3be   : > { %13443 = vmatprep.mubr.msk.bf16.mxu0 %vm6697_vm2, %v12447_v63  ;;  %v12416_v26 = vcombine.low %v9968_v37, %v9977_v5  ;;  %v9986_v16 = vrot.slane %v9984_v56, 7  ;;  %v9995_v27 = vrot.slane %v9993_v50, 7  ;;  %v17271_v41 = vadd.f32 %v16844_v10, %v16821_v13  ;;  %v17280_v10 = vld [vmem:[#allocation3 + $0x114] sm:$0xf] }
 0x3bf   : > { %v10001_v0 = vshrl.u32 %v9686_v47, 16  ;;  %v10006_v28 = vshrl.u32 %v17242_v32, 16  ;;  %v10015_v57 = vshrl.u32 %v17255_v30, 16  ;;  %v10009_v62 = vshll.u32 %v17242_v32, 16  ;;  %v10667_v15 = vld [vmem:[#allocation3 + $0x34] sm:$0xf] }
 0x3c0   : > { %v17267_v46 = vpop.f32.mrf.mxu1  ;;  %13413 = vmatprep.mubr.msk.bf16.mxu1 %vm6697_vm2, %v12416_v26  ;;  %v9989_v24 = vor.u32 %v9987_v21, %v9986_v16  ;;  %v9991_v63 = vrot.slane %v9986_v16, 4  ;;  %v9998_v31 = vor.u32 %v9996_v23, %v9995_v27  ;;  %v10018_v13 = vshll.u32 %v17255_v30, 16  ;;  %v17290_v16 = vld [vmem:[#allocation3 + $0x118] sm:$0xf] }
 0x3c1   : > { %v12401_v56 = vrot.slane %v10001_v0, 11  ;;  %v10008_v50 = vrot.slane %v10006_v28, 7  ;;  %v10017_v37 = vrot.slane %v10015_v57, 7  ;;  %v12448_v47 = vcombine.low %v17165_v54, %v17180_v19  ;;  %v18613_v19 = vld [vmem:[#allocation15_spill] sm:$0xff] }
 0x3c2   : > { %v9990_v5 = vsel %vm13892_vm8, %v12400_v53, %v9989_v24  ;;  %v9999_v21 = vsel %vm13892_vm8, %v9991_v63, %v9998_v31  ;;  %v12449_v26 = vcombine.low %v17191_v1, %v17204_v6  ;;  %v17292_v27 = vpop.f32.mrf.mxu1  ;;  %v17296_v54 = vadd.f32 %v16855_v25, %v18612_v20  ;;  %v10664_v63 = vld [vmem:[#allocation3 + $0x24] sm:$0xf]  ;;  %v10665_v31 = vld [vmem:[#allocation3 + $0x28] sm:$0xf] }
 0x3c3   : > { %v12417_v23 = vcombine.low %v9990_v5, %v9999_v21  ;;  %v10011_v0 = vor.u32 %v10009_v62, %v10008_v50  ;;  %v10013_v28 = vrot.slane %v10008_v50, 4  ;;  %v10020_v57 = vor.u32 %v10018_v13, %v10017_v37  ;;  %v17306_v62 = vpop.f32.mrf.mxu0  ;;  %v10666_v50 = vld [vmem:[#allocation3 + $0x2c] sm:$0x1]  ;;  %v18617_v37 = vld [vmem:[#allocation55_spill] sm:$0xff] }
 0x3c4   : > { %v17300_v53 = vadd.f32 %v16859_v9, %v18613_v19  ;;  %v424_v1 = vsel %vm15482_vm1, 0, %v423_v18  ;;  %v10028_v6 = vshrl.u32 %v17280_v10, 16  ;;  %18616 = vst [vmem:[#allocation24_spill] sm:$0xff] %v17306_v62  ;;  %v10037_v20 = vshrl.u32 %v17290_v16, 16  ;;  %v18620_v19 = vld [vmem:[#allocation12_spill] sm:$0xff] }
 0x3c5   : > { %13444 = vmatmul.mubr.msk.bf16.gmra.mxu0 %vm6697_vm2, %v12448_v47  ;;  %13414 = vmatmul.mubr.msk.bf16.gmra.mxu1 %vm6697_vm2, %v12417_v23  ;;  %v10012_v25 = vsel %vm13892_vm8, %v12401_v56, %v10011_v0  ;;  %v10021_v9 = vsel %vm13892_vm8, %v10013_v28, %v10020_v57  ;;  %425 = vst [vmem:[#allocation3 + $0x110] sm:$0x8] %v424_v1  ;;  %v10040_v18 = vshll.u32 %v17290_v16, 16  ;;  %v10031_v21 = vshll.u32 %v17280_v10, 16  ;;  %v18619_v57 = vld [vmem:[#allocation56_spill] sm:$0xff] }
 0x3c6   : > { %18614 = vst [vmem:[#allocation76_spill] sm:$0xff] %v17300_v53  ;;  %13447 = vmatprep.mubr.msk.bf16.mxu0 %vm6697_vm2, %v12449_v26  ;;  %v17318_v13 = vadd.f32 %v16869_v48, %v18617_v37  ;;  %v12418_v47 = vcombine.low %v10012_v25, %v10021_v9  ;;  %v10030_v5 = vrot.slane %v10028_v6, 7  ;;  %v17321_v26 = vpop.f32.mrf.mxu1  ;;  %v10039_v56 = vrot.slane %v10037_v20, 7  ;;  %v18622_v20 = vld [vmem:[#allocation60_spill] sm:$0xff] }
 0x3c7   : > { %v10713_v23 = vshrl.u32 %v10664_v63, 16  ;;  %v10716_v0 = vshll.u32 %v10664_v63, 16  ;;  %v10722_v28 = vshll.u32 %v10665_v31, 16  ;;  %v17325_v24 = vadd.f32 %v18620_v19, %v18619_v57 }
 0x3c8   : > { %18618 = vst [vmem:[#allocation78_spill] sm:$0xff] %v17318_v13  ;;  %13417 = vmatprep.mubr.msk.bf16.mxu1 %vm6697_vm2, %v12418_v47  ;;  %v10035_v1 = vrot.slane %v10030_v5, 4  ;;  %v10726_v53 = vshrl.u32 %v10665_v31, 16  ;;  %v10732_v48 = vshll.u32 %v10666_v50, 16  ;;  %v10042_v6 = vor.u32 %v10040_v18, %v10039_v56  ;;  %v18626_v13 = vld [vmem:[#allocation25_spill] sm:$0xff]  ;;  %v17340_v19 = vpop.f32.mrf.mxu1 }
 0x3c9   : > { %18621 = vst [vmem:[#allocation83_spill] sm:$0xff] %v17325_v24  ;;  %v17328_v37 = vpop.f32.mrf.mxu0  ;;  %v10715_v25 = vrot.slane %v10713_v23, 4  ;;  %v10718_v9 = vrot.slane %v10716_v0, 5  ;;  %v10724_v62 = vrot.slane %v10722_v28, 5  ;;  %v17332_v63 = vadd.f32 %v18623_v22, %v18622_v20  ;;  %v10668_v50 = vld [vmem:[#allocation3 + $0x38] sm:$0xf] }
 0x3ca   : > { %v17336_v57 = vadd.f32 %v18626_v13, %v18625_v34  ;;  %v12450_v47 = vcombine.low %v17224_v52, %v17232_v61  ;;  %v10728_v31 = vrot.slane %v10726_v53, 4  ;;  %18628 = vst [vmem:[#allocation79_spill] sm:$0xff] %v17340_v19  ;;  %v10033_v18 = vor.u32 %v10031_v21, %v10030_v5  ;;  %v10669_v28 = vld [vmem:[#allocation3 + $0x3c] sm:$0x1] }
 0x3cb   : > { %18624 = vst [vmem:[#allocation77_spill] sm:$0xff] %v17332_v63  ;;  %v12451_v56 = vcombine.low %v17242_v32, %v17255_v30  ;;  %v10719_v23 = vor.u32 %v10718_v9, %v10715_v25  ;;  %v10734_v0 = vrot.slane %v10732_v48, 5  ;;  %v10043_v34 = vsel %vm13892_vm8, %v10035_v1, %v10042_v6  ;;  %v17347_v61 = vpop.f32.mrf.mxu0 }
 0x3cc   : > { %18627 = vst [vmem:[#allocation80_spill] sm:$0xff] %v17336_v57  ;;  %v9689_v22 = vld [vmem:[#allocation3 + $0x110] sm:$0x8]  ;;  %v10729_v13 = vor.u32 %v10728_v31, %v10724_v62  ;;  %v10737_v20 = vshrl.u32 %v10667_v15, 16  ;;  %v10740_v52 = vshll.u32 %v10667_v15, 16  ;;  %v10746_v21 = vshll.u32 %v10668_v50, 16 }
 0x3cd   : > { %13448 = vmatmul.mubr.msk.bf16.gmra.mxu0 %vm6697_vm2, %v12450_v47  ;;  %v10023_v53 = vshrl.u32 %v9689_v22, 16  ;;  %v10720_v5 = vrot.slane %v10719_v23, 4  ;;  %v10750_v32 = vshrl.u32 %v10668_v50, 16  ;;  %v10756_v9 = vshll.u32 %v10669_v28, 16  ;;  %v10670_v47 = vld [vmem:[#allocation3 + $0x44] sm:$0xf]  ;;  %v17358_v28 = vpop.f32.mrf.mxu0 }
 0x3ce   : > { %13451 = vmatprep.mubr.msk.bf16.mxu0 %vm6697_vm2, %v12451_v56  ;;  %v10730_v30 = vrot.slane %v10729_v13, 4  ;;  %v10739_v48 = vrot.slane %v10737_v20, 4  ;;  %v10742_v25 = vrot.slane %v10740_v52, 5  ;;  %v12452_v1 = vcombine.low %v17280_v10, %v17290_v16  ;;  %v10671_v31 = vld [vmem:[#allocation3 + $0x48] sm:$0xf]  ;;  %18629 = vst [vmem:[#allocation82_spill] sm:$0xff] %v17358_v28 }
 0x3cf   : > { %v12402_v57 = vrot.slane %v10023_v53, 11  ;;  %v10748_v15 = vrot.slane %v10746_v21, 5  ;;  %v10752_v6 = vrot.slane %v10750_v32, 4  ;;  %v10725_v56 = vsel %vm14157_vm13, %v10720_v5, %v10724_v62  ;;  %v10672_v13 = vld [vmem:[#allocation3 + $0x4c] sm:$0x1]  ;;  %v18632_v28 = vld [vmem:[#allocation16_spill] sm:$0xff] }
 0x3d0   : > { %v17350_v19 = vpop.f32.mrf.mxu1  ;;  %v10735_v50 = vsel %vm14157_vm13, %v10730_v30, %v10734_v0  ;;  %v10743_v23 = vor.u32 %v10742_v25, %v10739_v48  ;;  %v10758_v22 = vrot.slane %v10756_v9, 5  ;;  %v10761_v10 = vshrl.u32 %v10670_v47, 16  ;;  %v18630_v48 = vld [vmem:[#allocation58_spill] sm:$0xff]  ;;  %v18631_v25 = vld [vmem:[#allocation21_spill] sm:$0xff] }
 0x3d1   : > { %v10034_v20 = vsel %vm13892_vm8, %v12402_v57, %v10033_v18  ;;  %v12470_v52 = vcombine.low %v10725_v56, %v10735_v50  ;;  %v10753_v53 = vor.u32 %v10752_v6, %v10748_v15  ;;  %v10764_v32 = vshll.u32 %v10670_v47, 16  ;;  %v17374_v47 = vpop.f32.mrf.mxu0  ;;  %v18635_v6 = vld [vmem:[#allocation19_spill] sm:$0xff]  ;;  %v18636_v56 = vld [vmem:[#allocation34_spill] sm:$0xff] }
 0x3d2   : > { %v12419_v16 = vcombine.low %v10034_v20, %v10043_v34  ;;  %v10744_v21 = vrot.slane %v10743_v23, 4  ;;  %v10770_v63 = vshll.u32 %v10671_v31, 16  ;;  %v17362_v24 = vpop.f32.mrf.mxu1  ;;  %v10763_v5 = vrot.slane %v10761_v10, 4  ;;  %18634 = vst [vmem:[#allocation81_spill] sm:$0xff] %v17374_v47  ;;  %v10674_v20 = vld [vmem:[#allocation3 + $0x58] sm:$0xf] }
 0x3d3   : > { %v10754_v62 = vrot.slane %v10753_v53, 4  ;;  %v10774_v0 = vshrl.u32 %v10671_v31, 16  ;;  %v10780_v30 = vshll.u32 %v10672_v13, 16  ;;  %v17366_v9 = vadd.f32 %v18631_v25, %v18630_v48  ;;  %v18641_v47 = vld [vmem:[#allocation40_spill] sm:$0xff] }
 0x3d4   : > { %v17370_v57 = vadd.f32 %v18633_v4, %v18632_v28  ;;  %13418 = vmatmul.mubr.msk.bf16.gmra.mxu1 %vm6697_vm2, %v12419_v16  ;;  %v10766_v18 = vrot.slane %v10764_v32, 5  ;;  %v10772_v34 = vrot.slane %v10770_v63, 5  ;;  %v17378_v31 = vadd.f32 %v18636_v56, %v18635_v6  ;;  %v10673_v28 = vld [vmem:[#allocation3 + $0x54] sm:$0xf]  ;;  %v10675_v16 = vld [vmem:[#allocation3 + $0x5c] sm:$0x1]  ;;  %v17389_v32 = vpop.f32.mrf.mxu1 }
 0x3d5   : > { %13452 = vmatmul.mubr.msk.bf16.gmra.mxu0 %vm6697_vm2, %v12452_v1  ;;  %13457 = vmatprep.mubr.msk.bf16.mxu1 %vm6697_vm2, %v12470_v52  ;;  %v7867_v50 = vadd.f32 %v16996_v51, %v17074_v14  ;;  %v10759_v23 = vsel %vm14157_vm13, %v10754_v62, %v10758_v22  ;;  %v10776_v13 = vrot.slane %v10774_v0, 4  ;;  %v10749_v63 = vsel %vm14157_vm13, %v10744_v21, %v10748_v15  ;;  %v18637_v51 = vld [vmem:[#allocation65_spill] sm:$0xff]  ;;  %v10676_v21 = vld [vmem:[#allocation3 + $0x64] sm:$0xf] }
 0x3d6   : > { %v10767_v1 = vor.u32 %v10766_v18, %v10763_v5  ;;  %v10782_v53 = vrot.slane %v10780_v30, 5  ;;  %v7865_v10 = vadd.f32 %v17010_v12, %v17102_v49  ;;  %v12471_v52 = vcombine.low %v10749_v63, %v10759_v23  ;;  %v18638_v4 = vld [vmem:[#allocation69_spill] sm:$0xff] }
 0x3d7   : > { %v10777_v48 = vor.u32 %v10776_v13, %v10772_v34  ;;  %v17392_v14 = vadd.f32 %v18637_v51, %v7867_v50  ;;  %v7871_v22 = vadd.f32 %v17061_v3, %v17134_v33  ;;  %v10785_v0 = vshrl.u32 %v10673_v28, 16  ;;  %v10677_v6 = vld [vmem:[#allocation3 + $0x68] sm:$0xf]  ;;  %v10678_v33 = vld [vmem:[#allocation3 + $0x6c] sm:$0x1]  ;;  %v17403_v13 = vpop.f32.mrf.mxu1 }
 0x3d8   : > { %v10768_v62 = vrot.slane %v10767_v1, 4  ;;  %v10788_v25 = vshll.u32 %v10673_v28, 16  ;;  %v10794_v15 = vshll.u32 %v10674_v20, 16  ;;  %v10798_v12 = vshrl.u32 %v10674_v20, 16 }
 0x3d9   : > { %v17396_v5 = vpop.f32.mrf.mxu0  ;;  %v10778_v30 = vrot.slane %v10777_v48, 4  ;;  %v10804_v49 = vshll.u32 %v10675_v16, 16  ;;  %v17399_v18 = vadd.f32 %v18638_v4, %v7865_v10  ;;  %v10787_v50 = vrot.slane %v10785_v0, 4 }
 0x3da   : > { %v10773_v56 = vsel %vm14157_vm13, %v10768_v62, %v10772_v34  ;;  %v10790_v23 = vrot.slane %v10788_v25, 5  ;;  %v10796_v3 = vrot.slane %v10794_v15, 5  ;;  %v10800_v63 = vrot.slane %v10798_v12, 4  ;;  %v18640_v15 = vld [vmem:[#allocation20_spill] sm:$0xff] }
 0x3db   : > { %18639 = vst [vmem:[#allocation84_spill] sm:$0xff] %v17399_v18  ;;  %v10783_v28 = vsel %vm14157_vm13, %v10778_v30, %v10782_v53  ;;  %v10806_v1 = vrot.slane %v10804_v49, 5  ;;  %v10809_v20 = vshrl.u32 %v10676_v21, 16  ;;  %v10812_v48 = vshll.u32 %v10676_v21, 16  ;;  %v17408_v4 = vpop.f32.mrf.mxu0  ;;  %v18642_v49 = vld [vmem:[#allocation27_spill] sm:$0xff]  ;;  %v18643_v21 = vld [vmem:[#allocation41_spill] sm:$0xff] }
 0x3dc   : > { %13458 = vmatmul.mubr.msk.bf16.vlgmr.msra.gmra.mxu1 %vm6697_vm2, %v12471_v52  ;;  %v12472_v10 = vcombine.low %v10773_v56, %v10783_v28  ;;  %v10791_v16 = vor.u32 %v10790_v23, %v10787_v50  ;;  %v10818_v51 = vshll.u32 %v10677_v6, 16  ;;  %v10801_v34 = vor.u32 %v10800_v63, %v10796_v3  ;;  %v18644_v50 = vld [vmem:[#allocation35_spill] sm:$0xff]  ;;  %v18645_v23 = vld [vmem:[#allocation42_spill] sm:$0xff] }
 0x3dd   : > { %v10811_v62 = vrot.slane %v10809_v20, 4  ;;  %v10822_v0 = vshrl.u32 %v10677_v6, 16  ;;  %v10828_v25 = vshll.u32 %v10678_v33, 16  ;;  %v17412_v18 = vadd.f32 %v18641_v47, %v18640_v15  ;;  %v10679_v63 = vld [vmem:[#allocation3 + $0x74] sm:$0xf] }
 0x3de   : > { %13461 = vmatprep.mubr.msk.bf16.mxu1 %vm6697_vm2, %v12472_v10  ;;  %v10792_v53 = vrot.slane %v10791_v16, 4  ;;  %v10814_v30 = vrot.slane %v10812_v48, 5  ;;  %v10820_v12 = vrot.slane %v10818_v51, 5  ;;  %v17419_v56 = vadd.f32 %v18643_v21, %v18642_v49  ;;  %v10680_v48 = vld [vmem:[#allocation3 + $0x78] sm:$0xf]  ;;  %v17429_v51 = vpop.f32.mrf.mxu0 }
 0x3df   : > { %v17423_v28 = vadd.f32 %v18645_v23, %v18644_v50  ;;  %v10802_v6 = vrot.slane %v10801_v34, 4  ;;  %v10824_v33 = vrot.slane %v10822_v0, 4  ;;  %v10830_v10 = vrot.slane %v10828_v25, 5  ;;  %v10681_v21 = vld [vmem:[#allocation3 + $0x7c] sm:$0x1] }
 0x3e0   : > { %v17415_v52 = vpop.f32.mrf.mxu1  ;;  %v10797_v47 = vsel %vm14157_vm13, %v10792_v53, %v10796_v3  ;;  %v10815_v20 = vor.u32 %v10814_v30, %v10811_v62  ;;  %v7869_v16 = vadd.f32 %v17081_v55, %v17157_v36  ;;  %v7872_v34 = vadd.f32 %v17111_v7, %v17172_v58  ;;  %v10682_v23 = vld [vmem:[#allocation3 + $0x84] sm:$0xf] }
 0x3e1   : > { %v10807_v15 = vsel %vm14157_vm13, %v10802_v6, %v10806_v1  ;;  %v10825_v49 = vor.u32 %v10824_v33, %v10820_v12  ;;  %v17436_v0 = vadd.f32 %v17122_v17, %v7871_v22  ;;  %v7875_v25 = vadd.f32 %v17161_v42, %v17195_v44  ;;  %v10683_v6 = vld [vmem:[#allocation3 + $0x88] sm:$0xf]  ;;  %v17448_v42 = vpop.f32.mrf.mxu0 }
 0x3e2   : > { %v12473_v3 = vcombine.low %v10797_v47, %v10807_v15  ;;  %v10816_v62 = vrot.slane %v10815_v20, 4  ;;  %v10833_v55 = vshrl.u32 %v10679_v63, 16  ;;  %v17440_v36 = vpop.f32.mrf.mxu1  ;;  %v10836_v30 = vshll.u32 %v10679_v63, 16  ;;  %v10684_v20 = vld [vmem:[#allocation3 + $0x8c] sm:$0x1] }
 0x3e3   : > { %18646 = vst [vmem:[#allocation26_spill] sm:$0xff] %v17436_v0  ;;  %v10826_v53 = vrot.slane %v10825_v49, 4  ;;  %v10842_v50 = vshll.u32 %v10680_v48, 16  ;;  %v10846_v1 = vshrl.u32 %v10680_v48, 16  ;;  %v10852_v58 = vshll.u32 %v10681_v21, 16 }
 0x3e4   : > { %13462 = vmatmul.mubr.msk.bf16.gmra.mxu1 %vm6697_vm2, %v12473_v3  ;;  %v10821_v7 = vsel %vm14157_vm13, %v10816_v62, %v10820_v12  ;;  %v10835_v17 = vrot.slane %v10833_v55, 4  ;;  %v17446_v22 = vadd.f32 %v17151_v40, %v7869_v16  ;;  %v10838_v33 = vrot.slane %v10836_v30, 5  ;;  %v17452_v12 = vpop.f32.mrf.mxu1 }
 0x3e5   : > { %v10831_v44 = vsel %vm14157_vm13, %v10826_v53, %v10830_v10  ;;  %v10844_v63 = vrot.slane %v10842_v50, 5  ;;  %v10848_v47 = vrot.slane %v10846_v1, 4  ;;  %v10854_v15 = vrot.slane %v10852_v58, 5  ;;  %v18649_v58 = vld [vmem:[#allocation48_spill] sm:$0xff] }
 0x3e6   : > { %18647 = vst [vmem:[#allocation7_spill] sm:$0xff] %v17446_v22  ;;  %v12474_v48 = vcombine.low %v10821_v7, %v10831_v44  ;;  %v10857_v49 = vshrl.u32 %v10682_v23, 16  ;;  %v10860_v3 = vshll.u32 %v10682_v23, 16  ;;  %v10839_v21 = vor.u32 %v10838_v33, %v10835_v17  ;;  %v18648_v7 = vld [vmem:[#allocation28_spill] sm:$0xff]  ;;  %v18650_v44 = vld [vmem:[#allocation37_spill] sm:$0xff] }
 0x3e7   : > { %v10849_v62 = vor.u32 %v10848_v47, %v10844_v63  ;;  %v10866_v40 = vshll.u32 %v10683_v6, 16  ;;  %v10870_v16 = vshrl.u32 %v10683_v6, 16  ;;  %v10876_v0 = vshll.u32 %v10684_v20, 16  ;;  %v18651_v6 = vld [vmem:[#allocation43_spill] sm:$0xff] }
 0x3e8   : > { %13465 = vmatprep.mubr.msk.bf16.mxu1 %vm6697_vm2, %v12474_v48  ;;  %v10859_v55 = vrot.slane %v10857_v49, 4  ;;  %v10862_v22 = vrot.slane %v10860_v3, 5  ;;  %v7873_v10 = vadd.f32 %v17182_v11, %v17216_v45  ;;  %v10840_v30 = vrot.slane %v10839_v21, 4  ;;  %v10685_v48 = vld [vmem:[#allocation3 + $0x94] sm:$0xf]  ;;  %v17470_v11 = vpop.f32.mrf.mxu1 }
 0x3e9   : > { %v17457_v53 = vpop.f32.mrf.mxu0  ;;  %v10850_v50 = vrot.slane %v10849_v62, 4  ;;  %v10868_v1 = vrot.slane %v10866_v40, 5  ;;  %v10872_v23 = vrot.slane %v10870_v16, 4  ;;  %v17461_v17 = vadd.f32 %v18649_v58, %v18648_v7  ;;  %v10686_v62 = vld [vmem:[#allocation3 + $0x98] sm:$0xf] }
 0x3ea   : > { %v17465_v33 = vadd.f32 %v18651_v6, %v18650_v44  ;;  %v10863_v47 = vor.u32 %v10862_v22, %v10859_v55  ;;  %v17468_v20 = vadd.f32 %v17168_v59, %v7872_v34  ;;  %v10845_v45 = vsel %vm14157_vm13, %v10840_v30, %v10844_v63  ;;  %v10687_v40 = vld [vmem:[#allocation3 + $0x9c] sm:$0x1] }
 0x3eb   : > { %v10855_v49 = vsel %vm14157_vm13, %v10850_v50, %v10854_v15  ;;  %v10873_v3 = vor.u32 %v10872_v23, %v10868_v1  ;;  %v10878_v21 = vrot.slane %v10876_v0, 5  ;;  %v7876_v22 = vadd.f32 %v17212_v2, %v17220_v60  ;;  %v17481_v34 = vpop.f32.mrf.mxu0  ;;  %v10688_v50 = vld [vmem:[#allocation3 + $0xa4] sm:$0xf]  ;;  %v10689_v60 = vld [vmem:[#allocation3 + $0xa8] sm:$0xf] }
 0x3ec   : > { %v12475_v16 = vcombine.low %v10845_v45, %v10855_v49  ;;  %v10864_v7 = vrot.slane %v10863_v47, 4  ;;  %v17479_v59 = vadd.f32 %v17227_v43, %v7875_v25  ;;  %v7879_v63 = vadd.f32 %v17267_v46, %v17250_v39  ;;  %v10690_v46 = vld [vmem:[#allocation3 + $0xac] sm:$0x1] }
 0x3ed   : > { %v10874_v55 = vrot.slane %v10873_v3, 4  ;;  %v10881_v30 = vshrl.u32 %v10685_v48, 16  ;;  %v10884_v15 = vshll.u32 %v10685_v48, 16  ;;  %v10890_v23 = vshll.u32 %v10686_v62, 16 }
 0x3ee   : > { %13466 = vmatmul.mubr.msk.bf16.gmra.mxu1 %vm6697_vm2, %v12475_v16  ;;  %v10869_v0 = vsel %vm14157_vm13, %v10864_v7, %v10868_v1  ;;  %v10894_v58 = vshrl.u32 %v10686_v62, 16  ;;  %v10900_v2 = vshll.u32 %v10687_v40, 16  ;;  %v17493_v39 = vadd.f32 %v17257_v29, %v7873_v10  ;;  %v17495_v1 = vpop.f32.mrf.mxu0 }
 0x3ef   : > { %v10879_v25 = vsel %vm14157_vm13, %v10874_v55, %v10878_v21  ;;  %v10883_v44 = vrot.slane %v10881_v30, 4  ;;  %v10886_v6 = vrot.slane %v10884_v15, 5  ;;  %v10892_v48 = vrot.slane %v10890_v23, 5 }
 0x3f0   : > { %v17488_v43 = vpop.f32.mrf.mxu1  ;;  %18652 = vst [vmem:[#allocation8_spill] sm:$0xff] %v17493_v39  ;;  %v12476_v47 = vcombine.low %v10869_v0, %v10879_v25  ;;  %v10896_v45 = vrot.slane %v10894_v58, 4  ;;  %v10902_v49 = vrot.slane %v10900_v2, 5  ;;  %v10905_v62 = vshrl.u32 %v10688_v50, 16  ;;  %v18653_v58 = vld [vmem:[#allocation36_spill] sm:$0xff]  ;;  %v18654_v2 = vld [vmem:[#allocation50_spill] sm:$0xff] }
 0x3f1   : > { %v10887_v3 = vor.u32 %v10886_v6, %v10883_v44  ;;  %v10908_v40 = vshll.u32 %v10688_v50, 16  ;;  %v10914_v16 = vshll.u32 %v10689_v60, 16  ;;  %v10918_v21 = vshrl.u32 %v10689_v60, 16  ;;  %v10691_v60 = vld [vmem:[#allocation3 + $0xb4] sm:$0xf] }
 0x3f2   : > { %13469 = vmatprep.mubr.msk.bf16.mxu1 %vm6697_vm2, %v12476_v47  ;;  %v10897_v7 = vor.u32 %v10896_v45, %v10892_v48  ;;  %v10924_v55 = vshll.u32 %v10690_v46, 16  ;;  %v7877_v29 = vadd.f32 %v17292_v27, %v17271_v41  ;;  %v17500_v10 = vpop.f32.mrf.mxu1  ;;  %v10907_v15 = vrot.slane %v10905_v62, 4  ;;  %v17509_v46 = vpop.f32.mrf.mxu0  ;;  %v18656_v41 = vld [vmem:[#allocation62_spill] sm:$0xff]  ;;  %v10692_v62 = vld [vmem:[#allocation3 + $0xb8] sm:$0xf] }
 0x3f3   : > { %v10888_v30 = vrot.slane %v10887_v3, 4  ;;  %v10910_v0 = vrot.slane %v10908_v40, 5  ;;  %v10916_v23 = vrot.slane %v10914_v16, 5  ;;  %v17504_v25 = vadd.f32 %v18654_v2, %v18653_v58 }
 0x3f4   : > { %v10898_v50 = vrot.slane %v10897_v7, 4  ;;  %v10920_v44 = vrot.slane %v10918_v21, 4  ;;  %v17507_v6 = vadd.f32 %v17277_v38, %v7876_v22  ;;  %v17513_v27 = vadd.f32 %v18656_v41, %v17106_v8  ;;  %v10693_v7 = vld [vmem:[#allocation3 + $0xbc] sm:$0x1]  ;;  %v17524_v21 = vpop.f32.mrf.mxu1 }
 0x3f5   : > { %v10911_v47 = vor.u32 %v10910_v0, %v10907_v15  ;;  %v10926_v45 = vrot.slane %v10924_v55, 5  ;;  %v7880_v3 = vadd.f32 %v17321_v26, %v17296_v54  ;;  %v10893_v40 = vsel %vm14157_vm13, %v10888_v30, %v10892_v48  ;;  %v18658_v55 = vld [vmem:[#allocation78_spill] sm:$0xff]  ;;  %v10694_v30 = vld [vmem:[#allocation3 + $0xc4] sm:$0xf] }
 0x3f6   : > { %18655 = vst [vmem:[#allocation9_spill] sm:$0xff] %v17507_v6  ;;  %v10903_v38 = vsel %vm14157_vm13, %v10898_v50, %v10902_v49  ;;  %v10921_v22 = vor.u32 %v10920_v44, %v10916_v23  ;;  %v17522_v16 = vadd.f32 %v17328_v37, %v7879_v63  ;;  %v7883_v0 = vadd.f32 %v17350_v19, %v18658_v55  ;;  %v10695_v44 = vld [vmem:[#allocation3 + $0xc8] sm:$0xf] }
 0x3f7   : > { %v12477_v8 = vcombine.low %v10893_v40, %v10903_v38  ;;  %v10912_v15 = vrot.slane %v10911_v47, 4  ;;  %v10929_v54 = vshrl.u32 %v10691_v60, 16  ;;  %v10932_v58 = vshll.u32 %v10691_v60, 16  ;;  %v10696_v40 = vld [vmem:[#allocation3 + $0xcc] sm:$0x1]  ;;  %v17538_v38 = vpop.f32.mrf.mxu1 }
 0x3f8   : > { %18657 = vst [vmem:[#allocation13_spill] sm:$0xff] %v17522_v16  ;;  %v10922_v26 = vrot.slane %v10921_v22, 4  ;;  %v10938_v2 = vshll.u32 %v10692_v62, 16  ;;  %v10942_v48 = vshrl.u32 %v10692_v62, 16  ;;  %v10948_v49 = vshll.u32 %v10693_v7, 16 }
 0x3f9   : > { %v17528_v41 = vpop.f32.mrf.mxu0  ;;  %13470 = vmatmul.mubr.msk.bf16.gmra.mxu1 %vm6697_vm2, %v12477_v8  ;;  %v10917_v37 = vsel %vm14157_vm13, %v10912_v15, %v10916_v23  ;;  %v10931_v63 = vrot.slane %v10929_v54, 4  ;;  %v17534_v50 = vadd.f32 %v17347_v61, %v7877_v29  ;;  %v10934_v60 = vrot.slane %v10932_v58, 5  ;;  %v18660_v58 = vld [vmem:[#allocation83_spill] sm:$0xff] }
 0x3fa   : > { %v10927_v19 = vsel %vm14157_vm13, %v10922_v26, %v10926_v45  ;;  %v10940_v47 = vrot.slane %v10938_v2, 5  ;;  %v10944_v62 = vrot.slane %v10942_v48, 4  ;;  %v10950_v8 = vrot.slane %v10948_v49, 5 }
 0x3fb   : > { %18659 = vst [vmem:[#allocation14_spill] sm:$0xff] %v17534_v50  ;;  %v12478_v22 = vcombine.low %v10917_v37, %v10927_v19  ;;  %v10953_v55 = vshrl.u32 %v10694_v30, 16  ;;  %v10956_v16 = vshll.u32 %v10694_v30, 16  ;;  %v10935_v23 = vor.u32 %v10934_v60, %v10931_v63  ;;  %v17540_v61 = vpop.f32.mrf.mxu0  ;;  %v18661_v30 = vld [vmem:[#allocation68_spill] sm:$0xff]  ;;  %v18662_v63 = vld [vmem:[#allocation67_spill] sm:$0xff] }
 0x3fc   : > { %v10945_v15 = vor.u32 %v10944_v62, %v10940_v47  ;;  %v10962_v7 = vshll.u32 %v10695_v44, 16  ;;  %v10966_v54 = vshrl.u32 %v10695_v44, 16  ;;  %v10972_v26 = vshll.u32 %v10696_v40, 16  ;;  %v18663_v62 = vld [vmem:[#allocation82_spill] sm:$0xff] }
 0x3fd   : > { %13473 = vmatprep.mubr.msk.bf16.mxu1 %vm6697_vm2, %v12478_v22  ;;  %v10955_v29 = vrot.slane %v10953_v55, 4  ;;  %v10958_v45 = vrot.slane %v10956_v16, 5  ;;  %v7881_v2 = vadd.f32 %v17362_v24, %v18660_v58  ;;  %v10936_v48 = vrot.slane %v10935_v23, 4  ;;  %v18665_v22 = vld [vmem:[#allocation77_spill] sm:$0xff]  ;;  %v10697_v40 = vld [vmem:[#allocation3 + $0xd4] sm:$0xf] }
 0x3fe   : > { %v10946_v50 = vrot.slane %v10945_v15, 4  ;;  %v10964_v37 = vrot.slane %v10962_v7, 5  ;;  %v10968_v49 = vrot.slane %v10966_v54, 4  ;;  %v17549_v60 = vadd.f32 %v18662_v63, %v18661_v30  ;;  %v10698_v7 = vld [vmem:[#allocation3 + $0xd8] sm:$0xf]  ;;  %v18666_v30 = vld [vmem:[#allocation80_spill] sm:$0xff] }
 0x3ff   : > { %v10959_v44 = vor.u32 %v10958_v45, %v10955_v29  ;;  %v17552_v6 = vadd.f32 %v18663_v62, %v7880_v3  ;;  %v7884_v16 = vadd.f32 %v17389_v32, %v18665_v22  ;;  %v10941_v24 = vsel %vm14157_vm13, %v10936_v48, %v10940_v47  ;;  %v10699_v54 = vld [vmem:[#allocation3 + $0xdc] sm:$0x1]  ;;  %v17562_v29 = vpop.f32.mrf.mxu0  ;;  %v10700_v48 = vld [vmem:[#allocation3 + $0xe4] sm:$0xf] }
 0x400   : > { %v17545_v19 = vpop.f32.mrf.mxu1  ;;  %v10951_v55 = vsel %vm14157_vm13, %v10946_v50, %v10950_v8  ;;  %v10969_v23 = vor.u32 %v10968_v49, %v10964_v37  ;;  %v10974_v15 = vrot.slane %v10972_v26, 5  ;;  %v7882_v32 = vadd.f32 %v17403_v13, %v18666_v30 }
 0x401   : > { %18664 = vst [vmem:[#allocation6_spill] sm:$0xff] %v17552_v6  ;;  %v12479_v3 = vcombine.low %v10941_v24, %v10951_v55  ;;  %v10960_v45 = vrot.slane %v10959_v44, 4  ;;  %v17567_v63 = vadd.f32 %v17396_v5, %v7883_v0  ;;  %v7887_v50 = vadd.f32 %v17415_v52, %v17366_v9  ;;  %v10701_v24 = vld [vmem:[#allocation3 + $0xe8] sm:$0xf]  ;;  %v10702_v52 = vld [vmem:[#allocation3 + $0xec] sm:$0x1] }
 0x402   : > { %v17560_v58 = vpop.f32.mrf.mxu1  ;;  %v10970_v47 = vrot.slane %v10969_v23, 4  ;;  %v10977_v8 = vshrl.u32 %v10697_v40, 16  ;;  %v10980_v26 = vshll.u32 %v10697_v40, 16  ;;  %v10986_v62 = vshll.u32 %v10698_v7, 16  ;;  %v17581_v40 = vpop.f32.mrf.mxu0 }
 0x403   : > { %18667 = vst [vmem:[#allocation4_spill] sm:$0xff] %v17567_v63  ;;  %13474 = vmatmul.mubr.msk.bf16.gmra.mxu1 %vm6697_vm2, %v12479_v3  ;;  %v10965_v44 = vsel %vm14157_vm13, %v10960_v45, %v10964_v37  ;;  %v10990_v22 = vshrl.u32 %v10698_v7, 16  ;;  %v10996_v13 = vshll.u32 %v10699_v54, 16  ;;  %v17579_v9 = vadd.f32 %v17408_v4, %v7881_v2 }
 0x404   : > { %v17571_v49 = vpop.f32.mrf.mxu1  ;;  %v10975_v5 = vsel %vm14157_vm13, %v10970_v47, %v10974_v15  ;;  %v10979_v0 = vrot.slane %v10977_v8, 4  ;;  %v10982_v55 = vrot.slane %v10980_v26, 5  ;;  %v10988_v30 = vrot.slane %v10986_v62, 5 }
 0x405   : > { %v12480_v3 = vcombine.low %v10965_v44, %v10975_v5  ;;  %v10992_v37 = vrot.slane %v10990_v22, 4  ;;  %v10998_v45 = vrot.slane %v10996_v13, 5  ;;  %v11001_v54 = vshrl.u32 %v10700_v48, 16 }
 0x406   : > { %v17583_v23 = vpop.f32.mrf.mxu1  ;;  %v10983_v7 = vor.u32 %v10982_v55, %v10979_v0  ;;  %v11004_v63 = vshll.u32 %v10700_v48, 16  ;;  %v11010_v6 = vshll.u32 %v10701_v24, 16  ;;  %v11014_v4 = vshrl.u32 %v10701_v24, 16 }
 0x407   : > { %13477 = vmatprep.mubr.msk.bf16.mxu1 %vm6697_vm2, %v12480_v3  ;;  %v10993_v15 = vor.u32 %v10992_v37, %v10988_v30  ;;  %v11020_v2 = vshll.u32 %v10702_v52, 16  ;;  %v7885_v47 = vadd.f32 %v17440_v36, %v17370_v57  ;;  %v11003_v26 = vrot.slane %v11001_v54, 4  ;;  %v10703_v3 = vld [vmem:[#allocation3 + $0xf4] sm:$0xf]  ;;  %v10705_v54 = vld [vmem:[#allocation3 + $0xfc] sm:$0x1] }
 0x408   : > { %v17585_v39 = vpop.f32.mrf.mxu1  ;;  %v10984_v8 = vrot.slane %v10983_v7, 4  ;;  %v11006_v44 = vrot.slane %v11004_v63, 5  ;;  %v11012_v62 = vrot.slane %v11010_v6, 5  ;;  %v11016_v5 = vrot.slane %v11014_v4, 4  ;;  %v10704_v6 = vld [vmem:[#allocation3 + $0xf8] sm:$0xf] }
 0x409   : > { %v10994_v48 = vrot.slane %v10993_v15, 4  ;;  %v11022_v0 = vrot.slane %v11020_v2, 5  ;;  %v17595_v55 = vadd.f32 %v17429_v51, %v7884_v16  ;;  %v7888_v57 = vadd.f32 %v17452_v12, %v17378_v31 }
 0x40a   : > { %v17590_v22 = vpop.f32.mrf.mxu0  ;;  %v17592_v13 = vpop.f32.mrf.mxu1  ;;  %v10989_v24 = vsel %vm14157_vm13, %v10984_v8, %v10988_v30  ;;  %v11007_v52 = vor.u32 %v11006_v44, %v11003_v26  ;;  %v17602_v36 = vadd.f32 %v17448_v42, %v7882_v32  ;;  %v11017_v16 = vor.u32 %v11016_v5, %v11012_v62  ;;  %v10706_v44 = vld [vmem:[#allocation3 + $0x104] sm:$0xf] }
 0x40b   : > { %v10999_v51 = vsel %vm14157_vm13, %v10994_v48, %v10998_v45  ;;  %v7886_v7 = vadd.f32 %v17470_v11, %v17412_v18  ;;  %v17613_v30 = vadd.f32 %v17457_v53, %v7887_v50  ;;  %v7891_v42 = vadd.f32 %v17488_v43, %v17419_v56  ;;  %v10707_v56 = vld [vmem:[#allocation3 + $0x108] sm:$0xf] }
 0x40c   : > { %v17604_v63 = vpop.f32.mrf.mxu0  ;;  %v17606_v37 = vpop.f32.mrf.mxu1  ;;  %v12481_v31 = vcombine.low %v10989_v24, %v10999_v51  ;;  %v11008_v12 = vrot.slane %v11007_v52, 4  ;;  %v11025_v32 = vshrl.u32 %v10703_v3, 16  ;;  %v11018_v2 = vrot.slane %v11017_v16, 4 }
 0x40d   : > { %18668 = vst [vmem:[#allocation18_spill] sm:$0xff] %v17613_v30  ;;  %v11028_v45 = vshll.u32 %v10703_v3, 16  ;;  %v11034_v8 = vshll.u32 %v10704_v6, 16  ;;  %v11038_v26 = vshrl.u32 %v10704_v6, 16  ;;  %v11044_v11 = vshll.u32 %v10705_v54, 16 }
 0x40e   : > { %v17617_v15 = vpop.f32.mrf.mxu0  ;;  %v17619_v4 = vpop.f32.mrf.mxu1  ;;  %13478 = vmatmul.mubr.msk.bf16.gmra.mxu1 %vm6697_vm2, %v12481_v31  ;;  %v11013_v18 = vsel %vm14157_vm13, %v11008_v12, %v11012_v62  ;;  %v11027_v53 = vrot.slane %v11025_v32, 4  ;;  %v17625_v50 = vadd.f32 %v17481_v34, %v7885_v47  ;;  %v11023_v5 = vsel %vm14157_vm13, %v11018_v2, %v11022_v0  ;;  %v10708_v6 = vld [vmem:[#allocation3 + $0x10c] sm:$0x1] }
 0x40f   : > { %v11030_v3 = vrot.slane %v11028_v45, 5  ;;  %v11036_v24 = vrot.slane %v11034_v8, 5  ;;  %v11040_v52 = vrot.slane %v11038_v26, 4  ;;  %v12482_v51 = vcombine.low %v11013_v18, %v11023_v5 }
 0x410   : > { %18669 = vst [vmem:[#allocation52_spill] sm:$0xff] %v17625_v50  ;;  %v17627_v43 = vpop.f32.mrf.mxu0  ;;  %v17629_v48 = vpop.f32.mrf.mxu1  ;;  %v11046_v16 = vrot.slane %v11044_v11, 5  ;;  %v11049_v62 = vshrl.u32 %v10706_v44, 16  ;;  %v11052_v31 = vshll.u32 %v10706_v44, 16  ;;  %v11058_v32 = vshll.u32 %v10707_v56, 16 }
 0x411   : > { %v11031_v47 = vor.u32 %v11030_v3, %v11027_v53  ;;  %v11041_v12 = vor.u32 %v11040_v52, %v11036_v24  ;;  %v11062_v50 = vshrl.u32 %v10707_v56, 16  ;;  %13481 = vmatprep.mubr.msk.bf16.mxu1 %vm6697_vm2, %v12482_v51  ;;  %v11068_v2 = vshll.u32 %v10708_v6, 16  ;;  %v367_v6 = vld [vmem:[#allocation3 + $0x11c] sm:$0x1] }
 0x412   : > { %v17633_v54 = vpop.f32.mrf.mxu0  ;;  %v17635_v34 = vpop.f32.mrf.mxu1  ;;  %v11051_v30 = vrot.slane %v11049_v62, 4  ;;  %v11054_v0 = vrot.slane %v11052_v31, 5  ;;  %v7889_v45 = vadd.f32 %v17500_v10, %v17423_v28  ;;  %v11060_v11 = vrot.slane %v11058_v32, 5 }
 0x413   : > { %v11032_v44 = vrot.slane %v11031_v47, 4  ;;  %v11042_v18 = vrot.slane %v11041_v12, 4  ;;  %v11064_v5 = vrot.slane %v11062_v50, 4  ;;  %v11070_v3 = vrot.slane %v11068_v2, 5  ;;  %v18670_v12 = vld [vmem:[#allocation5_spill] sm:$0xff] }
 0x414   : > { %v17640_v8 = vpop.f32.mrf.mxu0  ;;  %v17642_v26 = vpop.f32.mrf.mxu1  ;;  %v11055_v53 = vor.u32 %v11054_v0, %v11051_v30  ;;  %v17645_v56 = vadd.f32 %v17495_v1, %v7888_v57  ;;  %v7892_v52 = vadd.f32 %v17524_v21, %v17461_v17  ;;  %v17658_v30 = vadd.f32 %v17509_v46, %v7886_v7  ;;  %v10709_v2 = vld [vmem:[#allocation3 + $0x114] sm:$0xf]  ;;  %v18691_v46 = vld [vmem:[#allocation9_spill] sm:$0xff] }
 0x415   : > { %v11037_v10 = vsel %vm14157_vm13, %v11032_v44, %v11036_v24  ;;  %v11047_v62 = vsel %vm14157_vm13, %v11042_v18, %v11046_v16  ;;  %v11065_v50 = vor.u32 %v11064_v5, %v11060_v11  ;;  %v7890_v17 = vadd.f32 %v17538_v38, %v17465_v33  ;;  %v18671_v24 = vld [vmem:[#allocation45_spill] sm:$0xff]  ;;  %v18673_v44 = vld [vmem:[#allocation44_spill] sm:$0xff] }
 0x416   : > { %v17649_v51 = vpop.f32.mrf.mxu0  ;;  %v17651_v28 = vpop.f32.mrf.mxu1  ;;  %v12483_v1 = vcombine.low %v11037_v10, %v11047_v62  ;;  %v11056_v57 = vrot.slane %v11055_v53, 4  ;;  %v17663_v21 = vadd.f32 %v17528_v41, %v7891_v42  ;;  %v7157_v32 = vadd.f32 %v18671_v24, %v18670_v12  ;;  %v18674_v18 = vld [vmem:[#allocation64_spill] sm:$0xff]  ;;  %v18675_v38 = vld [vmem:[#allocation49_spill] sm:$0xff]  ;;  %v18676_v41 = vld [vmem:[#allocation66_spill] sm:$0xff] }
 0x417   : > { %v11066_v0 = vrot.slane %v11065_v50, 4  ;;  %v7895_v16 = vadd.f32 %v17545_v19, %v17504_v25  ;;  %v368_v7 = vsel %vm15543_vm5, 0, %v367_v6  ;;  %v7168_v33 = vadd.f32 %v18674_v18, %v18673_v44  ;;  %v18677_v5 = vld [vmem:[#allocation29_spill] sm:$0xff]  ;;  %v18678_v10 = vld [vmem:[#allocation75_spill] sm:$0xff]  ;;  %v18679_v44 = vld [vmem:[#allocation70_spill] sm:$0xff] }
 0x418   : > { %v17665_v31 = vpop.f32.mrf.mxu0  ;;  %v13331_v47 = vpop.f32.mrf.mxu1  ;;  %v7160_v42 = vadd.f32 %v18676_v41, %v18675_v38  ;;  %v8562_v53 = vadd.f32 %v18677_v5, %v17513_v27  ;;  %v8560_v62 = vadd.f32 %v18678_v10, %v17549_v60  ;;  %13482 = vmatmul.mubr.msk.bf16.gmra.mxu1 %vm6697_vm2, %v12483_v1  ;;  %369 = vst [vmem:[#allocation3 + $0x11c] sm:$0x1] %v368_v7  ;;  %v10710_v12 = vld [vmem:[#allocation3 + $0x118] sm:$0xf]  ;;  %v11073_v7 = vshrl.u32 %v10709_v2, 16 }
 0x419   : > { %v11061_v6 = vsel %vm14157_vm13, %v11056_v57, %v11060_v11  ;;  %v11071_v50 = vsel %vm14157_vm13, %v11066_v0, %v11070_v3  ;;  %v17689_v24 = vadd.f32 %v17540_v61, %v7889_v45  ;;  %v7893_v27 = vadd.f32 %v17560_v58, %v7157_v32  ;;  %v18680_v60 = vld [vmem:[#allocation71_spill] sm:$0xff] }
 0x41a   : > { %v17682_v25 = vpop.f32.mrf.mxu0  ;;  %v8790_v19 = vpop.f32.mrf.mxu1  ;;  %v7870_v18 = vadd.f32 %v18680_v60, %v18679_v44  ;;  %v12484_v1 = vcombine.low %v11061_v6, %v11071_v50  ;;  %v11076_v38 = vshll.u32 %v10709_v2, 16  ;;  %v17697_v11 = vadd.f32 %v17562_v29, %v7892_v52  ;;  %v18687_v44 = vld [vmem:[#allocation24_spill] sm:$0xff] }
 0x41b   : > { %v7896_v3 = vadd.f32 %v17571_v49, %v7168_v33  ;;  %v17701_v57 = vadd.f32 %v17581_v40, %v7890_v17  ;;  %v7894_v61 = vadd.f32 %v17583_v23, %v7160_v42  ;;  %v11082_v58 = vshll.u32 %v10710_v12, 16  ;;  %v18681_v40 = vld [vmem:[#allocation84_spill] sm:$0xff] }
 0x41c   : > { %v17694_v41 = vpop.f32.mrf.mxu0  ;;  %v13332_v5 = vpop.f32.mrf.mxu1  ;;  %13485 = vmatprep.mubr.msk.bf16.mxu1 %vm6697_vm2, %v12484_v1  ;;  %v11086_v45 = vshrl.u32 %v10710_v12, 16  ;;  %v17706_v32 = vadd.f32 %v17590_v22, %v7895_v16  ;;  %v17710_v0 = vadd.f32 %v17585_v39, %v17392_v14  ;;  %v17715_v49 = vadd.f32 %v17604_v63, %v7893_v27  ;;  %v18682_v16 = vld [vmem:[#allocation74_spill] sm:$0xff]  ;;  %v18683_v14 = vld [vmem:[#allocation73_spill] sm:$0xff]  ;;  %v18684_v39 = vld [vmem:[#allocation72_spill] sm:$0xff] }
 0x41d   : > { %v17719_v23 = vadd.f32 %v17592_v13, %v18681_v40  ;;  %v17722_v17 = vadd.f32 %v17617_v15, %v7896_v3  ;;  %v17725_v22 = vadd.f32 %v17606_v37, %v8562_v53  ;;  %v8564_v2 = vadd.f32 %v18682_v16, %v7870_v18  ;;  %v18685_v12 = vld [vmem:[#allocation26_spill] sm:$0xff]  ;;  %v18686_v53 = vld [vmem:[#allocation7_spill] sm:$0xff]  ;;  %v18688_v60 = vld [vmem:[#allocation76_spill] sm:$0xff] }
 0x41e   : > { %v17712_v29 = vpop.f32.mrf.mxu0  ;;  %v8793_v52 = vpop.f32.mrf.mxu1  ;;  %v7874_v33 = vadd.f32 %v18684_v39, %v18683_v14  ;;  %v17731_v42 = vadd.f32 %v17627_v43, %v7894_v61  ;;  %v17734_v63 = vadd.f32 %v17619_v4, %v8560_v62  ;;  %v11075_v15 = vrot.slane %v11073_v7, 4  ;;  %v18689_v18 = vld [vmem:[#allocation79_spill] sm:$0xff]  ;;  %v18690_v40 = vld [vmem:[#allocation8_spill] sm:$0xff]  ;;  %v18692_v39 = vld [vmem:[#allocation81_spill] sm:$0xff] }
 0x41f   : > { %v477_v6 = vld [vmem:[#allocation3 + $0x11c] sm:$0x1]  ;;  %v11078_v50 = vrot.slane %v11076_v38, 5  ;;  %v17740_v37 = vadd.f32 %v17629_v48, %v18685_v12  ;;  %v17744_v27 = vadd.f32 %v17635_v34, %v18686_v53  ;;  %v7878_v4 = vadd.f32 %v18689_v18, %v18688_v60 }
 0x420   : > { %v17736_v10 = vpop.f32.mrf.mxu0  ;;  %v13335_v13 = vpop.f32.mrf.mxu1  ;;  %v8568_v43 = vadd.f32 %v18687_v44, %v7874_v33  ;;  %v478_v62 = vsel %vm15543_vm5, 0, %v477_v6  ;;  %v17753_v1 = vadd.f32 %v17642_v26, %v17468_v20  ;;  %v11084_v38 = vrot.slane %v11082_v58, 5 }
 0x421   : > { %479 = vst [vmem:[#allocation3 + $0x11c] sm:$0x1] %v478_v62  ;;  %v11088_v3 = vrot.slane %v11086_v45, 4  ;;  %v17758_v34 = vadd.f32 %v17651_v28, %v8564_v2  ;;  %v17761_v61 = vadd.f32 %v13331_v47, %v17479_v59  ;;  %v17764_v16 = vadd.f32 %v8790_v19, %v18690_v40  ;;  %v18694_v45 = vld [vmem:[#allocation13_spill] sm:$0xff]  ;;  %v18695_v2 = vld [vmem:[#allocation14_spill] sm:$0xff]  ;;  %v18698_v40 = vld [vmem:[#allocation4_spill] sm:$0xff] }
 0x422   : > { %v17755_v7 = vpop.f32.mrf.mxu0  ;;  %v8806_v48 = vpop.f32.mrf.mxu1  ;;  %v17767_v14 = vadd.f32 %v13332_v5, %v18691_v46  ;;  %v8572_v33 = vadd.f32 %v18692_v39, %v7878_v4  ;;  %v11079_v6 = vor.u32 %v11078_v50, %v11075_v15  ;;  %v17772_v58 = vadd.f32 %v8793_v52, %v8568_v43  ;;  %v18696_v47 = vld [vmem:[#allocation6_spill] sm:$0xff] }
 0x423   : > { %v8899_v28 = vadd.f32 %v13335_v13, %v18694_v45  ;;  %v8897_v12 = vadd.f32 %v8806_v48, %v18695_v2  ;;  %v11089_v44 = vor.u32 %v11088_v3, %v11084_v38 }
 0x424   : > { %v17769_v20 = vpop.f32.mrf.mxu0  ;;  %v13336_v26 = vpop.f32.mrf.mxu1  ;;  %18693 = vst [vmem:[#allocation17_spill] sm:$0xff] %v17772_v58  ;;  %v11080_v62 = vrot.slane %v11079_v6, 4 }
 0x425   : > { %v8900_v19 = vadd.f32 %v13336_v26, %v18696_v47  ;;  %v11090_v43 = vrot.slane %v11089_v44, 4 }
 0x426   : > { %v17776_v59 = vpop.f32.mrf.mxu0  ;;  %v8809_v53 = vpop.f32.mrf.mxu1  ;;  %v11085_v3 = vsel %vm14157_vm13, %v11080_v62, %v11084_v38  ;;  %v18699_v38 = vld [vmem:[#allocation18_spill] sm:$0xff] }
 0x427   : > { %v8898_v5 = vadd.f32 %v8809_v53, %v8572_v33 }
 0x428   : > { %v17779_v60 = vpop.f32.mrf.mxu0  ;;  %v13339_v18 = vpop.f32.mrf.mxu1  ;;  %v10711_v15 = vld [vmem:[#allocation3 + $0x11c] sm:$0x1] }
 0x429   : > { %18697 = vst [vmem:[#allocation23_spill] sm:$0xff] %v17779_v60  ;;  %v8903_v4 = vadd.f32 %v13339_v18, %v18698_v40  ;;  %v11092_v13 = vshll.u32 %v10711_v15, 16 }
 0x42a   : > { %v8822_v50 = vpop.f32.mrf.mxu1 }
 0x42b   : > { %v13369_v52 = vpop.f32.mrf.mxu0  ;;  %v8901_v48 = vadd.f32 %v8822_v50, %v17579_v9  ;;  %v11094_v33 = vrot.slane %v11092_v13, 5 }
 0x42c   : > { %v17782_v46 = vadd.f32 %v13369_v52, %v8899_v28  ;;  %v13340_v26 = vpop.f32.mrf.mxu1 }
 0x42d   : > { %v9532_v39 = vpop.f32.mrf.mxu0  ;;  %v8904_v6 = vadd.f32 %v13340_v26, %v17595_v55  ;;  %v11095_v53 = vsel %vm14157_vm13, %v11090_v43, %v11094_v33  ;;  %v18700_v55 = vld [vmem:[#allocation52_spill] sm:$0xff] }
 0x42e   : > { %v17787_v45 = vadd.f32 %v9532_v39, %v8897_v12  ;;  %v8825_v47 = vpop.f32.mrf.mxu1  ;;  %v12485_v9 = vcombine.low %v11085_v3, %v11095_v53 }
 0x42f   : > { %v13370_v2 = vpop.f32.mrf.mxu0  ;;  %v8902_v28 = vadd.f32 %v8825_v47, %v17602_v36 }
 0x430   : > { %v17792_v44 = vadd.f32 %v13370_v2, %v8900_v19  ;;  %v13343_v40 = vpop.f32.mrf.mxu1  ;;  %13486 = vmatmul.mubr.msk.bf16.gmra.mxu1 %vm6697_vm2, %v12485_v9 }
 0x431   : > { %v9535_v18 = vpop.f32.mrf.mxu0  ;;  %v8907_v62 = vadd.f32 %v13343_v40, %v18699_v38 }
 0x432   : > { %v17795_v15 = vadd.f32 %v9535_v18, %v8898_v5  ;;  %v8838_v12 = vpop.f32.mrf.mxu1 }
 0x433   : > { %v8905_v52 = vadd.f32 %v8838_v12, %v18700_v55 }
 0x434   : > { %v13373_v50 = vpop.f32.mrf.mxu0  ;;  %v13344_v13 = vpop.f32.mrf.mxu1 }
 0x435   : > { %v17800_v35 = vadd.f32 %v13373_v50, %v8903_v4  ;;  %v8908_v19 = vadd.f32 %v13344_v13, %v17645_v56 }
 0x436   : > { %v9548_v43 = vpop.f32.mrf.mxu0  ;;  %v8841_v36 = vpop.f32.mrf.mxu1 }
 0x437   : > { %v17803_v39 = vadd.f32 %v9548_v43, %v8901_v48  ;;  %v8906_v5 = vadd.f32 %v8841_v36, %v17658_v30 }
 0x438   : > { %v13374_v26 = vpop.f32.mrf.mxu0  ;;  %v13347_v3 = vpop.f32.mrf.mxu1 }
 0x439   : > { %v17806_v33 = vadd.f32 %v13374_v26, %v8904_v6  ;;  %v8911_v2 = vadd.f32 %v13347_v3, %v17663_v21 }
 0x43a   : > { %v9551_v47 = vpop.f32.mrf.mxu0  ;;  %v8854_v53 = vpop.f32.mrf.mxu1 }
 0x43b   : > { %v17809_v9 = vadd.f32 %v9551_v47, %v8902_v28  ;;  %v8909_v4 = vadd.f32 %v8854_v53, %v17689_v24 }
 0x43c   : > { %v13377_v18 = vpop.f32.mrf.mxu0  ;;  %v13348_v56 = vpop.f32.mrf.mxu1 }
 0x43d   : > { %v17812_v40 = vadd.f32 %v13377_v18, %v8907_v62  ;;  %v8912_v48 = vadd.f32 %v13348_v56, %v17697_v11 }
 0x43e   : > { %v9564_v38 = vpop.f32.mrf.mxu0  ;;  %v8857_v30 = vpop.f32.mrf.mxu1 }
 0x43f   : > { %v17815_v12 = vadd.f32 %v9564_v38, %v8905_v52  ;;  %v8910_v6 = vadd.f32 %v8857_v30, %v17701_v57 }
 0x440   : > { %v13378_v55 = vpop.f32.mrf.mxu0  ;;  %v13351_v21 = vpop.f32.mrf.mxu1 }
 0x441   : > { %v17818_v50 = vadd.f32 %v13378_v55, %v8908_v19  ;;  %v8915_v28 = vadd.f32 %v13351_v21, %v17706_v32 }
 0x442   : > { %v9567_v13 = vpop.f32.mrf.mxu0  ;;  %v8870_v24 = vpop.f32.mrf.mxu1 }
 0x443   : > { %v17821_v43 = vadd.f32 %v9567_v13, %v8906_v5  ;;  %v8913_v62 = vadd.f32 %v8870_v24, %v17715_v49 }
 0x444   : > { %v13352_v36 = vpop.f32.mrf.mxu1 }
 0x445   : > { %v8916_v11 = vadd.f32 %v13352_v36, %v17722_v17 }
 0x446   : > { %v13381_v26 = vpop.f32.mrf.mxu0  ;;  %v8873_v52 = vpop.f32.mrf.mxu1 }
 0x447   : > { %v9637_v3 = vadd.f32 %v13381_v26, %v8911_v2  ;;  %v8914_v57 = vadd.f32 %v8873_v52, %v17731_v42 }
 0x448   : > { %v9580_v47 = vpop.f32.mrf.mxu0 }
 0x449   : > { %v9635_v53 = vadd.f32 %v9580_v47, %v8909_v4 }
 0x44a   : > { %v13382_v19 = vpop.f32.mrf.mxu0 }
 0x44b   : > { %v9638_v18 = vadd.f32 %v13382_v19, %v8912_v48 }
 0x44c   : > { %v9583_v56 = vpop.f32.mrf.mxu0 }
 0x44d   : > { %v9636_v32 = vadd.f32 %v9583_v56, %v8910_v6 }
 0x454   : > { %v17826_v38 = vpop.f32.mrf.mxu1 }
 0x455   : > { %v13385_v5 = vpop.f32.mrf.mxu0 }
 0x456   : > { %v17828_v30 = vpop.f32.mrf.mxu1  ;;  %v9641_v49 = vadd.f32 %v13385_v5, %v8915_v28 }
 0x457   : > { %v9596_v55 = vpop.f32.mrf.mxu0 }
 0x458   : > { %v17830_v21 = vpop.f32.mrf.mxu1  ;;  %v9639_v17 = vadd.f32 %v9596_v55, %v8913_v62 }
 0x459   : > { %v13386_v13 = vpop.f32.mrf.mxu0 }
 0x45a   : > { %v17832_v2 = vpop.f32.mrf.mxu1  ;;  %v9642_v42 = vadd.f32 %v13386_v13, %v8916_v11 }
 0x45b   : > { %v9599_v24 = vpop.f32.mrf.mxu0 }
 0x45c   : > { %v17834_v4 = vpop.f32.mrf.mxu1  ;;  %v17836_v48 = vadd.f32 %v9599_v24, %v8914_v57 }
 0x45d   : > { %v13425_v56 = vpop.f32.mrf.mxu0 }
 0x45e   : > { %v17838_v6 = vpop.f32.mrf.mxu1 }
 0x45f   : > { %v10505_v60 = vpop.f32.mrf.mxu0 }
 0x460   : > { %v17840_v36 = vpop.f32.mrf.mxu1 }
 0x462   : > { %v17842_v26 = vpop.f32.mrf.mxu1 }
 0x464   : > { %v17844_v28 = vpop.f32.mrf.mxu1 }
 0x466   : > { %v17846_v52 = vpop.f32.mrf.mxu1 }
 0x468   : > { %v17848_v62 = vpop.f32.mrf.mxu1 }
 0x469   : > { %18701 = vst [vmem:[#allocation31_spill] sm:$0xff] %v17848_v62 }
 0x46a   : > { %v17850_v47 = vpop.f32.mrf.mxu1 }
 0x46b   : > { %18702 = vst [vmem:[#allocation22_spill] sm:$0xff] %v17850_v47 }
 0x46c   : > { %v13403_v11 = vpop.f32.mrf.mxu1 }
 0x46d   : > { %v17853_v19 = vadd.f32 %v13403_v11, %v17782_v46  ;;  %v13426_v11 = vpop.f32.mrf.mxu0 }
 0x46e   : > { %v10227_v57 = vpop.f32.mrf.mxu1 }
 0x46f   : > { %18703 = vst [vmem:[#allocation30_spill] sm:$0xff] %v17853_v19  ;;  %v17856_v5 = vadd.f32 %v10227_v57, %v17787_v45 }
 0x470   : > { %v13404_v55 = vpop.f32.mrf.mxu1 }
 0x471   : > { %v17859_v13 = vadd.f32 %v13404_v55, %v17792_v44  ;;  %v10508_v55 = vpop.f32.mrf.mxu0 }
 0x472   : > { %v10230_v24 = vpop.f32.mrf.mxu1 }
 0x473   : > { %18704 = vst [vmem:[#allocation39_spill] sm:$0xff] %v17859_v13  ;;  %v17862_v58 = vadd.f32 %v10230_v24, %v17795_v15 }
 0x474   : > { %v13407_v62 = vpop.f32.mrf.mxu1 }
 0x475   : > { %v17865_v47 = vadd.f32 %v13407_v62, %v17800_v35  ;;  %v13429_v35 = vpop.f32.mrf.mxu0 }
 0x476   : > { %v10243_v46 = vpop.f32.mrf.mxu1 }
 0x477   : > { %18705 = vst [vmem:[#allocation46_spill] sm:$0xff] %v17865_v47  ;;  %v17868_v19 = vadd.f32 %v10243_v46, %v17803_v39 }
 0x478   : > { %v13408_v45 = vpop.f32.mrf.mxu1 }
 0x479   : > { %v17871_v57 = vadd.f32 %v13408_v45, %v17806_v33  ;;  %v10521_v33 = vpop.f32.mrf.mxu0 }
 0x47a   : > { %v10246_v44 = vpop.f32.mrf.mxu1 }
 0x47b   : > { %18706 = vst [vmem:[#allocation38_spill] sm:$0xff] %v17871_v57  ;;  %v17874_v13 = vadd.f32 %v10246_v44, %v17809_v9 }
 0x47d   : > { %18707 = vst [vmem:[#allocation51_spill] sm:$0xff] %v17874_v13  ;;  %v13411_v15 = vpop.f32.mrf.mxu1  ;;  %v17890_v13 = vpop.f32.mrf.mxu0 }
 0x47e   : > { %v17877_v24 = vadd.f32 %v13411_v15, %v17812_v40 }
 0x47f   : > { %v10259_v62 = vpop.f32.mrf.mxu1 }
 0x480   : > { %18708 = vst [vmem:[#allocation47_spill] sm:$0xff] %v17877_v24  ;;  %v17880_v47 = vadd.f32 %v10259_v62, %v17815_v12  ;;  %v17896_v62 = vpop.f32.mrf.mxu0 }
 0x481   : > { %v13412_v39 = vpop.f32.mrf.mxu1 }
 0x482   : > { %v17883_v46 = vadd.f32 %v13412_v39, %v17818_v50 }
 0x483   : > { %v10262_v45 = vpop.f32.mrf.mxu1 }
 0x484   : > { %18709 = vst [vmem:[#allocation53_spill] sm:$0xff] %v17883_v46  ;;  %v17886_v57 = vadd.f32 %v10262_v45, %v17821_v43  ;;  %v17900_v46 = vpop.f32.mrf.mxu0 }
 0x485   : > { %v13415_v9 = vpop.f32.mrf.mxu1 }
 0x486   : > { %v17888_v44 = vadd.f32 %v13415_v9, %v9637_v3  ;;  %v17902_v43 = vpop.f32.mrf.mxu0 }
 0x487   : > { %v10275_v40 = vpop.f32.mrf.mxu1 }
 0x488   : > { %v17892_v15 = vadd.f32 %v10275_v40, %v9635_v53  ;;  %v9613_v53 = vadd.f32 %v17633_v54, %v17710_v0  ;;  %v17908_v40 = vpop.f32.mrf.mxu0 }
 0x489   : > { %v13416_v24 = vpop.f32.mrf.mxu1 }
 0x48a   : > { %v17894_v12 = vadd.f32 %v13416_v24, %v9638_v18  ;;  %v17920_v54 = vpop.f32.mrf.mxu0 }
 0x48b   : > { %v10278_v50 = vpop.f32.mrf.mxu1 }
 0x48c   : > { %18710 = vst [vmem:[#allocation54_spill] sm:$0xff] %v17894_v12  ;;  %v17898_v39 = vadd.f32 %v10278_v50, %v9636_v32  ;;  %v9611_v32 = vadd.f32 %v17640_v8, %v17719_v23  ;;  %v10308_v50 = vadd.f32 %v17826_v38, %v9613_v53  ;;  %v17928_v8 = vld [vmem:[%s18265_s4] ss:$0 sm:$0xff]  ;;  %v9612_v23 = vadd.f32 %v17665_v31, %v17734_v63 }
 0x48d   : > { %v9615_v31 = vadd.f32 %v17694_v41, %v17744_v27 }
 0x48e   : > { %18711 = vst [vmem:[#allocation57_spill] sm:$0xff] %v17898_v39 }
 0x494   : > { %v13419_v45 = vpop.f32.mrf.mxu1 }
 0x495   : > { %v17904_v3 = vadd.f32 %v13419_v45, %v9641_v49  ;;  %v9614_v49 = vadd.f32 %v17649_v51, %v17725_v22  ;;  %v10306_v45 = vadd.f32 %v17828_v30, %v9611_v32  ;;  %v9617_v30 = vadd.f32 %v17682_v25, %v17740_v37 }
 0x496   : > { %v10291_v9 = vpop.f32.mrf.mxu1 }
 0x497   : > { %18712 = vst [vmem:[#allocation61_spill] sm:$0xff] %v17904_v3  ;;  %v17910_v18 = vadd.f32 %v10291_v9, %v9639_v17  ;;  %v10634_v3 = vadd.f32 %v13425_v56, %v10308_v50  ;;  %v10309_v38 = vadd.f32 %v17830_v21, %v9614_v49  ;;  %v10632_v51 = vadd.f32 %v10505_v60, %v10306_v45 }
 0x498   : > { %v13420_v24 = vpop.f32.mrf.mxu1  ;;  %v10312_v63 = vadd.f32 %v17834_v4, %v9617_v30 }
 0x499   : > { %v17915_v39 = vadd.f32 %v13420_v24, %v9642_v42  ;;  %v10635_v56 = vadd.f32 %v13426_v11, %v10309_v38  ;;  %v10310_v11 = vadd.f32 %v17838_v6, %v9615_v31 }
 0x49a   : > { %v10294_v12 = vpop.f32.mrf.mxu1  ;;  %v10638_v24 = vadd.f32 %v13429_v35, %v10312_v63 }
 0x49b   : > { %v17923_v0 = vadd.f32 %v10294_v12, %v17836_v48  ;;  %v10307_v48 = vadd.f32 %v17832_v2, %v9612_v23  ;;  %v17936_v12 = vpop.f32.mrf.mxu0  ;;  %v9618_v2 = vadd.f32 %v17712_v29, %v17753_v1  ;;  %v10636_v45 = vadd.f32 %v10521_v33, %v10310_v11 }
 0x49c   : > { %v13459_v17 = vpop.f32.mrf.mxu1  ;;  %v9621_v33 = vadd.f32 %v17755_v7, %v17761_v61 }
 0x49d   : > { %v11360_v22 = vadd.f32 %v13459_v17, %v10634_v3  ;;  %v10633_v21 = vadd.f32 %v10508_v55, %v10307_v48  ;;  %v17951_v50 = vpop.f32.mrf.mxu0  ;;  %v9616_v55 = vadd.f32 %v17736_v10, %v17758_v34  ;;  %v10313_v49 = vadd.f32 %v17840_v36, %v9618_v2 }
 0x49e   : > { %v11231_v42 = vpop.f32.mrf.mxu1  ;;  %v9619_v48 = vadd.f32 %v17769_v20, %v17764_v16  ;;  %v9622_v20 = vadd.f32 %v17776_v59, %v17767_v14 }
 0x49f   : > { %v17939_v9 = vadd.f32 %v17928_v8, %v11360_v22  ;;  %v11358_v53 = vadd.f32 %v11231_v42, %v10632_v51  ;;  %v10311_v17 = vadd.f32 %v17842_v26, %v9616_v55  ;;  %v10639_v23 = vadd.f32 %v17890_v13, %v10313_v49  ;;  %v17966_v51 = vpop.f32.mrf.mxu0 }
 0x4a0   : > { %v13460_v60 = vpop.f32.mrf.mxu1  ;;  %v10314_v63 = vadd.f32 %v17846_v52, %v9619_v48 }
 0x4a1   : > { %v11431_v3 = vmul.f32 0.5, %v17939_v9  ;;  %v17946_v25 = vadd.f32 %v17928_v8, %v11358_v53  ;;  %v11361_v37 = vadd.f32 %v13460_v60, %v10635_v56  ;;  %v10637_v22 = vadd.f32 %v17896_v62, %v10311_v17  ;;  %v17982_v31 = vpop.f32.mrf.mxu0 }
 0x4a2   : > { %v11234_v32 = vpop.f32.mrf.mxu1  ;;  %v10316_v56 = vadd.f32 %v17844_v28, %v9621_v33 }
 0x4a3   : > { %13661 = vtanh.f32 %v11431_v3  ;;  %v11429_v41 = vmul.f32 0.5, %v17946_v25  ;;  %v17955_v27 = vadd.f32 %v17928_v8, %v11361_v37  ;;  %v11359_v4 = vadd.f32 %v11234_v32, %v10633_v21  ;;  %v17997_v37 = vpop.f32.mrf.mxu0 }
 0x4a4   : > { %v13463_v29 = vpop.f32.mrf.mxu1  ;;  %v10642_v60 = vadd.f32 %v17900_v46, %v10316_v56  ;;  %v10640_v3 = vadd.f32 %v17902_v43, %v10314_v63  ;;  %v18713_v46 = vld [vmem:[#allocation17_spill] sm:$0xff] }
 0x4a5   : > { %13663 = vtanh.f32 %v11429_v41  ;;  %v11432_v1 = vmul.f32 0.5, %v17955_v27  ;;  %v17962_v6 = vadd.f32 %v17928_v8, %v11359_v4  ;;  %v11364_v35 = vadd.f32 %v13463_v29, %v10638_v24  ;;  %v18714_v24 = vld [vmem:[#allocation23_spill] sm:$0xff]  ;;  %v18008_v17 = vpop.f32.mrf.mxu0 }
 0x4a6   : > { %v11247_v38 = vpop.f32.mrf.mxu1  ;;  %v9620_v32 = vadd.f32 %v18714_v24, %v18713_v46  ;;  %v18715_v41 = vld [vmem:[#allocation31_spill] sm:$0xff] }
 0x4a7   : > { %13665 = vtanh.f32 %v11432_v1  ;;  %v11430_v10 = vmul.f32 0.5, %v17962_v6  ;;  %v17970_v34 = vadd.f32 %v17928_v8, %v11364_v35  ;;  %v11362_v36 = vadd.f32 %v11247_v38, %v10636_v45  ;;  %v18716_v45 = vld [vmem:[#allocation22_spill] sm:$0xff] }
 0x4a8   : > { %v13464_v30 = vpop.f32.mrf.mxu1  ;;  %v10317_v4 = vadd.f32 %v18715_v41, %v9622_v20  ;;  %v10315_v29 = vadd.f32 %v18716_v45, %v9620_v32 }
 0x4a9   : > { %13667 = vtanh.f32 %v11430_v10  ;;  %v11435_v26 = vmul.f32 0.5, %v17970_v34  ;;  %v17977_v13 = vadd.f32 %v17928_v8, %v11362_v36  ;;  %v11365_v42 = vadd.f32 %v13464_v30, %v10639_v23  ;;  %v11591_v30 = vld [vmem:[%s13849_s29 + $0x10] sm:$0xff] }
 0x4aa   : > { %v11250_v53 = vpop.f32.mrf.mxu1  ;;  %v10643_v1 = vadd.f32 %v17908_v40, %v10317_v4 }
 0x4ab   : > { %13669 = vtanh.f32 %v11435_v26  ;;  %v11433_v7 = vmul.f32 0.5, %v17977_v13  ;;  %v17986_v61 = vadd.f32 %v17928_v8, %v11365_v42  ;;  %v11363_v62 = vadd.f32 %v11250_v53, %v10637_v22 }
 0x4ac   : > { %v10641_v22 = vadd.f32 %v17920_v54, %v10315_v29 }
 0x4ad   : > { %13671 = vtanh.f32 %v11433_v7  ;;  %v11436_v21 = vmul.f32 0.5, %v17986_v61  ;;  %v17992_v16 = vadd.f32 %v17928_v8, %v11363_v62  ;;  %v11589_v7 = vld [vmem:[%s13849_s29] sm:$0xff] }
 0x4ae   : > { %v13467_v28 = vpop.f32.mrf.mxu1 }
 0x4af   : > { %13673 = vtanh.f32 %v11436_v21  ;;  %v11434_v2 = vmul.f32 0.5, %v17992_v16  ;;  %v11368_v52 = vadd.f32 %v13467_v28, %v10642_v60 }
 0x4b0   : > { %v13662_v11 = vpop.eup %13661  ;;  %v11263_v55 = vpop.f32.mrf.mxu1 }
 0x4b1   : > { %v11495_v49 = vmul.f32 0.5, %v13662_v11  ;;  %13675 = vtanh.f32 %v11434_v2  ;;  %v18004_v14 = vadd.f32 %v17928_v8, %v11368_v52  ;;  %v11366_v59 = vadd.f32 %v11263_v55, %v10640_v3  ;;  %v18717_v2 = vld [vmem:[#allocation30_spill] sm:$0xff]  ;;  %v11592_v11 = vld [vmem:[%s13849_s29 + $0x18] sm:$0xff] }
 0x4b2   : > { %v13664_v43 = vpop.eup %13663  ;;  %v13468_v35 = vpop.f32.mrf.mxu1  ;;  %v10646_v52 = vadd.f32 %v17936_v12, %v18717_v2  ;;  %v10644_v12 = vadd.f32 %v17951_v50, %v17856_v5  ;;  %v11595_v50 = vld [vmem:[%s13849_s29 + $0x30] sm:$0xff] }
 0x4b3   : > { %v11527_v23 = vadd.f32 0.5, %v11495_v49  ;;  %v11493_v38 = vmul.f32 0.5, %v13664_v43  ;;  %v11439_v10 = vmul.f32 0.5, %v18004_v14  ;;  %v18012_v36 = vadd.f32 %v17928_v8, %v11366_v59  ;;  %v11590_v59 = vld [vmem:[%s13849_s29 + $0x8] sm:$0xff] }
 0x4b4   : > { %v13666_v33 = vpop.eup %13665  ;;  %v11369_v26 = vadd.f32 %v13468_v35, %v10643_v1  ;;  %v11266_v42 = vpop.f32.mrf.mxu1 }
 0x4b5   : > { %v11559_v40 = vmul.f32 %v11527_v23, %v17939_v9  ;;  %v11525_v48 = vadd.f32 0.5, %v11493_v38  ;;  %v11496_v56 = vmul.f32 0.5, %v13666_v33  ;;  %13677 = vtanh.f32 %v11439_v10  ;;  %v18029_v9 = vpop.f32.mrf.mxu0  ;;  %v18718_v33 = vld [vmem:[#allocation39_spill] sm:$0xff] }
 0x4b6   : > { %v13668_v53 = vpop.eup %13667  ;;  %v11437_v54 = vmul.f32 0.5, %v18012_v36  ;;  %v18027_v62 = vadd.f32 %v17928_v8, %v11369_v26  ;;  %v11367_v63 = vadd.f32 %v11266_v42, %v10641_v22  ;;  %v10647_v5 = vadd.f32 %v17966_v51, %v18718_v33  ;;  %v11599_v33 = vld [vmem:[%s13849_s29 + $0x50] sm:$0xff] }
 0x4b7   : > { %v11623_v60 = vadd.f32 %v11591_v30, %v11559_v40  ;;  %v11557_v21 = vmul.f32 %v11525_v48, %v17946_v25  ;;  %v11528_v20 = vadd.f32 0.5, %v11496_v56  ;;  %v11494_v28 = vmul.f32 0.5, %v13668_v53  ;;  %v18046_v29 = vpop.f32.mrf.mxu0  ;;  %v11593_v53 = vld [vmem:[%s13849_s29 + $0x20] sm:$0xff] }
 0x4b8   : > { %v13670_v3 = vpop.eup %13669  ;;  %13679 = vtanh.f32 %v11437_v54  ;;  %v11440_v46 = vmul.f32 0.5, %v18027_v62  ;;  %v18037_v24 = vadd.f32 %v17928_v8, %v11367_v63  ;;  %v10645_v51 = vadd.f32 %v17982_v31, %v17862_v58  ;;  %v11596_v58 = vld [vmem:[%s13849_s29 + $0x38] sm:$0xff] }
 0x4b9   : > { %11655 = vst.msk [vmem:[%s18022_s30 + $0x10] sm:$0xff] %vm1158_vm7, %v11623_v60  ;;  %v11621_v32 = vadd.f32 %v11589_v7, %v11557_v21  ;;  %v11560_v25 = vmul.f32 %v11528_v20, %v17955_v27  ;;  %v11526_v41 = vadd.f32 0.5, %v11494_v28  ;;  %v11499_v4 = vmul.f32 0.5, %v13670_v3  ;;  %v13471_v55 = vpop.f32.mrf.mxu1  ;;  %v18067_v60 = vpop.f32.mrf.mxu0 }
 0x4ba   : > { %v13672_v49 = vpop.eup %13671  ;;  %13681 = vtanh.f32 %v11440_v46  ;;  %v11438_v43 = vmul.f32 0.5, %v18037_v24  ;;  %v11372_v45 = vadd.f32 %v13471_v55, %v10646_v52 }
 0x4bb   : > { %11653 = vst.msk [vmem:[%s18022_s30] sm:$0xff] %vm1158_vm7, %v11621_v32  ;;  %v11624_v1 = vadd.f32 %v11592_v11, %v11560_v25  ;;  %v11558_v27 = vmul.f32 %v11526_v41, %v17962_v6  ;;  %v11531_v35 = vadd.f32 0.5, %v11499_v4  ;;  %v11497_v23 = vmul.f32 0.5, %v13672_v49  ;;  %v11279_v38 = vpop.f32.mrf.mxu1  ;;  %v11594_v4 = vld [vmem:[%s13849_s29 + $0x28] sm:$0xff] }
 0x4bc   : > { %v13674_v10 = vpop.eup %13673  ;;  %13683 = vtanh.f32 %v11438_v43  ;;  %v18055_v22 = vadd.f32 %v17928_v8, %v11372_v45  ;;  %v11370_v30 = vadd.f32 %v11279_v38, %v10644_v12  ;;  %v10585_v12 = vpop.f32.mrf.mxu0 }
 0x4bd   : > { %11656 = vst.msk [vmem:[%s18022_s30 + $0x18] sm:$0xff] %vm1158_vm7, %v11624_v1  ;;  %v11622_v26 = vadd.f32 %v11590_v59, %v11558_v27  ;;  %v11563_v6 = vmul.f32 %v11531_v35, %v17970_v34  ;;  %v11529_v42 = vadd.f32 0.5, %v11497_v23  ;;  %v11500_v40 = vmul.f32 0.5, %v13674_v10  ;;  %v13472_v48 = vpop.f32.mrf.mxu1 }
 0x4be   : > { %v13676_v56 = vpop.eup %13675  ;;  %v11443_v7 = vmul.f32 0.5, %v18055_v22  ;;  %v18065_v54 = vadd.f32 %v17928_v8, %v11370_v30  ;;  %v11373_v63 = vadd.f32 %v13472_v48, %v10647_v5 }
 0x4bf   : > { %11654 = vst.msk [vmem:[%s18022_s30 + $0x8] sm:$0xff] %vm1158_vm7, %v11622_v26  ;;  %v11627_v34 = vadd.f32 %v11595_v50, %v11563_v6  ;;  %v11561_v21 = vmul.f32 %v11529_v42, %v17977_v13  ;;  %v11532_v20 = vadd.f32 0.5, %v11500_v40  ;;  %v11498_v28 = vmul.f32 0.5, %v13676_v56  ;;  %v11282_v3 = vpop.f32.mrf.mxu1  ;;  %v18719_v13 = vld [vmem:[#allocation46_spill] sm:$0xff]  ;;  %v13446_v26 = vpop.f32.mrf.mxu0 }
 0x4c0   : > { %13685 = vtanh.f32 %v11443_v7  ;;  %v11441_v31 = vmul.f32 0.5, %v18065_v54  ;;  %v18075_v2 = vadd.f32 %v17928_v8, %v11373_v63  ;;  %v11371_v52 = vadd.f32 %v11282_v3, %v10645_v51  ;;  %v18721_v7 = vld [vmem:[#allocation51_spill] sm:$0xff] }
 0x4c1   : > { %11659 = vst.msk [vmem:[%s18022_s30 + $0x30] sm:$0xff] %vm1158_vm7, %v11627_v34  ;;  %v11625_v11 = vadd.f32 %v11593_v53, %v11561_v21  ;;  %v11564_v46 = vmul.f32 %v11532_v20, %v17986_v61  ;;  %v11530_v32 = vadd.f32 0.5, %v11498_v28  ;;  %v10650_v41 = vadd.f32 %v17997_v37, %v18719_v13  ;;  %v11597_v34 = vld [vmem:[%s13849_s29 + $0x40] sm:$0xff] }
 0x4c2   : > { %v13678_v25 = vpop.eup %13677  ;;  %13687 = vtanh.f32 %v11441_v31  ;;  %v11444_v55 = vmul.f32 0.5, %v18075_v2  ;;  %v18085_v49 = vadd.f32 %v17928_v8, %v11371_v52  ;;  %v10648_v37 = vadd.f32 %v18008_v17, %v17868_v19  ;;  %v18720_v17 = vld [vmem:[#allocation38_spill] sm:$0xff]  ;;  %v11600_v31 = vld [vmem:[%s13849_s29 + $0x58] sm:$0xff] }
 0x4c3   : > { %11657 = vst.msk [vmem:[%s18022_s30 + $0x20] sm:$0xff] %vm1158_vm7, %v11625_v11  ;;  %v11628_v59 = vadd.f32 %v11596_v58, %v11564_v46  ;;  %v11562_v61 = vmul.f32 %v11530_v32, %v17992_v16  ;;  %v11503_v43 = vmul.f32 0.5, %v13678_v25  ;;  %v13475_v45 = vpop.f32.mrf.mxu1  ;;  %v10651_v30 = vadd.f32 %v18029_v9, %v18720_v17  ;;  %v10588_v58 = vpop.f32.mrf.mxu0 }
 0x4c4   : > { %13689 = vtanh.f32 %v11444_v55  ;;  %v11442_v1 = vmul.f32 0.5, %v18085_v49  ;;  %v11376_v27 = vadd.f32 %v13475_v45, %v10650_v41  ;;  %v10649_v63 = vadd.f32 %v18046_v29, %v18721_v7 }
 0x4c5   : > { %v13680_v35 = vpop.eup %13679  ;;  %11660 = vst.msk [vmem:[%s18022_s30 + $0x38] sm:$0xff] %vm1158_vm7, %v11628_v59  ;;  %v11626_v23 = vadd.f32 %v11594_v4, %v11562_v61  ;;  %v11535_v38 = vadd.f32 0.5, %v11503_v43  ;;  %v11295_v10 = vpop.f32.mrf.mxu1  ;;  %v11598_v4 = vld [vmem:[%s13849_s29 + $0x48] sm:$0xff] }
 0x4c6   : > { %v11501_v5 = vmul.f32 0.5, %v13680_v35  ;;  %13691 = vtanh.f32 %v11442_v1  ;;  %v18097_v16 = vadd.f32 %v17928_v8, %v11376_v27  ;;  %v11374_v50 = vadd.f32 %v11295_v10, %v10648_v37 }
 0x4c7   : > { %v13682_v19 = vpop.eup %13681  ;;  %11658 = vst.msk [vmem:[%s18022_s30 + $0x28] sm:$0xff] %vm1158_vm7, %v11626_v23  ;;  %v11567_v6 = vmul.f32 %v11535_v38, %v18004_v14  ;;  %v13476_v42 = vpop.f32.mrf.mxu1  ;;  %v10652_v1 = vadd.f32 %v10585_v12, %v17880_v47 }
 0x4c8   : > { %v11533_v40 = vadd.f32 0.5, %v11501_v5  ;;  %v11504_v48 = vmul.f32 0.5, %v13682_v19  ;;  %v11447_v56 = vmul.f32 0.5, %v18097_v16  ;;  %v18106_v51 = vadd.f32 %v17928_v8, %v11374_v50  ;;  %v18723_v5 = vld [vmem:[#allocation53_spill] sm:$0xff]  ;;  %v11603_v19 = vld [vmem:[%s13849_s29 + $0x70] sm:$0xff] }
 0x4c9   : > { %v13684_v53 = vpop.eup %13683  ;;  %v11631_v9 = vadd.f32 %v11599_v33, %v11567_v6  ;;  %v11377_v21 = vadd.f32 %v13476_v42, %v10651_v30  ;;  %v11298_v20 = vpop.f32.mrf.mxu1  ;;  %v10655_v50 = vadd.f32 %v13446_v26, %v18723_v5  ;;  %v11601_v26 = vld [vmem:[%s13849_s29 + $0x60] sm:$0xff] }
 0x4ca   : > { %v11565_v14 = vmul.f32 %v11533_v40, %v18012_v36  ;;  %v11536_v28 = vadd.f32 0.5, %v11504_v48  ;;  %v11502_v3 = vmul.f32 0.5, %v13684_v53  ;;  %13693 = vtanh.f32 %v11447_v56  ;;  %v18722_v36 = vld [vmem:[#allocation47_spill] sm:$0xff] }
 0x4cb   : > { %11663 = vst.msk [vmem:[%s18022_s30 + $0x50] sm:$0xff] %vm1158_vm7, %v11631_v9  ;;  %v11445_v52 = vmul.f32 0.5, %v18106_v51  ;;  %v18117_v11 = vadd.f32 %v17928_v8, %v11377_v21  ;;  %v11375_v29 = vadd.f32 %v11298_v20, %v10649_v63  ;;  %v10654_v41 = vadd.f32 %v18067_v60, %v18722_v36  ;;  %v13449_v60 = vpop.f32.mrf.mxu0 }
 0x4cc   : > { %v11629_v46 = vadd.f32 %v11597_v34, %v11565_v14  ;;  %v11568_v32 = vmul.f32 %v11536_v28, %v18027_v62  ;;  %v11534_v25 = vadd.f32 0.5, %v11502_v3  ;;  %v10653_v48 = vadd.f32 %v10588_v58, %v17886_v57  ;;  %v11604_v14 = vld [vmem:[%s13849_s29 + $0x78] sm:$0xff] }
 0x4cd   : > { %v13686_v13 = vpop.eup %13685  ;;  %13695 = vtanh.f32 %v11445_v52  ;;  %v11448_v55 = vmul.f32 0.5, %v18117_v11  ;;  %v18125_v59 = vadd.f32 %v17928_v8, %v11375_v29  ;;  %v10601_v56 = vpop.f32.mrf.mxu0  ;;  %v10658_v29 = vadd.f32 %v13449_v60, %v17888_v44  ;;  %v11607_v60 = vld [vmem:[%s13849_s29 + $0x90] sm:$0xff] }
 0x4ce   : > { %11661 = vst.msk [vmem:[%s18022_s30 + $0x40] sm:$0xff] %vm1158_vm7, %v11629_v46  ;;  %v11632_v61 = vadd.f32 %v11600_v31, %v11568_v32  ;;  %v11566_v43 = vmul.f32 %v11534_v25, %v18037_v24  ;;  %v11507_v62 = vmul.f32 0.5, %v13686_v13  ;;  %v13479_v45 = vpop.f32.mrf.mxu1  ;;  %v11602_v32 = vld [vmem:[%s13849_s29 + $0x68] sm:$0xff] }
 0x4cf   : > { %v13688_v37 = vpop.eup %13687  ;;  %13697 = vtanh.f32 %v11448_v55  ;;  %v11446_v27 = vmul.f32 0.5, %v18125_v59  ;;  %v11380_v35 = vadd.f32 %v13479_v45, %v10654_v41  ;;  %v13450_v46 = vpop.f32.mrf.mxu0  ;;  %v10656_v55 = vadd.f32 %v10601_v56, %v17892_v15 }
 0x4d0   : > { %11664 = vst.msk [vmem:[%s18022_s30 + $0x58] sm:$0xff] %vm1158_vm7, %v11632_v61  ;;  %v11630_v23 = vadd.f32 %v11598_v4, %v11566_v43  ;;  %v11539_v38 = vadd.f32 0.5, %v11507_v62  ;;  %v11505_v10 = vmul.f32 0.5, %v13688_v37  ;;  %v11311_v33 = vpop.f32.mrf.mxu1 }
 0x4d1   : > { %v13690_v24 = vpop.eup %13689  ;;  %13699 = vtanh.f32 %v11446_v27  ;;  %v18137_v47 = vadd.f32 %v17928_v8, %v11380_v35  ;;  %v11378_v12 = vadd.f32 %v11311_v33, %v10652_v1  ;;  %v10604_v1 = vpop.f32.mrf.mxu0 }
 0x4d2   : > { %11662 = vst.msk [vmem:[%s18022_s30 + $0x48] sm:$0xff] %vm1158_vm7, %v11630_v23  ;;  %v11571_v17 = vmul.f32 %v11539_v38, %v18055_v22  ;;  %v11537_v30 = vadd.f32 0.5, %v11505_v10  ;;  %v11508_v6 = vmul.f32 0.5, %v13690_v24  ;;  %v13480_v42 = vpop.f32.mrf.mxu1  ;;  %v18724_v23 = vld [vmem:[#allocation54_spill] sm:$0xff] }
 0x4d3   : > { %v13692_v40 = vpop.eup %13691  ;;  %v11451_v53 = vmul.f32 0.5, %v18137_v47  ;;  %v18146_v7 = vadd.f32 %v17928_v8, %v11378_v12  ;;  %v11381_v63 = vadd.f32 %v13480_v42, %v10655_v50  ;;  %v10659_v38 = vadd.f32 %v13450_v46, %v18724_v23  ;;  %v11605_v42 = vld [vmem:[%s13849_s29 + $0x80] sm:$0xff] }
 0x4d4   : > { %v11635_v9 = vadd.f32 %v11603_v19, %v11571_v17  ;;  %v11569_v34 = vmul.f32 %v11537_v30, %v18065_v54  ;;  %v11540_v22 = vadd.f32 0.5, %v11508_v6  ;;  %v11506_v21 = vmul.f32 0.5, %v13692_v40  ;;  %v11314_v20 = vpop.f32.mrf.mxu1  ;;  %v18725_v17 = vld [vmem:[#allocation57_spill] sm:$0xff] }
 0x4d5   : > { %13701 = vtanh.f32 %v11451_v53  ;;  %v11449_v57 = vmul.f32 0.5, %v18146_v7  ;;  %v18152_v28 = vadd.f32 %v17928_v8, %v11381_v63  ;;  %v11379_v3 = vadd.f32 %v11314_v20, %v10653_v48  ;;  %v11608_v53 = vld [vmem:[%s13849_s29 + $0x98] sm:$0xff] }
 0x4d6   : > { %11667 = vst.msk [vmem:[%s18022_s30 + $0x70] sm:$0xff] %vm1158_vm7, %v11635_v9  ;;  %v11633_v58 = vadd.f32 %v11601_v26, %v11569_v34  ;;  %v11572_v31 = vmul.f32 %v11540_v22, %v18075_v2  ;;  %v11538_v52 = vadd.f32 0.5, %v11506_v21  ;;  %v10657_v30 = vadd.f32 %v10604_v1, %v18725_v17  ;;  %v11612_v1 = vld [vmem:[%s13849_s29 + $0xb8] sm:$0xff] }
 0x4d7   : > { %v13694_v54 = vpop.eup %13693  ;;  %13703 = vtanh.f32 %v11449_v57  ;;  %v11452_v25 = vmul.f32 0.5, %v18152_v28  ;;  %v18161_v13 = vadd.f32 %v17928_v8, %v11379_v3 }
 0x4d8   : > { %11665 = vst.msk [vmem:[%s18022_s30 + $0x60] sm:$0xff] %vm1158_vm7, %v11633_v58  ;;  %v11636_v36 = vadd.f32 %v11604_v14, %v11572_v31  ;;  %v11570_v41 = vmul.f32 %v11538_v52, %v18085_v49  ;;  %v11511_v2 = vmul.f32 0.5, %v13694_v54  ;;  %v13483_v4 = vpop.f32.mrf.mxu1 }
 0x4d9   : > { %13705 = vtanh.f32 %v11452_v25  ;;  %v11450_v44 = vmul.f32 0.5, %v18161_v13  ;;  %v11384_v61 = vadd.f32 %v13483_v4, %v10658_v29 }
 0x4da   : > { %v13696_v43 = vpop.eup %13695  ;;  %11668 = vst.msk [vmem:[%s18022_s30 + $0x78] sm:$0xff] %vm1158_vm7, %v11636_v36  ;;  %v11634_v62 = vadd.f32 %v11602_v32, %v11570_v41  ;;  %v11543_v45 = vadd.f32 0.5, %v11511_v2  ;;  %v11327_v37 = vpop.f32.mrf.mxu1  ;;  %v11611_v41 = vld [vmem:[%s13849_s29 + $0xb0] sm:$0xff] }
 0x4db   : > { %v11509_v27 = vmul.f32 0.5, %v13696_v43  ;;  %13707 = vtanh.f32 %v11450_v44  ;;  %v18172_v49 = vadd.f32 %v17928_v8, %v11384_v61  ;;  %v11382_v15 = vadd.f32 %v11327_v37, %v10656_v55  ;;  %v13453_v36 = vpop.f32.mrf.mxu0  ;;  %v11609_v44 = vld [vmem:[%s13849_s29 + $0xa0] sm:$0xff] }
 0x4dc   : > { %v13698_v35 = vpop.eup %13697  ;;  %11666 = vst.msk [vmem:[%s18022_s30 + $0x68] sm:$0xff] %vm1158_vm7, %v11634_v62  ;;  %v11575_v10 = vmul.f32 %v11543_v45, %v18097_v16  ;;  %v13484_v33 = vpop.f32.mrf.mxu1 }
 0x4dd   : > { %v11541_v24 = vadd.f32 0.5, %v11509_v27  ;;  %v11512_v5 = vmul.f32 0.5, %v13698_v35  ;;  %v11455_v50 = vmul.f32 0.5, %v18172_v49  ;;  %v18180_v19 = vadd.f32 %v17928_v8, %v11382_v15  ;;  %v10617_v37 = vpop.f32.mrf.mxu0  ;;  %v11610_v35 = vld [vmem:[%s13849_s29 + $0xa8] sm:$0xff] }
 0x4de   : > { %v13700_v12 = vpop.eup %13699  ;;  %v11639_v6 = vadd.f32 %v11607_v60, %v11575_v10  ;;  %v11385_v40 = vadd.f32 %v13484_v33, %v10659_v38  ;;  %v11330_v48 = vpop.f32.mrf.mxu1 }
 0x4df   : > { %v11573_v16 = vmul.f32 %v11541_v24, %v18106_v51  ;;  %v11544_v56 = vadd.f32 0.5, %v11512_v5  ;;  %v11510_v26 = vmul.f32 0.5, %v13700_v12  ;;  %13709 = vtanh.f32 %v11455_v50  ;;  %v11606_v51 = vld [vmem:[%s13849_s29 + $0x88] sm:$0xff]  ;;  %v13454_v10 = vpop.f32.mrf.mxu0 }
 0x4e0   : > { %11671 = vst.msk [vmem:[%s18022_s30 + $0x90] sm:$0xff] %vm1158_vm7, %v11639_v6  ;;  %v11453_v63 = vmul.f32 0.5, %v18180_v19  ;;  %v18190_v9 = vadd.f32 %v17928_v8, %v11385_v40  ;;  %v11383_v34 = vadd.f32 %v11330_v48, %v10657_v30  ;;  %v18726_v24 = vld [vmem:[#allocation61_spill] sm:$0xff] }
 0x4e1   : > { %v11637_v22 = vadd.f32 %v11605_v42, %v11573_v16  ;;  %v11576_v21 = vmul.f32 %v11544_v56, %v18117_v11  ;;  %v11542_v20 = vadd.f32 0.5, %v11510_v26  ;;  %v10662_v5 = vadd.f32 %v13453_v36, %v18726_v24  ;;  %v10620_v48 = vpop.f32.mrf.mxu0  ;;  %v11618_v24 = vld [vmem:[%s13849_s29 + $0xe8] sm:$0xff] }
 0x4e2   : > { %v13702_v14 = vpop.eup %13701  ;;  %13711 = vtanh.f32 %v11453_v63  ;;  %v11456_v57 = vmul.f32 0.5, %v18190_v9  ;;  %v18196_v3 = vadd.f32 %v17928_v8, %v11383_v34  ;;  %v10660_v42 = vadd.f32 %v10617_v37, %v17910_v18 }
 0x4e3   : > { %11669 = vst.msk [vmem:[%s18022_s30 + $0x80] sm:$0xff] %vm1158_vm7, %v11637_v22  ;;  %v11640_v58 = vadd.f32 %v11608_v53, %v11576_v21  ;;  %v11574_v31 = vmul.f32 %v11542_v20, %v18125_v59  ;;  %v11515_v52 = vmul.f32 0.5, %v13702_v14  ;;  %v10663_v63 = vadd.f32 %v13454_v10, %v17915_v39  ;;  %v11613_v22 = vld [vmem:[%s13849_s29 + $0xc0] sm:$0xff] }
 0x4e4   : > { %v13704_v54 = vpop.eup %13703  ;;  %13713 = vtanh.f32 %v11456_v57  ;;  %v11454_v11 = vmul.f32 0.5, %v18196_v3  ;;  %v10661_v57 = vadd.f32 %v10620_v48, %v17923_v0 }
 0x4e5   : > { %11672 = vst.msk [vmem:[%s18022_s30 + $0x98] sm:$0xff] %vm1158_vm7, %v11640_v58  ;;  %v11638_v29 = vadd.f32 %v11606_v51, %v11574_v31  ;;  %v11547_v46 = vadd.f32 0.5, %v11515_v52  ;;  %v11513_v32 = vmul.f32 0.5, %v13704_v54  ;;  %v11616_v58 = vld [vmem:[%s13849_s29 + $0xd8] sm:$0xff] }
 0x4e6   : > { %v13706_v25 = vpop.eup %13705  ;;  %13715 = vtanh.f32 %v11454_v11 }
 0x4e7   : > { %11670 = vst.msk [vmem:[%s18022_s30 + $0x88] sm:$0xff] %vm1158_vm7, %v11638_v29  ;;  %v11579_v59 = vmul.f32 %v11547_v46, %v18137_v47  ;;  %v11545_v2 = vadd.f32 0.5, %v11513_v32  ;;  %v11516_v4 = vmul.f32 0.5, %v13706_v25 }
 0x4e8   : > { %v13708_v55 = vpop.eup %13707 }
 0x4e9   : > { %v11643_v61 = vadd.f32 %v11611_v41, %v11579_v59  ;;  %v11577_v43 = vmul.f32 %v11545_v2, %v18146_v7  ;;  %v11548_v62 = vadd.f32 0.5, %v11516_v4  ;;  %v11514_v45 = vmul.f32 0.5, %v13708_v55 }
 0x4eb   : > { %11675 = vst.msk [vmem:[%s18022_s30 + $0xb0] sm:$0xff] %vm1158_vm7, %v11643_v61  ;;  %v11641_v60 = vadd.f32 %v11609_v44, %v11577_v43  ;;  %v11580_v47 = vmul.f32 %v11548_v62, %v18152_v28  ;;  %v11546_v27 = vadd.f32 0.5, %v11514_v45  ;;  %v11615_v28 = vld [vmem:[%s13849_s29 + $0xd0] sm:$0xff] }
 0x4ec   : > { %v13710_v15 = vpop.eup %13709  ;;  %v11619_v45 = vld [vmem:[%s13849_s29 + $0xf0] sm:$0xff] }
 0x4ed   : > { %11673 = vst.msk [vmem:[%s18022_s30 + $0xa0] sm:$0xff] %vm1158_vm7, %v11641_v60  ;;  %v11644_v23 = vadd.f32 %v11612_v1, %v11580_v47  ;;  %v11578_v7 = vmul.f32 %v11546_v27, %v18161_v13  ;;  %v11519_v38 = vmul.f32 0.5, %v13710_v15  ;;  %v11617_v47 = vld [vmem:[%s13849_s29 + $0xe0] sm:$0xff] }
 0x4ef   : > { %v13712_v33 = vpop.eup %13711  ;;  %11676 = vst.msk [vmem:[%s18022_s30 + $0xb8] sm:$0xff] %vm1158_vm7, %v11644_v23  ;;  %v11642_v50 = vadd.f32 %v11610_v35, %v11578_v7  ;;  %v11551_v12 = vadd.f32 0.5, %v11519_v38  ;;  %v11620_v7 = vld [vmem:[%s13849_s29 + $0xf8] sm:$0xff] }
 0x4f0   : > { %v11517_v17 = vmul.f32 0.5, %v13712_v33  ;;  %v13487_v30 = vpop.f32.mrf.mxu1 }
 0x4f1   : > { %v13714_v6 = vpop.eup %13713  ;;  %11674 = vst.msk [vmem:[%s18022_s30 + $0xa8] sm:$0xff] %vm1158_vm7, %v11642_v50  ;;  %v11583_v13 = vmul.f32 %v11551_v12, %v18172_v49  ;;  %v11388_v40 = vadd.f32 %v13487_v30, %v10662_v5 }
 0x4f2   : > { %v11549_v16 = vadd.f32 0.5, %v11517_v17  ;;  %v11520_v56 = vmul.f32 0.5, %v13714_v6  ;;  %v11343_v26 = vpop.f32.mrf.mxu1 }
 0x4f3   : > { %v13716_v53 = vpop.eup %13715  ;;  %v11647_v34 = vadd.f32 %v11615_v28, %v11583_v13  ;;  %v11427_v21 = vadd.f32 %v17928_v8, %v11388_v40  ;;  %v11386_v18 = vadd.f32 %v11343_v26, %v10660_v42 }
 0x4f4   : > { %v11581_v20 = vmul.f32 %v11549_v16, %v18180_v19  ;;  %v11552_v14 = vadd.f32 0.5, %v11520_v56  ;;  %v11518_v49 = vmul.f32 0.5, %v13716_v53  ;;  %v13488_v51 = vpop.f32.mrf.mxu1  ;;  %v11614_v19 = vld [vmem:[%s13849_s29 + $0xc8] sm:$0xff] }
 0x4f5   : > { %11679 = vst.msk [vmem:[%s18022_s30 + $0xd0] sm:$0xff] %vm1158_vm7, %v11647_v34  ;;  %v11459_v31 = vmul.f32 0.5, %v11427_v21  ;;  %v11425_v39 = vadd.f32 %v17928_v8, %v11386_v18  ;;  %v11389_v52 = vadd.f32 %v13488_v51, %v10663_v63 }
 0x4f6   : > { %v11645_v54 = vadd.f32 %v11613_v22, %v11581_v20  ;;  %v11584_v11 = vmul.f32 %v11552_v14, %v18190_v9  ;;  %v11550_v29 = vadd.f32 0.5, %v11518_v49  ;;  %v11346_v46 = vpop.f32.mrf.mxu1 }
 0x4f7   : > { %13717 = vtanh.f32 %v11459_v31  ;;  %v11457_v32 = vmul.f32 0.5, %v11425_v39  ;;  %v11428_v25 = vadd.f32 %v17928_v8, %v11389_v52  ;;  %v11387_v0 = vadd.f32 %v11346_v46, %v10661_v57 }
 0x4f8   : > { %11677 = vst.msk [vmem:[%s18022_s30 + $0xc0] sm:$0xff] %vm1158_vm7, %v11645_v54  ;;  %v11648_v36 = vadd.f32 %v11616_v58, %v11584_v11  ;;  %v11582_v41 = vmul.f32 %v11550_v29, %v18196_v3 }
 0x4f9   : > { %13719 = vtanh.f32 %v11457_v32  ;;  %v11460_v59 = vmul.f32 0.5, %v11428_v25  ;;  %v11426_v2 = vadd.f32 %v17928_v8, %v11387_v0 }
 0x4fa   : > { %11680 = vst.msk [vmem:[%s18022_s30 + $0xd8] sm:$0xff] %vm1158_vm7, %v11648_v36  ;;  %v11646_v9 = vadd.f32 %v11614_v19, %v11582_v41 }
 0x4fb   : > { %13721 = vtanh.f32 %v11460_v59  ;;  %v11458_v4 = vmul.f32 0.5, %v11426_v2 }
 0x4fc   : > { %11678 = vst.msk [vmem:[%s18022_s30 + $0xc8] sm:$0xff] %vm1158_vm7, %v11646_v9 }
 0x4fd   : > { %13723 = vtanh.f32 %v11458_v4 }
 0x504   : > { %v13718_v55 = vpop.eup %13717 }
 0x505   : > { %v11523_v44 = vmul.f32 0.5, %v13718_v55 }
 0x506   : > { %v13720_v61 = vpop.eup %13719 }
 0x507   : > { %v11555_v3 = vadd.f32 0.5, %v11523_v44  ;;  %v11521_v43 = vmul.f32 0.5, %v13720_v61 }
 0x508   : > { %v13722_v62 = vpop.eup %13721 }
 0x509   : > { %v11587_v8 = vmul.f32 %v11555_v3, %v11427_v21  ;;  %v11553_v37 = vadd.f32 0.5, %v11521_v43  ;;  %v11524_v1 = vmul.f32 0.5, %v13722_v62 }
 0x50a   : > { %v13724_v60 = vpop.eup %13723 }
 0x50b   : > { %v11651_v27 = vadd.f32 %v11619_v45, %v11587_v8  ;;  %v11585_v15 = vmul.f32 %v11553_v37, %v11425_v39  ;;  %v11556_v35 = vadd.f32 0.5, %v11524_v1  ;;  %v11522_v23 = vmul.f32 0.5, %v13724_v60 }
 0x50d   : > { %11683 = vst.msk [vmem:[%s18022_s30 + $0xf0] sm:$0xff] %vm1158_vm7, %v11651_v27  ;;  %v11649_v38 = vadd.f32 %v11617_v47, %v11585_v15  ;;  %v11588_v10 = vmul.f32 %v11556_v35, %v11428_v25  ;;  %v11554_v33 = vadd.f32 0.5, %v11522_v23 }
 0x50f   : > { %11681 = vst.msk [vmem:[%s18022_s30 + $0xe0] sm:$0xff] %vm1158_vm7, %v11649_v38  ;;  %v11652_v5 = vadd.f32 %v11620_v7, %v11588_v10  ;;  %v11586_v50 = vmul.f32 %v11554_v33, %v11426_v2 }
 0x511   : > { %11684 = vst.msk [vmem:[%s18022_s30 + $0xf8] sm:$0xff] %vm1158_vm7, %v11652_v5  ;;  %v11650_v12 = vadd.f32 %v11618_v24, %v11586_v50 }
 0x513   : > { %11682 = vst.msk [vmem:[%s18022_s30 + $0xe8] sm:$0xff] %vm1158_vm7, %v11650_v12 }
 0x514 PF: > { %s15_s18 = sadd.s32 1, %s13765_s18  }
 0x515   : > { %p12_p4 = scmp.ge.s32.totalorder %s15_s18, 4  }
 0x517   :  { %14 = sbr.rel (!%p12_p4) target bundleno = 1 (0x1), region = 92 }

</bundles_post_ra>
